<compile_context>
chip_gen: v6e
topology: v6e:2x2x1
jax: 0.10.0
libtpu: 0.0.40
codegen_flags: <defaults>
</compile_context>

<pallas_src>
import functools
import math

import numpy as np
import jax
import jax.numpy as jnp
from jax.experimental import pallas as pl
from jax.experimental.pallas import tpu as pltpu

_VMEM_LIMIT = 48 * 1024 * 1024  # fits under v7x's 64 MiB physical VMEM


def _compiler_params(semantics):
    return pltpu.CompilerParams(dimension_semantics=semantics,
                                vmem_limit_bytes=_VMEM_LIMIT)


def _row_tile(m, target=256):
    """Largest divisor of m that is <= target and a multiple of 8 (else m)."""
    if m <= target:
        return m
    for t in range(target - (target % 8), 7, -8):
        if m % t == 0:
            return t
    return m


def _col_tile(n, target=512):
    """Largest 128-multiple divisor of n that is <= target (else full n)."""
    if n % 128 != 0:
        return n
    t = min(target, n)
    t -= t % 128
    while n % t != 0:
        t -= 128
    return t


def _apply_act(y, act):
    if act == "gelu":
        # TODO(synk): HF dinov2 uses exact (erf) GELU; tanh approximation here.
        return jax.nn.gelu(y, approximate=True)
    return y


# ----------------------------- Pallas kernels -----------------------------

def _matmul_kernel(x_ref, w_ref, b_ref, o_ref, *, act):
    x = x_ref[...].astype(jnp.bfloat16)
    y = jnp.dot(x, w_ref[...], preferred_element_type=jnp.float32) + b_ref[...]
    o_ref[...] = _apply_act(y, act).astype(o_ref.dtype)


def _ln_matmul_kernel(x_ref, g_ref, bt_ref, w_ref, b_ref, o_ref, *, act, eps):
    x = x_ref[...]
    mu = jnp.mean(x, axis=-1, keepdims=True)
    xc = x - mu
    var = jnp.mean(xc * xc, axis=-1, keepdims=True)
    xn = xc * jax.lax.rsqrt(var + eps) * g_ref[...] + bt_ref[...]
    y = jnp.dot(xn.astype(jnp.bfloat16), w_ref[...],
                preferred_element_type=jnp.float32) + b_ref[...]
    o_ref[...] = _apply_act(y, act).astype(o_ref.dtype)


def _matmul_scale_res_kernel(x_ref, w_ref, b_ref, ls_ref, r_ref, o_ref):
    y = jnp.dot(x_ref[...].astype(jnp.bfloat16), w_ref[...],
                preferred_element_type=jnp.float32) + b_ref[...]
    o_ref[...] = (r_ref[...] + ls_ref[...] * y).astype(o_ref.dtype)


def _layernorm_kernel(x_ref, g_ref, b_ref, o_ref, *, eps):
    x = x_ref[...]
    mu = jnp.mean(x, axis=-1, keepdims=True)
    xc = x - mu
    var = jnp.mean(xc * xc, axis=-1, keepdims=True)
    o_ref[...] = (xc * jax.lax.rsqrt(var + eps) * g_ref[...]
                  + b_ref[...]).astype(o_ref.dtype)


def _attention_kernel(qkv_ref, o_ref, *, heads, hd, s_real, scale):
    """One batch element per grid step; heads split in-kernel via lane slices."""
    s_pad = qkv_ref.shape[1]
    e = heads * hd
    kmask = jax.lax.broadcasted_iota(jnp.int32, (s_pad, s_pad), 1) < s_real
    outs = []
    for h in range(heads):
        q = qkv_ref[0, :, h * hd:(h + 1) * hd]
        k = qkv_ref[0, :, e + h * hd:e + (h + 1) * hd]
        v = qkv_ref[0, :, 2 * e + h * hd:2 * e + (h + 1) * hd]
        s = jax.lax.dot_general(q, k, (((1,), (1,)), ((), ())),
                                preferred_element_type=jnp.float32) * scale
        s = jnp.where(kmask, s, -1e30)        # mask padded keys
        m = jnp.max(s, axis=-1, keepdims=True)
        p = jnp.exp(s - m)
        denom = jnp.sum(p, axis=-1, keepdims=True)
        p = p * pl.reciprocal(denom, approx=True)
        outs.append(jnp.dot(p.astype(jnp.bfloat16), v,
                            preferred_element_type=jnp.float32))
    # single lane-dense store of all heads
    o_ref[0] = jnp.concatenate(outs, axis=-1).astype(o_ref.dtype)


def _conv3x3_kernel(x_ref, w_ref, b_ref, o_ref, *, H, W, leaky):
    """3x3 same conv on a row-flattened image.

    x_ref: (1, H*W + 2*W + 2, Cin) -- image flattened row-major with W+1 zero
    rows prepended/appended (done in the wrapper, tiny).  The 9 taps are 9
    shifted contiguous row-slices; left/right-edge wraparound contributions
    are zeroed with per-row masks.  Accumulation in f32, operands in bf16.
    """
    hw = H * W
    col = jax.lax.broadcasted_iota(jnp.int32, (hw, 1), 0) % W
    m_left = (col > 0).astype(jnp.float32)
    m_right = (col < (W - 1)).astype(jnp.float32)
    acc = None
    for kw in range(3):
        part = None
        for kh in range(3):
            s = kh * W + kw
            xs = x_ref[0, s:s + hw, :].astype(jnp.bfloat16)
            d = jnp.dot(xs, w_ref[kh * 3 + kw],
                        preferred_element_type=jnp.float32)
            part = d if part is None else part + d
        if kw == 0:
            part = part * m_left
        elif kw == 2:
            part = part * m_right
        acc = part if acc is None else acc + part
    y = acc + b_ref[...]
    if leaky:
        y = jnp.where(y > 0, y, 0.01 * y)   # nn.LeakyReLU default slope
    o_ref[0] = y.astype(o_ref.dtype)


# ----------------------------- kernel wrappers -----------------------------

def matmul(x, w, b=None, act="none", out_dtype=jnp.float32):
    m, k = x.shape
    n = w.shape[1]
    if b is None:
        b = jnp.zeros((n,), jnp.float32)
    w = w.astype(jnp.bfloat16)
    tm, tn = _row_tile(m), _col_tile(n)
    kern = functools.partial(_matmul_kernel, act=act)
    return pl.pallas_call(
        kern,
        out_shape=jax.ShapeDtypeStruct((m, n), out_dtype),
        grid=(m // tm, n // tn),
        in_specs=[pl.BlockSpec((tm, k), lambda i, j: (i, 0)),
                  pl.BlockSpec((k, tn), lambda i, j: (0, j)),
                  pl.BlockSpec((1, tn), lambda i, j: (0, j))],
        out_specs=pl.BlockSpec((tm, tn), lambda i, j: (i, j)),
        compiler_params=_compiler_params(("parallel", "parallel")),
    )(x, w, b.reshape(1, n))


def ln_matmul(x, g, beta, w, b, act="none", out_dtype=jnp.float32, eps=1e-6):
    m, k = x.shape
    n = w.shape[1]
    w = w.astype(jnp.bfloat16)
    tm, tn = _row_tile(m), _col_tile(n)
    kern = functools.partial(_ln_matmul_kernel, act=act, eps=eps)
    return pl.pallas_call(
        kern,
        out_shape=jax.ShapeDtypeStruct((m, n), out_dtype),
        grid=(m // tm, n // tn),
        in_specs=[pl.BlockSpec((tm, k), lambda i, j: (i, 0)),
                  pl.BlockSpec((1, k), lambda i, j: (0, 0)),
                  pl.BlockSpec((1, k), lambda i, j: (0, 0)),
                  pl.BlockSpec((k, tn), lambda i, j: (0, j)),
                  pl.BlockSpec((1, tn), lambda i, j: (0, j))],
        out_specs=pl.BlockSpec((tm, tn), lambda i, j: (i, j)),
        compiler_params=_compiler_params(("parallel", "parallel")),
    )(x, g.reshape(1, k), beta.reshape(1, k), w, b.reshape(1, n))


def matmul_scale_residual(x, w, b, ls, res):
    m, k = x.shape
    n = w.shape[1]
    w = w.astype(jnp.bfloat16)
    tm, tn = _row_tile(m), _col_tile(n)
    return pl.pallas_call(
        _matmul_scale_res_kernel,
        out_shape=jax.ShapeDtypeStruct((m, n), jnp.float32),
        grid=(m // tm, n // tn),
        in_specs=[pl.BlockSpec((tm, k), lambda i, j: (i, 0)),
                  pl.BlockSpec((k, tn), lambda i, j: (0, j)),
                  pl.BlockSpec((1, tn), lambda i, j: (0, j)),
                  pl.BlockSpec((1, tn), lambda i, j: (0, j)),
                  pl.BlockSpec((tm, tn), lambda i, j: (i, j))],
        out_specs=pl.BlockSpec((tm, tn), lambda i, j: (i, j)),
        compiler_params=_compiler_params(("parallel", "parallel")),
    )(x, w, b.reshape(1, n), ls.reshape(1, n), res)


def layernorm(x, g, b, eps=1e-6):
    m, d = x.shape
    tm = _row_tile(m)
    kern = functools.partial(_layernorm_kernel, eps=eps)
    return pl.pallas_call(
        kern,
        out_shape=jax.ShapeDtypeStruct((m, d), jnp.float32),
        grid=(m // tm,),
        in_specs=[pl.BlockSpec((tm, d), lambda i: (i, 0)),
                  pl.BlockSpec((1, d), lambda i: (0, 0)),
                  pl.BlockSpec((1, d), lambda i: (0, 0))],
        out_specs=pl.BlockSpec((tm, d), lambda i: (i, 0)),
        compiler_params=_compiler_params(("parallel",)),
    )(x, g.reshape(1, d), b.reshape(1, d))


def attention(qkv, heads, hd, s_real, scale):
    """qkv: (B, S_pad, 3*E) bf16 -> (B, S_pad, E) bf16."""
    bsz, s_pad, three_e = qkv.shape
    e = heads * hd
    kern = functools.partial(_attention_kernel, heads=heads, hd=hd,
                             s_real=s_real, scale=scale)
    return pl.pallas_call(
        kern,
        out_shape=jax.ShapeDtypeStruct((bsz, s_pad, e), jnp.bfloat16),
        grid=(bsz,),
        in_specs=[pl.BlockSpec((1, s_pad, three_e), lambda i: (i, 0, 0))],
        out_specs=pl.BlockSpec((1, s_pad, e), lambda i: (i, 0, 0)),
        compiler_params=_compiler_params(("parallel",)),
    )(qkv)


def conv3x3_flat(x_flat, w9, b, H, W, *, leaky):
    """x_flat: (B, H*W, Cin); w9: (9, Cin, Cout) bf16 -> (B, H*W, Cout) bf16."""
    bsz, hw, cin = x_flat.shape
    cout = w9.shape[-1]
    xp = jnp.pad(x_flat, ((0, 0), (W + 1, W + 1), (0, 0)))  # zero halo rows
    hwp = hw + 2 * W + 2
    kern = functools.partial(_conv3x3_kernel, H=H, W=W, leaky=leaky)
    return pl.pallas_call(
        kern,
        out_shape=jax.ShapeDtypeStruct((bsz, hw, cout), jnp.bfloat16),
        grid=(bsz,),
        in_specs=[pl.BlockSpec((1, hwp, cin), lambda i: (i, 0, 0)),
                  pl.BlockSpec((9, cin, cout), lambda i: (0, 0, 0)),
                  pl.BlockSpec((1, cout), lambda i: (0, 0))],
        out_specs=pl.BlockSpec((1, hw, cout), lambda i: (i, 0, 0)),
        compiler_params=_compiler_params(("parallel",)),
    )(xp, w9, b.reshape(1, cout))


def upsample2x_flat(x_flat, H, W):
    # TODO(synk): nearest 2x upsample kept as XLA replication glue; fusing the
    # interleaved write into the conv kernel needs sublane-interleave support.
    bsz, hw, c = x_flat.shape
    x = x_flat.reshape(bsz, H, W, c)
    x = jnp.repeat(jnp.repeat(x, 2, axis=1), 2, axis=2)
    return x.reshape(bsz, 4 * hw, c)


def bilinear_matrix(out_size, in_size):
    """F.interpolate(mode='bilinear', align_corners=False) as a dense matrix."""
    m = np.zeros((out_size, in_size), np.float32)
    scale = in_size / out_size
    for i in range(out_size):
        src = max((i + 0.5) * scale - 0.5, 0.0)
        i0 = min(int(np.floor(src)), in_size - 1)
        i1 = min(i0 + 1, in_size - 1)
        w1 = src - i0
        m[i, i0] += 1.0 - w1
        m[i, i1] += w1
    return m


# ----------------------------- parameters -----------------------------

def init_params(key, cfg):
    """Synthetic parameters in torch-like layouts (stand-in for pretrained dinov2)."""
    E, P, L = cfg["emb"], cfg["patch"], cfg["layers"]
    tok = cfg["img"] // P
    n_tokens = tok * tok
    keys = iter(jax.random.split(key, 64))

    def nrm(shape, s=0.02):
        return (s * jax.random.normal(next(keys), shape)).astype(jnp.float32)

    p = {
        "patch_w": nrm((E, 3, P, P)), "patch_b": nrm((E,)),
        "cls": nrm((1, 1, E)), "pos": nrm((1, n_tokens + 1, E)),
        "blocks": [],
        "ln_f_g": jnp.ones((E,), jnp.float32), "ln_f_b": jnp.zeros((E,), jnp.float32),
    }
    for _ in range(L):
        p["blocks"].append(dict(
            ln1_g=jnp.ones((E,), jnp.float32), ln1_b=jnp.zeros((E,), jnp.float32),
            qkv_w=nrm((E, 3 * E)), qkv_b=nrm((3 * E,)),
            proj_w=nrm((E, E)), proj_b=nrm((E,)),
            ls1=jnp.full((E,), 0.1, jnp.float32),
            ln2_g=jnp.ones((E,), jnp.float32), ln2_b=jnp.zeros((E,), jnp.float32),
            fc1_w=nrm((E, cfg["mlp"])), fc1_b=nrm((cfg["mlp"],)),
            fc2_w=nrm((cfg["mlp"], E)), fc2_b=nrm((E,)),
            ls2=jnp.full((E,), 0.1, jnp.float32),
        ))
    C1, C2, NC = cfg["conv1"], cfg["conv2"], cfg["num_classes"]
    p["c1_w"] = nrm((C1, E, 3, 3)); p["c1_b"] = nrm((C1,))
    p["c2_w"] = nrm((C2, C1, 3, 3)); p["c2_b"] = nrm((C2,))
    p["c3_w"] = nrm((NC, C2, 3, 3)); p["c3_b"] = nrm((NC,))
    return p


def prepare_params(p, cfg):
    """One-time conversion to kernel layouts: bf16 MXU weights, conv (9,Cin,Cout)."""
    E, P = cfg["emb"], cfg["patch"]
    bf = lambda a: a.astype(jnp.bfloat16)
    q = {
        "patch_w": bf(p["patch_w"].reshape(E, 3 * P * P).T),
        "patch_b": p["patch_b"],
        "cls": p["cls"], "pos": p["pos"],
        "ln_f_g": p["ln_f_g"], "ln_f_b": p["ln_f_b"],
        "blocks": [],
    }
    for blk in p["blocks"]:
        q["blocks"].append(dict(
            ln1_g=blk["ln1_g"], ln1_b=blk["ln1_b"],
            qkv_w=bf(blk["qkv_w"]), qkv_b=blk["qkv_b"],
            proj_w=bf(blk["proj_w"]), proj_b=blk["proj_b"], ls1=blk["ls1"],
            ln2_g=blk["ln2_g"], ln2_b=blk["ln2_b"],
            fc1_w=bf(blk["fc1_w"]), fc1_b=blk["fc1_b"],
            fc2_w=bf(blk["fc2_w"]), fc2_b=blk["fc2_b"], ls2=blk["ls2"],
        ))

    def conv_w(w):  # torch (Cout, Cin, 3, 3) -> (9, Cin, Cout), tap = kh*3+kw
        return bf(jnp.transpose(w, (2, 3, 1, 0)).reshape(9, w.shape[1], w.shape[0]))

    q["c1_w"] = conv_w(p["c1_w"]); q["c1_b"] = p["c1_b"]
    q["c2_w"] = conv_w(p["c2_w"]); q["c2_b"] = p["c2_b"]
    q["c3_w"] = conv_w(p["c3_w"]); q["c3_b"] = p["c3_b"]
    return q


# ----------------------------- model -----------------------------

def dino_semantic_segmentation(params, image, cfg):
    B, _, H, W = image.shape
    P, E, heads = cfg["patch"], cfg["emb"], cfg["heads"]
    hd = E // heads
    Ht, Wt = H // P, W // P
    n = Ht * Wt
    S = n + 1
    S_pad = ((S + 7) // 8) * 8          # pad sequence to a sublane multiple

    # --- patch embedding (stride-P conv == patch-flatten matmul; flatten is glue) ---
    x = image.reshape(B, 3, Ht, P, Wt, P).transpose(0, 2, 4, 1, 3, 5)
    x = x.reshape(B * n, 3 * P * P)
    tokens = matmul(x, params["patch_w"], params["patch_b"]).reshape(B, n, E)

    # --- CLS token + position embeddings, pad sequence (glue) ---
    cls = jnp.broadcast_to(params["cls"], (B, 1, E))
    h = jnp.concatenate([cls, tokens], axis=1) + params["pos"]          # (B, S, E)
    h = jnp.pad(h, ((0, 0), (0, S_pad - S), (0, 0)))                    # (B, S_pad, E)
    hm = h.reshape(B * S_pad, E)                                        # residual (f32)

    # --- transformer encoder ---
    # TODO(synk): pretrained facebook/dinov2-base is replaced by a scaled-down
    # deterministic ViT encoder with the same per-block dataflow.
    scale = 1.0 / math.sqrt(hd)
    for blk in params["blocks"]:
        qkv = ln_matmul(hm, blk["ln1_g"], blk["ln1_b"], blk["qkv_w"], blk["qkv_b"],
                        out_dtype=jnp.bfloat16)                          # (M, 3E)
        a = attention(qkv.reshape(B, S_pad, 3 * E), heads, hd, S, scale) # (B,S_pad,E)
        hm = matmul_scale_residual(a.reshape(B * S_pad, E),
                                   blk["proj_w"], blk["proj_b"], blk["ls1"], hm)
        m1 = ln_matmul(hm, blk["ln2_g"], blk["ln2_b"], blk["fc1_w"], blk["fc1_b"],
                       act="gelu", out_dtype=jnp.bfloat16)               # (M, mlp)
        hm = matmul_scale_residual(m1, blk["fc2_w"], blk["fc2_b"], blk["ls2"], hm)

    hm = layernorm(hm, params["ln_f_g"], params["ln_f_b"])
    patch_emb = hm.reshape(B, S_pad, E)[:, 1:1 + n, :]   # drop CLS + padding  (B,n,E)

    # --- ConvToken head: conv3x3(+leaky fused) / nearest-2x upsample chain ---
    y = conv3x3_flat(patch_emb, params["c1_w"], params["c1_b"], Ht, Wt, leaky=True)
    y = upsample2x_flat(y, Ht, Wt)
    y = conv3x3_flat(y, params["c2_w"], params["c2_b"], 2 * Ht, 2 * Wt, leaky=True)
    y = upsample2x_flat(y, 2 * Ht, 2 * Wt)
    y = conv3x3_flat(y, params["c3_w"], params["c3_b"], 4 * Ht, 4 * Wt, leaky=False)

    # --- bilinear resize (align_corners=False) as two big batched matmuls ---
    Hin, Win = 4 * Ht, 4 * Wt
    NC = y.shape[-1]
    rh = jnp.asarray(bilinear_matrix(H, Hin))            # (H, Hin)
    rw = jnp.asarray(bilinear_matrix(W, Win))            # (W, Win)

    slab = y.reshape(B, Hin, Win, NC).transpose(1, 0, 2, 3).reshape(Hin, B * Win * NC)
    z = matmul(rh, slab, out_dtype=jnp.bfloat16)         # (H, B*Win*NC)
    z = z.reshape(H, B, Win, NC).transpose(1, 3, 0, 2).reshape(B * NC * H, Win)
    logits = matmul(z, rw.T)                             # (B*NC*H, W) f32
    return logits.reshape(B, NC, H, W)                   # NCHW


# ----------------------------- demo -----------------------------

if __name__ == "__main__":
    # Small shapes consistent with the module (reference: img=448, patch=14,
    # emb=768, 12 layers/heads, conv 256/128, 21 classes, 32x32 tokens).
    cfg = dict(img=32, patch=8, emb=32, heads=4, layers=2, mlp=128,
               conv1=64, conv2=32, num_classes=5)
    key = jax.random.PRNGKey(0)
    pkey, xkey = jax.random.split(key)
    params = prepare_params(init_params(pkey, cfg), cfg)
    image = jax.random.normal(xkey, (2, 3, cfg["img"], cfg["img"]), jnp.float32)

    fwd = jax.jit(functools.partial(dino_semantic_segmentation, cfg=cfg))
    logits = jax.block_until_ready(fwd(params, image))

    assert logits.shape == (2, cfg["num_classes"], cfg["img"], cfg["img"]), logits.shape
    assert bool(jnp.all(jnp.isfinite(logits)))
    print("KERNEL_OK")
</pallas_src>

<mosaic_0001>
module attributes {stable_mosaic.version = 11 : i64} {
  func.func @_matmul_kernel(%arg0: i32, %arg1: i32, %arg2: memref<32x192xf32, #tpu.memory_space<vmem>>, %arg3: memref<192x32xbf16, #tpu.memory_space<vmem>>, %arg4: memref<1x32xf32, #tpu.memory_space<vmem>>, %arg5: memref<32x32xf32, #tpu.memory_space<vmem>>) attributes {dimension_semantics = [#tpu.dimension_semantics<parallel>, #tpu.dimension_semantics<parallel>], iteration_bounds = array<i64: 1, 1>, scalar_prefetch = 0 : i64, scratch_operands = 0 : i64, tpu.core_type = #tpu.core_type<tc>, window_params = [{transform_indices = @transform_0, window_bounds = array<i64: 32, 192>}, {transform_indices = @transform_1, window_bounds = array<i64: 192, 32>}, {transform_indices = @transform_2, window_bounds = array<i64: 1, 32>}, {transform_indices = @transform_3, window_bounds = array<i64: 32, 32>}]} {
    %c0 = arith.constant 0 : index
    %c0_0 = arith.constant 0 : index
    %0 = vector.load %arg2[%c0, %c0_0] : memref<32x192xf32, #tpu.memory_space<vmem>>, vector<32x192xf32>
    %1 = arith.truncf %0 : vector<32x192xf32> to vector<32x192xbf16>
    %c0_1 = arith.constant 0 : index
    %c0_2 = arith.constant 0 : index
    %2 = vector.load %arg3[%c0_1, %c0_2] : memref<192x32xbf16, #tpu.memory_space<vmem>>, vector<192x32xbf16>
    %cst = arith.constant dense<0.000000e+00> : vector<32x32xf32>
    %3 = tpu.matmul %1, %2, %cst {dimension_numbers = #tpu.dot_dimension_numbers<[1], [0], [0], [1], [0, 0, 1, 1], [], []>} : vector<32x192xbf16>, vector<192x32xbf16>, vector<32x32xf32> -> vector<32x32xf32>
    %c0_3 = arith.constant 0 : index
    %c0_4 = arith.constant 0 : index
    %4 = vector.load %arg4[%c0_3, %c0_4] : memref<1x32xf32, #tpu.memory_space<vmem>>, vector<1x32xf32>
    %5 = vector.broadcast %4 : vector<1x32xf32> to vector<32x32xf32>
    %6 = arith.addf %3, %5 : vector<32x32xf32>
    %c0_5 = arith.constant 0 : index
    %c0_6 = arith.constant 0 : index
    %7 = vector.load %arg5[%c0_5, %c0_6] : memref<32x32xf32, #tpu.memory_space<vmem>>, vector<32x32xf32>
    tpu.vector_store %arg5[%c0_5, %c0_6], %6 {strides = array<i32>} : memref<32x32xf32, #tpu.memory_space<vmem>>, vector<32x32xf32>,
    return
  }
  func.func @transform_0(%arg0: i32, %arg1: i32) -> (i32, i32) {
    %c0_i32 = arith.constant 0 : i32
    %c0_i32_0 = arith.constant 0 : i32
    return %arg0, %c0_i32 : i32, i32
  }
  func.func @transform_1(%arg0: i32, %arg1: i32) -> (i32, i32) {
    %c0_i32 = arith.constant 0 : i32
    %c0_i32_0 = arith.constant 0 : i32
    return %c0_i32, %arg1 : i32, i32
  }
  func.func @transform_2(%arg0: i32, %arg1: i32) -> (i32, i32) {
    %c0_i32 = arith.constant 0 : i32
    %c0_i32_0 = arith.constant 0 : i32
    return %c0_i32, %arg1 : i32, i32
  }
  func.func @transform_3(%arg0: i32, %arg1: i32) -> (i32, i32) {
    %c0_i32 = arith.constant 0 : i32
    return %arg0, %arg1 : i32, i32
  }
}

module attributes {stable_mosaic.version = 11 : i64} {
  func.func @_attention_kernel(%arg0: i32, %arg1: memref<1x24x96xbf16, #tpu.memory_space<vmem>>, %arg2: memref<1x24x32xbf16, #tpu.memory_space<vmem>>) attributes {dimension_semantics = [#tpu.dimension_semantics<parallel>], iteration_bounds = array<i64: 2>, scalar_prefetch = 0 : i64, scratch_operands = 0 : i64, tpu.core_type = #tpu.core_type<tc>, window_params = [{transform_indices = @transform_0, window_bounds = array<i64: 1, 24, 96>}, {transform_indices = @transform_1, window_bounds = array<i64: 1, 24, 32>}]} {
    %0 = tpu.iota {dimensions = array<i32: 1>} : vector<24x24xi32>
    %c17_i32 = arith.constant 17 : i32
    %1 = vector.broadcast %c17_i32 : i32 to vector<24x24xi32>
    %2 = arith.cmpi slt, %0, %1 : vector<24x24xi32>
    %c0 = arith.constant 0 : index
    %c0_0 = arith.constant 0 : index
    %c0_1 = arith.constant 0 : index
    %3 = vector.load %arg1[%c0, %c0_0, %c0_1] : memref<1x24x96xbf16, #tpu.memory_space<vmem>>, vector<1x24x8xbf16>
    %4 = vector.shape_cast %3 : vector<1x24x8xbf16> to vector<24x8xbf16>
    %c0_2 = arith.constant 0 : index
    %c0_3 = arith.constant 0 : index
    %c32 = arith.constant 32 : index
    %5 = vector.load %arg1[%c0_2, %c0_3, %c32] : memref<1x24x96xbf16, #tpu.memory_space<vmem>>, vector<1x24x8xbf16>
    %6 = vector.shape_cast %5 : vector<1x24x8xbf16> to vector<24x8xbf16>
    %c0_4 = arith.constant 0 : index
    %c0_5 = arith.constant 0 : index
    %c64 = arith.constant 64 : index
    %7 = vector.load %arg1[%c0_4, %c0_5, %c64] : memref<1x24x96xbf16, #tpu.memory_space<vmem>>, vector<1x24x8xbf16>
    %8 = vector.shape_cast %7 : vector<1x24x8xbf16> to vector<24x8xbf16>
    %cst = arith.constant dense<0.000000e+00> : vector<24x24xf32>
    %9 = tpu.matmul %4, %6, %cst {dimension_numbers = #tpu.dot_dimension_numbers<[1], [1], [0], [0], [0, 0, 1, 0], [], []>} : vector<24x8xbf16>, vector<24x8xbf16>, vector<24x24xf32> -> vector<24x24xf32>
    %cst_6 = arith.constant 0.353553385 : f32
    %10 = vector.broadcast %cst_6 : f32 to vector<24x24xf32>
    %11 = arith.mulf %9, %10 : vector<24x24xf32>
    %cst_7 = arith.constant -1.000000e+30 : f32
    %12 = vector.broadcast %cst_7 : f32 to vector<24x24xf32>
    %13 = arith.select %2, %11, %12 : vector<24x24xi1>, vector<24x24xf32>
    %cst_8 = arith.constant dense<0xFF800000> : vector<24xf32>
    %14 = vector.multi_reduction <maximumf>, %13, %cst_8 [1] : vector<24x24xf32> to vector<24xf32>
    %15 = vector.shape_cast %14 : vector<24xf32> to vector<24x1xf32>
    %16 = vector.broadcast %15 : vector<24x1xf32> to vector<24x24xf32>
    %17 = arith.subf %13, %16 : vector<24x24xf32>
    %18 = math.exp %17 : vector<24x24xf32>
    %cst_9 = arith.constant dense<0.000000e+00> : vector<24xf32>
    %19 = vector.multi_reduction <add>, %18, %cst_9 [1] : vector<24x24xf32> to vector<24xf32>
    %20 = vector.shape_cast %19 : vector<24xf32> to vector<24x1xf32>
    %21 = tpu.reciprocal %20 {approx = true} : vector<24x1xf32> -> vector<24x1xf32>
    %22 = vector.broadcast %21 : vector<24x1xf32> to vector<24x24xf32>
    %23 = arith.mulf %18, %22 : vector<24x24xf32>
    %24 = arith.truncf %23 : vector<24x24xf32> to vector<24x24xbf16>
    %cst_10 = arith.constant dense<0.000000e+00> : vector<24x8xf32>
    %25 = tpu.matmul %24, %8, %cst_10 {dimension_numbers = #tpu.dot_dimension_numbers<[1], [0], [0], [1], [0, 0, 1, 1], [], []>} : vector<24x24xbf16>, vector<24x8xbf16>, vector<24x8xf32> -> vector<24x8xf32>
    %c0_11 = arith.constant 0 : index
    %c0_12 = arith.constant 0 : index
    %c8 = arith.constant 8 : index
    %26 = vector.load %arg1[%c0_11, %c0_12, %c8] : memref<1x24x96xbf16, #tpu.memory_space<vmem>>, vector<1x24x8xbf16>
    %27 = vector.shape_cast %26 : vector<1x24x8xbf16> to vector<24x8xbf16>
    %c0_13 = arith.constant 0 : index
    %c0_14 = arith.constant 0 : index
    %c40 = arith.constant 40 : index
    %28 = vector.load %arg1[%c0_13, %c0_14, %c40] : memref<1x24x96xbf16, #tpu.memory_space<vmem>>, vector<1x24x8xbf16>
    %29 = vector.shape_cast %28 : vector<1x24x8xbf16> to vector<24x8xbf16>
    %c0_15 = arith.constant 0 : index
    %c0_16 = arith.constant 0 : index
    %c72 = arith.constant 72 : index
    %30 = vector.load %arg1[%c0_15, %c0_16, %c72] : memref<1x24x96xbf16, #tpu.memory_space<vmem>>, vector<1x24x8xbf16>
    %31 = vector.shape_cast %30 : vector<1x24x8xbf16> to vector<24x8xbf16>
    %cst_17 = arith.constant dense<0.000000e+00> : vector<24x24xf32>
    %32 = tpu.matmul %27, %29, %cst_17 {dimension_numbers = #tpu.dot_dimension_numbers<[1], [1], [0], [0], [0, 0, 1, 0], [], []>} : vector<24x8xbf16>, vector<24x8xbf16>, vector<24x24xf32> -> vector<24x24xf32>
    %cst_18 = arith.constant 0.353553385 : f32
    %33 = vector.broadcast %cst_18 : f32 to vector<24x24xf32>
    %34 = arith.mulf %32, %33 : vector<24x24xf32>
    %cst_19 = arith.constant -1.000000e+30 : f32
    %35 = vector.broadcast %cst_19 : f32 to vector<24x24xf32>
    %36 = arith.select %2, %34, %35 : vector<24x24xi1>, vector<24x24xf32>
    %cst_20 = arith.constant dense<0xFF800000> : vector<24xf32>
    %37 = vector.multi_reduction <maximumf>, %36, %cst_20 [1] : vector<24x24xf32> to vector<24xf32>
    %38 = vector.shape_cast %37 : vector<24xf32> to vector<24x1xf32>
    %39 = vector.broadcast %38 : vector<24x1xf32> to vector<24x24xf32>
    %40 = arith.subf %36, %39 : vector<24x24xf32>
    %41 = math.exp %40 : vector<24x24xf32>
    %cst_21 = arith.constant dense<0.000000e+00> : vector<24xf32>
    %42 = vector.multi_reduction <add>, %41, %cst_21 [1] : vector<24x24xf32> to vector<24xf32>
    %43 = vector.shape_cast %42 : vector<24xf32> to vector<24x1xf32>
    %44 = tpu.reciprocal %43 {approx = true} : vector<24x1xf32> -> vector<24x1xf32>
    %45 = vector.broadcast %44 : vector<24x1xf32> to vector<24x24xf32>
    %46 = arith.mulf %41, %45 : vector<24x24xf32>
    %47 = arith.truncf %46 : vector<24x24xf32> to vector<24x24xbf16>
    %cst_22 = arith.constant dense<0.000000e+00> : vector<24x8xf32>
    %48 = tpu.matmul %47, %31, %cst_22 {dimension_numbers = #tpu.dot_dimension_numbers<[1], [0], [0], [1], [0, 0, 1, 1], [], []>} : vector<24x24xbf16>, vector<24x8xbf16>, vector<24x8xf32> -> vector<24x8xf32>
    %c0_23 = arith.constant 0 : index
    %c0_24 = arith.constant 0 : index
    %c16 = arith.constant 16 : index
    %49 = vector.load %arg1[%c0_23, %c0_24, %c16] : memref<1x24x96xbf16, #tpu.memory_space<vmem>>, vector<1x24x8xbf16>
    %50 = vector.shape_cast %49 : vector<1x24x8xbf16> to vector<24x8xbf16>
    %c0_25 = arith.constant 0 : index
    %c0_26 = arith.constant 0 : index
    %c48 = arith.constant 48 : index
    %51 = vector.load %arg1[%c0_25, %c0_26, %c48] : memref<1x24x96xbf16, #tpu.memory_space<vmem>>, vector<1x24x8xbf16>
    %52 = vector.shape_cast %51 : vector<1x24x8xbf16> to vector<24x8xbf16>
    %c0_27 = arith.constant 0 : index
    %c0_28 = arith.constant 0 : index
    %c80 = arith.constant 80 : index
    %53 = vector.load %arg1[%c0_27, %c0_28, %c80] : memref<1x24x96xbf16, #tpu.memory_space<vmem>>, vector<1x24x8xbf16>
    %54 = vector.shape_cast %53 : vector<1x24x8xbf16> to vector<24x8xbf16>
    %cst_29 = arith.constant dense<0.000000e+00> : vector<24x24xf32>
    %55 = tpu.matmul %50, %52, %cst_29 {dimension_numbers = #tpu.dot_dimension_numbers<[1], [1], [0], [0], [0, 0, 1, 0], [], []>} : vector<24x8xbf16>, vector<24x8xbf16>, vector<24x24xf32> -> vector<24x24xf32>
    %cst_30 = arith.constant 0.353553385 : f32
    %56 = vector.broadcast %cst_30 : f32 to vector<24x24xf32>
    %57 = arith.mulf %55, %56 : vector<24x24xf32>
    %cst_31 = arith.constant -1.000000e+30 : f32
    %58 = vector.broadcast %cst_31 : f32 to vector<24x24xf32>
    %59 = arith.select %2, %57, %58 : vector<24x24xi1>, vector<24x24xf32>
    %cst_32 = arith.constant dense<0xFF800000> : vector<24xf32>
    %60 = vector.multi_reduction <maximumf>, %59, %cst_32 [1] : vector<24x24xf32> to vector<24xf32>
    %61 = vector.shape_cast %60 : vector<24xf32> to vector<24x1xf32>
    %62 = vector.broadcast %61 : vector<24x1xf32> to vector<24x24xf32>
    %63 = arith.subf %59, %62 : vector<24x24xf32>
    %64 = math.exp %63 : vector<24x24xf32>
    %cst_33 = arith.constant dense<0.000000e+00> : vector<24xf32>
    %65 = vector.multi_reduction <add>, %64, %cst_33 [1] : vector<24x24xf32> to vector<24xf32>
    %66 = vector.shape_cast %65 : vector<24xf32> to vector<24x1xf32>
    %67 = tpu.reciprocal %66 {approx = true} : vector<24x1xf32> -> vector<24x1xf32>
    %68 = vector.broadcast %67 : vector<24x1xf32> to vector<24x24xf32>
    %69 = arith.mulf %64, %68 : vector<24x24xf32>
    %70 = arith.truncf %69 : vector<24x24xf32> to vector<24x24xbf16>
    %cst_34 = arith.constant dense<0.000000e+00> : vector<24x8xf32>
    %71 = tpu.matmul %70, %54, %cst_34 {dimension_numbers = #tpu.dot_dimension_numbers<[1], [0], [0], [1], [0, 0, 1, 1], [], []>} : vector<24x24xbf16>, vector<24x8xbf16>, vector<24x8xf32> -> vector<24x8xf32>
    %c0_35 = arith.constant 0 : index
    %c0_36 = arith.constant 0 : index
    %c24 = arith.constant 24 : index
    %72 = vector.load %arg1[%c0_35, %c0_36, %c24] : memref<1x24x96xbf16, #tpu.memory_space<vmem>>, vector<1x24x8xbf16>
    %73 = vector.shape_cast %72 : vector<1x24x8xbf16> to vector<24x8xbf16>
    %c0_37 = arith.constant 0 : index
    %c0_38 = arith.constant 0 : index
    %c56 = arith.constant 56 : index
    %74 = vector.load %arg1[%c0_37, %c0_38, %c56] : memref<1x24x96xbf16, #tpu.memory_space<vmem>>, vector<1x24x8xbf16>
    %75 = vector.shape_cast %74 : vector<1x24x8xbf16> to vector<24x8xbf16>
    %c0_39 = arith.constant 0 : index
    %c0_40 = arith.constant 0 : index
    %c88 = arith.constant 88 : index
    %76 = vector.load %arg1[%c0_39, %c0_40, %c88] : memref<1x24x96xbf16, #tpu.memory_space<vmem>>, vector<1x24x8xbf16>
    %77 = vector.shape_cast %76 : vector<1x24x8xbf16> to vector<24x8xbf16>
    %cst_41 = arith.constant dense<0.000000e+00> : vector<24x24xf32>
    %78 = tpu.matmul %73, %75, %cst_41 {dimension_numbers = #tpu.dot_dimension_numbers<[1], [1], [0], [0], [0, 0, 1, 0], [], []>} : vector<24x8xbf16>, vector<24x8xbf16>, vector<24x24xf32> -> vector<24x24xf32>
    %cst_42 = arith.constant 0.353553385 : f32
    %79 = vector.broadcast %cst_42 : f32 to vector<24x24xf32>
    %80 = arith.mulf %78, %79 : vector<24x24xf32>
    %cst_43 = arith.constant -1.000000e+30 : f32
    %81 = vector.broadcast %cst_43 : f32 to vector<24x24xf32>
    %82 = arith.select %2, %80, %81 : vector<24x24xi1>, vector<24x24xf32>
    %cst_44 = arith.constant dense<0xFF800000> : vector<24xf32>
    %83 = vector.multi_reduction <maximumf>, %82, %cst_44 [1] : vector<24x24xf32> to vector<24xf32>
    %84 = vector.shape_cast %83 : vector<24xf32> to vector<24x1xf32>
    %85 = vector.broadcast %84 : vector<24x1xf32> to vector<24x24xf32>
    %86 = arith.subf %82, %85 : vector<24x24xf32>
    %87 = math.exp %86 : vector<24x24xf32>
    %cst_45 = arith.constant dense<0.000000e+00> : vector<24xf32>
    %88 = vector.multi_reduction <add>, %87, %cst_45 [1] : vector<24x24xf32> to vector<24xf32>
    %89 = vector.shape_cast %88 : vector<24xf32> to vector<24x1xf32>
    %90 = tpu.reciprocal %89 {approx = true} : vector<24x1xf32> -> vector<24x1xf32>
    %91 = vector.broadcast %90 : vector<24x1xf32> to vector<24x24xf32>
    %92 = arith.mulf %87, %91 : vector<24x24xf32>
    %93 = arith.truncf %92 : vector<24x24xf32> to vector<24x24xbf16>
    %cst_46 = arith.constant dense<0.000000e+00> : vector<24x8xf32>
    %94 = tpu.matmul %93, %77, %cst_46 {dimension_numbers = #tpu.dot_dimension_numbers<[1], [0], [0], [1], [0, 0, 1, 1], [], []>} : vector<24x24xbf16>, vector<24x8xbf16>, vector<24x8xf32> -> vector<24x8xf32>
    %95 = tpu.concatenate %25, %48, %71, %94 in 1 : vector<24x8xf32>, vector<24x8xf32>, vector<24x8xf32>, vector<24x8xf32> -> vector<24x32xf32>
    %96 = arith.truncf %95 : vector<24x32xf32> to vector<24x32xbf16>
    %c0_47 = arith.constant 0 : index
    %c0_48 = arith.constant 0 : index
    %c0_49 = arith.constant 0 : index
    %97 = vector.load %arg2[%c0_47, %c0_48, %c0_49] : memref<1x24x32xbf16, #tpu.memory_space<vmem>>, vector<1x24x32xbf16>
    %98 = vector.shape_cast %97 : vector<1x24x32xbf16> to vector<24x32xbf16>
    %99 = vector.shape_cast %96 : vector<24x32xbf16> to vector<1x24x32xbf16>
    tpu.vector_store %arg2[%c0_47, %c0_48, %c0_49], %99 {strides = array<i32>} : memref<1x24x32xbf16, #tpu.memory_space<vmem>>, vector<1x24x32xbf16>,
    return
  }
  func.func @transform_0(%arg0: i32) -> (i32, i32, i32) {
    %c0_i32 = arith.constant 0 : i32
    %c0_i32_0 = arith.constant 0 : i32
    %c0_i32_1 = arith.constant 0 : i32
    return %arg0, %c0_i32, %c0_i32_0 : i32, i32, i32
  }
  func.func @transform_1(%arg0: i32) -> (i32, i32, i32) {
    %c0_i32 = arith.constant 0 : i32
    %c0_i32_0 = arith.constant 0 : i32
    %c0_i32_1 = arith.constant 0 : i32
    return %arg0, %c0_i32, %c0_i32_0 : i32, i32, i32
  }
}

module attributes {stable_mosaic.version = 11 : i64} {
  func.func @_ln_matmul_kernel(%arg0: i32, %arg1: i32, %arg2: memref<48x32xf32, #tpu.memory_space<vmem>>, %arg3: memref<1x32xf32, #tpu.memory_space<vmem>>, %arg4: memref<1x32xf32, #tpu.memory_space<vmem>>, %arg5: memref<32x96xbf16, #tpu.memory_space<vmem>>, %arg6: memref<1x96xf32, #tpu.memory_space<vmem>>, %arg7: memref<48x96xbf16, #tpu.memory_space<vmem>>) attributes {dimension_semantics = [#tpu.dimension_semantics<parallel>, #tpu.dimension_semantics<parallel>], iteration_bounds = array<i64: 1, 1>, scalar_prefetch = 0 : i64, scratch_operands = 0 : i64, tpu.core_type = #tpu.core_type<tc>, window_params = [{transform_indices = @transform_0, window_bounds = array<i64: 48, 32>}, {pipeline_mode = #tpu.pipeline_mode<synchronous>, transform_indices = @transform_1, window_bounds = array<i64: 1, 32>}, {pipeline_mode = #tpu.pipeline_mode<synchronous>, transform_indices = @transform_2, window_bounds = array<i64: 1, 32>}, {transform_indices = @transform_3, window_bounds = array<i64: 32, 96>}, {transform_indices = @transform_4, window_bounds = array<i64: 1, 96>}, {transform_indices = @transform_5, window_bounds = array<i64: 48, 96>}]} {
    %c0 = arith.constant 0 : index
    %c0_0 = arith.constant 0 : index
    %0 = vector.load %arg2[%c0, %c0_0] : memref<48x32xf32, #tpu.memory_space<vmem>>, vector<48x32xf32>
    %cst = arith.constant dense<0.000000e+00> : vector<48xf32>
    %1 = vector.multi_reduction <add>, %0, %cst [1] : vector<48x32xf32> to vector<48xf32>
    %2 = vector.shape_cast %1 : vector<48xf32> to vector<48x1xf32>
    %cst_1 = arith.constant 3.200000e+01 : f32
    %3 = vector.broadcast %cst_1 : f32 to vector<48x1xf32>
    %4 = arith.divf %2, %3 : vector<48x1xf32>
    %5 = vector.broadcast %4 : vector<48x1xf32> to vector<48x32xf32>
    %6 = arith.subf %0, %5 : vector<48x32xf32>
    %7 = arith.mulf %6, %6 : vector<48x32xf32>
    %cst_2 = arith.constant dense<0.000000e+00> : vector<48xf32>
    %8 = vector.multi_reduction <add>, %7, %cst_2 [1] : vector<48x32xf32> to vector<48xf32>
    %9 = vector.shape_cast %8 : vector<48xf32> to vector<48x1xf32>
    %cst_3 = arith.constant 3.200000e+01 : f32
    %10 = vector.broadcast %cst_3 : f32 to vector<48x1xf32>
    %11 = arith.divf %9, %10 : vector<48x1xf32>
    %cst_4 = arith.constant 9.99999997E-7 : f32
    %12 = vector.broadcast %cst_4 : f32 to vector<48x1xf32>
    %13 = arith.addf %11, %12 : vector<48x1xf32>
    %14 = math.rsqrt %13 : vector<48x1xf32>
    %15 = vector.broadcast %14 : vector<48x1xf32> to vector<48x32xf32>
    %16 = arith.mulf %6, %15 : vector<48x32xf32>
    %c0_5 = arith.constant 0 : index
    %c0_6 = arith.constant 0 : index
    %17 = vector.load %arg3[%c0_5, %c0_6] : memref<1x32xf32, #tpu.memory_space<vmem>>, vector<1x32xf32>
    %18 = vector.broadcast %17 : vector<1x32xf32> to vector<48x32xf32>
    %19 = arith.mulf %16, %18 : vector<48x32xf32>
    %c0_7 = arith.constant 0 : index
    %c0_8 = arith.constant 0 : index
    %20 = vector.load %arg4[%c0_7, %c0_8] : memref<1x32xf32, #tpu.memory_space<vmem>>, vector<1x32xf32>
    %21 = vector.broadcast %20 : vector<1x32xf32> to vector<48x32xf32>
    %22 = arith.addf %19, %21 : vector<48x32xf32>
    %23 = arith.truncf %22 : vector<48x32xf32> to vector<48x32xbf16>
    %c0_9 = arith.constant 0 : index
    %c0_10 = arith.constant 0 : index
    %24 = vector.load %arg5[%c0_9, %c0_10] : memref<32x96xbf16, #tpu.memory_space<vmem>>, vector<32x96xbf16>
    %cst_11 = arith.constant dense<0.000000e+00> : vector<48x96xf32>
    %25 = tpu.matmul %23, %24, %cst_11 {dimension_numbers = #tpu.dot_dimension_numbers<[1], [0], [0], [1], [0, 0, 1, 1], [], []>} : vector<48x32xbf16>, vector<32x96xbf16>, vector<48x96xf32> -> vector<48x96xf32>
    %c0_12 = arith.constant 0 : index
    %c0_13 = arith.constant 0 : index
    %26 = vector.load %arg6[%c0_12, %c0_13] : memref<1x96xf32, #tpu.memory_space<vmem>>, vector<1x96xf32>
    %27 = vector.broadcast %26 : vector<1x96xf32> to vector<48x96xf32>
    %28 = arith.addf %25, %27 : vector<48x96xf32>
    %29 = arith.truncf %28 : vector<48x96xf32> to vector<48x96xbf16>
    %c0_14 = arith.constant 0 : index
    %c0_15 = arith.constant 0 : index
    %30 = vector.load %arg7[%c0_14, %c0_15] : memref<48x96xbf16, #tpu.memory_space<vmem>>, vector<48x96xbf16>
    tpu.vector_store %arg7[%c0_14, %c0_15], %29 {strides = array<i32>} : memref<48x96xbf16, #tpu.memory_space<vmem>>, vector<48x96xbf16>,
    return
  }
  func.func @transform_0(%arg0: i32, %arg1: i32) -> (i32, i32) {
    %c0_i32 = arith.constant 0 : i32
    %c0_i32_0 = arith.constant 0 : i32
    return %arg0, %c0_i32 : i32, i32
  }
  func.func @transform_1(%arg0: i32, %arg1: i32) -> (i32, i32) {
    %c0_i32 = arith.constant 0 : i32
    %c0_i32_0 = arith.constant 0 : i32
    %c0_i32_1 = arith.constant 0 : i32
    return %c0_i32, %c0_i32_0 : i32, i32
  }
  func.func @transform_2(%arg0: i32, %arg1: i32) -> (i32, i32) {
    %c0_i32 = arith.constant 0 : i32
    %c0_i32_0 = arith.constant 0 : i32
    %c0_i32_1 = arith.constant 0 : i32
    return %c0_i32, %c0_i32_0 : i32, i32
  }
  func.func @transform_3(%arg0: i32, %arg1: i32) -> (i32, i32) {
    %c0_i32 = arith.constant 0 : i32
    %c0_i32_0 = arith.constant 0 : i32
    return %c0_i32, %arg1 : i32, i32
  }
  func.func @transform_4(%arg0: i32, %arg1: i32) -> (i32, i32) {
    %c0_i32 = arith.constant 0 : i32
    %c0_i32_0 = arith.constant 0 : i32
    return %c0_i32, %arg1 : i32, i32
  }
  func.func @transform_5(%arg0: i32, %arg1: i32) -> (i32, i32) {
    %c0_i32 = arith.constant 0 : i32
    return %arg0, %arg1 : i32, i32
  }
}

module attributes {stable_mosaic.version = 11 : i64} {
  func.func @_matmul_scale_res_kernel(%arg0: i32, %arg1: i32, %arg2: memref<48x32xbf16, #tpu.memory_space<vmem>>, %arg3: memref<32x32xbf16, #tpu.memory_space<vmem>>, %arg4: memref<1x32xf32, #tpu.memory_space<vmem>>, %arg5: memref<1x32xf32, #tpu.memory_space<vmem>>, %arg6: memref<48x32xf32, #tpu.memory_space<vmem>>, %arg7: memref<48x32xf32, #tpu.memory_space<vmem>>) attributes {dimension_semantics = [#tpu.dimension_semantics<parallel>, #tpu.dimension_semantics<parallel>], iteration_bounds = array<i64: 1, 1>, scalar_prefetch = 0 : i64, scratch_operands = 0 : i64, tpu.core_type = #tpu.core_type<tc>, window_params = [{transform_indices = @transform_0, window_bounds = array<i64: 48, 32>}, {transform_indices = @transform_1, window_bounds = array<i64: 32, 32>}, {transform_indices = @transform_2, window_bounds = array<i64: 1, 32>}, {transform_indices = @transform_3, window_bounds = array<i64: 1, 32>}, {transform_indices = @transform_4, window_bounds = array<i64: 48, 32>}, {transform_indices = @transform_5, window_bounds = array<i64: 48, 32>}]} {
    %c0 = arith.constant 0 : index
    %c0_0 = arith.constant 0 : index
    %0 = vector.load %arg2[%c0, %c0_0] : memref<48x32xbf16, #tpu.memory_space<vmem>>, vector<48x32xbf16>
    %c0_1 = arith.constant 0 : index
    %c0_2 = arith.constant 0 : index
    %1 = vector.load %arg3[%c0_1, %c0_2] : memref<32x32xbf16, #tpu.memory_space<vmem>>, vector<32x32xbf16>
    %cst = arith.constant dense<0.000000e+00> : vector<48x32xf32>
    %2 = tpu.matmul %0, %1, %cst {dimension_numbers = #tpu.dot_dimension_numbers<[1], [0], [0], [1], [0, 0, 1, 1], [], []>} : vector<48x32xbf16>, vector<32x32xbf16>, vector<48x32xf32> -> vector<48x32xf32>
    %c0_3 = arith.constant 0 : index
    %c0_4 = arith.constant 0 : index
    %3 = vector.load %arg4[%c0_3, %c0_4] : memref<1x32xf32, #tpu.memory_space<vmem>>, vector<1x32xf32>
    %4 = vector.broadcast %3 : vector<1x32xf32> to vector<48x32xf32>
    %5 = arith.addf %2, %4 : vector<48x32xf32>
    %c0_5 = arith.constant 0 : index
    %c0_6 = arith.constant 0 : index
    %6 = vector.load %arg6[%c0_5, %c0_6] : memref<48x32xf32, #tpu.memory_space<vmem>>, vector<48x32xf32>
    %c0_7 = arith.constant 0 : index
    %c0_8 = arith.constant 0 : index
    %7 = vector.load %arg5[%c0_7, %c0_8] : memref<1x32xf32, #tpu.memory_space<vmem>>, vector<1x32xf32>
    %8 = vector.broadcast %7 : vector<1x32xf32> to vector<48x32xf32>
    %9 = arith.mulf %8, %5 : vector<48x32xf32>
    %10 = arith.addf %6, %9 : vector<48x32xf32>
    %c0_9 = arith.constant 0 : index
    %c0_10 = arith.constant 0 : index
    %11 = vector.load %arg7[%c0_9, %c0_10] : memref<48x32xf32, #tpu.memory_space<vmem>>, vector<48x32xf32>
    tpu.vector_store %arg7[%c0_9, %c0_10], %10 {strides = array<i32>} : memref<48x32xf32, #tpu.memory_space<vmem>>, vector<48x32xf32>,
    return
  }
  func.func @transform_0(%arg0: i32, %arg1: i32) -> (i32, i32) {
    %c0_i32 = arith.constant 0 : i32
    %c0_i32_0 = arith.constant 0 : i32
    return %arg0, %c0_i32 : i32, i32
  }
  func.func @transform_1(%arg0: i32, %arg1: i32) -> (i32, i32) {
    %c0_i32 = arith.constant 0 : i32
    %c0_i32_0 = arith.constant 0 : i32
    return %c0_i32, %arg1 : i32, i32
  }
  func.func @transform_2(%arg0: i32, %arg1: i32) -> (i32, i32) {
    %c0_i32 = arith.constant 0 : i32
    %c0_i32_0 = arith.constant 0 : i32
    return %c0_i32, %arg1 : i32, i32
  }
  func.func @transform_3(%arg0: i32, %arg1: i32) -> (i32, i32) {
    %c0_i32 = arith.constant 0 : i32
    %c0_i32_0 = arith.constant 0 : i32
    return %c0_i32, %arg1 : i32, i32
  }
  func.func @transform_4(%arg0: i32, %arg1: i32) -> (i32, i32) {
    %c0_i32 = arith.constant 0 : i32
    return %arg0, %arg1 : i32, i32
  }
  func.func @transform_5(%arg0: i32, %arg1: i32) -> (i32, i32) {
    %c0_i32 = arith.constant 0 : i32
    return %arg0, %arg1 : i32, i32
  }
}

module attributes {stable_mosaic.version = 11 : i64} {
  func.func @_ln_matmul_kernel(%arg0: i32, %arg1: i32, %arg2: memref<48x32xf32, #tpu.memory_space<vmem>>, %arg3: memref<1x32xf32, #tpu.memory_space<vmem>>, %arg4: memref<1x32xf32, #tpu.memory_space<vmem>>, %arg5: memref<32x128xbf16, #tpu.memory_space<vmem>>, %arg6: memref<1x128xf32, #tpu.memory_space<vmem>>, %arg7: memref<48x128xbf16, #tpu.memory_space<vmem>>) attributes {dimension_semantics = [#tpu.dimension_semantics<parallel>, #tpu.dimension_semantics<parallel>], iteration_bounds = array<i64: 1, 1>, scalar_prefetch = 0 : i64, scratch_operands = 0 : i64, tpu.core_type = #tpu.core_type<tc>, window_params = [{transform_indices = @transform_0, window_bounds = array<i64: 48, 32>}, {pipeline_mode = #tpu.pipeline_mode<synchronous>, transform_indices = @transform_1, window_bounds = array<i64: 1, 32>}, {pipeline_mode = #tpu.pipeline_mode<synchronous>, transform_indices = @transform_2, window_bounds = array<i64: 1, 32>}, {transform_indices = @transform_3, window_bounds = array<i64: 32, 128>}, {transform_indices = @transform_4, window_bounds = array<i64: 1, 128>}, {transform_indices = @transform_5, window_bounds = array<i64: 48, 128>}]} {
    %c0 = arith.constant 0 : index
    %c0_0 = arith.constant 0 : index
    %0 = vector.load %arg2[%c0, %c0_0] : memref<48x32xf32, #tpu.memory_space<vmem>>, vector<48x32xf32>
    %cst = arith.constant dense<0.000000e+00> : vector<48xf32>
    %1 = vector.multi_reduction <add>, %0, %cst [1] : vector<48x32xf32> to vector<48xf32>
    %2 = vector.shape_cast %1 : vector<48xf32> to vector<48x1xf32>
    %cst_1 = arith.constant 3.200000e+01 : f32
    %3 = vector.broadcast %cst_1 : f32 to vector<48x1xf32>
    %4 = arith.divf %2, %3 : vector<48x1xf32>
    %5 = vector.broadcast %4 : vector<48x1xf32> to vector<48x32xf32>
    %6 = arith.subf %0, %5 : vector<48x32xf32>
    %7 = arith.mulf %6, %6 : vector<48x32xf32>
    %cst_2 = arith.constant dense<0.000000e+00> : vector<48xf32>
    %8 = vector.multi_reduction <add>, %7, %cst_2 [1] : vector<48x32xf32> to vector<48xf32>
    %9 = vector.shape_cast %8 : vector<48xf32> to vector<48x1xf32>
    %cst_3 = arith.constant 3.200000e+01 : f32
    %10 = vector.broadcast %cst_3 : f32 to vector<48x1xf32>
    %11 = arith.divf %9, %10 : vector<48x1xf32>
    %cst_4 = arith.constant 9.99999997E-7 : f32
    %12 = vector.broadcast %cst_4 : f32 to vector<48x1xf32>
    %13 = arith.addf %11, %12 : vector<48x1xf32>
    %14 = math.rsqrt %13 : vector<48x1xf32>
    %15 = vector.broadcast %14 : vector<48x1xf32> to vector<48x32xf32>
    %16 = arith.mulf %6, %15 : vector<48x32xf32>
    %c0_5 = arith.constant 0 : index
    %c0_6 = arith.constant 0 : index
    %17 = vector.load %arg3[%c0_5, %c0_6] : memref<1x32xf32, #tpu.memory_space<vmem>>, vector<1x32xf32>
    %18 = vector.broadcast %17 : vector<1x32xf32> to vector<48x32xf32>
    %19 = arith.mulf %16, %18 : vector<48x32xf32>
    %c0_7 = arith.constant 0 : index
    %c0_8 = arith.constant 0 : index
    %20 = vector.load %arg4[%c0_7, %c0_8] : memref<1x32xf32, #tpu.memory_space<vmem>>, vector<1x32xf32>
    %21 = vector.broadcast %20 : vector<1x32xf32> to vector<48x32xf32>
    %22 = arith.addf %19, %21 : vector<48x32xf32>
    %23 = arith.truncf %22 : vector<48x32xf32> to vector<48x32xbf16>
    %c0_9 = arith.constant 0 : index
    %c0_10 = arith.constant 0 : index
    %24 = vector.load %arg5[%c0_9, %c0_10] : memref<32x128xbf16, #tpu.memory_space<vmem>>, vector<32x128xbf16>
    %cst_11 = arith.constant dense<0.000000e+00> : vector<48x128xf32>
    %25 = tpu.matmul %23, %24, %cst_11 {dimension_numbers = #tpu.dot_dimension_numbers<[1], [0], [0], [1], [0, 0, 1, 1], [], []>} : vector<48x32xbf16>, vector<32x128xbf16>, vector<48x128xf32> -> vector<48x128xf32>
    %c0_12 = arith.constant 0 : index
    %c0_13 = arith.constant 0 : index
    %26 = vector.load %arg6[%c0_12, %c0_13] : memref<1x128xf32, #tpu.memory_space<vmem>>, vector<1x128xf32>
    %27 = vector.broadcast %26 : vector<1x128xf32> to vector<48x128xf32>
    %28 = arith.addf %25, %27 : vector<48x128xf32>
    %29 = arith.mulf %28, %28 : vector<48x128xf32>
    %30 = arith.mulf %28, %29 : vector<48x128xf32>
    %cst_14 = arith.constant 4.471500e-02 : f32
    %31 = vector.broadcast %cst_14 : f32 to vector<48x128xf32>
    %32 = arith.mulf %31, %30 : vector<48x128xf32>
    %33 = arith.addf %28, %32 : vector<48x128xf32>
    %cst_15 = arith.constant 0.797884583 : f32
    %34 = vector.broadcast %cst_15 : f32 to vector<48x128xf32>
    %35 = arith.mulf %34, %33 : vector<48x128xf32>
    %36 = math.tanh %35 : vector<48x128xf32>
    %cst_16 = arith.constant 1.000000e+00 : f32
    %37 = vector.broadcast %cst_16 : f32 to vector<48x128xf32>
    %38 = arith.addf %37, %36 : vector<48x128xf32>
    %cst_17 = arith.constant 5.000000e-01 : f32
    %39 = vector.broadcast %cst_17 : f32 to vector<48x128xf32>
    %40 = arith.mulf %39, %38 : vector<48x128xf32>
    %41 = arith.mulf %28, %40 : vector<48x128xf32>
    %42 = arith.truncf %41 : vector<48x128xf32> to vector<48x128xbf16>
    %c0_18 = arith.constant 0 : index
    %c0_19 = arith.constant 0 : index
    %43 = vector.load %arg7[%c0_18, %c0_19] : memref<48x128xbf16, #tpu.memory_space<vmem>>, vector<48x128xbf16>
    tpu.vector_store %arg7[%c0_18, %c0_19], %42 {strides = array<i32>} : memref<48x128xbf16, #tpu.memory_space<vmem>>, vector<48x128xbf16>,
    return
  }
  func.func @transform_0(%arg0: i32, %arg1: i32) -> (i32, i32) {
    %c0_i32 = arith.constant 0 : i32
    %c0_i32_0 = arith.constant 0 : i32
    return %arg0, %c0_i32 : i32, i32
  }
  func.func @transform_1(%arg0: i32, %arg1: i32) -> (i32, i32) {
    %c0_i32 = arith.constant 0 : i32
    %c0_i32_0 = arith.constant 0 : i32
    %c0_i32_1 = arith.constant 0 : i32
    return %c0_i32, %c0_i32_0 : i32, i32
  }
  func.func @transform_2(%arg0: i32, %arg1: i32) -> (i32, i32) {
    %c0_i32 = arith.constant 0 : i32
    %c0_i32_0 = arith.constant 0 : i32
    %c0_i32_1 = arith.constant 0 : i32
    return %c0_i32, %c0_i32_0 : i32, i32
  }
  func.func @transform_3(%arg0: i32, %arg1: i32) -> (i32, i32) {
    %c0_i32 = arith.constant 0 : i32
    %c0_i32_0 = arith.constant 0 : i32
    return %c0_i32, %arg1 : i32, i32
  }
  func.func @transform_4(%arg0: i32, %arg1: i32) -> (i32, i32) {
    %c0_i32 = arith.constant 0 : i32
    %c0_i32_0 = arith.constant 0 : i32
    return %c0_i32, %arg1 : i32, i32
  }
  func.func @transform_5(%arg0: i32, %arg1: i32) -> (i32, i32) {
    %c0_i32 = arith.constant 0 : i32
    return %arg0, %arg1 : i32, i32
  }
}

module attributes {stable_mosaic.version = 11 : i64} {
  func.func @_matmul_scale_res_kernel(%arg0: i32, %arg1: i32, %arg2: memref<48x128xbf16, #tpu.memory_space<vmem>>, %arg3: memref<128x32xbf16, #tpu.memory_space<vmem>>, %arg4: memref<1x32xf32, #tpu.memory_space<vmem>>, %arg5: memref<1x32xf32, #tpu.memory_space<vmem>>, %arg6: memref<48x32xf32, #tpu.memory_space<vmem>>, %arg7: memref<48x32xf32, #tpu.memory_space<vmem>>) attributes {dimension_semantics = [#tpu.dimension_semantics<parallel>, #tpu.dimension_semantics<parallel>], iteration_bounds = array<i64: 1, 1>, scalar_prefetch = 0 : i64, scratch_operands = 0 : i64, tpu.core_type = #tpu.core_type<tc>, window_params = [{transform_indices = @transform_0, window_bounds = array<i64: 48, 128>}, {transform_indices = @transform_1, window_bounds = array<i64: 128, 32>}, {transform_indices = @transform_2, window_bounds = array<i64: 1, 32>}, {transform_indices = @transform_3, window_bounds = array<i64: 1, 32>}, {transform_indices = @transform_4, window_bounds = array<i64: 48, 32>}, {transform_indices = @transform_5, window_bounds = array<i64: 48, 32>}]} {
    %c0 = arith.constant 0 : index
    %c0_0 = arith.constant 0 : index
    %0 = vector.load %arg2[%c0, %c0_0] : memref<48x128xbf16, #tpu.memory_space<vmem>>, vector<48x128xbf16>
    %c0_1 = arith.constant 0 : index
    %c0_2 = arith.constant 0 : index
    %1 = vector.load %arg3[%c0_1, %c0_2] : memref<128x32xbf16, #tpu.memory_space<vmem>>, vector<128x32xbf16>
    %cst = arith.constant dense<0.000000e+00> : vector<48x32xf32>
    %2 = tpu.matmul %0, %1, %cst {dimension_numbers = #tpu.dot_dimension_numbers<[1], [0], [0], [1], [0, 0, 1, 1], [], []>} : vector<48x128xbf16>, vector<128x32xbf16>, vector<48x32xf32> -> vector<48x32xf32>
    %c0_3 = arith.constant 0 : index
    %c0_4 = arith.constant 0 : index
    %3 = vector.load %arg4[%c0_3, %c0_4] : memref<1x32xf32, #tpu.memory_space<vmem>>, vector<1x32xf32>
    %4 = vector.broadcast %3 : vector<1x32xf32> to vector<48x32xf32>
    %5 = arith.addf %2, %4 : vector<48x32xf32>
    %c0_5 = arith.constant 0 : index
    %c0_6 = arith.constant 0 : index
    %6 = vector.load %arg6[%c0_5, %c0_6] : memref<48x32xf32, #tpu.memory_space<vmem>>, vector<48x32xf32>
    %c0_7 = arith.constant 0 : index
    %c0_8 = arith.constant 0 : index
    %7 = vector.load %arg5[%c0_7, %c0_8] : memref<1x32xf32, #tpu.memory_space<vmem>>, vector<1x32xf32>
    %8 = vector.broadcast %7 : vector<1x32xf32> to vector<48x32xf32>
    %9 = arith.mulf %8, %5 : vector<48x32xf32>
    %10 = arith.addf %6, %9 : vector<48x32xf32>
    %c0_9 = arith.constant 0 : index
    %c0_10 = arith.constant 0 : index
    %11 = vector.load %arg7[%c0_9, %c0_10] : memref<48x32xf32, #tpu.memory_space<vmem>>, vector<48x32xf32>
    tpu.vector_store %arg7[%c0_9, %c0_10], %10 {strides = array<i32>} : memref<48x32xf32, #tpu.memory_space<vmem>>, vector<48x32xf32>,
    return
  }
  func.func @transform_0(%arg0: i32, %arg1: i32) -> (i32, i32) {
    %c0_i32 = arith.constant 0 : i32
    %c0_i32_0 = arith.constant 0 : i32
    return %arg0, %c0_i32 : i32, i32
  }
  func.func @transform_1(%arg0: i32, %arg1: i32) -> (i32, i32) {
    %c0_i32 = arith.constant 0 : i32
    %c0_i32_0 = arith.constant 0 : i32
    return %c0_i32, %arg1 : i32, i32
  }
  func.func @transform_2(%arg0: i32, %arg1: i32) -> (i32, i32) {
    %c0_i32 = arith.constant 0 : i32
    %c0_i32_0 = arith.constant 0 : i32
    return %c0_i32, %arg1 : i32, i32
  }
  func.func @transform_3(%arg0: i32, %arg1: i32) -> (i32, i32) {
    %c0_i32 = arith.constant 0 : i32
    %c0_i32_0 = arith.constant 0 : i32
    return %c0_i32, %arg1 : i32, i32
  }
  func.func @transform_4(%arg0: i32, %arg1: i32) -> (i32, i32) {
    %c0_i32 = arith.constant 0 : i32
    return %arg0, %arg1 : i32, i32
  }
  func.func @transform_5(%arg0: i32, %arg1: i32) -> (i32, i32) {
    %c0_i32 = arith.constant 0 : i32
    return %arg0, %arg1 : i32, i32
  }
}

module attributes {stable_mosaic.version = 11 : i64} {
  func.func @_layernorm_kernel(%arg0: i32, %arg1: memref<48x32xf32, #tpu.memory_space<vmem>>, %arg2: memref<1x32xf32, #tpu.memory_space<vmem>>, %arg3: memref<1x32xf32, #tpu.memory_space<vmem>>, %arg4: memref<48x32xf32, #tpu.memory_space<vmem>>) attributes {dimension_semantics = [#tpu.dimension_semantics<parallel>], iteration_bounds = array<i64: 1>, scalar_prefetch = 0 : i64, scratch_operands = 0 : i64, tpu.core_type = #tpu.core_type<tc>, window_params = [{transform_indices = @transform_0, window_bounds = array<i64: 48, 32>}, {pipeline_mode = #tpu.pipeline_mode<synchronous>, transform_indices = @transform_1, window_bounds = array<i64: 1, 32>}, {pipeline_mode = #tpu.pipeline_mode<synchronous>, transform_indices = @transform_2, window_bounds = array<i64: 1, 32>}, {transform_indices = @transform_3, window_bounds = array<i64: 48, 32>}]} {
    %c0 = arith.constant 0 : index
    %c0_0 = arith.constant 0 : index
    %0 = vector.load %arg1[%c0, %c0_0] : memref<48x32xf32, #tpu.memory_space<vmem>>, vector<48x32xf32>
    %cst = arith.constant dense<0.000000e+00> : vector<48xf32>
    %1 = vector.multi_reduction <add>, %0, %cst [1] : vector<48x32xf32> to vector<48xf32>
    %2 = vector.shape_cast %1 : vector<48xf32> to vector<48x1xf32>
    %cst_1 = arith.constant 3.200000e+01 : f32
    %3 = vector.broadcast %cst_1 : f32 to vector<48x1xf32>
    %4 = arith.divf %2, %3 : vector<48x1xf32>
    %5 = vector.broadcast %4 : vector<48x1xf32> to vector<48x32xf32>
    %6 = arith.subf %0, %5 : vector<48x32xf32>
    %7 = arith.mulf %6, %6 : vector<48x32xf32>
    %cst_2 = arith.constant dense<0.000000e+00> : vector<48xf32>
    %8 = vector.multi_reduction <add>, %7, %cst_2 [1] : vector<48x32xf32> to vector<48xf32>
    %9 = vector.shape_cast %8 : vector<48xf32> to vector<48x1xf32>
    %cst_3 = arith.constant 3.200000e+01 : f32
    %10 = vector.broadcast %cst_3 : f32 to vector<48x1xf32>
    %11 = arith.divf %9, %10 : vector<48x1xf32>
    %cst_4 = arith.constant 9.99999997E-7 : f32
    %12 = vector.broadcast %cst_4 : f32 to vector<48x1xf32>
    %13 = arith.addf %11, %12 : vector<48x1xf32>
    %14 = math.rsqrt %13 : vector<48x1xf32>
    %15 = vector.broadcast %14 : vector<48x1xf32> to vector<48x32xf32>
    %16 = arith.mulf %6, %15 : vector<48x32xf32>
    %c0_5 = arith.constant 0 : index
    %c0_6 = arith.constant 0 : index
    %17 = vector.load %arg2[%c0_5, %c0_6] : memref<1x32xf32, #tpu.memory_space<vmem>>, vector<1x32xf32>
    %18 = vector.broadcast %17 : vector<1x32xf32> to vector<48x32xf32>
    %19 = arith.mulf %16, %18 : vector<48x32xf32>
    %c0_7 = arith.constant 0 : index
    %c0_8 = arith.constant 0 : index
    %20 = vector.load %arg3[%c0_7, %c0_8] : memref<1x32xf32, #tpu.memory_space<vmem>>, vector<1x32xf32>
    %21 = vector.broadcast %20 : vector<1x32xf32> to vector<48x32xf32>
    %22 = arith.addf %19, %21 : vector<48x32xf32>
    %c0_9 = arith.constant 0 : index
    %c0_10 = arith.constant 0 : index
    %23 = vector.load %arg4[%c0_9, %c0_10] : memref<48x32xf32, #tpu.memory_space<vmem>>, vector<48x32xf32>
    tpu.vector_store %arg4[%c0_9, %c0_10], %22 {strides = array<i32>} : memref<48x32xf32, #tpu.memory_space<vmem>>, vector<48x32xf32>,
    return
  }
  func.func @transform_0(%arg0: i32) -> (i32, i32) {
    %c0_i32 = arith.constant 0 : i32
    %c0_i32_0 = arith.constant 0 : i32
    return %arg0, %c0_i32 : i32, i32
  }
  func.func @transform_1(%arg0: i32) -> (i32, i32) {
    %c0_i32 = arith.constant 0 : i32
    %c0_i32_0 = arith.constant 0 : i32
    %c0_i32_1 = arith.constant 0 : i32
    return %c0_i32, %c0_i32_0 : i32, i32
  }
  func.func @transform_2(%arg0: i32) -> (i32, i32) {
    %c0_i32 = arith.constant 0 : i32
    %c0_i32_0 = arith.constant 0 : i32
    %c0_i32_1 = arith.constant 0 : i32
    return %c0_i32, %c0_i32_0 : i32, i32
  }
  func.func @transform_3(%arg0: i32) -> (i32, i32) {
    %c0_i32 = arith.constant 0 : i32
    %c0_i32_0 = arith.constant 0 : i32
    return %arg0, %c0_i32 : i32, i32
  }
}

module attributes {stable_mosaic.version = 11 : i64} {
  func.func @_conv3x3_kernel(%arg0: i32, %arg1: memref<1x26x32xf32, #tpu.memory_space<vmem>>, %arg2: memref<9x32x64xbf16, #tpu.memory_space<vmem>>, %arg3: memref<1x64xf32, #tpu.memory_space<vmem>>, %arg4: memref<1x16x64xbf16, #tpu.memory_space<vmem>>) attributes {dimension_semantics = [#tpu.dimension_semantics<parallel>], iteration_bounds = array<i64: 2>, scalar_prefetch = 0 : i64, scratch_operands = 0 : i64, tpu.core_type = #tpu.core_type<tc>, window_params = [{transform_indices = @transform_0, window_bounds = array<i64: 1, 26, 32>}, {pipeline_mode = #tpu.pipeline_mode<synchronous>, transform_indices = @transform_1, window_bounds = array<i64: 9, 32, 64>}, {pipeline_mode = #tpu.pipeline_mode<synchronous>, transform_indices = @transform_2, window_bounds = array<i64: 1, 64>}, {transform_indices = @transform_3, window_bounds = array<i64: 1, 16, 64>}]} {
    %0 = tpu.iota {dimensions = array<i32: 0>} : vector<16x1xi32>
    %c4_i32 = arith.constant 4 : i32
    %c0_i32 = arith.constant 0 : i32
    %1 = arith.cmpi eq, %c4_i32, %c0_i32 : i32
    %c1_i32 = arith.constant 1 : i32
    %2 = arith.select %1, %c1_i32, %c4_i32 : i32
    %3 = vector.broadcast %2 : i32 to vector<16x1xi32>
    %4 = arith.remsi %0, %3 : vector<16x1xi32>
    %c0_i32_0 = arith.constant 0 : i32
    %5 = vector.broadcast %c0_i32_0 : i32 to vector<16x1xi32>
    %6 = arith.cmpi ne, %4, %5 : vector<16x1xi32>
    %c0_i32_1 = arith.constant 0 : i32
    %7 = vector.broadcast %c0_i32_1 : i32 to vector<16x1xi32>
    %8 = arith.cmpi slt, %4, %7 : vector<16x1xi32>
    %c0_i32_2 = arith.constant 0 : i32
    %9 = arith.cmpi slt, %2, %c0_i32_2 : i32
    %10 = vector.broadcast %9 : i1 to vector<16x1xi1>
    %11 = vector.broadcast %10 : vector<16x1xi1> to vector<16x1xi1>
    %12 = arith.xori %8, %11 : vector<16x1xi1>
    %13 = arith.andi %12, %6 : vector<16x1xi1>
    %14 = vector.broadcast %2 : i32 to vector<16x1xi32>
    %15 = arith.addi %4, %14 : vector<16x1xi32>
    %16 = arith.select %13, %15, %4 : vector<16x1xi1>, vector<16x1xi32>
    %c0_i32_3 = arith.constant 0 : i32
    %17 = vector.broadcast %c0_i32_3 : i32 to vector<16x1xi32>
    %18 = arith.cmpi sgt, %16, %17 : vector<16x1xi32>
    %19 = arith.extui %18 : vector<16x1xi1> to vector<16x1xi32>
    %20 = arith.sitofp %19 : vector<16x1xi32> to vector<16x1xf32>
    %c3_i32 = arith.constant 3 : i32
    %21 = vector.broadcast %c3_i32 : i32 to vector<16x1xi32>
    %22 = arith.cmpi slt, %16, %21 : vector<16x1xi32>
    %23 = arith.extui %22 : vector<16x1xi1> to vector<16x1xi32>
    %24 = arith.sitofp %23 : vector<16x1xi32> to vector<16x1xf32>
    %c0 = arith.constant 0 : index
    %c0_4 = arith.constant 0 : index
    %c0_5 = arith.constant 0 : index
    %25 = vector.load %arg1[%c0, %c0_4, %c0_5] : memref<1x26x32xf32, #tpu.memory_space<vmem>>, vector<1x16x32xf32>
    %26 = vector.shape_cast %25 : vector<1x16x32xf32> to vector<16x32xf32>
    %27 = arith.truncf %26 : vector<16x32xf32> to vector<16x32xbf16>
    %c0_6 = arith.constant 0 : index
    %c0_7 = arith.constant 0 : index
    %c0_8 = arith.constant 0 : index
    %28 = vector.load %arg2[%c0_6, %c0_7, %c0_8] : memref<9x32x64xbf16, #tpu.memory_space<vmem>>, vector<1x32x64xbf16>
    %29 = vector.shape_cast %28 : vector<1x32x64xbf16> to vector<32x64xbf16>
    %cst = arith.constant dense<0.000000e+00> : vector<16x64xf32>
    %30 = tpu.matmul %27, %29, %cst {dimension_numbers = #tpu.dot_dimension_numbers<[1], [0], [0], [1], [0, 0, 1, 1], [], []>} : vector<16x32xbf16>, vector<32x64xbf16>, vector<16x64xf32> -> vector<16x64xf32>
    %c0_9 = arith.constant 0 : index
    %c4 = arith.constant 4 : index
    %c0_10 = arith.constant 0 : index
    %31 = vector.load %arg1[%c0_9, %c4, %c0_10] : memref<1x26x32xf32, #tpu.memory_space<vmem>>, vector<1x16x32xf32>
    %32 = vector.shape_cast %31 : vector<1x16x32xf32> to vector<16x32xf32>
    %33 = arith.truncf %32 : vector<16x32xf32> to vector<16x32xbf16>
    %c3 = arith.constant 3 : index
    %c0_11 = arith.constant 0 : index
    %c0_12 = arith.constant 0 : index
    %34 = vector.load %arg2[%c3, %c0_11, %c0_12] : memref<9x32x64xbf16, #tpu.memory_space<vmem>>, vector<1x32x64xbf16>
    %35 = vector.shape_cast %34 : vector<1x32x64xbf16> to vector<32x64xbf16>
    %cst_13 = arith.constant dense<0.000000e+00> : vector<16x64xf32>
    %36 = tpu.matmul %33, %35, %cst_13 {dimension_numbers = #tpu.dot_dimension_numbers<[1], [0], [0], [1], [0, 0, 1, 1], [], []>} : vector<16x32xbf16>, vector<32x64xbf16>, vector<16x64xf32> -> vector<16x64xf32>
    %37 = arith.addf %30, %36 : vector<16x64xf32>
    %c0_14 = arith.constant 0 : index
    %c8 = arith.constant 8 : index
    %c0_15 = arith.constant 0 : index
    %38 = vector.load %arg1[%c0_14, %c8, %c0_15] : memref<1x26x32xf32, #tpu.memory_space<vmem>>, vector<1x16x32xf32>
    %39 = vector.shape_cast %38 : vector<1x16x32xf32> to vector<16x32xf32>
    %40 = arith.truncf %39 : vector<16x32xf32> to vector<16x32xbf16>
    %c6 = arith.constant 6 : index
    %c0_16 = arith.constant 0 : index
    %c0_17 = arith.constant 0 : index
    %41 = vector.load %arg2[%c6, %c0_16, %c0_17] : memref<9x32x64xbf16, #tpu.memory_space<vmem>>, vector<1x32x64xbf16>
    %42 = vector.shape_cast %41 : vector<1x32x64xbf16> to vector<32x64xbf16>
    %cst_18 = arith.constant dense<0.000000e+00> : vector<16x64xf32>
    %43 = tpu.matmul %40, %42, %cst_18 {dimension_numbers = #tpu.dot_dimension_numbers<[1], [0], [0], [1], [0, 0, 1, 1], [], []>} : vector<16x32xbf16>, vector<32x64xbf16>, vector<16x64xf32> -> vector<16x64xf32>
    %44 = arith.addf %37, %43 : vector<16x64xf32>
    %45 = vector.broadcast %20 : vector<16x1xf32> to vector<16x64xf32>
    %46 = arith.mulf %44, %45 : vector<16x64xf32>
    %c0_19 = arith.constant 0 : index
    %c1 = arith.constant 1 : index
    %c0_20 = arith.constant 0 : index
    %47 = vector.load %arg1[%c0_19, %c1, %c0_20] : memref<1x26x32xf32, #tpu.memory_space<vmem>>, vector<1x16x32xf32>
    %48 = vector.shape_cast %47 : vector<1x16x32xf32> to vector<16x32xf32>
    %49 = arith.truncf %48 : vector<16x32xf32> to vector<16x32xbf16>
    %c1_21 = arith.constant 1 : index
    %c0_22 = arith.constant 0 : index
    %c0_23 = arith.constant 0 : index
    %50 = vector.load %arg2[%c1_21, %c0_22, %c0_23] : memref<9x32x64xbf16, #tpu.memory_space<vmem>>, vector<1x32x64xbf16>
    %51 = vector.shape_cast %50 : vector<1x32x64xbf16> to vector<32x64xbf16>
    %cst_24 = arith.constant dense<0.000000e+00> : vector<16x64xf32>
    %52 = tpu.matmul %49, %51, %cst_24 {dimension_numbers = #tpu.dot_dimension_numbers<[1], [0], [0], [1], [0, 0, 1, 1], [], []>} : vector<16x32xbf16>, vector<32x64xbf16>, vector<16x64xf32> -> vector<16x64xf32>
    %c0_25 = arith.constant 0 : index
    %c5 = arith.constant 5 : index
    %c0_26 = arith.constant 0 : index
    %53 = vector.load %arg1[%c0_25, %c5, %c0_26] : memref<1x26x32xf32, #tpu.memory_space<vmem>>, vector<1x16x32xf32>
    %54 = vector.shape_cast %53 : vector<1x16x32xf32> to vector<16x32xf32>
    %55 = arith.truncf %54 : vector<16x32xf32> to vector<16x32xbf16>
    %c4_27 = arith.constant 4 : index
    %c0_28 = arith.constant 0 : index
    %c0_29 = arith.constant 0 : index
    %56 = vector.load %arg2[%c4_27, %c0_28, %c0_29] : memref<9x32x64xbf16, #tpu.memory_space<vmem>>, vector<1x32x64xbf16>
    %57 = vector.shape_cast %56 : vector<1x32x64xbf16> to vector<32x64xbf16>
    %cst_30 = arith.constant dense<0.000000e+00> : vector<16x64xf32>
    %58 = tpu.matmul %55, %57, %cst_30 {dimension_numbers = #tpu.dot_dimension_numbers<[1], [0], [0], [1], [0, 0, 1, 1], [], []>} : vector<16x32xbf16>, vector<32x64xbf16>, vector<16x64xf32> -> vector<16x64xf32>
    %59 = arith.addf %52, %58 : vector<16x64xf32>
    %c0_31 = arith.constant 0 : index
    %c9 = arith.constant 9 : index
    %c0_32 = arith.constant 0 : index
    %60 = vector.load %arg1[%c0_31, %c9, %c0_32] : memref<1x26x32xf32, #tpu.memory_space<vmem>>, vector<1x16x32xf32>
    %61 = vector.shape_cast %60 : vector<1x16x32xf32> to vector<16x32xf32>
    %62 = arith.truncf %61 : vector<16x32xf32> to vector<16x32xbf16>
    %c7 = arith.constant 7 : index
    %c0_33 = arith.constant 0 : index
    %c0_34 = arith.constant 0 : index
    %63 = vector.load %arg2[%c7, %c0_33, %c0_34] : memref<9x32x64xbf16, #tpu.memory_space<vmem>>, vector<1x32x64xbf16>
    %64 = vector.shape_cast %63 : vector<1x32x64xbf16> to vector<32x64xbf16>
    %cst_35 = arith.constant dense<0.000000e+00> : vector<16x64xf32>
    %65 = tpu.matmul %62, %64, %cst_35 {dimension_numbers = #tpu.dot_dimension_numbers<[1], [0], [0], [1], [0, 0, 1, 1], [], []>} : vector<16x32xbf16>, vector<32x64xbf16>, vector<16x64xf32> -> vector<16x64xf32>
    %66 = arith.addf %59, %65 : vector<16x64xf32>
    %67 = arith.addf %46, %66 : vector<16x64xf32>
    %c0_36 = arith.constant 0 : index
    %c2 = arith.constant 2 : index
    %c0_37 = arith.constant 0 : index
    %68 = vector.load %arg1[%c0_36, %c2, %c0_37] : memref<1x26x32xf32, #tpu.memory_space<vmem>>, vector<1x16x32xf32>
    %69 = vector.shape_cast %68 : vector<1x16x32xf32> to vector<16x32xf32>
    %70 = arith.truncf %69 : vector<16x32xf32> to vector<16x32xbf16>
    %c2_38 = arith.constant 2 : index
    %c0_39 = arith.constant 0 : index
    %c0_40 = arith.constant 0 : index
    %71 = vector.load %arg2[%c2_38, %c0_39, %c0_40] : memref<9x32x64xbf16, #tpu.memory_space<vmem>>, vector<1x32x64xbf16>
    %72 = vector.shape_cast %71 : vector<1x32x64xbf16> to vector<32x64xbf16>
    %cst_41 = arith.constant dense<0.000000e+00> : vector<16x64xf32>
    %73 = tpu.matmul %70, %72, %cst_41 {dimension_numbers = #tpu.dot_dimension_numbers<[1], [0], [0], [1], [0, 0, 1, 1], [], []>} : vector<16x32xbf16>, vector<32x64xbf16>, vector<16x64xf32> -> vector<16x64xf32>
    %c0_42 = arith.constant 0 : index
    %c6_43 = arith.constant 6 : index
    %c0_44 = arith.constant 0 : index
    %74 = vector.load %arg1[%c0_42, %c6_43, %c0_44] : memref<1x26x32xf32, #tpu.memory_space<vmem>>, vector<1x16x32xf32>
    %75 = vector.shape_cast %74 : vector<1x16x32xf32> to vector<16x32xf32>
    %76 = arith.truncf %75 : vector<16x32xf32> to vector<16x32xbf16>
    %c5_45 = arith.constant 5 : index
    %c0_46 = arith.constant 0 : index
    %c0_47 = arith.constant 0 : index
    %77 = vector.load %arg2[%c5_45, %c0_46, %c0_47] : memref<9x32x64xbf16, #tpu.memory_space<vmem>>, vector<1x32x64xbf16>
    %78 = vector.shape_cast %77 : vector<1x32x64xbf16> to vector<32x64xbf16>
    %cst_48 = arith.constant dense<0.000000e+00> : vector<16x64xf32>
    %79 = tpu.matmul %76, %78, %cst_48 {dimension_numbers = #tpu.dot_dimension_numbers<[1], [0], [0], [1], [0, 0, 1, 1], [], []>} : vector<16x32xbf16>, vector<32x64xbf16>, vector<16x64xf32> -> vector<16x64xf32>
    %80 = arith.addf %73, %79 : vector<16x64xf32>
    %c0_49 = arith.constant 0 : index
    %c10 = arith.constant 10 : index
    %c0_50 = arith.constant 0 : index
    %81 = vector.load %arg1[%c0_49, %c10, %c0_50] : memref<1x26x32xf32, #tpu.memory_space<vmem>>, vector<1x16x32xf32>
    %82 = vector.shape_cast %81 : vector<1x16x32xf32> to vector<16x32xf32>
    %83 = arith.truncf %82 : vector<16x32xf32> to vector<16x32xbf16>
    %c8_51 = arith.constant 8 : index
    %c0_52 = arith.constant 0 : index
    %c0_53 = arith.constant 0 : index
    %84 = vector.load %arg2[%c8_51, %c0_52, %c0_53] : memref<9x32x64xbf16, #tpu.memory_space<vmem>>, vector<1x32x64xbf16>
    %85 = vector.shape_cast %84 : vector<1x32x64xbf16> to vector<32x64xbf16>
    %cst_54 = arith.constant dense<0.000000e+00> : vector<16x64xf32>
    %86 = tpu.matmul %83, %85, %cst_54 {dimension_numbers = #tpu.dot_dimension_numbers<[1], [0], [0], [1], [0, 0, 1, 1], [], []>} : vector<16x32xbf16>, vector<32x64xbf16>, vector<16x64xf32> -> vector<16x64xf32>
    %87 = arith.addf %80, %86 : vector<16x64xf32>
    %88 = vector.broadcast %24 : vector<16x1xf32> to vector<16x64xf32>
    %89 = arith.mulf %87, %88 : vector<16x64xf32>
    %90 = arith.addf %67, %89 : vector<16x64xf32>
    %c0_55 = arith.constant 0 : index
    %c0_56 = arith.constant 0 : index
    %91 = vector.load %arg3[%c0_55, %c0_56] : memref<1x64xf32, #tpu.memory_space<vmem>>, vector<1x64xf32>
    %92 = vector.broadcast %91 : vector<1x64xf32> to vector<16x64xf32>
    %93 = arith.addf %90, %92 : vector<16x64xf32>
    %cst_57 = arith.constant 0.000000e+00 : f32
    %94 = vector.broadcast %cst_57 : f32 to vector<16x64xf32>
    %95 = arith.cmpf ogt, %93, %94 : vector<16x64xf32>
    %cst_58 = arith.constant 0.00999999977 : f32
    %96 = vector.broadcast %cst_58 : f32 to vector<16x64xf32>
    %97 = arith.mulf %96, %93 : vector<16x64xf32>
    %98 = arith.select %95, %93, %97 : vector<16x64xi1>, vector<16x64xf32>
    %99 = arith.truncf %98 : vector<16x64xf32> to vector<16x64xbf16>
    %c0_59 = arith.constant 0 : index
    %c0_60 = arith.constant 0 : index
    %c0_61 = arith.constant 0 : index
    %100 = vector.load %arg4[%c0_59, %c0_60, %c0_61] : memref<1x16x64xbf16, #tpu.memory_space<vmem>>, vector<1x16x64xbf16>
    %101 = vector.shape_cast %100 : vector<1x16x64xbf16> to vector<16x64xbf16>
    %102 = vector.shape_cast %99 : vector<16x64xbf16> to vector<1x16x64xbf16>
    tpu.vector_store %arg4[%c0_59, %c0_60, %c0_61], %102 {strides = array<i32>} : memref<1x16x64xbf16, #tpu.memory_space<vmem>>, vector<1x16x64xbf16>,
    return
  }
  func.func @transform_0(%arg0: i32) -> (i32, i32, i32) {
    %c0_i32 = arith.constant 0 : i32
    %c0_i32_0 = arith.constant 0 : i32
    %c0_i32_1 = arith.constant 0 : i32
    return %arg0, %c0_i32, %c0_i32_0 : i32, i32, i32
  }
  func.func @transform_1(%arg0: i32) -> (i32, i32, i32) {
    %c0_i32 = arith.constant 0 : i32
    %c0_i32_0 = arith.constant 0 : i32
    %c0_i32_1 = arith.constant 0 : i32
    %c0_i32_2 = arith.constant 0 : i32
    return %c0_i32, %c0_i32_0, %c0_i32_1 : i32, i32, i32
  }
  func.func @transform_2(%arg0: i32) -> (i32, i32) {
    %c0_i32 = arith.constant 0 : i32
    %c0_i32_0 = arith.constant 0 : i32
    %c0_i32_1 = arith.constant 0 : i32
    return %c0_i32, %c0_i32_0 : i32, i32
  }
  func.func @transform_3(%arg0: i32) -> (i32, i32, i32) {
    %c0_i32 = arith.constant 0 : i32
    %c0_i32_0 = arith.constant 0 : i32
    %c0_i32_1 = arith.constant 0 : i32
    return %arg0, %c0_i32, %c0_i32_0 : i32, i32, i32
  }
}

module attributes {stable_mosaic.version = 11 : i64} {
  func.func @_conv3x3_kernel(%arg0: i32, %arg1: memref<1x82x64xbf16, #tpu.memory_space<vmem>>, %arg2: memref<9x64x32xbf16, #tpu.memory_space<vmem>>, %arg3: memref<1x32xf32, #tpu.memory_space<vmem>>, %arg4: memref<1x64x32xbf16, #tpu.memory_space<vmem>>) attributes {dimension_semantics = [#tpu.dimension_semantics<parallel>], iteration_bounds = array<i64: 2>, scalar_prefetch = 0 : i64, scratch_operands = 0 : i64, tpu.core_type = #tpu.core_type<tc>, window_params = [{transform_indices = @transform_0, window_bounds = array<i64: 1, 82, 64>}, {pipeline_mode = #tpu.pipeline_mode<synchronous>, transform_indices = @transform_1, window_bounds = array<i64: 9, 64, 32>}, {pipeline_mode = #tpu.pipeline_mode<synchronous>, transform_indices = @transform_2, window_bounds = array<i64: 1, 32>}, {transform_indices = @transform_3, window_bounds = array<i64: 1, 64, 32>}]} {
    %0 = tpu.iota {dimensions = array<i32: 0>} : vector<64x1xi32>
    %c8_i32 = arith.constant 8 : i32
    %c0_i32 = arith.constant 0 : i32
    %1 = arith.cmpi eq, %c8_i32, %c0_i32 : i32
    %c1_i32 = arith.constant 1 : i32
    %2 = arith.select %1, %c1_i32, %c8_i32 : i32
    %3 = vector.broadcast %2 : i32 to vector<64x1xi32>
    %4 = arith.remsi %0, %3 : vector<64x1xi32>
    %c0_i32_0 = arith.constant 0 : i32
    %5 = vector.broadcast %c0_i32_0 : i32 to vector<64x1xi32>
    %6 = arith.cmpi ne, %4, %5 : vector<64x1xi32>
    %c0_i32_1 = arith.constant 0 : i32
    %7 = vector.broadcast %c0_i32_1 : i32 to vector<64x1xi32>
    %8 = arith.cmpi slt, %4, %7 : vector<64x1xi32>
    %c0_i32_2 = arith.constant 0 : i32
    %9 = arith.cmpi slt, %2, %c0_i32_2 : i32
    %10 = vector.broadcast %9 : i1 to vector<64x1xi1>
    %11 = vector.broadcast %10 : vector<64x1xi1> to vector<64x1xi1>
    %12 = arith.xori %8, %11 : vector<64x1xi1>
    %13 = arith.andi %12, %6 : vector<64x1xi1>
    %14 = vector.broadcast %2 : i32 to vector<64x1xi32>
    %15 = arith.addi %4, %14 : vector<64x1xi32>
    %16 = arith.select %13, %15, %4 : vector<64x1xi1>, vector<64x1xi32>
    %c0_i32_3 = arith.constant 0 : i32
    %17 = vector.broadcast %c0_i32_3 : i32 to vector<64x1xi32>
    %18 = arith.cmpi sgt, %16, %17 : vector<64x1xi32>
    %19 = arith.extui %18 : vector<64x1xi1> to vector<64x1xi32>
    %20 = arith.sitofp %19 : vector<64x1xi32> to vector<64x1xf32>
    %c7_i32 = arith.constant 7 : i32
    %21 = vector.broadcast %c7_i32 : i32 to vector<64x1xi32>
    %22 = arith.cmpi slt, %16, %21 : vector<64x1xi32>
    %23 = arith.extui %22 : vector<64x1xi1> to vector<64x1xi32>
    %24 = arith.sitofp %23 : vector<64x1xi32> to vector<64x1xf32>
    %c0 = arith.constant 0 : index
    %c0_4 = arith.constant 0 : index
    %c0_5 = arith.constant 0 : index
    %25 = vector.load %arg1[%c0, %c0_4, %c0_5] : memref<1x82x64xbf16, #tpu.memory_space<vmem>>, vector<1x64x64xbf16>
    %26 = vector.shape_cast %25 : vector<1x64x64xbf16> to vector<64x64xbf16>
    %c0_6 = arith.constant 0 : index
    %c0_7 = arith.constant 0 : index
    %c0_8 = arith.constant 0 : index
    %27 = vector.load %arg2[%c0_6, %c0_7, %c0_8] : memref<9x64x32xbf16, #tpu.memory_space<vmem>>, vector<1x64x32xbf16>
    %28 = vector.shape_cast %27 : vector<1x64x32xbf16> to vector<64x32xbf16>
    %cst = arith.constant dense<0.000000e+00> : vector<64x32xf32>
    %29 = tpu.matmul %26, %28, %cst {dimension_numbers = #tpu.dot_dimension_numbers<[1], [0], [0], [1], [0, 0, 1, 1], [], []>} : vector<64x64xbf16>, vector<64x32xbf16>, vector<64x32xf32> -> vector<64x32xf32>
    %c0_9 = arith.constant 0 : index
    %c8 = arith.constant 8 : index
    %c0_10 = arith.constant 0 : index
    %30 = vector.load %arg1[%c0_9, %c8, %c0_10] : memref<1x82x64xbf16, #tpu.memory_space<vmem>>, vector<1x64x64xbf16>
    %31 = vector.shape_cast %30 : vector<1x64x64xbf16> to vector<64x64xbf16>
    %c3 = arith.constant 3 : index
    %c0_11 = arith.constant 0 : index
    %c0_12 = arith.constant 0 : index
    %32 = vector.load %arg2[%c3, %c0_11, %c0_12] : memref<9x64x32xbf16, #tpu.memory_space<vmem>>, vector<1x64x32xbf16>
    %33 = vector.shape_cast %32 : vector<1x64x32xbf16> to vector<64x32xbf16>
    %cst_13 = arith.constant dense<0.000000e+00> : vector<64x32xf32>
    %34 = tpu.matmul %31, %33, %cst_13 {dimension_numbers = #tpu.dot_dimension_numbers<[1], [0], [0], [1], [0, 0, 1, 1], [], []>} : vector<64x64xbf16>, vector<64x32xbf16>, vector<64x32xf32> -> vector<64x32xf32>
    %35 = arith.addf %29, %34 : vector<64x32xf32>
    %c0_14 = arith.constant 0 : index
    %c16 = arith.constant 16 : index
    %c0_15 = arith.constant 0 : index
    %36 = vector.load %arg1[%c0_14, %c16, %c0_15] : memref<1x82x64xbf16, #tpu.memory_space<vmem>>, vector<1x64x64xbf16>
    %37 = vector.shape_cast %36 : vector<1x64x64xbf16> to vector<64x64xbf16>
    %c6 = arith.constant 6 : index
    %c0_16 = arith.constant 0 : index
    %c0_17 = arith.constant 0 : index
    %38 = vector.load %arg2[%c6, %c0_16, %c0_17] : memref<9x64x32xbf16, #tpu.memory_space<vmem>>, vector<1x64x32xbf16>
    %39 = vector.shape_cast %38 : vector<1x64x32xbf16> to vector<64x32xbf16>
    %cst_18 = arith.constant dense<0.000000e+00> : vector<64x32xf32>
    %40 = tpu.matmul %37, %39, %cst_18 {dimension_numbers = #tpu.dot_dimension_numbers<[1], [0], [0], [1], [0, 0, 1, 1], [], []>} : vector<64x64xbf16>, vector<64x32xbf16>, vector<64x32xf32> -> vector<64x32xf32>
    %41 = arith.addf %35, %40 : vector<64x32xf32>
    %42 = vector.broadcast %20 : vector<64x1xf32> to vector<64x32xf32>
    %43 = arith.mulf %41, %42 : vector<64x32xf32>
    %c0_19 = arith.constant 0 : index
    %c1 = arith.constant 1 : index
    %c0_20 = arith.constant 0 : index
    %44 = vector.load %arg1[%c0_19, %c1, %c0_20] : memref<1x82x64xbf16, #tpu.memory_space<vmem>>, vector<1x64x64xbf16>
    %45 = vector.shape_cast %44 : vector<1x64x64xbf16> to vector<64x64xbf16>
    %c1_21 = arith.constant 1 : index
    %c0_22 = arith.constant 0 : index
    %c0_23 = arith.constant 0 : index
    %46 = vector.load %arg2[%c1_21, %c0_22, %c0_23] : memref<9x64x32xbf16, #tpu.memory_space<vmem>>, vector<1x64x32xbf16>
    %47 = vector.shape_cast %46 : vector<1x64x32xbf16> to vector<64x32xbf16>
    %cst_24 = arith.constant dense<0.000000e+00> : vector<64x32xf32>
    %48 = tpu.matmul %45, %47, %cst_24 {dimension_numbers = #tpu.dot_dimension_numbers<[1], [0], [0], [1], [0, 0, 1, 1], [], []>} : vector<64x64xbf16>, vector<64x32xbf16>, vector<64x32xf32> -> vector<64x32xf32>
    %c0_25 = arith.constant 0 : index
    %c9 = arith.constant 9 : index
    %c0_26 = arith.constant 0 : index
    %49 = vector.load %arg1[%c0_25, %c9, %c0_26] : memref<1x82x64xbf16, #tpu.memory_space<vmem>>, vector<1x64x64xbf16>
    %50 = vector.shape_cast %49 : vector<1x64x64xbf16> to vector<64x64xbf16>
    %c4 = arith.constant 4 : index
    %c0_27 = arith.constant 0 : index
    %c0_28 = arith.constant 0 : index
    %51 = vector.load %arg2[%c4, %c0_27, %c0_28] : memref<9x64x32xbf16, #tpu.memory_space<vmem>>, vector<1x64x32xbf16>
    %52 = vector.shape_cast %51 : vector<1x64x32xbf16> to vector<64x32xbf16>
    %cst_29 = arith.constant dense<0.000000e+00> : vector<64x32xf32>
    %53 = tpu.matmul %50, %52, %cst_29 {dimension_numbers = #tpu.dot_dimension_numbers<[1], [0], [0], [1], [0, 0, 1, 1], [], []>} : vector<64x64xbf16>, vector<64x32xbf16>, vector<64x32xf32> -> vector<64x32xf32>
    %54 = arith.addf %48, %53 : vector<64x32xf32>
    %c0_30 = arith.constant 0 : index
    %c17 = arith.constant 17 : index
    %c0_31 = arith.constant 0 : index
    %55 = vector.load %arg1[%c0_30, %c17, %c0_31] : memref<1x82x64xbf16, #tpu.memory_space<vmem>>, vector<1x64x64xbf16>
    %56 = vector.shape_cast %55 : vector<1x64x64xbf16> to vector<64x64xbf16>
    %c7 = arith.constant 7 : index
    %c0_32 = arith.constant 0 : index
    %c0_33 = arith.constant 0 : index
    %57 = vector.load %arg2[%c7, %c0_32, %c0_33] : memref<9x64x32xbf16, #tpu.memory_space<vmem>>, vector<1x64x32xbf16>
    %58 = vector.shape_cast %57 : vector<1x64x32xbf16> to vector<64x32xbf16>
    %cst_34 = arith.constant dense<0.000000e+00> : vector<64x32xf32>
    %59 = tpu.matmul %56, %58, %cst_34 {dimension_numbers = #tpu.dot_dimension_numbers<[1], [0], [0], [1], [0, 0, 1, 1], [], []>} : vector<64x64xbf16>, vector<64x32xbf16>, vector<64x32xf32> -> vector<64x32xf32>
    %60 = arith.addf %54, %59 : vector<64x32xf32>
    %61 = arith.addf %43, %60 : vector<64x32xf32>
    %c0_35 = arith.constant 0 : index
    %c2 = arith.constant 2 : index
    %c0_36 = arith.constant 0 : index
    %62 = vector.load %arg1[%c0_35, %c2, %c0_36] : memref<1x82x64xbf16, #tpu.memory_space<vmem>>, vector<1x64x64xbf16>
    %63 = vector.shape_cast %62 : vector<1x64x64xbf16> to vector<64x64xbf16>
    %c2_37 = arith.constant 2 : index
    %c0_38 = arith.constant 0 : index
    %c0_39 = arith.constant 0 : index
    %64 = vector.load %arg2[%c2_37, %c0_38, %c0_39] : memref<9x64x32xbf16, #tpu.memory_space<vmem>>, vector<1x64x32xbf16>
    %65 = vector.shape_cast %64 : vector<1x64x32xbf16> to vector<64x32xbf16>
    %cst_40 = arith.constant dense<0.000000e+00> : vector<64x32xf32>
    %66 = tpu.matmul %63, %65, %cst_40 {dimension_numbers = #tpu.dot_dimension_numbers<[1], [0], [0], [1], [0, 0, 1, 1], [], []>} : vector<64x64xbf16>, vector<64x32xbf16>, vector<64x32xf32> -> vector<64x32xf32>
    %c0_41 = arith.constant 0 : index
    %c10 = arith.constant 10 : index
    %c0_42 = arith.constant 0 : index
    %67 = vector.load %arg1[%c0_41, %c10, %c0_42] : memref<1x82x64xbf16, #tpu.memory_space<vmem>>, vector<1x64x64xbf16>
    %68 = vector.shape_cast %67 : vector<1x64x64xbf16> to vector<64x64xbf16>
    %c5 = arith.constant 5 : index
    %c0_43 = arith.constant 0 : index
    %c0_44 = arith.constant 0 : index
    %69 = vector.load %arg2[%c5, %c0_43, %c0_44] : memref<9x64x32xbf16, #tpu.memory_space<vmem>>, vector<1x64x32xbf16>
    %70 = vector.shape_cast %69 : vector<1x64x32xbf16> to vector<64x32xbf16>
    %cst_45 = arith.constant dense<0.000000e+00> : vector<64x32xf32>
    %71 = tpu.matmul %68, %70, %cst_45 {dimension_numbers = #tpu.dot_dimension_numbers<[1], [0], [0], [1], [0, 0, 1, 1], [], []>} : vector<64x64xbf16>, vector<64x32xbf16>, vector<64x32xf32> -> vector<64x32xf32>
    %72 = arith.addf %66, %71 : vector<64x32xf32>
    %c0_46 = arith.constant 0 : index
    %c18 = arith.constant 18 : index
    %c0_47 = arith.constant 0 : index
    %73 = vector.load %arg1[%c0_46, %c18, %c0_47] : memref<1x82x64xbf16, #tpu.memory_space<vmem>>, vector<1x64x64xbf16>
    %74 = vector.shape_cast %73 : vector<1x64x64xbf16> to vector<64x64xbf16>
    %c8_48 = arith.constant 8 : index
    %c0_49 = arith.constant 0 : index
    %c0_50 = arith.constant 0 : index
    %75 = vector.load %arg2[%c8_48, %c0_49, %c0_50] : memref<9x64x32xbf16, #tpu.memory_space<vmem>>, vector<1x64x32xbf16>
    %76 = vector.shape_cast %75 : vector<1x64x32xbf16> to vector<64x32xbf16>
    %cst_51 = arith.constant dense<0.000000e+00> : vector<64x32xf32>
    %77 = tpu.matmul %74, %76, %cst_51 {dimension_numbers = #tpu.dot_dimension_numbers<[1], [0], [0], [1], [0, 0, 1, 1], [], []>} : vector<64x64xbf16>, vector<64x32xbf16>, vector<64x32xf32> -> vector<64x32xf32>
    %78 = arith.addf %72, %77 : vector<64x32xf32>
    %79 = vector.broadcast %24 : vector<64x1xf32> to vector<64x32xf32>
    %80 = arith.mulf %78, %79 : vector<64x32xf32>
    %81 = arith.addf %61, %80 : vector<64x32xf32>
    %c0_52 = arith.constant 0 : index
    %c0_53 = arith.constant 0 : index
    %82 = vector.load %arg3[%c0_52, %c0_53] : memref<1x32xf32, #tpu.memory_space<vmem>>, vector<1x32xf32>
    %83 = vector.broadcast %82 : vector<1x32xf32> to vector<64x32xf32>
    %84 = arith.addf %81, %83 : vector<64x32xf32>
    %cst_54 = arith.constant 0.000000e+00 : f32
    %85 = vector.broadcast %cst_54 : f32 to vector<64x32xf32>
    %86 = arith.cmpf ogt, %84, %85 : vector<64x32xf32>
    %cst_55 = arith.constant 0.00999999977 : f32
    %87 = vector.broadcast %cst_55 : f32 to vector<64x32xf32>
    %88 = arith.mulf %87, %84 : vector<64x32xf32>
    %89 = arith.select %86, %84, %88 : vector<64x32xi1>, vector<64x32xf32>
    %90 = arith.truncf %89 : vector<64x32xf32> to vector<64x32xbf16>
    %c0_56 = arith.constant 0 : index
    %c0_57 = arith.constant 0 : index
    %c0_58 = arith.constant 0 : index
    %91 = vector.load %arg4[%c0_56, %c0_57, %c0_58] : memref<1x64x32xbf16, #tpu.memory_space<vmem>>, vector<1x64x32xbf16>
    %92 = vector.shape_cast %91 : vector<1x64x32xbf16> to vector<64x32xbf16>
    %93 = vector.shape_cast %90 : vector<64x32xbf16> to vector<1x64x32xbf16>
    tpu.vector_store %arg4[%c0_56, %c0_57, %c0_58], %93 {strides = array<i32>} : memref<1x64x32xbf16, #tpu.memory_space<vmem>>, vector<1x64x32xbf16>,
    return
  }
  func.func @transform_0(%arg0: i32) -> (i32, i32, i32) {
    %c0_i32 = arith.constant 0 : i32
    %c0_i32_0 = arith.constant 0 : i32
    %c0_i32_1 = arith.constant 0 : i32
    return %arg0, %c0_i32, %c0_i32_0 : i32, i32, i32
  }
  func.func @transform_1(%arg0: i32) -> (i32, i32, i32) {
    %c0_i32 = arith.constant 0 : i32
    %c0_i32_0 = arith.constant 0 : i32
    %c0_i32_1 = arith.constant 0 : i32
    %c0_i32_2 = arith.constant 0 : i32
    return %c0_i32, %c0_i32_0, %c0_i32_1 : i32, i32, i32
  }
  func.func @transform_2(%arg0: i32) -> (i32, i32) {
    %c0_i32 = arith.constant 0 : i32
    %c0_i32_0 = arith.constant 0 : i32
    %c0_i32_1 = arith.constant 0 : i32
    return %c0_i32, %c0_i32_0 : i32, i32
  }
  func.func @transform_3(%arg0: i32) -> (i32, i32, i32) {
    %c0_i32 = arith.constant 0 : i32
    %c0_i32_0 = arith.constant 0 : i32
    %c0_i32_1 = arith.constant 0 : i32
    return %arg0, %c0_i32, %c0_i32_0 : i32, i32, i32
  }
}

module attributes {stable_mosaic.version = 11 : i64} {
  func.func @_conv3x3_kernel(%arg0: i32, %arg1: memref<1x290x32xbf16, #tpu.memory_space<vmem>>, %arg2: memref<9x32x5xbf16, #tpu.memory_space<vmem>>, %arg3: memref<1x5xf32, #tpu.memory_space<vmem>>, %arg4: memref<1x256x5xbf16, #tpu.memory_space<vmem>>) attributes {dimension_semantics = [#tpu.dimension_semantics<parallel>], iteration_bounds = array<i64: 2>, scalar_prefetch = 0 : i64, scratch_operands = 0 : i64, tpu.core_type = #tpu.core_type<tc>, window_params = [{transform_indices = @transform_0, window_bounds = array<i64: 1, 290, 32>}, {pipeline_mode = #tpu.pipeline_mode<synchronous>, transform_indices = @transform_1, window_bounds = array<i64: 9, 32, 5>}, {pipeline_mode = #tpu.pipeline_mode<synchronous>, transform_indices = @transform_2, window_bounds = array<i64: 1, 5>}, {transform_indices = @transform_3, window_bounds = array<i64: 1, 256, 5>}]} {
    %0 = tpu.iota {dimensions = array<i32: 0>} : vector<256x1xi32>
    %c16_i32 = arith.constant 16 : i32
    %c0_i32 = arith.constant 0 : i32
    %1 = arith.cmpi eq, %c16_i32, %c0_i32 : i32
    %c1_i32 = arith.constant 1 : i32
    %2 = arith.select %1, %c1_i32, %c16_i32 : i32
    %3 = vector.broadcast %2 : i32 to vector<256x1xi32>
    %4 = arith.remsi %0, %3 : vector<256x1xi32>
    %c0_i32_0 = arith.constant 0 : i32
    %5 = vector.broadcast %c0_i32_0 : i32 to vector<256x1xi32>
    %6 = arith.cmpi ne, %4, %5 : vector<256x1xi32>
    %c0_i32_1 = arith.constant 0 : i32
    %7 = vector.broadcast %c0_i32_1 : i32 to vector<256x1xi32>
    %8 = arith.cmpi slt, %4, %7 : vector<256x1xi32>
    %c0_i32_2 = arith.constant 0 : i32
    %9 = arith.cmpi slt, %2, %c0_i32_2 : i32
    %10 = vector.broadcast %9 : i1 to vector<256x1xi1>
    %11 = vector.broadcast %10 : vector<256x1xi1> to vector<256x1xi1>
    %12 = arith.xori %8, %11 : vector<256x1xi1>
    %13 = arith.andi %12, %6 : vector<256x1xi1>
    %14 = vector.broadcast %2 : i32 to vector<256x1xi32>
    %15 = arith.addi %4, %14 : vector<256x1xi32>
    %16 = arith.select %13, %15, %4 : vector<256x1xi1>, vector<256x1xi32>
    %c0_i32_3 = arith.constant 0 : i32
    %17 = vector.broadcast %c0_i32_3 : i32 to vector<256x1xi32>
    %18 = arith.cmpi sgt, %16, %17 : vector<256x1xi32>
    %19 = arith.extui %18 : vector<256x1xi1> to vector<256x1xi32>
    %20 = arith.sitofp %19 : vector<256x1xi32> to vector<256x1xf32>
    %c15_i32 = arith.constant 15 : i32
    %21 = vector.broadcast %c15_i32 : i32 to vector<256x1xi32>
    %22 = arith.cmpi slt, %16, %21 : vector<256x1xi32>
    %23 = arith.extui %22 : vector<256x1xi1> to vector<256x1xi32>
    %24 = arith.sitofp %23 : vector<256x1xi32> to vector<256x1xf32>
    %c0 = arith.constant 0 : index
    %c0_4 = arith.constant 0 : index
    %c0_5 = arith.constant 0 : index
    %25 = vector.load %arg1[%c0, %c0_4, %c0_5] : memref<1x290x32xbf16, #tpu.memory_space<vmem>>, vector<1x256x32xbf16>
    %26 = vector.shape_cast %25 : vector<1x256x32xbf16> to vector<256x32xbf16>
    %c0_6 = arith.constant 0 : index
    %c0_7 = arith.constant 0 : index
    %c0_8 = arith.constant 0 : index
    %27 = vector.load %arg2[%c0_6, %c0_7, %c0_8] : memref<9x32x5xbf16, #tpu.memory_space<vmem>>, vector<1x32x5xbf16>
    %28 = vector.shape_cast %27 : vector<1x32x5xbf16> to vector<32x5xbf16>
    %cst = arith.constant dense<0.000000e+00> : vector<256x5xf32>
    %29 = tpu.matmul %26, %28, %cst {dimension_numbers = #tpu.dot_dimension_numbers<[1], [0], [0], [1], [0, 0, 1, 1], [], []>} : vector<256x32xbf16>, vector<32x5xbf16>, vector<256x5xf32> -> vector<256x5xf32>
    %c0_9 = arith.constant 0 : index
    %c16 = arith.constant 16 : index
    %c0_10 = arith.constant 0 : index
    %30 = vector.load %arg1[%c0_9, %c16, %c0_10] : memref<1x290x32xbf16, #tpu.memory_space<vmem>>, vector<1x256x32xbf16>
    %31 = vector.shape_cast %30 : vector<1x256x32xbf16> to vector<256x32xbf16>
    %c3 = arith.constant 3 : index
    %c0_11 = arith.constant 0 : index
    %c0_12 = arith.constant 0 : index
    %32 = vector.load %arg2[%c3, %c0_11, %c0_12] : memref<9x32x5xbf16, #tpu.memory_space<vmem>>, vector<1x32x5xbf16>
    %33 = vector.shape_cast %32 : vector<1x32x5xbf16> to vector<32x5xbf16>
    %cst_13 = arith.constant dense<0.000000e+00> : vector<256x5xf32>
    %34 = tpu.matmul %31, %33, %cst_13 {dimension_numbers = #tpu.dot_dimension_numbers<[1], [0], [0], [1], [0, 0, 1, 1], [], []>} : vector<256x32xbf16>, vector<32x5xbf16>, vector<256x5xf32> -> vector<256x5xf32>
    %35 = arith.addf %29, %34 : vector<256x5xf32>
    %c0_14 = arith.constant 0 : index
    %c32 = arith.constant 32 : index
    %c0_15 = arith.constant 0 : index
    %36 = vector.load %arg1[%c0_14, %c32, %c0_15] : memref<1x290x32xbf16, #tpu.memory_space<vmem>>, vector<1x256x32xbf16>
    %37 = vector.shape_cast %36 : vector<1x256x32xbf16> to vector<256x32xbf16>
    %c6 = arith.constant 6 : index
    %c0_16 = arith.constant 0 : index
    %c0_17 = arith.constant 0 : index
    %38 = vector.load %arg2[%c6, %c0_16, %c0_17] : memref<9x32x5xbf16, #tpu.memory_space<vmem>>, vector<1x32x5xbf16>
    %39 = vector.shape_cast %38 : vector<1x32x5xbf16> to vector<32x5xbf16>
    %cst_18 = arith.constant dense<0.000000e+00> : vector<256x5xf32>
    %40 = tpu.matmul %37, %39, %cst_18 {dimension_numbers = #tpu.dot_dimension_numbers<[1], [0], [0], [1], [0, 0, 1, 1], [], []>} : vector<256x32xbf16>, vector<32x5xbf16>, vector<256x5xf32> -> vector<256x5xf32>
    %41 = arith.addf %35, %40 : vector<256x5xf32>
    %42 = vector.broadcast %20 : vector<256x1xf32> to vector<256x5xf32>
    %43 = arith.mulf %41, %42 : vector<256x5xf32>
    %c0_19 = arith.constant 0 : index
    %c1 = arith.constant 1 : index
    %c0_20 = arith.constant 0 : index
    %44 = vector.load %arg1[%c0_19, %c1, %c0_20] : memref<1x290x32xbf16, #tpu.memory_space<vmem>>, vector<1x256x32xbf16>
    %45 = vector.shape_cast %44 : vector<1x256x32xbf16> to vector<256x32xbf16>
    %c1_21 = arith.constant 1 : index
    %c0_22 = arith.constant 0 : index
    %c0_23 = arith.constant 0 : index
    %46 = vector.load %arg2[%c1_21, %c0_22, %c0_23] : memref<9x32x5xbf16, #tpu.memory_space<vmem>>, vector<1x32x5xbf16>
    %47 = vector.shape_cast %46 : vector<1x32x5xbf16> to vector<32x5xbf16>
    %cst_24 = arith.constant dense<0.000000e+00> : vector<256x5xf32>
    %48 = tpu.matmul %45, %47, %cst_24 {dimension_numbers = #tpu.dot_dimension_numbers<[1], [0], [0], [1], [0, 0, 1, 1], [], []>} : vector<256x32xbf16>, vector<32x5xbf16>, vector<256x5xf32> -> vector<256x5xf32>
    %c0_25 = arith.constant 0 : index
    %c17 = arith.constant 17 : index
    %c0_26 = arith.constant 0 : index
    %49 = vector.load %arg1[%c0_25, %c17, %c0_26] : memref<1x290x32xbf16, #tpu.memory_space<vmem>>, vector<1x256x32xbf16>
    %50 = vector.shape_cast %49 : vector<1x256x32xbf16> to vector<256x32xbf16>
    %c4 = arith.constant 4 : index
    %c0_27 = arith.constant 0 : index
    %c0_28 = arith.constant 0 : index
    %51 = vector.load %arg2[%c4, %c0_27, %c0_28] : memref<9x32x5xbf16, #tpu.memory_space<vmem>>, vector<1x32x5xbf16>
    %52 = vector.shape_cast %51 : vector<1x32x5xbf16> to vector<32x5xbf16>
    %cst_29 = arith.constant dense<0.000000e+00> : vector<256x5xf32>
    %53 = tpu.matmul %50, %52, %cst_29 {dimension_numbers = #tpu.dot_dimension_numbers<[1], [0], [0], [1], [0, 0, 1, 1], [], []>} : vector<256x32xbf16>, vector<32x5xbf16>, vector<256x5xf32> -> vector<256x5xf32>
    %54 = arith.addf %48, %53 : vector<256x5xf32>
    %c0_30 = arith.constant 0 : index
    %c33 = arith.constant 33 : index
    %c0_31 = arith.constant 0 : index
    %55 = vector.load %arg1[%c0_30, %c33, %c0_31] : memref<1x290x32xbf16, #tpu.memory_space<vmem>>, vector<1x256x32xbf16>
    %56 = vector.shape_cast %55 : vector<1x256x32xbf16> to vector<256x32xbf16>
    %c7 = arith.constant 7 : index
    %c0_32 = arith.constant 0 : index
    %c0_33 = arith.constant 0 : index
    %57 = vector.load %arg2[%c7, %c0_32, %c0_33] : memref<9x32x5xbf16, #tpu.memory_space<vmem>>, vector<1x32x5xbf16>
    %58 = vector.shape_cast %57 : vector<1x32x5xbf16> to vector<32x5xbf16>
    %cst_34 = arith.constant dense<0.000000e+00> : vector<256x5xf32>
    %59 = tpu.matmul %56, %58, %cst_34 {dimension_numbers = #tpu.dot_dimension_numbers<[1], [0], [0], [1], [0, 0, 1, 1], [], []>} : vector<256x32xbf16>, vector<32x5xbf16>, vector<256x5xf32> -> vector<256x5xf32>
    %60 = arith.addf %54, %59 : vector<256x5xf32>
    %61 = arith.addf %43, %60 : vector<256x5xf32>
    %c0_35 = arith.constant 0 : index
    %c2 = arith.constant 2 : index
    %c0_36 = arith.constant 0 : index
    %62 = vector.load %arg1[%c0_35, %c2, %c0_36] : memref<1x290x32xbf16, #tpu.memory_space<vmem>>, vector<1x256x32xbf16>
    %63 = vector.shape_cast %62 : vector<1x256x32xbf16> to vector<256x32xbf16>
    %c2_37 = arith.constant 2 : index
    %c0_38 = arith.constant 0 : index
    %c0_39 = arith.constant 0 : index
    %64 = vector.load %arg2[%c2_37, %c0_38, %c0_39] : memref<9x32x5xbf16, #tpu.memory_space<vmem>>, vector<1x32x5xbf16>
    %65 = vector.shape_cast %64 : vector<1x32x5xbf16> to vector<32x5xbf16>
    %cst_40 = arith.constant dense<0.000000e+00> : vector<256x5xf32>
    %66 = tpu.matmul %63, %65, %cst_40 {dimension_numbers = #tpu.dot_dimension_numbers<[1], [0], [0], [1], [0, 0, 1, 1], [], []>} : vector<256x32xbf16>, vector<32x5xbf16>, vector<256x5xf32> -> vector<256x5xf32>
    %c0_41 = arith.constant 0 : index
    %c18 = arith.constant 18 : index
    %c0_42 = arith.constant 0 : index
    %67 = vector.load %arg1[%c0_41, %c18, %c0_42] : memref<1x290x32xbf16, #tpu.memory_space<vmem>>, vector<1x256x32xbf16>
    %68 = vector.shape_cast %67 : vector<1x256x32xbf16> to vector<256x32xbf16>
    %c5 = arith.constant 5 : index
    %c0_43 = arith.constant 0 : index
    %c0_44 = arith.constant 0 : index
    %69 = vector.load %arg2[%c5, %c0_43, %c0_44] : memref<9x32x5xbf16, #tpu.memory_space<vmem>>, vector<1x32x5xbf16>
    %70 = vector.shape_cast %69 : vector<1x32x5xbf16> to vector<32x5xbf16>
    %cst_45 = arith.constant dense<0.000000e+00> : vector<256x5xf32>
    %71 = tpu.matmul %68, %70, %cst_45 {dimension_numbers = #tpu.dot_dimension_numbers<[1], [0], [0], [1], [0, 0, 1, 1], [], []>} : vector<256x32xbf16>, vector<32x5xbf16>, vector<256x5xf32> -> vector<256x5xf32>
    %72 = arith.addf %66, %71 : vector<256x5xf32>
    %c0_46 = arith.constant 0 : index
    %c34 = arith.constant 34 : index
    %c0_47 = arith.constant 0 : index
    %73 = vector.load %arg1[%c0_46, %c34, %c0_47] : memref<1x290x32xbf16, #tpu.memory_space<vmem>>, vector<1x256x32xbf16>
    %74 = vector.shape_cast %73 : vector<1x256x32xbf16> to vector<256x32xbf16>
    %c8 = arith.constant 8 : index
    %c0_48 = arith.constant 0 : index
    %c0_49 = arith.constant 0 : index
    %75 = vector.load %arg2[%c8, %c0_48, %c0_49] : memref<9x32x5xbf16, #tpu.memory_space<vmem>>, vector<1x32x5xbf16>
    %76 = vector.shape_cast %75 : vector<1x32x5xbf16> to vector<32x5xbf16>
    %cst_50 = arith.constant dense<0.000000e+00> : vector<256x5xf32>
    %77 = tpu.matmul %74, %76, %cst_50 {dimension_numbers = #tpu.dot_dimension_numbers<[1], [0], [0], [1], [0, 0, 1, 1], [], []>} : vector<256x32xbf16>, vector<32x5xbf16>, vector<256x5xf32> -> vector<256x5xf32>
    %78 = arith.addf %72, %77 : vector<256x5xf32>
    %79 = vector.broadcast %24 : vector<256x1xf32> to vector<256x5xf32>
    %80 = arith.mulf %78, %79 : vector<256x5xf32>
    %81 = arith.addf %61, %80 : vector<256x5xf32>
    %c0_51 = arith.constant 0 : index
    %c0_52 = arith.constant 0 : index
    %82 = vector.load %arg3[%c0_51, %c0_52] : memref<1x5xf32, #tpu.memory_space<vmem>>, vector<1x5xf32>
    %83 = vector.broadcast %82 : vector<1x5xf32> to vector<256x5xf32>
    %84 = arith.addf %81, %83 : vector<256x5xf32>
    %85 = arith.truncf %84 : vector<256x5xf32> to vector<256x5xbf16>
    %c0_53 = arith.constant 0 : index
    %c0_54 = arith.constant 0 : index
    %c0_55 = arith.constant 0 : index
    %86 = vector.load %arg4[%c0_53, %c0_54, %c0_55] : memref<1x256x5xbf16, #tpu.memory_space<vmem>>, vector<1x256x5xbf16>
    %87 = vector.shape_cast %86 : vector<1x256x5xbf16> to vector<256x5xbf16>
    %88 = vector.shape_cast %85 : vector<256x5xbf16> to vector<1x256x5xbf16>
    tpu.vector_store %arg4[%c0_53, %c0_54, %c0_55], %88 {strides = array<i32>} : memref<1x256x5xbf16, #tpu.memory_space<vmem>>, vector<1x256x5xbf16>,
    return
  }
  func.func @transform_0(%arg0: i32) -> (i32, i32, i32) {
    %c0_i32 = arith.constant 0 : i32
    %c0_i32_0 = arith.constant 0 : i32
    %c0_i32_1 = arith.constant 0 : i32
    return %arg0, %c0_i32, %c0_i32_0 : i32, i32, i32
  }
  func.func @transform_1(%arg0: i32) -> (i32, i32, i32) {
    %c0_i32 = arith.constant 0 : i32
    %c0_i32_0 = arith.constant 0 : i32
    %c0_i32_1 = arith.constant 0 : i32
    %c0_i32_2 = arith.constant 0 : i32
    return %c0_i32, %c0_i32_0, %c0_i32_1 : i32, i32, i32
  }
  func.func @transform_2(%arg0: i32) -> (i32, i32) {
    %c0_i32 = arith.constant 0 : i32
    %c0_i32_0 = arith.constant 0 : i32
    %c0_i32_1 = arith.constant 0 : i32
    return %c0_i32, %c0_i32_0 : i32, i32
  }
  func.func @transform_3(%arg0: i32) -> (i32, i32, i32) {
    %c0_i32 = arith.constant 0 : i32
    %c0_i32_0 = arith.constant 0 : i32
    %c0_i32_1 = arith.constant 0 : i32
    return %arg0, %c0_i32, %c0_i32_0 : i32, i32, i32
  }
}

module attributes {stable_mosaic.version = 11 : i64} {
  func.func @_matmul_kernel(%arg0: i32, %arg1: i32, %arg2: memref<32x16xf32, #tpu.memory_space<vmem>>, %arg3: memref<16x160xbf16, #tpu.memory_space<vmem>>, %arg4: memref<1x160xf32, #tpu.memory_space<vmem>>, %arg5: memref<32x160xbf16, #tpu.memory_space<vmem>>) attributes {dimension_semantics = [#tpu.dimension_semantics<parallel>, #tpu.dimension_semantics<parallel>], iteration_bounds = array<i64: 1, 1>, scalar_prefetch = 0 : i64, scratch_operands = 0 : i64, tpu.core_type = #tpu.core_type<tc>, window_params = [{transform_indices = @transform_0, window_bounds = array<i64: 32, 16>}, {transform_indices = @transform_1, window_bounds = array<i64: 16, 160>}, {transform_indices = @transform_2, window_bounds = array<i64: 1, 160>}, {transform_indices = @transform_3, window_bounds = array<i64: 32, 160>}]} {
    %c0 = arith.constant 0 : index
    %c0_0 = arith.constant 0 : index
    %0 = vector.load %arg2[%c0, %c0_0] : memref<32x16xf32, #tpu.memory_space<vmem>>, vector<32x16xf32>
    %1 = arith.truncf %0 : vector<32x16xf32> to vector<32x16xbf16>
    %c0_1 = arith.constant 0 : index
    %c0_2 = arith.constant 0 : index
    %2 = vector.load %arg3[%c0_1, %c0_2] : memref<16x160xbf16, #tpu.memory_space<vmem>>, vector<16x160xbf16>
    %cst = arith.constant dense<0.000000e+00> : vector<32x160xf32>
    %3 = tpu.matmul %1, %2, %cst {dimension_numbers = #tpu.dot_dimension_numbers<[1], [0], [0], [1], [0, 0, 1, 1], [], []>} : vector<32x16xbf16>, vector<16x160xbf16>, vector<32x160xf32> -> vector<32x160xf32>
    %c0_3 = arith.constant 0 : index
    %c0_4 = arith.constant 0 : index
    %4 = vector.load %arg4[%c0_3, %c0_4] : memref<1x160xf32, #tpu.memory_space<vmem>>, vector<1x160xf32>
    %5 = vector.broadcast %4 : vector<1x160xf32> to vector<32x160xf32>
    %6 = arith.addf %3, %5 : vector<32x160xf32>
    %7 = arith.truncf %6 : vector<32x160xf32> to vector<32x160xbf16>
    %c0_5 = arith.constant 0 : index
    %c0_6 = arith.constant 0 : index
    %8 = vector.load %arg5[%c0_5, %c0_6] : memref<32x160xbf16, #tpu.memory_space<vmem>>, vector<32x160xbf16>
    tpu.vector_store %arg5[%c0_5, %c0_6], %7 {strides = array<i32>} : memref<32x160xbf16, #tpu.memory_space<vmem>>, vector<32x160xbf16>,
    return
  }
  func.func @transform_0(%arg0: i32, %arg1: i32) -> (i32, i32) {
    %c0_i32 = arith.constant 0 : i32
    %c0_i32_0 = arith.constant 0 : i32
    return %arg0, %c0_i32 : i32, i32
  }
  func.func @transform_1(%arg0: i32, %arg1: i32) -> (i32, i32) {
    %c0_i32 = arith.constant 0 : i32
    %c0_i32_0 = arith.constant 0 : i32
    return %c0_i32, %arg1 : i32, i32
  }
  func.func @transform_2(%arg0: i32, %arg1: i32) -> (i32, i32) {
    %c0_i32 = arith.constant 0 : i32
    %c0_i32_0 = arith.constant 0 : i32
    return %c0_i32, %arg1 : i32, i32
  }
  func.func @transform_3(%arg0: i32, %arg1: i32) -> (i32, i32) {
    %c0_i32 = arith.constant 0 : i32
    return %arg0, %arg1 : i32, i32
  }
}

module attributes {stable_mosaic.version = 11 : i64} {
  func.func @_matmul_kernel(%arg0: i32, %arg1: i32, %arg2: memref<160x16xbf16, #tpu.memory_space<vmem>>, %arg3: memref<16x32xbf16, #tpu.memory_space<vmem>>, %arg4: memref<1x32xf32, #tpu.memory_space<vmem>>, %arg5: memref<160x32xf32, #tpu.memory_space<vmem>>) attributes {dimension_semantics = [#tpu.dimension_semantics<parallel>, #tpu.dimension_semantics<parallel>], iteration_bounds = array<i64: 2, 1>, scalar_prefetch = 0 : i64, scratch_operands = 0 : i64, tpu.core_type = #tpu.core_type<tc>, window_params = [{transform_indices = @transform_0, window_bounds = array<i64: 160, 16>}, {transform_indices = @transform_1, window_bounds = array<i64: 16, 32>}, {transform_indices = @transform_2, window_bounds = array<i64: 1, 32>}, {transform_indices = @transform_3, window_bounds = array<i64: 160, 32>}]} {
    %c0 = arith.constant 0 : index
    %c0_0 = arith.constant 0 : index
    %0 = vector.load %arg2[%c0, %c0_0] : memref<160x16xbf16, #tpu.memory_space<vmem>>, vector<160x16xbf16>
    %c0_1 = arith.constant 0 : index
    %c0_2 = arith.constant 0 : index
    %1 = vector.load %arg3[%c0_1, %c0_2] : memref<16x32xbf16, #tpu.memory_space<vmem>>, vector<16x32xbf16>
    %cst = arith.constant dense<0.000000e+00> : vector<160x32xf32>
    %2 = tpu.matmul %0, %1, %cst {dimension_numbers = #tpu.dot_dimension_numbers<[1], [0], [0], [1], [0, 0, 1, 1], [], []>} : vector<160x16xbf16>, vector<16x32xbf16>, vector<160x32xf32> -> vector<160x32xf32>
    %c0_3 = arith.constant 0 : index
    %c0_4 = arith.constant 0 : index
    %3 = vector.load %arg4[%c0_3, %c0_4] : memref<1x32xf32, #tpu.memory_space<vmem>>, vector<1x32xf32>
    %4 = vector.broadcast %3 : vector<1x32xf32> to vector<160x32xf32>
    %5 = arith.addf %2, %4 : vector<160x32xf32>
    %c0_5 = arith.constant 0 : index
    %c0_6 = arith.constant 0 : index
    %6 = vector.load %arg5[%c0_5, %c0_6] : memref<160x32xf32, #tpu.memory_space<vmem>>, vector<160x32xf32>
    tpu.vector_store %arg5[%c0_5, %c0_6], %5 {strides = array<i32>} : memref<160x32xf32, #tpu.memory_space<vmem>>, vector<160x32xf32>,
    return
  }
  func.func @transform_0(%arg0: i32, %arg1: i32) -> (i32, i32) {
    %c0_i32 = arith.constant 0 : i32
    %c0_i32_0 = arith.constant 0 : i32
    return %arg0, %c0_i32 : i32, i32
  }
  func.func @transform_1(%arg0: i32, %arg1: i32) -> (i32, i32) {
    %c0_i32 = arith.constant 0 : i32
    %c0_i32_0 = arith.constant 0 : i32
    return %c0_i32, %arg1 : i32, i32
  }
  func.func @transform_2(%arg0: i32, %arg1: i32) -> (i32, i32) {
    %c0_i32 = arith.constant 0 : i32
    %c0_i32_0 = arith.constant 0 : i32
    return %c0_i32, %arg1 : i32, i32
  }
  func.func @transform_3(%arg0: i32, %arg1: i32) -> (i32, i32) {
    %c0_i32 = arith.constant 0 : i32
    return %arg0, %arg1 : i32, i32
  }
}

</mosaic_0001>

<bundles_post_ra>
// kernel: dino_semantic_segmentation.17
= control target key start
LH: loop header
LB: loop body
LE: loop exit
PB: predicated region body
PF: predicated region fallthrough
CT: control target
= control target key end

     0   :  { %v247_v0 = vmov 0   ;;  %vm130_vm0 = vcmask 523264   ;;  %vm186_vm1 = vcmask 261120   ;;  %s367_s1 = inlined_call_operand.vmem [shape: bf16[192,32], index: 1, kind: input, shape index: {}]   ;;  %s368_s0 = inlined_call_operand.vmem [shape: f32[32,192], index: 0, kind: input, shape index: {}]   ;;  %s369_s2 = inlined_call_operand.vmem [shape: f32[1,32], index: 2, kind: input, shape index: {}]   ;;  %s370_s3 = inlined_call_operand.vmem [shape: f32[32,32], index: 3, kind: output, shape index: {}]  }
   0x1   :  { %137 = vmatprep.subr.bf16.mxu0 %v247_v0  ;;  %210 = vmatprep.subr.bf16.mxu1 %v247_v0  ;;  %v235_v1 = vld [vmem:[%s367_s1 + $0x38] sm:$0xff]   ;;  %v236_v2 = vld [vmem:[%s367_s1 + $0x30] sm:$0xff]   ;;  %v237_v3 = vld [vmem:[%s367_s1 + $0x28] sm:$0xff]  }
   0x2   :  { %138 = vmatpush1.bf16.msra.mxu0 %v235_v1  ;;  %222 = vmatpush1.bf16.msra.mxu1 %v235_v1  ;;  %v238_v4 = vld [vmem:[%s367_s1 + $0x20] sm:$0xff]   ;;  %v16_v5 = vld [vmem:[%s368_s0 + $0x8] sm:$0xff]  ;;  %v18_v6 = vld [vmem:[%s368_s0 + $0x18] sm:$0xff] }
   0x3   :  { %139 = vmatprep.subr.bf16.mxu0 %v247_v0  ;;  %211 = vmatprep.subr.bf16.mxu1 %v247_v0  ;;  %v20_v7 = vld [vmem:[%s368_s0 + $0x28] sm:$0xff]  ;;  %v24_v8 = vpack.c.bf16 %v18_v6, %v16_v5  ;;  %v22_v9 = vld [vmem:[%s368_s0 + $0x38] sm:$0xff]  ;;  %v240_v12 = vld [vmem:[%s367_s1 + $0x10] sm:$0xff]  }
   0x4   :  { %v239_v10 = vld [vmem:[%s367_s1 + $0x18] sm:$0xff]   ;;  %v26_v11 = vpack.c.bf16 %v22_v9, %v20_v7  ;;  %v241_v13 = vld [vmem:[%s367_s1 + $0x8] sm:$0xff]   ;;  %v242_v14 = vld [vmem:[%s367_s1] sm:$0xff]  }
   0x5   :  { %208 = vmatprep.mubr.msk.bf16.mxu0 %vm130_vm0, %v24_v8  ;;  %v243_v15 = vld [vmem:[%s367_s1 + $0x58] sm:$0xff]   ;;  %v244_v16 = vld [vmem:[%s367_s1 + $0x50] sm:$0xff]   ;;  %v245_v17 = vld [vmem:[%s367_s1 + $0x48] sm:$0xff]  }
   0x6   :  { %140 = vmatpush1.bf16.msra.mxu0 %v236_v2  ;;  %223 = vmatpush1.bf16.msra.mxu1 %v236_v2  ;;  %v246_v18 = vld [vmem:[%s367_s1 + $0x40] sm:$0xff]   ;;  %v17_v20 = vld [vmem:[%s368_s0 + $0x10] sm:$0xff] }
   0x7   :  { %141 = vmatprep.subr.bf16.mxu0 %v247_v0  ;;  %212 = vmatprep.subr.bf16.mxu1 %v247_v0  ;;  %v15_v19 = vld [vmem:[%s368_s0] sm:$0xff]  ;;  %v21_v22 = vld [vmem:[%s368_s0 + $0x30] sm:$0xff] }
   0x8   :  { %209 = vmatprep.mubr.msk.bf16.mxu1 %vm130_vm0, %v26_v11  ;;  %v19_v21 = vld [vmem:[%s368_s0 + $0x20] sm:$0xff]  ;;  %v23_v23 = vpack.c.bf16 %v17_v20, %v15_v19 }
   0x9   :  { %v25_v24 = vpack.c.bf16 %v21_v22, %v19_v21  ;;  %v195_v25 = vld [vmem:[%s369_s2] ss:$0 sm:$0xff] }
   0xa   :  { %142 = vmatpush1.bf16.msra.mxu0 %v237_v3  ;;  %224 = vmatpush1.bf16.msra.mxu1 %v237_v3 }
   0xb   :  { %143 = vmatprep.subr.bf16.mxu0 %v247_v0  ;;  %213 = vmatprep.subr.bf16.mxu1 %v247_v0 }
   0xe   :  { %144 = vmatpush1.bf16.msra.mxu0 %v238_v4  ;;  %225 = vmatpush1.bf16.msra.mxu1 %v238_v4 }
   0xf   :  { %145 = vmatprep.subr.bf16.mxu0 %v247_v0  ;;  %214 = vmatprep.subr.bf16.mxu1 %v247_v0 }
  0x12   :  { %146 = vmatpush1.bf16.msra.mxu0 %v239_v10  ;;  %226 = vmatpush1.bf16.msra.mxu1 %v239_v10 }
  0x13   :  { %147 = vmatprep.subr.bf16.mxu0 %v247_v0  ;;  %215 = vmatprep.subr.bf16.mxu1 %v247_v0 }
  0x16   :  { %148 = vmatpush1.bf16.msra.mxu0 %v240_v12  ;;  %227 = vmatpush1.bf16.msra.mxu1 %v240_v12 }
  0x17   :  { %149 = vmatprep.subr.bf16.mxu0 %v247_v0  ;;  %216 = vmatprep.subr.bf16.mxu1 %v247_v0 }
  0x1a   :  { %150 = vmatpush1.bf16.msra.mxu0 %v241_v13  ;;  %228 = vmatpush1.bf16.msra.mxu1 %v241_v13 }
  0x1b   :  { %151 = vmatprep.subr.bf16.mxu0 %v247_v0  ;;  %217 = vmatprep.subr.bf16.mxu1 %v247_v0 }
  0x1e   :  { %152 = vmatpush1.bf16.msra.mxu0 %v242_v14  ;;  %229 = vmatpush1.bf16.msra.mxu1 %v242_v14 }
  0x1f   :  { %161 = vmatprep.subr.bf16.mxu0 %v247_v0  ;;  %218 = vmatprep.subr.bf16.mxu1 %v247_v0 }
  0x22   :  { %162 = vmatpush2.bf16.msra.mxu0 %v243_v15  ;;  %230 = vmatpush2.bf16.msra.mxu1 %v243_v15 }
  0x23   :  { %163 = vmatprep.subr.bf16.mxu0 %v247_v0  ;;  %219 = vmatprep.subr.bf16.mxu1 %v247_v0 }
  0x26   :  { %164 = vmatpush2.bf16.msra.mxu0 %v244_v16  ;;  %231 = vmatpush2.bf16.msra.mxu1 %v244_v16 }
  0x27   :  { %165 = vmatprep.subr.bf16.mxu0 %v247_v0  ;;  %220 = vmatprep.subr.bf16.mxu1 %v247_v0 }
  0x2a   :  { %166 = vmatpush2.bf16.msra.mxu0 %v245_v17  ;;  %232 = vmatpush2.bf16.msra.mxu1 %v245_v17 }
  0x2b   :  { %167 = vmatprep.subr.bf16.mxu0 %v247_v0  ;;  %221 = vmatprep.subr.bf16.mxu1 %v247_v0 }
  0x2e   :  { %168 = vmatpush2.bf16.msra.mxu0 %v246_v18  ;;  %233 = vmatpush2.bf16.msra.mxu1 %v246_v18 }
  0x31   :  { %170 = vmatmul.mubr.bf16.vlgmr.msra.gmra.mxu0 %v23_v23  ;;  %178 = vmatmul.mubr.bf16.vlgmr.msra.gmra.mxu1 %v25_v24 }
  0xf1   :  { %v171_v26 = vpop.f32.mrf.mxu0  ;;  %v179_v27 = vpop.f32.mrf.mxu1 }
  0xf2   :  { %v172_v28 = vadd.f32 %v195_v25, %v171_v26  ;;  %v180_v29 = vadd.f32 %v195_v25, %v179_v27 }
  0xf3   :  { %v173_v30 = vpop.f32.mrf.mxu0  ;;  %v181_v31 = vpop.f32.mrf.mxu1 }
  0xf4   :  { %187 = vst.msk [vmem:[%s370_s3] sm:$0xff] %vm186_vm1, %v172_v28  ;;  %189 = vst.msk [vmem:[%s370_s3 + $0x10] sm:$0xff] %vm186_vm1, %v180_v29 }
  0xf5   :  { %v174_v32 = vpop.f32.mrf.mxu0  ;;  %v182_v33 = vpop.f32.mrf.mxu1 }
  0xf6   :  { %v175_v34 = vadd.f32 %v195_v25, %v174_v32  ;;  %v183_v35 = vadd.f32 %v195_v25, %v182_v33 }
  0xf7   :  { %v176_v36 = vpop.f32.mrf.mxu0  ;;  %v184_v37 = vpop.f32.mrf.mxu1 }
  0xf8   :  { %188 = vst.msk [vmem:[%s370_s3 + $0x8] sm:$0xff] %vm186_vm1, %v175_v34  ;;  %190 = vst.msk [vmem:[%s370_s3 + $0x18] sm:$0xff] %vm186_vm1, %v183_v35 }

// kernel: dino_semantic_segmentation.18
= control target key start
LH: loop header
LB: loop body
LE: loop exit
PB: predicated region body
PF: predicated region fallthrough
CT: control target
= control target key end

     0   :  { %vm27_vm0 = vcmask 261120   ;;  %v321_v42 = vmov 0.0   ;;  %vm322_vm1 = vmmov 0   ;;  %vm249_vm2 = vcmask 781312   ;;  %s465_s0 = inlined_call_operand.vmem [shape: f32[48,32], index: 0, kind: input, shape index: {}]   ;;  %s466_s3 = inlined_call_operand.vmem [shape: bf16[32,96], index: 3, kind: input, shape index: {}]   ;;  %s467_s1 = inlined_call_operand.vmem [shape: f32[1,32], index: 1, kind: input, shape index: {}]   ;;  %s468_s2 = inlined_call_operand.vmem [shape: f32[1,32], index: 2, kind: input, shape index: {}]   ;;  %s469_s4 = inlined_call_operand.vmem [shape: f32[1,96], index: 4, kind: input, shape index: {}]   ;;  %s470_s5 = inlined_call_operand.vmem [shape: bf16[48,96], index: 5, kind: output, shape index: {}]  }
   0x1   :  { %v23_v0 = vld [vmem:[%s465_s0 + $0x10] sm:$0xff]  ;;  %v24_v1 = vld [vmem:[%s465_s0 + $0x18] sm:$0xff]  ;;  %v21_v2 = vld [vmem:[%s465_s0] sm:$0xff]  ;;  %301 = vmatprep.subr.bf16.mxu1 %v321_v42  ;;  %285 = vmatprep.subr.bf16.mxu0 %v321_v42 }
   0x2   :  { %v34_v3 = vsel %vm27_vm0, %v23_v0, 0.0  ;;  %v28_v4 = vsel %vm27_vm0, %v21_v2, 0.0  ;;  %v22_v5 = vld [vmem:[%s465_s0 + $0x8] sm:$0xff]  ;;  %v37_v6 = vsel %vm27_vm0, %v24_v1, 0.0  ;;  %v25_v8 = vld [vmem:[%s465_s0 + $0x20] sm:$0xff]  ;;  %293 = vmatprep.mubr.msk.bf16.mxu1 %vm322_vm1, %v321_v42  ;;  %289 = vmatprep.mubr.msk.bf16.mxu0 %vm322_vm1, %v321_v42 }
   0x3   :  { %35 = vadd.xlane.f32.xlu0 %v34_v3  ;;  %29 = vadd.xlane.f32.xlu1 %v28_v4  ;;  %v31_v7 = vsel %vm27_vm0, %v22_v5, 0.0  ;;  %v26_v9 = vld [vmem:[%s465_s0 + $0x28] sm:$0xff]  ;;  %v40_v10 = vsel %vm27_vm0, %v25_v8, 0.0  ;;  %v308_v44 = vld [vmem:[%s466_s3] sm:$0xff]  }
   0x4   :  { %v43_v11 = vsel %vm27_vm0, %v26_v9, 0.0  ;;  %v307_v43 = vld [vmem:[%s466_s3 + $0x8] sm:$0xff]  }
   0x5   :  { %303 = vmatpush3.bf16.msra.mxu1 %v307_v43  ;;  %286 = vmatpush3.bf16.msra.mxu0 %v307_v43 }
   0x6   :  { %302 = vmatprep.subr.bf16.mxu1 %v321_v42  ;;  %287 = vmatprep.subr.bf16.mxu0 %v321_v42 }
   0x7   :  { %38 = vadd.xlane.f32.xlu0 %v37_v6  ;;  %32 = vadd.xlane.f32.xlu1 %v31_v7  ;;  %v261_v7 = vld [vmem:[%s468_s2] ss:$0 sm:$0xff] }
   0x9   :  { %304 = vmatpush3.bf16.msra.mxu1 %v308_v44  ;;  %288 = vmatpush3.bf16.msra.mxu0 %v308_v44 }
   0xb   :  { %41 = vadd.xlane.f32.xlu0 %v40_v10  ;;  %44 = vadd.xlane.f32.xlu1 %v43_v11 }
  0x8c   :  { %v36_v12 = vpop.xlane.xlu0 %35  ;;  %v30_v13 = vpop.xlane.xlu1 %29 }
  0x8d   :  { %v49_v14 = vmul.f32 0.03125, %v36_v12  ;;  %v47_v15 = vmul.f32 0.03125, %v30_v13 }
  0x8f   :  { %v377_v16 = vsub.f32 %v23_v0, %v49_v14  ;;  %v379_v17 = vsub.f32 %v21_v2, %v47_v15 }
  0x90   :  { %v39_v18 = vpop.xlane.xlu0 %38  ;;  %v33_v19 = vpop.xlane.xlu1 %32 }
  0x91   :  { %v50_v20 = vmul.f32 0.03125, %v39_v18  ;;  %v61_v21 = vmul.f32 %v377_v16, %v377_v16  ;;  %v48_v22 = vmul.f32 0.03125, %v33_v19  ;;  %v59_v23 = vmul.f32 %v379_v17, %v379_v17 }
  0x93   :  { %v385_v24 = vsub.f32 %v24_v1, %v50_v20  ;;  %v71_v25 = vsel %vm27_vm0, %v61_v21, 0.0  ;;  %v388_v26 = vsub.f32 %v22_v5, %v48_v22  ;;  %v65_v28 = vsel %vm27_vm0, %v59_v23, 0.0  ;;  %v260_v1 = vld [vmem:[%s467_s1] ss:$0 sm:$0xff] }
  0x94   :  { %72 = vadd.xlane.f32.xlu0 %v71_v25  ;;  %v42_v27 = vpop.xlane.xlu0 %41  ;;  %v45_v29 = vpop.xlane.xlu1 %44 }
  0x95   :  { %v51_v30 = vmul.f32 0.03125, %v42_v27  ;;  %v62_v31 = vmul.f32 %v385_v24, %v385_v24  ;;  %v52_v32 = vmul.f32 0.03125, %v45_v29  ;;  %v60_v33 = vmul.f32 %v388_v26, %v388_v26 }
  0x97   :  { %v395_v34 = vsub.f32 %v25_v8, %v51_v30  ;;  %v74_v35 = vsel %vm27_vm0, %v62_v31, 0.0  ;;  %v398_v36 = vsub.f32 %v26_v9, %v52_v32  ;;  %v68_v38 = vsel %vm27_vm0, %v60_v33, 0.0 }
  0x98   :  { %75 = vadd.xlane.f32.xlu1 %v74_v35  ;;  %66 = vadd.xlane.f32.xlu0 %v65_v28  ;;  %v262_v28 = vld [vmem:[%s469_s4] ss:$0 sm:$0xff] }
  0x99   :  { %v63_v37 = vmul.f32 %v395_v34, %v395_v34  ;;  %v64_v39 = vmul.f32 %v398_v36, %v398_v36 }
  0x9b   :  { %v77_v40 = vsel %vm27_vm0, %v63_v37, 0.0  ;;  %v80_v41 = vsel %vm27_vm0, %v64_v39, 0.0 }
  0x9c   :  { %78 = vadd.xlane.f32.xlu0 %v77_v40  ;;  %69 = vadd.xlane.f32.xlu1 %v68_v38 }
  0xa0   :  { %81 = vadd.xlane.f32.xlu1 %v80_v41 }
 0x11d   :  { %v73_v45 = vpop.xlane.xlu0 %72 }
 0x11e   :  { %v85_v46 = vmul.f32 0.03125, %v73_v45 }
 0x120   :  { %v91_v47 = vadd.f32 1e-06, %v85_v46 }
 0x121   :  { %v67_v48 = vpop.xlane.xlu0 %66  ;;  %v76_v49 = vpop.xlane.xlu1 %75 }
 0x122   :  { %309 = vrsqrt.f32 %v91_v47  ;;  %v83_v50 = vmul.f32 0.03125, %v67_v48  ;;  %v86_v51 = vmul.f32 0.03125, %v76_v49 }
 0x124   :  { %v89_v52 = vadd.f32 1e-06, %v83_v50  ;;  %v92_v53 = vadd.f32 1e-06, %v86_v51 }
 0x125   :  { %v79_v54 = vpop.xlane.xlu0 %78  ;;  %v70_v55 = vpop.xlane.xlu1 %69 }
 0x126   :  { %311 = vrsqrt.f32 %v89_v52  ;;  %v87_v56 = vmul.f32 0.03125, %v79_v54  ;;  %v84_v57 = vmul.f32 0.03125, %v70_v55 }
 0x127   :  { %313 = vrsqrt.f32 %v92_v53 }
 0x128   :  { %v93_v58 = vadd.f32 1e-06, %v87_v56  ;;  %v90_v59 = vadd.f32 1e-06, %v84_v57 }
 0x129   :  { %v82_v60 = vpop.xlane.xlu1 %81 }
 0x12a   :  { %315 = vrsqrt.f32 %v93_v58  ;;  %v88_v61 = vmul.f32 0.03125, %v82_v60 }
 0x12b   :  { %317 = vrsqrt.f32 %v90_v59 }
 0x12c   :  { %v94_v62 = vadd.f32 1e-06, %v88_v61 }
 0x12e   :  { %319 = vrsqrt.f32 %v94_v62 }
 0x12f   :  { %v310_v63 = vpop.eup %309 }
 0x130   :  { %v103_v0 = vmul.f32 %v310_v63, %v377_v16 }
 0x132   :  { %v116_v5 = vmul.f32 %v260_v1, %v103_v0 }
 0x133   :  { %v312_v2 = vpop.eup %311 }
 0x134   :  { %v314_v3 = vpop.eup %313  ;;  %v101_v6 = vmul.f32 %v312_v2, %v379_v17  ;;  %v129_v12 = vadd.f32 %v261_v7, %v116_v5 }
 0x135   :  { %v104_v4 = vmul.f32 %v314_v3, %v385_v24 }
 0x136   :  { %v114_v15 = vmul.f32 %v260_v1, %v101_v6 }
 0x137   :  { %v316_v8 = vpop.eup %315  ;;  %v117_v9 = vmul.f32 %v260_v1, %v104_v4 }
 0x138   :  { %v318_v10 = vpop.eup %317  ;;  %v105_v11 = vmul.f32 %v316_v8, %v395_v34  ;;  %v127_v21 = vadd.f32 %v261_v7, %v114_v15 }
 0x139   :  { %v130_v13 = vadd.f32 %v261_v7, %v117_v9  ;;  %v102_v14 = vmul.f32 %v318_v10, %v388_v26 }
 0x13a   :  { %v118_v17 = vmul.f32 %v260_v1, %v105_v11 }
 0x13b   :  { %v320_v16 = vpop.eup %319  ;;  %v134_v18 = vpack.c.bf16 %v130_v13, %v129_v12  ;;  %v115_v19 = vmul.f32 %v260_v1, %v102_v14 }
 0x13c   :  { %v106_v20 = vmul.f32 %v320_v16, %v398_v36  ;;  %v131_v25 = vadd.f32 %v261_v7, %v118_v17 }
 0x13d   :  { %294 = vmatmul.mubr.msk.bf16.vlgmr.msra.gmra.mxu1 %vm27_vm0, %v134_v18  ;;  %v128_v22 = vadd.f32 %v261_v7, %v115_v19 }
 0x13e   :  { %297 = vmatprep.mubr.msk.bf16.mxu1 %vm322_vm1, %v321_v42  ;;  %v119_v23 = vmul.f32 %v260_v1, %v106_v20 }
 0x13f   :  { %v133_v24 = vpack.c.bf16 %v128_v22, %v127_v21 }
 0x140   :  { %v132_v27 = vadd.f32 %v261_v7, %v119_v23 }
 0x141   :  { %290 = vmatmul.mubr.msk.bf16.vlgmr.msra.gmra.mxu0 %vm27_vm0, %v133_v24 }
 0x142   :  { %v135_v26 = vpack.c.bf16 %v132_v27, %v131_v25 }
 0x145   :  { %298 = vmatmul.mubr.msk.bf16.gmra.mxu1 %vm27_vm0, %v135_v26 }
 0x1fd   :  { %v210_v29 = vpop.f32.mrf.mxu1 }
 0x1fe   :  { %v211_v30 = vadd.f32 %v262_v28, %v210_v29 }
 0x1ff   :  { %v295_v31 = vpop.f32.mrf.mxu1 }
 0x200   :  { %v276_v32 = vpack.c.bf16 %v211_v30, %v211_v30 }
 0x201   :  { %v202_v33 = vpop.f32.mrf.mxu0  ;;  %v213_v34 = vpop.f32.mrf.mxu1 }
 0x202   :  { %252 = vst.msk [vmem:[%s470_s5 + $0x8] sm:$0xf] %vm249_vm2, %v276_v32  ;;  %v203_v35 = vadd.f32 %v262_v28, %v202_v33  ;;  %v214_v36 = vadd.f32 %v262_v28, %v213_v34 }
 0x203   :  { %v291_v37 = vpop.f32.mrf.mxu0  ;;  %v296_v38 = vpop.f32.mrf.mxu1 }
 0x204   :  { %v274_v39 = vpack.c.bf16 %v203_v35, %v203_v35  ;;  %v277_v40 = vpack.c.bf16 %v214_v36, %v214_v36 }
 0x205   :  { %v205_v41 = vpop.f32.mrf.mxu0  ;;  %v218_v42 = vpop.f32.mrf.mxu1 }
 0x206   :  { %250 = vst.msk [vmem:[%s470_s5] sm:$0xf] %vm249_vm2, %v274_v39  ;;  %253 = vst.msk [vmem:[%s470_s5 + $0xc] sm:$0xf] %vm249_vm2, %v277_v40  ;;  %v206_v43 = vadd.f32 %v262_v28, %v205_v41  ;;  %v219_v44 = vadd.f32 %v262_v28, %v218_v42 }
 0x207   :  { %v292_v45 = vpop.f32.mrf.mxu0  ;;  %v299_v46 = vpop.f32.mrf.mxu1 }
 0x208   :  { %v275_v47 = vpack.c.bf16 %v206_v43, %v206_v43  ;;  %v278_v48 = vpack.c.bf16 %v219_v44, %v219_v44 }
 0x209   :  { %v221_v49 = vpop.f32.mrf.mxu1 }
 0x20a   :  { %251 = vst.msk [vmem:[%s470_s5 + $0x4] sm:$0xf] %vm249_vm2, %v275_v47  ;;  %254 = vst.msk [vmem:[%s470_s5 + $0x10] sm:$0xf] %vm249_vm2, %v278_v48  ;;  %v222_v50 = vadd.f32 %v262_v28, %v221_v49 }
 0x20b   :  { %v300_v51 = vpop.f32.mrf.mxu1 }
 0x20c   :  { %v279_v52 = vpack.c.bf16 %v222_v50, %v222_v50 }
 0x20e   :  { %255 = vst.msk [vmem:[%s470_s5 + $0x14] sm:$0xf] %vm249_vm2, %v279_v52 }

// kernel: dino_semantic_segmentation.20
= control target key start
LH: loop header
LB: loop body
LE: loop exit
PB: predicated region body
PF: predicated region fallthrough
CT: control target
= control target key end

     0   :  { %v209_v0 = vmov 0.0   ;;  %vm210_vm0 = vmmov 0   ;;  %vm65_vm1 = vcmask 261120   ;;  %s310_s1 = inlined_call_operand.vmem [shape: bf16[32,32], index: 1, kind: input, shape index: {}]   ;;  %s311_s0 = inlined_call_operand.vmem [shape: bf16[48,32], index: 0, kind: input, shape index: {}]   ;;  %s312_s2 = inlined_call_operand.vmem [shape: f32[1,32], index: 2, kind: input, shape index: {}]   ;;  %s313_s3 = inlined_call_operand.vmem [shape: f32[1,32], index: 3, kind: input, shape index: {}]   ;;  %s314_s4 = inlined_call_operand.vmem [shape: f32[48,32], index: 4, kind: input, shape index: {}]   ;;  %s315_s5 = inlined_call_operand.vmem [shape: f32[48,32], index: 5, kind: output, shape index: {}]  }
   0x1   :  { %198 = vmatprep.subr.bf16.mxu1 %v209_v0  ;;  %v204_v1 = vld [vmem:[%s310_s1 + $0x8] sm:$0xff]   ;;  %182 = vmatprep.subr.bf16.mxu0 %v209_v0  ;;  %v205_v2 = vld [vmem:[%s310_s1] sm:$0xff]   ;;  %v208_v5 = vld [vmem:[%s311_s0 + $0x10] sm:$0xff]  }
   0x2   :  { %190 = vmatprep.mubr.msk.bf16.mxu1 %vm210_vm0, %v209_v0  ;;  %186 = vmatprep.mubr.msk.bf16.mxu0 %vm210_vm0, %v209_v0  ;;  %v206_v3 = vld [vmem:[%s311_s0 + $0x8] sm:$0xff]   ;;  %v207_v4 = vld [vmem:[%s311_s0] sm:$0xff]   ;;  %v134_v12 = vld [vmem:[%s314_s4 + $0x10] sm:$0xff] }
   0x3   :  { %200 = vmatpush3.bf16.msra.mxu1 %v204_v1  ;;  %183 = vmatpush3.bf16.msra.mxu0 %v204_v1  ;;  %v167_v6 = vld [vmem:[%s312_s2] ss:$0 sm:$0xff]  ;;  %v135_v24 = vld [vmem:[%s314_s4 + $0x18] sm:$0xff]  ;;  %v133_v25 = vld [vmem:[%s314_s4 + $0x8] sm:$0xff] }
   0x4   :  { %199 = vmatprep.subr.bf16.mxu1 %v209_v0  ;;  %184 = vmatprep.subr.bf16.mxu0 %v209_v0  ;;  %v176_v8 = vld [vmem:[%s313_s3] ss:$0 sm:$0xff]  ;;  %v137_v40 = vld [vmem:[%s314_s4 + $0x28] sm:$0xff] }
   0x5   :  { %v132_v13 = vld [vmem:[%s314_s4] sm:$0xff] }
   0x6   :  { %v136_v34 = vld [vmem:[%s314_s4 + $0x20] sm:$0xff] }
   0x7   :  { %201 = vmatpush3.bf16.msra.mxu1 %v205_v2  ;;  %185 = vmatpush3.bf16.msra.mxu0 %v205_v2 }
   0xa   :  { %191 = vmatmul.mubr.msk.bf16.vlgmr.msra.gmra.mxu1 %vm65_vm1, %v206_v3  ;;  %187 = vmatmul.mubr.msk.bf16.vlgmr.msra.gmra.mxu0 %vm65_vm1, %v207_v4 }
   0xb   :  { %194 = vmatprep.mubr.msk.bf16.mxu1 %vm210_vm0, %v209_v0 }
  0x12   :  { %195 = vmatmul.mubr.msk.bf16.gmra.mxu1 %vm65_vm1, %v208_v5 }
  0xca   :  { %v117_v7 = vpop.f32.mrf.mxu1  ;;  %v109_v9 = vpop.f32.mrf.mxu0 }
  0xcb   :  { %v118_v10 = vadd.f32 %v167_v6, %v117_v7  ;;  %v110_v11 = vadd.f32 %v167_v6, %v109_v9 }
  0xcc   :  { %v192_v14 = vpop.f32.mrf.mxu1  ;;  %v188_v15 = vpop.f32.mrf.mxu0 }
  0xcd   :  { %v147_v16 = vmul.f32 %v176_v8, %v118_v10  ;;  %v145_v17 = vmul.f32 %v176_v8, %v110_v11 }
  0xce   :  { %v120_v18 = vpop.f32.mrf.mxu1  ;;  %v112_v19 = vpop.f32.mrf.mxu0 }
  0xcf   :  { %v153_v20 = vadd.f32 %v147_v16, %v134_v12  ;;  %v151_v21 = vadd.f32 %v145_v17, %v132_v13  ;;  %v121_v22 = vadd.f32 %v167_v6, %v120_v18  ;;  %v113_v23 = vadd.f32 %v167_v6, %v112_v19 }
  0xd0   :  { %v193_v26 = vpop.f32.mrf.mxu1  ;;  %v189_v27 = vpop.f32.mrf.mxu0 }
  0xd1   :  { %159 = vst.msk [vmem:[%s315_s5 + $0x10] sm:$0xff] %vm65_vm1, %v153_v20  ;;  %157 = vst.msk [vmem:[%s315_s5] sm:$0xff] %vm65_vm1, %v151_v21  ;;  %v148_v28 = vmul.f32 %v176_v8, %v121_v22  ;;  %v146_v29 = vmul.f32 %v176_v8, %v113_v23 }
  0xd2   :  { %v125_v30 = vpop.f32.mrf.mxu1 }
  0xd3   :  { %v154_v31 = vadd.f32 %v148_v28, %v135_v24  ;;  %v152_v32 = vadd.f32 %v146_v29, %v133_v25  ;;  %v126_v33 = vadd.f32 %v167_v6, %v125_v30 }
  0xd4   :  { %v196_v35 = vpop.f32.mrf.mxu1 }
  0xd5   :  { %160 = vst.msk [vmem:[%s315_s5 + $0x18] sm:$0xff] %vm65_vm1, %v154_v31  ;;  %158 = vst.msk [vmem:[%s315_s5 + $0x8] sm:$0xff] %vm65_vm1, %v152_v32  ;;  %v149_v36 = vmul.f32 %v176_v8, %v126_v33 }
  0xd6   :  { %v128_v37 = vpop.f32.mrf.mxu1 }
  0xd7   :  { %v155_v38 = vadd.f32 %v149_v36, %v136_v34  ;;  %v129_v39 = vadd.f32 %v167_v6, %v128_v37 }
  0xd8   :  { %v197_v41 = vpop.f32.mrf.mxu1 }
  0xd9   :  { %161 = vst.msk [vmem:[%s315_s5 + $0x20] sm:$0xff] %vm65_vm1, %v155_v38  ;;  %v150_v42 = vmul.f32 %v176_v8, %v129_v39 }
  0xdb   :  { %v156_v43 = vadd.f32 %v150_v42, %v137_v40 }
  0xdd   :  { %162 = vst.msk [vmem:[%s315_s5 + $0x28] sm:$0xff] %vm65_vm1, %v156_v43 }

// kernel: dino_semantic_segmentation.19
= control target key start
LH: loop header
LB: loop body
LE: loop exit
PB: predicated region body
PF: predicated region fallthrough
CT: control target
= control target key end

     0   :  { %s1194_s6 = smov 0   ;;  %s1374_s0 = inlined_call_operand.vmem [shape: bf16[2,24,96], index: 0, kind: input, shape index: {}]   ;;  %s1375_s1 = inlined_call_operand.vmem [shape: bf16[2,24,32], index: 1, kind: output, shape index: {}]  }
   0x1 LB: > { %s933_s7 = sadd.s32 4294967295, %s1168_s6   ;;  %p937_p0 = scmp.ge.s32.totalorder %s1168_s6, 1  ;;  %s1168_s6 = sphi %s1194_s6, %s11_s6  }
   0x2   : > { %p87_p1 = scmp.lt.s32.totalorder %s1168_s6, 3 }
   0x4   : > { %p88_p2 = pnand %p937_p0, %p87_p1 }
   0x5   : > { %p107_p3 = scmp.lt.s32.totalorder (!%p88_p2), %s933_s7, 1  ;;  %s1170_s12 = smov (!%p88_p2), 96  }
   0x6   : > { %91 = sbr.rel (%p88_p2) target bundleno = 2599 (0xa27), region = 24  ;;  %s1171_s13 = smov (!%p88_p2), 64  }
   0x7   : > { %s1172_s14 = smov (!%p88_p2), 88   ;;  %s1173_s15 = smov (!%p88_p2), 120  }
   0x8   : > { %s1174_s16 = smov (!%p88_p2), 56   ;;  %s1175_s17 = smov (!%p88_p2), 80  }
   0x9   : > { %s1176_s18 = smov (!%p88_p2), 112   ;;  %s1177_s19 = smov (!%p88_p2), 48  }
   0xa   : > { %s1178_s20 = smov (!%p88_p2), 72   ;;  %s1179_s21 = smov (!%p88_p2), 104  }
   0xb   : > { %s1377_s7 = smov (!%p107_p3, %s933_s7), 1  ;;  %vm136_vm0 = vcmask 64512   ;;  %v118_v6 = vlaneseq  ;;  %vm203_vm2 = vcmask 195584   ;;  %vm250_vm3 = vcmask 1043456   ;;  %s1180_s22 = smov 40  }
   0xc   : > { %s1074_s8 = smul.u32 12, %s1377_s7  ;;  %s1181_s23 = smov 8   ;;  %vm854_vm4 = vcmask 130048   ;;  %vm874_vm5 = vcmask 257024  }
   0xd   : > { %v1224_v7 = vand.u32 127, %v118_v6  ;;  %s1182_s24 = smov 16   ;;  %s1183_s25 = smov 24  }
   0xe   : > { %s111_s11 = scalar_lea.vmem %s1374_s0, %s1074_s8  ;;  %s116_s28 = scalar_lea.vmem %s1375_s1, %s1074_s8 }
   0xf   : > { %v1210_v0 = vld [vmem:[%s111_s11 + $0x8] ss:$0 sps:$4 sm:$0xff]   ;;  %v1212_v1 = vld [vmem:[%s111_s11] sm:$0xff]   ;;  %vm120_vm1 = vcmp.lt.s32.totalorder %v1224_v7, 17 }
  0x10   : > { %134 = vrot.lane.b32.xlu0 %v1210_v0, %s1170_s12  ;;  %1002 = vmatprep.mubr.msk.bf16.mxu0 %vm136_vm0, %v1212_v1 }
  0x14   : > { %132 = vrot.lane.b32.xlu0 %v1212_v1, %s1170_s12 }
  0x82   : > { %v135_v2 = vpop.permute.xlu0 %134 }
  0x83   : > { %1062 = vmatprep.subr.msk.bf16.mxu0 %vm136_vm0, %v135_v2  ;;  %v147_v3 = vsel %vm136_vm0, %v135_v2, 0 }
  0x84   : > { %999 = vmatpush3.bf16.xpose.msra.mxu0 %v147_v3 }
  0x86   : > { %v133_v4 = vpop.permute.xlu0 %132 }
  0x87   : > { %1063 = vmatprep.subr.msk.bf16.mxu0 %vm136_vm0, %v133_v4  ;;  %v144_v5 = vsel %vm136_vm0, %v133_v4, 0 }
  0x8c   : > { %1001 = vmatpush3.bf16.xpose.msra.mxu0 %v144_v5 }
  0x93   : > { %1003 = vmatmul.mubr.msk.bf16.vlgmr.msra.gmra.mxu0 %vm136_vm0, %v1210_v0 }
 0x153   : > { %v1004_v8 = vpop.f32.mrf.mxu0 }
 0x154   : > { %v199_v9 = vmul.f32 0.35355338, %v1004_v8 }
 0x155   : > { %v183_v10 = vpop.f32.mrf.mxu0 }
 0x156   : > { %v197_v11 = vmul.f32 0.35355338, %v183_v10  ;;  %v202_v12 = vsel %vm120_vm1, %v199_v9, -1e+30 }
 0x157   : > { %v1005_v13 = vpop.f32.mrf.mxu0  ;;  %v210_v14 = vsel %vm203_vm2, %v202_v12, -inf }
 0x158   : > { %211 = vmax.xlane.f32.xlu0 %v210_v14  ;;  %v200_v15 = vsel %vm120_vm1, %v197_v11, -1e+30 }
 0x159   : > { %v186_v16 = vpop.f32.mrf.mxu0  ;;  %v204_v17 = vsel %vm203_vm2, %v200_v15, -inf }
 0x15a   : > { %v198_v18 = vmul.f32 0.35355338, %v186_v16  ;;  %205 = vmax.xlane.f32.xlu1 %v204_v17 }
 0x15c   : > { %v201_v19 = vsel %vm120_vm1, %v198_v18, -1e+30 }
 0x15d   : > { %v207_v20 = vsel %vm203_vm2, %v201_v19, -inf }
 0x15e   : > { %208 = vmax.xlane.f32.xlu1 %v207_v20 }
 0x16e   : > { %308 = vrot.lane.b32.xlu0 %v1210_v0, %s1172_s14 }
 0x16f   : > { %241 = vrot.lane.b32.xlu1 %v1210_v0, %s1171_s13 }
 0x1e1   : > { %v212_v21 = vpop.xlane.xlu0 %211 }
 0x1e2   : > { %v215_v22 = vsub.f32 %v202_v12, %v212_v21 }
 0x1e3   : > { %v206_v23 = vpop.xlane.xlu1 %205 }
 0x1e4   : > { %v220_v24 = vmul.f32 1.442695, %v215_v22  ;;  %v213_v25 = vsub.f32 %v200_v15, %v206_v23 }
 0x1e5   : > { %v309_v42 = vpop.permute.xlu0 %308 }
 0x1e6   : > { %1114 = vpow2.f32 %v220_v24  ;;  %v216_v26 = vmul.f32 1.442695, %v213_v25  ;;  %v320_v51 = vsel %vm136_vm0, %v309_v42, 0 }
 0x1e7   : > { %v209_v27 = vpop.xlane.xlu1 %208 }
 0x1e8   : > { %1116 = vpow2.f32 %v216_v26  ;;  %v214_v28 = vsub.f32 %v201_v19, %v209_v27 }
 0x1ea   : > { %v218_v29 = vmul.f32 1.442695, %v214_v28 }
 0x1eb   : > { %v242_v30 = vpop.permute.xlu1 %241 }
 0x1ec   : > { %1118 = vpow2.f32 %v218_v29  ;;  %1064 = vmatprep.subr.msk.bf16.mxu1 %vm250_vm3, %v242_v30  ;;  %v252_v31 = vsel %vm250_vm3, %v242_v30, 0 }
 0x1ed   : > { %1007 = vmatpush3.bf16.msra.mxu1 %v252_v31 }
 0x1f3   : > { %v1115_v32 = vpop.eup %1114 }
 0x1f4   : > { %v228_v33 = vsel %vm203_vm2, %v1115_v32, 0.0 }
 0x1f5   : > { %v1117_v34 = vpop.eup %1116  ;;  %229 = vadd.xlane.f32.xlu1 %v228_v33 }
 0x1f6   : > { %v222_v35 = vsel %vm203_vm2, %v1117_v34, 0.0 }
 0x1f9   : > { %v1119_v36 = vpop.eup %1118  ;;  %223 = vadd.xlane.f32.xlu1 %v222_v35 }
 0x1fa   : > { %v225_v37 = vsel %vm203_vm2, %v1119_v36, 0.0 }
 0x1fd   : > { %226 = vadd.xlane.f32.xlu1 %v225_v37 }
 0x20e   : > { %239 = vrot.lane.b32.xlu1 %v1212_v1, %s1171_s13 }
 0x212   : > { %306 = vrot.lane.b32.xlu1 %v1212_v1, %s1172_s14 }
 0x216   : > { %302 = vrot.lane.b32.xlu1 %v1212_v1, %s1173_s15 }
 0x21a   : > { %304 = vrot.lane.b32.xlu1 %v1210_v0, %s1173_s15 }
 0x27e   : > { %v230_v38 = vpop.xlane.xlu1 %229 }
 0x27f   : > { %1120 = vrcp.f32 %v230_v38 }
 0x282   : > { %v224_v39 = vpop.xlane.xlu1 %223 }
 0x283   : > { %1122 = vrcp.f32 %v224_v39 }
 0x286   : > { %v227_v40 = vpop.xlane.xlu1 %226 }
 0x287   : > { %1124 = vrcp.f32 %v227_v40 }
 0x28a   : > { %v240_v41 = vpop.permute.xlu1 %239 }
 0x28b   : > { %1008 = vmatprep.subr.bf16.mxu1 %v240_v41 }
 0x28c   : > { %1009 = vmatpush3.bf16.msra.mxu1 %v240_v41  ;;  %v1121_v43 = vpop.eup %1120 }
 0x28d   : > { %1065 = vmatprep.subr.msk.bf16.mxu1 %vm136_vm0, %v309_v42  ;;  %v236_v47 = vmul.f32 %v1121_v43, %v1115_v32 }
 0x28e   : > { %v307_v45 = vpop.permute.xlu1 %306 }
 0x28f   : > { %v238_v52 = vpack.c.bf16 %v236_v47, %v236_v47  ;;  %v317_v54 = vsel %vm136_vm0, %v307_v45, 0 }
 0x290   : > { %v1123_v44 = vpop.eup %1122 }
 0x291   : > { %v234_v48 = vmul.f32 %v1123_v44, %v1117_v34 }
 0x292   : > { %v303_v53 = vpop.permute.xlu1 %302 }
 0x294   : > { %v1125_v46 = vpop.eup %1124 }
 0x295   : > { %v235_v49 = vmul.f32 %v1125_v46, %v1119_v36 }
 0x296   : > { %v305_v55 = vpop.permute.xlu1 %304 }
 0x297   : > { %v237_v50 = vpack.c.bf16 %v235_v49, %v234_v48 }
 0x299   : > { %1010 = vmatprep.mubr.msk.bf16.mxu1 %vm203_vm2, %v237_v50 }
 0x29a   : > { %1011 = vmatmul.mubr.msk.bf16.vlgmr.msra.gmra.mxu1 %vm203_vm2, %v238_v52 }
 0x29b   : > { %1015 = vmatpush3.bf16.xpose.msra.mxu1 %v320_v51  ;;  %1018 = vmatprep.mubr.msk.bf16.mxu1 %vm136_vm0, %v303_v53 }
 0x29c   : > { %1066 = vmatprep.subr.msk.bf16.mxu1 %vm136_vm0, %v307_v45 }
 0x2a3   : > { %1017 = vmatpush3.bf16.xpose.msra.mxu1 %v317_v54 }
 0x2aa   : > { %1019 = vmatmul.mubr.msk.bf16.vlgmr.msra.gmra.mxu1 %vm136_vm0, %v305_v55 }
 0x35a   : > { %v1255_v56 = vpop.f32.mrf.mxu1 }
 0x35c   : > { %v1257_v57 = vpop.f32.mrf.mxu1 }
 0x35e   : > { %v1013_v58 = vpop.f32.mrf.mxu1 }
 0x360   : > { %v1259_v59 = vpop.f32.mrf.mxu1 }
 0x36a   : > { %v1020_v60 = vpop.f32.mrf.mxu1 }
 0x36b   : > { %v372_v62 = vmul.f32 0.35355338, %v1020_v60 }
 0x36c   : > { %v356_v61 = vpop.f32.mrf.mxu1 }
 0x36d   : > { %v370_v63 = vmul.f32 0.35355338, %v356_v61  ;;  %v375_v8 = vsel %vm120_vm1, %v372_v62, -1e+30 }
 0x36e   : > { %v1021_v2 = vpop.f32.mrf.mxu1  ;;  %v382_v10 = vsel %vm203_vm2, %v375_v8, -inf }
 0x36f   : > { %v373_v3 = vsel %vm120_vm1, %v370_v63, -1e+30 }
 0x370   : > { %v359_v4 = vpop.f32.mrf.mxu1  ;;  %v376_v5 = vsel %vm203_vm2, %v373_v3, -inf }
 0x371   : > { %v371_v6 = vmul.f32 0.35355338, %v359_v4  ;;  %377 = vmax.xlane.f32.xlu1 %v376_v5 }
 0x373   : > { %v374_v9 = vsel %vm120_vm1, %v371_v6, -1e+30 }
 0x374   : > { %v379_v11 = vsel %vm203_vm2, %v374_v9, -inf }
 0x375   : > { %383 = vmax.xlane.f32.xlu1 %v382_v10  ;;  %380 = vmax.xlane.f32.xlu0 %v379_v11 }
 0x386   : > { %413 = vrot.lane.b32.xlu1 %v1210_v0, %s1174_s16 }
 0x3fa   : > { %v378_v12 = vpop.xlane.xlu1 %377 }
 0x3fb   : > { %v385_v13 = vsub.f32 %v373_v3, %v378_v12 }
 0x3fd   : > { %v388_v18 = vmul.f32 1.442695, %v385_v13 }
 0x3fe   : > { %v384_v14 = vpop.xlane.xlu1 %383  ;;  %v381_v15 = vpop.xlane.xlu0 %380 }
 0x3ff   : > { %v387_v16 = vsub.f32 %v375_v8, %v384_v14  ;;  %v386_v17 = vsub.f32 %v374_v9, %v381_v15 }
 0x401   : > { %v392_v19 = vmul.f32 1.442695, %v387_v16  ;;  %v390_v20 = vmul.f32 1.442695, %v386_v17 }
 0x402   : > { %v414_v21 = vpop.permute.xlu1 %413 }
 0x403   : > { %1126 = vpow2.f32 %v392_v19  ;;  %v423_v22 = vsel %vm250_vm3, %v414_v21, 0  ;;  %1067 = vmatprep.subr.msk.bf16.mxu0 %vm250_vm3, %v414_v21 }
 0x404   : > { %1128 = vpow2.f32 %v390_v20  ;;  %1023 = vmatpush3.bf16.msra.mxu0 %v423_v22 }
 0x405   : > { %1130 = vpow2.f32 %v388_v18 }
 0x410   : > { %v1127_v23 = vpop.eup %1126 }
 0x411   : > { %v1129_v24 = vpop.eup %1128  ;;  %v400_v25 = vsel %vm203_vm2, %v1127_v23, 0.0 }
 0x412   : > { %v1131_v26 = vpop.eup %1130  ;;  %401 = vadd.xlane.f32.xlu0 %v400_v25  ;;  %v397_v27 = vsel %vm203_vm2, %v1129_v24, 0.0 }
 0x413   : > { %398 = vadd.xlane.f32.xlu1 %v397_v27  ;;  %v394_v28 = vsel %vm203_vm2, %v1131_v26, 0.0 }
 0x416   : > { %395 = vadd.xlane.f32.xlu0 %v394_v28 }
 0x424   : > { %479 = vrot.lane.b32.xlu1 %v1210_v0, %s1175_s17 }
 0x428   : > { %477 = vrot.lane.b32.xlu1 %v1212_v1, %s1175_s17 }
 0x42c   : > { %411 = vrot.lane.b32.xlu0 %v1212_v1, %s1174_s16  ;;  %475 = vrot.lane.b32.xlu1 %v1210_v0, %s1176_s18 }
 0x430   : > { %473 = vrot.lane.b32.xlu0 %v1212_v1, %s1176_s18 }
 0x49b   : > { %v402_v29 = vpop.xlane.xlu0 %401 }
 0x49c   : > { %v399_v30 = vpop.xlane.xlu1 %398  ;;  %1132 = vrcp.f32 %v402_v29 }
 0x49d   : > { %1134 = vrcp.f32 %v399_v30 }
 0x49f   : > { %v396_v31 = vpop.xlane.xlu0 %395 }
 0x4a0   : > { %1136 = vrcp.f32 %v396_v31  ;;  %v480_v33 = vpop.permute.xlu1 %479 }
 0x4a1   : > { %v491_v41 = vsel %vm136_vm0, %v480_v33, 0 }
 0x4a3   : > { %v412_v32 = vpop.permute.xlu0 %411 }
 0x4a4   : > { %1024 = vmatprep.subr.bf16.mxu0 %v412_v32  ;;  %v478_v44 = vpop.permute.xlu1 %477 }
 0x4a5   : > { %1025 = vmatpush3.bf16.msra.mxu0 %v412_v32  ;;  %v488_v45 = vsel %vm136_vm0, %v478_v44, 0 }
 0x4a6   : > { %1068 = vmatprep.subr.msk.bf16.mxu0 %vm136_vm0, %v480_v33 }
 0x4a7   : > { %v474_v43 = vpop.permute.xlu0 %473 }
 0x4a8   : > { %v476_v46 = vpop.permute.xlu1 %475 }
 0x4a9   : > { %v1133_v34 = vpop.eup %1132 }
 0x4aa   : > { %v1135_v35 = vpop.eup %1134  ;;  %v408_v37 = vmul.f32 %v1133_v34, %v1127_v23 }
 0x4ab   : > { %v407_v39 = vmul.f32 %v1135_v35, %v1129_v24 }
 0x4ac   : > { %v410_v42 = vpack.c.bf16 %v408_v37, %v408_v37 }
 0x4ad   : > { %v1137_v36 = vpop.eup %1136 }
 0x4ae   : > { %v406_v38 = vmul.f32 %v1137_v36, %v1131_v26 }
 0x4b0   : > { %v409_v40 = vpack.c.bf16 %v407_v39, %v406_v38 }
 0x4b2   : > { %1026 = vmatprep.mubr.msk.bf16.mxu0 %vm203_vm2, %v409_v40 }
 0x4b3   : > { %1027 = vmatmul.mubr.msk.bf16.vlgmr.msra.gmra.mxu0 %vm203_vm2, %v410_v42 }
 0x4b4   : > { %1031 = vmatpush3.bf16.xpose.msra.mxu0 %v491_v41  ;;  %1034 = vmatprep.mubr.msk.bf16.mxu0 %vm136_vm0, %v474_v43 }
 0x4b5   : > { %1069 = vmatprep.subr.msk.bf16.mxu0 %vm136_vm0, %v478_v44 }
 0x4bc   : > { %1033 = vmatpush3.bf16.xpose.msra.mxu0 %v488_v45 }
 0x4c3   : > { %1035 = vmatmul.mubr.msk.bf16.vlgmr.msra.gmra.mxu0 %vm136_vm0, %v476_v46 }
 0x573   : > { %v1291_v47 = vpop.f32.mrf.mxu0 }
 0x575   : > { %v1293_v48 = vpop.f32.mrf.mxu0 }
 0x577   : > { %v1029_v49 = vpop.f32.mrf.mxu0 }
 0x579   : > { %v1295_v50 = vpop.f32.mrf.mxu0 }
 0x57a   : > { %v1097_v51 = vpack.i.bf16 %v1295_v50, %v1293_v48 }
 0x583   : > { %v1036_v52 = vpop.f32.mrf.mxu0 }
 0x584   : > { %v543_v54 = vmul.f32 0.35355338, %v1036_v52 }
 0x585   : > { %v527_v53 = vpop.f32.mrf.mxu0 }
 0x586   : > { %v541_v55 = vmul.f32 0.35355338, %v527_v53  ;;  %v546_v2 = vsel %vm120_vm1, %v543_v54, -1e+30 }
 0x587   : > { %v1037_v58 = vpop.f32.mrf.mxu0  ;;  %v553_v4 = vsel %vm203_vm2, %v546_v2, -inf }
 0x588   : > { %v544_v60 = vsel %vm120_vm1, %v541_v55, -1e+30 }
 0x589   : > { %v530_v61 = vpop.f32.mrf.mxu0  ;;  %v547_v62 = vsel %vm203_vm2, %v544_v60, -inf }
 0x58a   : > { %v542_v63 = vmul.f32 0.35355338, %v530_v61  ;;  %548 = vmax.xlane.f32.xlu0 %v547_v62 }
 0x58c   : > { %v545_v3 = vsel %vm120_vm1, %v542_v63, -1e+30 }
 0x58d   : > { %v550_v5 = vsel %vm203_vm2, %v545_v3, -inf }
 0x58e   : > { %554 = vmax.xlane.f32.xlu0 %v553_v4  ;;  %551 = vmax.xlane.f32.xlu1 %v550_v5 }
 0x59f   : > { %584 = vrot.lane.b32.xlu1 %v1210_v0, %s1177_s19 }
 0x613   : > { %v549_v6 = vpop.xlane.xlu0 %548 }
 0x614   : > { %v556_v8 = vsub.f32 %v544_v60, %v549_v6 }
 0x616   : > { %v559_v13 = vmul.f32 1.442695, %v556_v8 }
 0x617   : > { %v555_v9 = vpop.xlane.xlu0 %554  ;;  %v552_v10 = vpop.xlane.xlu1 %551 }
 0x618   : > { %v558_v11 = vsub.f32 %v546_v2, %v555_v9  ;;  %v557_v12 = vsub.f32 %v545_v3, %v552_v10 }
 0x61a   : > { %v563_v14 = vmul.f32 1.442695, %v558_v11  ;;  %v561_v15 = vmul.f32 1.442695, %v557_v12 }
 0x61b   : > { %v585_v16 = vpop.permute.xlu1 %584 }
 0x61c   : > { %1138 = vpow2.f32 %v563_v14  ;;  %v594_v17 = vsel %vm250_vm3, %v585_v16, 0  ;;  %1070 = vmatprep.subr.msk.bf16.mxu1 %vm250_vm3, %v585_v16 }
 0x61d   : > { %1140 = vpow2.f32 %v561_v15  ;;  %1039 = vmatpush3.bf16.msra.mxu1 %v594_v17 }
 0x61e   : > { %1142 = vpow2.f32 %v559_v13 }
 0x629   : > { %v1139_v18 = vpop.eup %1138 }
 0x62a   : > { %v1141_v19 = vpop.eup %1140  ;;  %v571_v20 = vsel %vm203_vm2, %v1139_v18, 0.0 }
 0x62b   : > { %v1143_v21 = vpop.eup %1142  ;;  %572 = vadd.xlane.f32.xlu0 %v571_v20  ;;  %v568_v22 = vsel %vm203_vm2, %v1141_v19, 0.0 }
 0x62c   : > { %569 = vadd.xlane.f32.xlu1 %v568_v22  ;;  %v565_v23 = vsel %vm203_vm2, %v1143_v21, 0.0 }
 0x62f   : > { %566 = vadd.xlane.f32.xlu0 %v565_v23 }
 0x63d   : > { %650 = vrot.lane.b32.xlu1 %v1210_v0, %s1178_s20 }
 0x641   : > { %648 = vrot.lane.b32.xlu1 %v1212_v1, %s1178_s20 }
 0x645   : > { %582 = vrot.lane.b32.xlu0 %v1212_v1, %s1177_s19  ;;  %646 = vrot.lane.b32.xlu1 %v1210_v0, %s1179_s21 }
 0x649   : > { %644 = vrot.lane.b32.xlu0 %v1212_v1, %s1179_s21 }
 0x6b4   : > { %v573_v24 = vpop.xlane.xlu0 %572 }
 0x6b5   : > { %v570_v25 = vpop.xlane.xlu1 %569  ;;  %1144 = vrcp.f32 %v573_v24 }
 0x6b6   : > { %1146 = vrcp.f32 %v570_v25 }
 0x6b8   : > { %v567_v26 = vpop.xlane.xlu0 %566 }
 0x6b9   : > { %1148 = vrcp.f32 %v567_v26  ;;  %v651_v28 = vpop.permute.xlu1 %650 }
 0x6ba   : > { %v662_v36 = vsel %vm136_vm0, %v651_v28, 0 }
 0x6bc   : > { %v583_v27 = vpop.permute.xlu0 %582 }
 0x6bd   : > { %1040 = vmatprep.subr.bf16.mxu1 %v583_v27  ;;  %v649_v39 = vpop.permute.xlu1 %648 }
 0x6be   : > { %1041 = vmatpush3.bf16.msra.mxu1 %v583_v27  ;;  %v659_v40 = vsel %vm136_vm0, %v649_v39, 0 }
 0x6bf   : > { %1071 = vmatprep.subr.msk.bf16.mxu1 %vm136_vm0, %v651_v28 }
 0x6c0   : > { %v645_v38 = vpop.permute.xlu0 %644 }
 0x6c1   : > { %v647_v41 = vpop.permute.xlu1 %646 }
 0x6c2   : > { %v1145_v29 = vpop.eup %1144 }
 0x6c3   : > { %v1147_v30 = vpop.eup %1146  ;;  %v579_v32 = vmul.f32 %v1145_v29, %v1139_v18 }
 0x6c4   : > { %v578_v34 = vmul.f32 %v1147_v30, %v1141_v19 }
 0x6c5   : > { %v581_v37 = vpack.c.bf16 %v579_v32, %v579_v32 }
 0x6c6   : > { %v1149_v31 = vpop.eup %1148 }
 0x6c7   : > { %v577_v33 = vmul.f32 %v1149_v31, %v1143_v21 }
 0x6c9   : > { %v580_v35 = vpack.c.bf16 %v578_v34, %v577_v33 }
 0x6cb   : > { %1042 = vmatprep.mubr.msk.bf16.mxu1 %vm203_vm2, %v580_v35 }
 0x6cc   : > { %1043 = vmatmul.mubr.msk.bf16.vlgmr.msra.gmra.mxu1 %vm203_vm2, %v581_v37 }
 0x6cd   : > { %1047 = vmatpush3.bf16.xpose.msra.mxu1 %v662_v36  ;;  %1050 = vmatprep.mubr.msk.bf16.mxu1 %vm136_vm0, %v645_v38 }
 0x6ce   : > { %1072 = vmatprep.subr.msk.bf16.mxu1 %vm136_vm0, %v649_v39 }
 0x6d5   : > { %1049 = vmatpush3.bf16.xpose.msra.mxu1 %v659_v40 }
 0x6dc   : > { %1051 = vmatmul.mubr.msk.bf16.vlgmr.msra.gmra.mxu1 %vm136_vm0, %v647_v41 }
 0x78c   : > { %v1044_v42 = vpop.f32.mrf.mxu1 }
 0x78e   : > { %v630_v43 = vpop.f32.mrf.mxu1 }
 0x790   : > { %v1045_v44 = vpop.f32.mrf.mxu1 }
 0x792   : > { %v633_v45 = vpop.f32.mrf.mxu1 }
 0x793   : > { %v1102_v46 = vpack.i.bf16 %v633_v45, %v630_v43 }
 0x79c   : > { %v1052_v49 = vpop.f32.mrf.mxu1 }
 0x79d   : > { %v714_v53 = vmul.f32 0.35355338, %v1052_v49 }
 0x79e   : > { %v698_v52 = vpop.f32.mrf.mxu1 }
 0x79f   : > { %v712_v54 = vmul.f32 0.35355338, %v698_v52  ;;  %v717_v63 = vsel %vm120_vm1, %v714_v53, -1e+30 }
 0x7a0   : > { %v1053_v55 = vpop.f32.mrf.mxu1  ;;  %v724_v3 = vsel %vm203_vm2, %v717_v63, -inf }
 0x7a1   : > { %v715_v58 = vsel %vm120_vm1, %v712_v54, -1e+30 }
 0x7a2   : > { %v701_v60 = vpop.f32.mrf.mxu1  ;;  %v718_v61 = vsel %vm203_vm2, %v715_v58, -inf }
 0x7a3   : > { %v713_v62 = vmul.f32 0.35355338, %v701_v60  ;;  %719 = vmax.xlane.f32.xlu0 %v718_v61 }
 0x7a5   : > { %v716_v2 = vsel %vm120_vm1, %v713_v62, -1e+30 }
 0x7a6   : > { %v721_v4 = vsel %vm203_vm2, %v716_v2, -inf }
 0x7a7   : > { %725 = vmax.xlane.f32.xlu0 %v724_v3  ;;  %722 = vmax.xlane.f32.xlu1 %v721_v4 }
 0x82c   : > { %v720_v5 = vpop.xlane.xlu0 %719 }
 0x82d   : > { %v727_v6 = vsub.f32 %v715_v58, %v720_v5 }
 0x82f   : > { %v730_v12 = vmul.f32 1.442695, %v727_v6 }
 0x830   : > { %v726_v8 = vpop.xlane.xlu0 %725  ;;  %v723_v9 = vpop.xlane.xlu1 %722 }
 0x831   : > { %v729_v10 = vsub.f32 %v717_v63, %v726_v8  ;;  %v728_v11 = vsub.f32 %v716_v2, %v723_v9 }
 0x833   : > { %v734_v13 = vmul.f32 1.442695, %v729_v10  ;;  %v732_v14 = vmul.f32 1.442695, %v728_v11 }
 0x835   : > { %1150 = vpow2.f32 %v734_v13 }
 0x836   : > { %1152 = vpow2.f32 %v732_v14 }
 0x837   : > { %1154 = vpow2.f32 %v730_v12 }
 0x842   : > { %v1151_v7 = vpop.eup %1150 }
 0x843   : > { %v1153_v15 = vpop.eup %1152  ;;  %v742_v16 = vsel %vm203_vm2, %v1151_v7, 0.0 }
 0x844   : > { %v1155_v17 = vpop.eup %1154  ;;  %743 = vadd.xlane.f32.xlu0 %v742_v16  ;;  %v739_v18 = vsel %vm203_vm2, %v1153_v15, 0.0 }
 0x845   : > { %740 = vadd.xlane.f32.xlu1 %v739_v18  ;;  %v736_v19 = vsel %vm203_vm2, %v1155_v17, 0.0 }
 0x848   : > { %737 = vadd.xlane.f32.xlu0 %v736_v19 }
 0x856   : > { %755 = vrot.lane.b32.xlu1 %v1210_v0, %s1180_s22 }
 0x85a   : > { %1098 = vrot.lane.b32.xlu1 %v1097_v51, %s1181_s23 }
 0x85e   : > { %822 = vrot.lane.b32.xlu1 %v1291_v47, %s1181_s23  ;;  %753 = vrot.lane.b32.xlu0 %v1212_v1, %s1180_s22 }
 0x862   : > { %834 = vrot.lane.b32.xlu1 %v1044_v42, %s1182_s24  ;;  %1103 = vrot.lane.b32.xlu0 %v1102_v46, %s1182_s24 }
 0x8cd   : > { %v744_v20 = vpop.xlane.xlu0 %743 }
 0x8ce   : > { %v741_v21 = vpop.xlane.xlu1 %740  ;;  %1156 = vrcp.f32 %v744_v20 }
 0x8cf   : > { %1158 = vrcp.f32 %v741_v21 }
 0x8d1   : > { %v738_v22 = vpop.xlane.xlu0 %737 }
 0x8d2   : > { %1160 = vrcp.f32 %v738_v22  ;;  %v756_v23 = vpop.permute.xlu1 %755 }
 0x8d3   : > { %v765_v0 = vsel %vm250_vm3, %v756_v23, 0  ;;  %1073 = vmatprep.subr.msk.bf16.mxu0 %vm250_vm3, %v756_v23 }
 0x8d4   : > { %1055 = vmatpush3.bf16.msra.mxu0 %v765_v0 }
 0x8d5   : > { %v754_v48 = vpop.permute.xlu0 %753 }
 0x8d6   : > { %1056 = vmatprep.subr.bf16.mxu0 %v754_v48  ;;  %v1099_v33 = vpop.permute.xlu1 %1098 }
 0x8d7   : > { %v1101_v42 = vunpack.i.h.bf16 %v1099_v33  ;;  %v1100_v43 = vunpack.i.l.bf16 %v1099_v33 }
 0x8d8   : > { %1057 = vmatpush3.bf16.msra.mxu0 %v754_v48 }
 0x8d9   : > { %v1104_v41 = vpop.permute.xlu0 %1103  ;;  %v852_v46 = vsel %vm136_vm0, %v1259_v59, %v1101_v42  ;;  %v851_v49 = vsel %vm136_vm0, %v1257_v57, %v1100_v43 }
 0x8da   : > { %v823_v34 = vpop.permute.xlu1 %822  ;;  %v1106_v44 = vunpack.i.h.bf16 %v1104_v41 }
 0x8db   : > { %v1157_v47 = vpop.eup %1156  ;;  %v853_v36 = vsel %vm136_vm0, %v1255_v56, %v823_v34  ;;  %v1105_v56 = vunpack.i.l.bf16 %v1104_v41 }
 0x8dc   : > { %v1159_v1 = vpop.eup %1158  ;;  %v750_v51 = vmul.f32 %v1157_v47, %v1151_v7  ;;  %v856_v55 = vsel %vm854_vm4, %v852_v46, %v1106_v44 }
 0x8dd   : > { %v749_v25 = vmul.f32 %v1159_v1, %v1153_v15  ;;  %v855_v54 = vsel %vm854_vm4, %v851_v49, %v1105_v56 }
 0x8de   : > { %v752_v27 = vpack.c.bf16 %v750_v51, %v750_v51  ;;  %v835_v35 = vpop.permute.xlu1 %834 }
 0x8df   : > { %v1161_v50 = vpop.eup %1160  ;;  %v857_v37 = vsel %vm854_vm4, %v853_v36, %v835_v35 }
 0x8e0   : > { %v748_v24 = vmul.f32 %v1161_v50, %v1155_v17 }
 0x8e2   : > { %v751_v26 = vpack.c.bf16 %v749_v25, %v748_v24 }
 0x8e4   : > { %1058 = vmatprep.mubr.msk.bf16.mxu0 %vm203_vm2, %v751_v26 }
 0x8e5   : > { %1059 = vmatmul.mubr.msk.bf16.vlgmr.msra.gmra.mxu0 %vm203_vm2, %v752_v27 }
 0x9a5   : > { %v1060_v28 = vpop.f32.mrf.mxu0 }
 0x9a6   : > { %846 = vrot.lane.b32.xlu1 %v1060_v28, %s1183_s25 }
 0x9a7   : > { %v801_v29 = vpop.f32.mrf.mxu0 }
 0x9a9   : > { %v1061_v30 = vpop.f32.mrf.mxu0 }
 0x9ab   : > { %v804_v31 = vpop.f32.mrf.mxu0 }
 0x9ac   : > { %v1107_v32 = vpack.i.bf16 %v804_v31, %v801_v29 }
 0x9ae   : > { %1108 = vrot.lane.b32.xlu0 %v1107_v32, %s1183_s25 }
 0xa18   : > { %v847_v38 = vpop.permute.xlu1 %846 }
 0xa19   : > { %v860_v39 = vsel %vm203_vm2, %v857_v37, %v847_v38 }
 0xa1a   : > { %v965_v40 = vpack.c.bf16 %v860_v39, %v860_v39 }
 0xa1c   : > { %877 = vst.msk [vmem:[%s116_s28 + $0x8] sm:$0xf] %vm874_vm5, %v965_v40 }
 0xa20   : > { %v1109_v45 = vpop.permute.xlu0 %1108 }
 0xa21   : > { %v1111_v52 = vunpack.i.h.bf16 %v1109_v45  ;;  %v1110_v53 = vunpack.i.l.bf16 %v1109_v45 }
 0xa23   : > { %v858_v58 = vsel %vm203_vm2, %v855_v54, %v1110_v53  ;;  %v859_v60 = vsel %vm203_vm2, %v856_v55, %v1111_v52 }
 0xa24   : > { %v963_v61 = vpack.c.bf16 %v858_v58, %v858_v58  ;;  %v964_v62 = vpack.c.bf16 %v859_v60, %v859_v60 }
 0xa26   : > { %875 = vst.msk [vmem:[%s116_s28] sm:$0xf] %vm874_vm5, %v963_v61  ;;  %876 = vst.msk [vmem:[%s116_s28 + $0x4] sm:$0xf] %vm874_vm5, %v964_v62 }
 0xa27 PF: > { %s11_s6 = sadd.s32 1, %s1168_s6  }
 0xa28   : > { %p8_p4 = scmp.ge.s32.totalorder %s11_s6, 4  }
 0xa2a   :  { %10 = sbr.rel (!%p8_p4) target bundleno = 1 (0x1), region = 54 }

// kernel: dino_semantic_segmentation.21
= control target key start
LH: loop header
LB: loop body
LE: loop exit
PB: predicated region body
PF: predicated region fallthrough
CT: control target
= control target key end

     0   :  { %vm27_vm0 = vcmask 261120   ;;  %v403_v42 = vmov 0.0   ;;  %vm404_vm1 = vmmov 0   ;;  %s546_s0 = inlined_call_operand.vmem [shape: f32[48,32], index: 0, kind: input, shape index: {}]   ;;  %s547_s3 = inlined_call_operand.vmem [shape: bf16[32,128], index: 3, kind: input, shape index: {}]   ;;  %s548_s1 = inlined_call_operand.vmem [shape: f32[1,32], index: 1, kind: input, shape index: {}]   ;;  %s549_s2 = inlined_call_operand.vmem [shape: f32[1,32], index: 2, kind: input, shape index: {}]   ;;  %s550_s4 = inlined_call_operand.vmem [shape: f32[1,128], index: 4, kind: input, shape index: {}]   ;;  %s551_s5 = inlined_call_operand.vmem [shape: bf16[48,128], index: 5, kind: output, shape index: {}]  }
   0x1   :  { %v23_v0 = vld [vmem:[%s546_s0 + $0x10] sm:$0xff]  ;;  %v24_v1 = vld [vmem:[%s546_s0 + $0x18] sm:$0xff]  ;;  %v21_v2 = vld [vmem:[%s546_s0] sm:$0xff]  ;;  %371 = vmatprep.subr.bf16.mxu1 %v403_v42  ;;  %355 = vmatprep.subr.bf16.mxu0 %v403_v42 }
   0x2   :  { %v34_v3 = vsel %vm27_vm0, %v23_v0, 0.0  ;;  %v28_v4 = vsel %vm27_vm0, %v21_v2, 0.0  ;;  %v22_v5 = vld [vmem:[%s546_s0 + $0x8] sm:$0xff]  ;;  %v37_v6 = vsel %vm27_vm0, %v24_v1, 0.0  ;;  %v25_v8 = vld [vmem:[%s546_s0 + $0x20] sm:$0xff]  ;;  %363 = vmatprep.mubr.msk.bf16.mxu1 %vm404_vm1, %v403_v42  ;;  %359 = vmatprep.mubr.msk.bf16.mxu0 %vm404_vm1, %v403_v42 }
   0x3   :  { %35 = vadd.xlane.f32.xlu0 %v34_v3  ;;  %29 = vadd.xlane.f32.xlu1 %v28_v4  ;;  %v31_v7 = vsel %vm27_vm0, %v22_v5, 0.0  ;;  %v26_v9 = vld [vmem:[%s546_s0 + $0x28] sm:$0xff]  ;;  %v40_v10 = vsel %vm27_vm0, %v25_v8, 0.0  ;;  %v378_v44 = vld [vmem:[%s547_s3] sm:$0xff]  }
   0x4   :  { %v43_v11 = vsel %vm27_vm0, %v26_v9, 0.0  ;;  %v377_v43 = vld [vmem:[%s547_s3 + $0x8] sm:$0xff]  }
   0x5   :  { %373 = vmatpush3.bf16.msra.mxu1 %v377_v43  ;;  %356 = vmatpush3.bf16.msra.mxu0 %v377_v43 }
   0x6   :  { %372 = vmatprep.subr.bf16.mxu1 %v403_v42  ;;  %357 = vmatprep.subr.bf16.mxu0 %v403_v42 }
   0x7   :  { %38 = vadd.xlane.f32.xlu0 %v37_v6  ;;  %32 = vadd.xlane.f32.xlu1 %v31_v7  ;;  %v314_v7 = vld [vmem:[%s549_s2] ss:$0 sm:$0xff] }
   0x9   :  { %374 = vmatpush3.bf16.msra.mxu1 %v378_v44  ;;  %358 = vmatpush3.bf16.msra.mxu0 %v378_v44 }
   0xb   :  { %41 = vadd.xlane.f32.xlu0 %v40_v10  ;;  %44 = vadd.xlane.f32.xlu1 %v43_v11 }
  0x8c   :  { %v36_v12 = vpop.xlane.xlu0 %35  ;;  %v30_v13 = vpop.xlane.xlu1 %29 }
  0x8d   :  { %v49_v14 = vmul.f32 0.03125, %v36_v12  ;;  %v47_v15 = vmul.f32 0.03125, %v30_v13 }
  0x8f   :  { %v459_v16 = vsub.f32 %v23_v0, %v49_v14  ;;  %v461_v17 = vsub.f32 %v21_v2, %v47_v15 }
  0x90   :  { %v39_v18 = vpop.xlane.xlu0 %38  ;;  %v33_v19 = vpop.xlane.xlu1 %32 }
  0x91   :  { %v50_v20 = vmul.f32 0.03125, %v39_v18  ;;  %v61_v21 = vmul.f32 %v459_v16, %v459_v16  ;;  %v48_v22 = vmul.f32 0.03125, %v33_v19  ;;  %v59_v23 = vmul.f32 %v461_v17, %v461_v17 }
  0x93   :  { %v467_v24 = vsub.f32 %v24_v1, %v50_v20  ;;  %v71_v25 = vsel %vm27_vm0, %v61_v21, 0.0  ;;  %v470_v26 = vsub.f32 %v22_v5, %v48_v22  ;;  %v65_v28 = vsel %vm27_vm0, %v59_v23, 0.0  ;;  %v313_v1 = vld [vmem:[%s548_s1] ss:$0 sm:$0xff] }
  0x94   :  { %72 = vadd.xlane.f32.xlu0 %v71_v25  ;;  %v42_v27 = vpop.xlane.xlu0 %41  ;;  %v45_v29 = vpop.xlane.xlu1 %44 }
  0x95   :  { %v51_v30 = vmul.f32 0.03125, %v42_v27  ;;  %v62_v31 = vmul.f32 %v467_v24, %v467_v24  ;;  %v52_v32 = vmul.f32 0.03125, %v45_v29  ;;  %v60_v33 = vmul.f32 %v470_v26, %v470_v26 }
  0x97   :  { %v477_v34 = vsub.f32 %v25_v8, %v51_v30  ;;  %v74_v35 = vsel %vm27_vm0, %v62_v31, 0.0  ;;  %v480_v36 = vsub.f32 %v26_v9, %v52_v32  ;;  %v68_v38 = vsel %vm27_vm0, %v60_v33, 0.0 }
  0x98   :  { %75 = vadd.xlane.f32.xlu1 %v74_v35  ;;  %66 = vadd.xlane.f32.xlu0 %v65_v28  ;;  %v315_v28 = vld [vmem:[%s550_s4] ss:$0 sm:$0xff] }
  0x99   :  { %v63_v37 = vmul.f32 %v477_v34, %v477_v34  ;;  %v64_v39 = vmul.f32 %v480_v36, %v480_v36 }
  0x9b   :  { %v77_v40 = vsel %vm27_vm0, %v63_v37, 0.0  ;;  %v80_v41 = vsel %vm27_vm0, %v64_v39, 0.0 }
  0x9c   :  { %78 = vadd.xlane.f32.xlu0 %v77_v40  ;;  %69 = vadd.xlane.f32.xlu1 %v68_v38 }
  0xa0   :  { %81 = vadd.xlane.f32.xlu1 %v80_v41 }
 0x11d   :  { %v73_v45 = vpop.xlane.xlu0 %72 }
 0x11e   :  { %v85_v46 = vmul.f32 0.03125, %v73_v45 }
 0x120   :  { %v91_v47 = vadd.f32 1e-06, %v85_v46 }
 0x121   :  { %v67_v48 = vpop.xlane.xlu0 %66  ;;  %v76_v49 = vpop.xlane.xlu1 %75 }
 0x122   :  { %379 = vrsqrt.f32 %v91_v47  ;;  %v83_v50 = vmul.f32 0.03125, %v67_v48  ;;  %v86_v51 = vmul.f32 0.03125, %v76_v49 }
 0x124   :  { %v89_v52 = vadd.f32 1e-06, %v83_v50  ;;  %v92_v53 = vadd.f32 1e-06, %v86_v51 }
 0x125   :  { %v79_v54 = vpop.xlane.xlu0 %78  ;;  %v70_v55 = vpop.xlane.xlu1 %69 }
 0x126   :  { %381 = vrsqrt.f32 %v89_v52  ;;  %v87_v56 = vmul.f32 0.03125, %v79_v54  ;;  %v84_v57 = vmul.f32 0.03125, %v70_v55 }
 0x127   :  { %383 = vrsqrt.f32 %v92_v53 }
 0x128   :  { %v93_v58 = vadd.f32 1e-06, %v87_v56  ;;  %v90_v59 = vadd.f32 1e-06, %v84_v57 }
 0x129   :  { %v82_v60 = vpop.xlane.xlu1 %81 }
 0x12a   :  { %385 = vrsqrt.f32 %v93_v58  ;;  %v88_v61 = vmul.f32 0.03125, %v82_v60 }
 0x12b   :  { %387 = vrsqrt.f32 %v90_v59 }
 0x12c   :  { %v94_v62 = vadd.f32 1e-06, %v88_v61 }
 0x12e   :  { %389 = vrsqrt.f32 %v94_v62 }
 0x12f   :  { %v380_v63 = vpop.eup %379 }
 0x130   :  { %v103_v0 = vmul.f32 %v380_v63, %v459_v16 }
 0x132   :  { %v116_v5 = vmul.f32 %v313_v1, %v103_v0 }
 0x133   :  { %v382_v2 = vpop.eup %381 }
 0x134   :  { %v384_v3 = vpop.eup %383  ;;  %v101_v6 = vmul.f32 %v382_v2, %v461_v17  ;;  %v129_v12 = vadd.f32 %v314_v7, %v116_v5 }
 0x135   :  { %v104_v4 = vmul.f32 %v384_v3, %v467_v24 }
 0x136   :  { %v114_v15 = vmul.f32 %v313_v1, %v101_v6 }
 0x137   :  { %v386_v8 = vpop.eup %385  ;;  %v117_v9 = vmul.f32 %v313_v1, %v104_v4 }
 0x138   :  { %v388_v10 = vpop.eup %387  ;;  %v105_v11 = vmul.f32 %v386_v8, %v477_v34  ;;  %v127_v21 = vadd.f32 %v314_v7, %v114_v15 }
 0x139   :  { %v130_v13 = vadd.f32 %v314_v7, %v117_v9  ;;  %v102_v14 = vmul.f32 %v388_v10, %v470_v26 }
 0x13a   :  { %v118_v17 = vmul.f32 %v313_v1, %v105_v11 }
 0x13b   :  { %v390_v16 = vpop.eup %389  ;;  %v134_v18 = vpack.c.bf16 %v130_v13, %v129_v12  ;;  %v115_v19 = vmul.f32 %v313_v1, %v102_v14 }
 0x13c   :  { %v106_v20 = vmul.f32 %v390_v16, %v480_v36  ;;  %v131_v25 = vadd.f32 %v314_v7, %v118_v17 }
 0x13d   :  { %364 = vmatmul.mubr.msk.bf16.vlgmr.msra.gmra.mxu1 %vm27_vm0, %v134_v18  ;;  %v128_v22 = vadd.f32 %v314_v7, %v115_v19 }
 0x13e   :  { %367 = vmatprep.mubr.msk.bf16.mxu1 %vm404_vm1, %v403_v42  ;;  %v119_v23 = vmul.f32 %v313_v1, %v106_v20 }
 0x13f   :  { %v133_v24 = vpack.c.bf16 %v128_v22, %v127_v21 }
 0x140   :  { %v132_v27 = vadd.f32 %v314_v7, %v119_v23 }
 0x141   :  { %360 = vmatmul.mubr.msk.bf16.vlgmr.msra.gmra.mxu0 %vm27_vm0, %v133_v24 }
 0x142   :  { %v135_v26 = vpack.c.bf16 %v132_v27, %v131_v25 }
 0x145   :  { %368 = vmatmul.mubr.msk.bf16.gmra.mxu1 %vm27_vm0, %v135_v26 }
 0x1fd   :  { %v210_v29 = vpop.f32.mrf.mxu1 }
 0x1fe   :  { %v523_v30 = vadd.f32 %v315_v28, %v210_v29 }
 0x1ff   :  { %v365_v31 = vpop.f32.mrf.mxu1 }
 0x200   :  { %v227_v32 = vmul.f32 %v523_v30, %v523_v30 }
 0x201   :  { %v202_v33 = vpop.f32.mrf.mxu0  ;;  %v213_v34 = vpop.f32.mrf.mxu1 }
 0x202   :  { %v233_v35 = vmul.f32 %v227_v32, %v523_v30  ;;  %v528_v36 = vadd.f32 %v315_v28, %v202_v33  ;;  %v214_v37 = vadd.f32 %v315_v28, %v213_v34 }
 0x203   :  { %v361_v38 = vpop.f32.mrf.mxu0  ;;  %v366_v39 = vpop.f32.mrf.mxu1 }
 0x204   :  { %v239_v40 = vmul.f32 0.044715, %v233_v35  ;;  %v225_v41 = vmul.f32 %v528_v36, %v528_v36  ;;  %v228_v42 = vmul.f32 %v214_v37, %v214_v37 }
 0x205   :  { %v205_v43 = vpop.f32.mrf.mxu0  ;;  %v218_v44 = vpop.f32.mrf.mxu1 }
 0x206   :  { %v245_v45 = vadd.f32 %v239_v40, %v523_v30  ;;  %v231_v46 = vmul.f32 %v225_v41, %v528_v36  ;;  %v234_v47 = vmul.f32 %v228_v42, %v214_v37  ;;  %v206_v48 = vadd.f32 %v315_v28, %v205_v43 }
 0x207   :  { %v219_v49 = vadd.f32 %v315_v28, %v218_v44  ;;  %v362_v50 = vpop.f32.mrf.mxu0  ;;  %v369_v51 = vpop.f32.mrf.mxu1 }
 0x208   :  { %v251_v52 = vmul.f32 0.7978846, %v245_v45  ;;  %v237_v53 = vmul.f32 0.044715, %v231_v46  ;;  %v240_v54 = vmul.f32 0.044715, %v234_v47  ;;  %v226_v55 = vmul.f32 %v206_v48, %v206_v48 }
 0x209   :  { %v229_v56 = vmul.f32 %v219_v49, %v219_v49  ;;  %v221_v57 = vpop.f32.mrf.mxu1 }
 0x20a   :  { %391 = vtanh.f32 %v251_v52  ;;  %v243_v58 = vadd.f32 %v237_v53, %v528_v36  ;;  %v246_v59 = vadd.f32 %v240_v54, %v214_v37  ;;  %v232_v60 = vmul.f32 %v226_v55, %v206_v48 }
 0x20b   :  { %v235_v61 = vmul.f32 %v229_v56, %v219_v49  ;;  %v222_v62 = vadd.f32 %v315_v28, %v221_v57  ;;  %v370_v63 = vpop.f32.mrf.mxu1 }
 0x20c   :  { %v249_v0 = vmul.f32 0.7978846, %v243_v58  ;;  %v252_v1 = vmul.f32 0.7978846, %v246_v59  ;;  %v238_v2 = vmul.f32 0.044715, %v232_v60 }
 0x20d   :  { %v241_v3 = vmul.f32 0.044715, %v235_v61  ;;  %v230_v4 = vmul.f32 %v222_v62, %v222_v62 }
 0x20e   :  { %393 = vtanh.f32 %v249_v0  ;;  %v244_v5 = vadd.f32 %v238_v2, %v206_v48 }
 0x20f   :  { %395 = vtanh.f32 %v252_v1  ;;  %v247_v6 = vadd.f32 %v241_v3, %v219_v49  ;;  %v236_v7 = vmul.f32 %v230_v4, %v222_v62 }
 0x210   :  { %v250_v8 = vmul.f32 0.7978846, %v244_v5 }
 0x211   :  { %v253_v9 = vmul.f32 0.7978846, %v247_v6  ;;  %v242_v10 = vmul.f32 0.044715, %v236_v7 }
 0x212   :  { %397 = vtanh.f32 %v250_v8 }
 0x213   :  { %399 = vtanh.f32 %v253_v9  ;;  %v248_v11 = vadd.f32 %v242_v10, %v222_v62 }
 0x215   :  { %v254_v12 = vmul.f32 0.7978846, %v248_v11 }
 0x217   :  { %v392_v13 = vpop.eup %391  ;;  %401 = vtanh.f32 %v254_v12 }
 0x218   :  { %v263_v14 = vadd.f32 1.0, %v392_v13 }
 0x21a   :  { %v269_v19 = vmul.f32 0.5, %v263_v14 }
 0x21b   :  { %v394_v15 = vpop.eup %393 }
 0x21c   :  { %v396_v16 = vpop.eup %395  ;;  %v261_v18 = vadd.f32 1.0, %v394_v15  ;;  %v275_v25 = vmul.f32 %v269_v19, %v523_v30 }
 0x21d   :  { %v264_v20 = vadd.f32 1.0, %v396_v16 }
 0x21e   :  { %v267_v23 = vmul.f32 0.5, %v261_v18 }
 0x21f   :  { %v398_v17 = vpop.eup %397  ;;  %v270_v21 = vmul.f32 0.5, %v264_v20 }
 0x220   :  { %v400_v22 = vpop.eup %399  ;;  %v262_v24 = vadd.f32 1.0, %v398_v17  ;;  %v273_v32 = vmul.f32 %v267_v23, %v528_v36 }
 0x221   :  { %v276_v27 = vmul.f32 %v270_v21, %v214_v37  ;;  %v265_v26 = vadd.f32 1.0, %v400_v22 }
 0x222   :  { %v268_v28 = vmul.f32 0.5, %v262_v24 }
 0x223   :  { %v341_v29 = vpack.c.bf16 %v276_v27, %v275_v25  ;;  %v271_v34 = vmul.f32 0.5, %v265_v26 }
 0x224   :  { %v402_v31 = vpop.eup %401  ;;  %v274_v33 = vmul.f32 %v268_v28, %v206_v48 }
 0x225   :  { %348 = vst [vmem:[%s551_s5 + $0x8] sm:$0xff] %v341_v29   ;;  %v266_v35 = vadd.f32 1.0, %v402_v31  ;;  %v277_v30 = vmul.f32 %v271_v34, %v219_v49 }
 0x226   :  { %v336_v38 = vpack.c.bf16 %v274_v33, %v273_v32 }
 0x227   :  { %v272_v39 = vmul.f32 0.5, %v266_v35 }
 0x228   :  { %337 = vst [vmem:[%s551_s5] sm:$0xff] %v336_v38  }
 0x229   :  { %v278_v37 = vmul.f32 %v272_v39, %v222_v62 }
 0x22b   :  { %v346_v40 = vpack.c.bf16 %v278_v37, %v277_v30 }
 0x22d   :  { %349 = vst [vmem:[%s551_s5 + $0x10] sm:$0xff] %v346_v40  }

// kernel: dino_semantic_segmentation.22
= control target key start
LH: loop header
LB: loop body
LE: loop exit
PB: predicated region body
PF: predicated region fallthrough
CT: control target
= control target key end

     0   :  { %v290_v0 = vmov 0.0   ;;  %vm291_vm0 = vmmov 0   ;;  %vm198_vm1 = vcmask 261120   ;;  %s406_s1 = inlined_call_operand.vmem [shape: bf16[128,32], index: 1, kind: input, shape index: {}]   ;;  %s407_s0 = inlined_call_operand.vmem [shape: bf16[48,128], index: 0, kind: input, shape index: {}]   ;;  %s408_s2 = inlined_call_operand.vmem [shape: f32[1,32], index: 2, kind: input, shape index: {}]   ;;  %s409_s3 = inlined_call_operand.vmem [shape: f32[1,32], index: 3, kind: input, shape index: {}]   ;;  %s410_s4 = inlined_call_operand.vmem [shape: f32[48,32], index: 4, kind: input, shape index: {}]   ;;  %s411_s5 = inlined_call_operand.vmem [shape: f32[48,32], index: 5, kind: output, shape index: {}]  }
   0x1   :  { %261 = vmatprep.subr.bf16.mxu1 %v290_v0  ;;  %v279_v1 = vld [vmem:[%s406_s1 + $0x38] sm:$0xff]   ;;  %233 = vmatprep.subr.bf16.mxu0 %v290_v0  ;;  %v280_v2 = vld [vmem:[%s406_s1 + $0x30] sm:$0xff]   ;;  %v281_v3 = vld [vmem:[%s406_s1 + $0x28] sm:$0xff]  }
   0x2   :  { %253 = vmatprep.mubr.msk.bf16.mxu1 %vm291_vm0, %v290_v0  ;;  %249 = vmatprep.mubr.msk.bf16.mxu0 %vm291_vm0, %v290_v0  ;;  %v282_v4 = vld [vmem:[%s406_s1 + $0x20] sm:$0xff]   ;;  %v283_v5 = vld [vmem:[%s406_s1 + $0x18] sm:$0xff]   ;;  %v284_v6 = vld [vmem:[%s406_s1 + $0x10] sm:$0xff]  }
   0x3   :  { %269 = vmatpush3.bf16.msra.mxu1 %v279_v1  ;;  %234 = vmatpush3.bf16.msra.mxu0 %v279_v1  ;;  %v285_v7 = vld [vmem:[%s406_s1 + $0x8] sm:$0xff]   ;;  %v286_v8 = vld [vmem:[%s406_s1] sm:$0xff]   ;;  %v289_v11 = vld [vmem:[%s407_s0 + $0x10] sm:$0xff]  }
   0x4   :  { %262 = vmatprep.subr.bf16.mxu1 %v290_v0  ;;  %235 = vmatprep.subr.bf16.mxu0 %v290_v0  ;;  %v287_v9 = vld [vmem:[%s407_s0 + $0x8] sm:$0xff]   ;;  %v288_v10 = vld [vmem:[%s407_s0] sm:$0xff]   ;;  %v175_v18 = vld [vmem:[%s410_s4 + $0x10] sm:$0xff] }
   0x5   :  { %v209_v12 = vld [vmem:[%s408_s2] ss:$0 sm:$0xff]  ;;  %v176_v30 = vld [vmem:[%s410_s4 + $0x18] sm:$0xff]  ;;  %v174_v31 = vld [vmem:[%s410_s4 + $0x8] sm:$0xff] }
   0x6   :  { %v221_v14 = vld [vmem:[%s409_s3] ss:$0 sm:$0xff]  ;;  %v178_v46 = vld [vmem:[%s410_s4 + $0x28] sm:$0xff] }
   0x7   :  { %270 = vmatpush3.bf16.msra.mxu1 %v280_v2  ;;  %236 = vmatpush3.bf16.msra.mxu0 %v280_v2  ;;  %v173_v19 = vld [vmem:[%s410_s4] sm:$0xff] }
   0x8   :  { %263 = vmatprep.subr.bf16.mxu1 %v290_v0  ;;  %237 = vmatprep.subr.bf16.mxu0 %v290_v0  ;;  %v177_v40 = vld [vmem:[%s410_s4 + $0x20] sm:$0xff] }
   0xb   :  { %271 = vmatpush3.bf16.msra.mxu1 %v281_v3  ;;  %238 = vmatpush3.bf16.msra.mxu0 %v281_v3 }
   0xc   :  { %264 = vmatprep.subr.bf16.mxu1 %v290_v0  ;;  %239 = vmatprep.subr.bf16.mxu0 %v290_v0 }
   0xf   :  { %272 = vmatpush3.bf16.msra.mxu1 %v282_v4  ;;  %240 = vmatpush3.bf16.msra.mxu0 %v282_v4 }
  0x10   :  { %265 = vmatprep.subr.bf16.mxu1 %v290_v0  ;;  %241 = vmatprep.subr.bf16.mxu0 %v290_v0 }
  0x13   :  { %273 = vmatpush3.bf16.msra.mxu1 %v283_v5  ;;  %242 = vmatpush3.bf16.msra.mxu0 %v283_v5 }
  0x14   :  { %266 = vmatprep.subr.bf16.mxu1 %v290_v0  ;;  %243 = vmatprep.subr.bf16.mxu0 %v290_v0 }
  0x17   :  { %274 = vmatpush3.bf16.msra.mxu1 %v284_v6  ;;  %244 = vmatpush3.bf16.msra.mxu0 %v284_v6 }
  0x18   :  { %267 = vmatprep.subr.bf16.mxu1 %v290_v0  ;;  %245 = vmatprep.subr.bf16.mxu0 %v290_v0 }
  0x1b   :  { %275 = vmatpush3.bf16.msra.mxu1 %v285_v7  ;;  %246 = vmatpush3.bf16.msra.mxu0 %v285_v7 }
  0x1c   :  { %268 = vmatprep.subr.bf16.mxu1 %v290_v0  ;;  %247 = vmatprep.subr.bf16.mxu0 %v290_v0 }
  0x1f   :  { %276 = vmatpush3.bf16.msra.mxu1 %v286_v8  ;;  %248 = vmatpush3.bf16.msra.mxu0 %v286_v8 }
  0x22   :  { %254 = vmatmul.mubr.bf16.vlgmr.msra.gmra.mxu1 %v287_v9  ;;  %250 = vmatmul.mubr.bf16.vlgmr.msra.gmra.mxu0 %v288_v10 }
  0x23   :  { %257 = vmatprep.mubr.msk.bf16.mxu1 %vm291_vm0, %v290_v0 }
  0x2a   :  { %258 = vmatmul.mubr.bf16.gmra.mxu1 %v289_v11 }
  0xe2   :  { %v158_v13 = vpop.f32.mrf.mxu1  ;;  %v150_v15 = vpop.f32.mrf.mxu0 }
  0xe3   :  { %v159_v16 = vadd.f32 %v209_v12, %v158_v13  ;;  %v151_v17 = vadd.f32 %v209_v12, %v150_v15 }
  0xe4   :  { %v255_v20 = vpop.f32.mrf.mxu1  ;;  %v251_v21 = vpop.f32.mrf.mxu0 }
  0xe5   :  { %v188_v22 = vmul.f32 %v221_v14, %v159_v16  ;;  %v186_v23 = vmul.f32 %v221_v14, %v151_v17 }
  0xe6   :  { %v161_v24 = vpop.f32.mrf.mxu1  ;;  %v153_v25 = vpop.f32.mrf.mxu0 }
  0xe7   :  { %v194_v26 = vadd.f32 %v188_v22, %v175_v18  ;;  %v192_v27 = vadd.f32 %v186_v23, %v173_v19  ;;  %v162_v28 = vadd.f32 %v209_v12, %v161_v24  ;;  %v154_v29 = vadd.f32 %v209_v12, %v153_v25 }
  0xe8   :  { %v256_v32 = vpop.f32.mrf.mxu1  ;;  %v252_v33 = vpop.f32.mrf.mxu0 }
  0xe9   :  { %201 = vst.msk [vmem:[%s411_s5 + $0x10] sm:$0xff] %vm198_vm1, %v194_v26  ;;  %199 = vst.msk [vmem:[%s411_s5] sm:$0xff] %vm198_vm1, %v192_v27  ;;  %v189_v34 = vmul.f32 %v221_v14, %v162_v28  ;;  %v187_v35 = vmul.f32 %v221_v14, %v154_v29 }
  0xea   :  { %v166_v36 = vpop.f32.mrf.mxu1 }
  0xeb   :  { %v195_v37 = vadd.f32 %v189_v34, %v176_v30  ;;  %v193_v38 = vadd.f32 %v187_v35, %v174_v31  ;;  %v167_v39 = vadd.f32 %v209_v12, %v166_v36 }
  0xec   :  { %v259_v41 = vpop.f32.mrf.mxu1 }
  0xed   :  { %202 = vst.msk [vmem:[%s411_s5 + $0x18] sm:$0xff] %vm198_vm1, %v195_v37  ;;  %200 = vst.msk [vmem:[%s411_s5 + $0x8] sm:$0xff] %vm198_vm1, %v193_v38  ;;  %v190_v42 = vmul.f32 %v221_v14, %v167_v39 }
  0xee   :  { %v169_v43 = vpop.f32.mrf.mxu1 }
  0xef   :  { %v196_v44 = vadd.f32 %v190_v42, %v177_v40  ;;  %v170_v45 = vadd.f32 %v209_v12, %v169_v43 }
  0xf0   :  { %v260_v47 = vpop.f32.mrf.mxu1 }
  0xf1   :  { %203 = vst.msk [vmem:[%s411_s5 + $0x20] sm:$0xff] %vm198_vm1, %v196_v44  ;;  %v191_v48 = vmul.f32 %v221_v14, %v170_v45 }
  0xf3   :  { %v197_v49 = vadd.f32 %v191_v48, %v178_v46 }
  0xf5   :  { %204 = vst.msk [vmem:[%s411_s5 + $0x28] sm:$0xff] %vm198_vm1, %v197_v49 }

// kernel: dino_semantic_segmentation.28
= control target key start
LH: loop header
LB: loop body
LE: loop exit
PB: predicated region body
PF: predicated region fallthrough
CT: control target
= control target key end

     0   :  { %vm20_vm0 = vcmask 261120   ;;  %s245_s0 = inlined_call_operand.vmem [shape: f32[48,32], index: 0, kind: input, shape index: {}]   ;;  %s246_s1 = inlined_call_operand.vmem [shape: f32[1,32], index: 1, kind: input, shape index: {}]   ;;  %s247_s2 = inlined_call_operand.vmem [shape: f32[1,32], index: 2, kind: input, shape index: {}]   ;;  %s248_s3 = inlined_call_operand.vmem [shape: f32[48,32], index: 3, kind: output, shape index: {}]  }
   0x1   :  { %v14_v0 = vld [vmem:[%s245_s0] sm:$0xff]  ;;  %v16_v1 = vld [vmem:[%s245_s0 + $0x10] sm:$0xff]  ;;  %v15_v2 = vld [vmem:[%s245_s0 + $0x8] sm:$0xff] }
   0x2   :  { %v21_v3 = vsel %vm20_vm0, %v14_v0, 0.0  ;;  %v27_v4 = vsel %vm20_vm0, %v16_v1, 0.0  ;;  %v17_v5 = vld [vmem:[%s245_s0 + $0x18] sm:$0xff]  ;;  %v24_v6 = vsel %vm20_vm0, %v15_v2, 0.0  ;;  %v18_v8 = vld [vmem:[%s245_s0 + $0x20] sm:$0xff]  ;;  %v19_v9 = vld [vmem:[%s245_s0 + $0x28] sm:$0xff] }
   0x3   :  { %22 = vadd.xlane.f32.xlu0 %v21_v3  ;;  %28 = vadd.xlane.f32.xlu1 %v27_v4  ;;  %v30_v7 = vsel %vm20_vm0, %v17_v5, 0.0  ;;  %v33_v10 = vsel %vm20_vm0, %v18_v8, 0.0  ;;  %v36_v11 = vsel %vm20_vm0, %v19_v9, 0.0  ;;  %v136_v61 = vld [vmem:[%s246_s1] ss:$0 sm:$0xff] }
   0x4   :  { %v137_v63 = vld [vmem:[%s247_s2] ss:$0 sm:$0xff] }
   0x7   :  { %25 = vadd.xlane.f32.xlu0 %v24_v6  ;;  %31 = vadd.xlane.f32.xlu1 %v30_v7 }
   0xb   :  { %34 = vadd.xlane.f32.xlu0 %v33_v10  ;;  %37 = vadd.xlane.f32.xlu1 %v36_v11 }
  0x8c   :  { %v23_v12 = vpop.xlane.xlu0 %22  ;;  %v29_v13 = vpop.xlane.xlu1 %28 }
  0x8d   :  { %v40_v14 = vmul.f32 0.03125, %v23_v12  ;;  %v42_v15 = vmul.f32 0.03125, %v29_v13 }
  0x8f   :  { %v46_v16 = vsub.f32 %v14_v0, %v40_v14  ;;  %v194_v17 = vsub.f32 %v16_v1, %v42_v15 }
  0x90   :  { %v26_v18 = vpop.xlane.xlu0 %25  ;;  %v32_v19 = vpop.xlane.xlu1 %31 }
  0x91   :  { %v41_v20 = vmul.f32 0.03125, %v26_v18  ;;  %v43_v21 = vmul.f32 0.03125, %v32_v19  ;;  %v52_v22 = vmul.f32 %v46_v16, %v46_v16  ;;  %v54_v23 = vmul.f32 %v194_v17, %v194_v17 }
  0x93   :  { %v47_v24 = vsub.f32 %v15_v2, %v41_v20  ;;  %v198_v25 = vsub.f32 %v17_v5, %v43_v21  ;;  %v58_v26 = vsel %vm20_vm0, %v52_v22, 0.0  ;;  %v64_v29 = vsel %vm20_vm0, %v54_v23, 0.0 }
  0x94   :  { %59 = vadd.xlane.f32.xlu0 %v58_v26  ;;  %v35_v27 = vpop.xlane.xlu0 %34  ;;  %v38_v28 = vpop.xlane.xlu1 %37 }
  0x95   :  { %v44_v30 = vmul.f32 0.03125, %v35_v27  ;;  %v45_v31 = vmul.f32 0.03125, %v38_v28  ;;  %v53_v32 = vmul.f32 %v47_v24, %v47_v24  ;;  %v55_v33 = vmul.f32 %v198_v25, %v198_v25 }
  0x97   :  { %v50_v34 = vsub.f32 %v18_v8, %v44_v30  ;;  %v204_v35 = vsub.f32 %v19_v9, %v45_v31  ;;  %v61_v36 = vsel %vm20_vm0, %v53_v32, 0.0  ;;  %v67_v37 = vsel %vm20_vm0, %v55_v33, 0.0 }
  0x98   :  { %65 = vadd.xlane.f32.xlu0 %v64_v29  ;;  %62 = vadd.xlane.f32.xlu1 %v61_v36 }
  0x99   :  { %v56_v38 = vmul.f32 %v50_v34, %v50_v34  ;;  %v57_v39 = vmul.f32 %v204_v35, %v204_v35 }
  0x9b   :  { %v70_v40 = vsel %vm20_vm0, %v56_v38, 0.0  ;;  %v73_v41 = vsel %vm20_vm0, %v57_v39, 0.0 }
  0x9c   :  { %68 = vadd.xlane.f32.xlu1 %v67_v37  ;;  %71 = vadd.xlane.f32.xlu0 %v70_v40 }
  0xa0   :  { %74 = vadd.xlane.f32.xlu1 %v73_v41 }
 0x11d   :  { %v60_v42 = vpop.xlane.xlu0 %59 }
 0x11e   :  { %v76_v43 = vmul.f32 0.03125, %v60_v42 }
 0x120   :  { %v82_v44 = vadd.f32 1e-06, %v76_v43 }
 0x121   :  { %v63_v45 = vpop.xlane.xlu1 %62  ;;  %v66_v46 = vpop.xlane.xlu0 %65 }
 0x122   :  { %138 = vrsqrt.f32 %v82_v44  ;;  %v77_v47 = vmul.f32 0.03125, %v63_v45  ;;  %v78_v48 = vmul.f32 0.03125, %v66_v46 }
 0x124   :  { %v83_v49 = vadd.f32 1e-06, %v77_v47  ;;  %v84_v50 = vadd.f32 1e-06, %v78_v48 }
 0x125   :  { %v69_v51 = vpop.xlane.xlu1 %68  ;;  %v72_v52 = vpop.xlane.xlu0 %71 }
 0x126   :  { %140 = vrsqrt.f32 %v83_v49  ;;  %v79_v53 = vmul.f32 0.03125, %v69_v51  ;;  %v80_v54 = vmul.f32 0.03125, %v72_v52 }
 0x127   :  { %142 = vrsqrt.f32 %v84_v50 }
 0x128   :  { %v85_v55 = vadd.f32 1e-06, %v79_v53  ;;  %v86_v56 = vadd.f32 1e-06, %v80_v54 }
 0x129   :  { %v75_v57 = vpop.xlane.xlu1 %74 }
 0x12a   :  { %144 = vrsqrt.f32 %v85_v55  ;;  %v81_v58 = vmul.f32 0.03125, %v75_v57 }
 0x12b   :  { %146 = vrsqrt.f32 %v86_v56 }
 0x12c   :  { %v87_v59 = vadd.f32 1e-06, %v81_v58 }
 0x12e   :  { %148 = vrsqrt.f32 %v87_v59 }
 0x12f   :  { %v139_v60 = vpop.eup %138 }
 0x130   :  { %v94_v62 = vmul.f32 %v139_v60, %v46_v16 }
 0x132   :  { %v107_v0 = vmul.f32 %v136_v61, %v94_v62 }
 0x133   :  { %v141_v1 = vpop.eup %140 }
 0x134   :  { %v143_v2 = vpop.eup %142  ;;  %v120_v3 = vadd.f32 %v137_v63, %v107_v0  ;;  %v95_v4 = vmul.f32 %v141_v1, %v47_v24 }
 0x135   :  { %v96_v5 = vmul.f32 %v143_v2, %v194_v17 }
 0x136   :  { %126 = vst.msk [vmem:[%s248_s3] sm:$0xff] %vm20_vm0, %v120_v3  ;;  %v108_v6 = vmul.f32 %v136_v61, %v95_v4 }
 0x137   :  { %v145_v7 = vpop.eup %144  ;;  %v109_v8 = vmul.f32 %v136_v61, %v96_v5 }
 0x138   :  { %v147_v9 = vpop.eup %146  ;;  %v121_v10 = vadd.f32 %v137_v63, %v108_v6  ;;  %v97_v11 = vmul.f32 %v145_v7, %v198_v25 }
 0x139   :  { %v122_v12 = vadd.f32 %v137_v63, %v109_v8  ;;  %v98_v13 = vmul.f32 %v147_v9, %v50_v34 }
 0x13a   :  { %127 = vst.msk [vmem:[%s248_s3 + $0x8] sm:$0xff] %vm20_vm0, %v121_v10  ;;  %v110_v14 = vmul.f32 %v136_v61, %v97_v11 }
 0x13b   :  { %v149_v15 = vpop.eup %148  ;;  %128 = vst.msk [vmem:[%s248_s3 + $0x10] sm:$0xff] %vm20_vm0, %v122_v12  ;;  %v111_v16 = vmul.f32 %v136_v61, %v98_v13 }
 0x13c   :  { %v123_v17 = vadd.f32 %v137_v63, %v110_v14  ;;  %v99_v18 = vmul.f32 %v149_v15, %v204_v35 }
 0x13d   :  { %v124_v19 = vadd.f32 %v137_v63, %v111_v16 }
 0x13e   :  { %129 = vst.msk [vmem:[%s248_s3 + $0x18] sm:$0xff] %vm20_vm0, %v123_v17  ;;  %v112_v20 = vmul.f32 %v136_v61, %v99_v18 }
 0x13f   :  { %130 = vst.msk [vmem:[%s248_s3 + $0x20] sm:$0xff] %vm20_vm0, %v124_v19 }
 0x140   :  { %v125_v21 = vadd.f32 %v137_v63, %v112_v20 }
 0x142   :  { %131 = vst.msk [vmem:[%s248_s3 + $0x28] sm:$0xff] %vm20_vm0, %v125_v21 }

// kernel: dino_semantic_segmentation.29
= control target key start
LH: loop header
LB: loop body
LE: loop exit
PB: predicated region body
PF: predicated region fallthrough
CT: control target
= control target key end

     0   :  { %s1120_s12 = smov 0   ;;  %s1264_s0 = inlined_call_operand.vmem [shape: f32[2,26,32], index: 0, kind: input, shape index: {}]   ;;  %s1265_s1 = inlined_call_operand.vmem [shape: bf16[9,32,64], index: 1, kind: input, shape index: {}]   ;;  %s1266_s2 = inlined_call_operand.vmem [shape: f32[1,64], index: 2, kind: input, shape index: {}]   ;;  %s1267_s3 = inlined_call_operand.vmem [shape: bf16[2,16,64], index: 3, kind: output, shape index: {}]  }
   0x1 LB: > { %s882_s13 = sadd.s32 4294967295, %s1096_s12   ;;  %p886_p0 = scmp.ge.s32.totalorder %s1096_s12, 1  ;;  %s1096_s12 = sphi %s1120_s12, %s13_s12  }
   0x2   : > { %p137_p1 = scmp.lt.s32.totalorder %s1096_s12, 3 }
   0x4   : > { %p138_p2 = pnand %p886_p0, %p137_p1 }
   0x5   : > { %p161_p3 = scmp.lt.s32.totalorder (!%p138_p2), %s882_s13, 1 }
   0x6   : > { %141 = sbr.rel (%p138_p2) target bundleno = 263 (0x107), region = 32 }
   0xb   : > { %v1072_v0 = vld [vmem:[%s1265_s1 + $0x38] sm:$0xff]   ;;  %v1098_v1 = vmov 0.0   ;;  %v1073_v2 = vld [vmem:[%s1265_s1 + $0x8] sm:$0xff]   ;;  %v1074_v3 = vld [vmem:[%s1265_s1 + $0x30] sm:$0xff]   ;;  %vm1099_vm0 = vmmov 0   ;;  %s1269_s13 = smov (!%p161_p3, %s882_s13), 1  ;;  %v172_v58 = vlaneseq }
   0xc   : > { %990 = vmatprep.subr.bf16.mxu0 %v1098_v1  ;;  %998 = vmatprep.subr.bf16.mxu1 %v1098_v1  ;;  %v1075_v4 = vld [vmem:[%s1265_s1] sm:$0xff]   ;;  %s959_s22 = sshll.u32 %s1269_s13, 5  ;;  %v1076_v5 = vld [vmem:[%s1265_s1 + $0x68] sm:$0xff]   ;;  %vm238_vm1 = vcmask 261120   ;;  %v1080_v20 = vld [vmem:[%s1265_s1 + $0x18] sm:$0xff]   ;;  %s960_s4 = sshll.u32 %s1269_s13, 3 }
   0xd   : > { %991 = vmatpush3.bf16.msra.mxu0 %v1072_v0  ;;  %994 = vmatprep.mubr.msk.bf16.mxu0 %vm1099_vm0, %v1098_v1  ;;  %s1154_s25 = scalar_lea.vmem %s1264_s0, %s959_s22  ;;  %v1077_v11 = vld [vmem:[%s1265_s1 + $0x48] sm:$0xff]   ;;  %v1078_v13 = vld [vmem:[%s1265_s1 + $0x60] sm:$0xff]   ;;  %v1081_v21 = vld [vmem:[%s1265_s1 + $0x78] sm:$0xff]   ;;  %v173_v63 = vshrl.u32 %v172_v58, 7  ;;  %s170_s7 = scalar_lea.vmem %s1267_s3, %s960_s4  ;;  %vm824_vm7 = vcmask 519168  }
   0xe   : > { %999 = vmatpush3.bf16.msra.mxu1 %v1073_v2  ;;  %992 = vmatprep.subr.bf16.mxu0 %v1098_v1  ;;  %v218_v6 = vld [vmem:[%s1154_s25 + $0x4] sm:$0xff]  ;;  %v219_v7 = vld [vmem:[%s1154_s25 + $0xc] sm:$0xff]  ;;  %v1084_v29 = vld [vmem:[%s1265_s1 + $0x58] sm:$0xff]  }
   0xf   : > { %1000 = vmatprep.subr.bf16.mxu1 %v1098_v1  ;;  %1002 = vmatprep.mubr.msk.bf16.mxu1 %vm1099_vm0, %v1098_v1  ;;  %v211_v8 = vld [vmem:[%s1154_s25] sm:$0xff]  ;;  %v220_v9 = vpack.c.bf16 %v219_v7, %v218_v6  ;;  %v212_v10 = vld [vmem:[%s1154_s25 + $0x8] sm:$0xff]  ;;  %v340_v15 = vld [vmem:[%s1154_s25 + $0x10] sm:$0xff]  ;;  %v179_v6 = vand.u32 3, %v173_v63 }
  0x10   : > { %v213_v12 = vpack.c.bf16 %v212_v10, %v211_v8  ;;  %v1079_v14 = vld [vmem:[%s1265_s1 + $0x40] sm:$0xff]   ;;  %v416_v17 = vld [vmem:[%s1154_s25 + $0xd] sm:$0xff]  ;;  %v341_v18 = vpack.c.bf16 %v340_v15, %v212_v10 }
  0x11   : > { %993 = vmatpush3.bf16.msra.mxu0 %v1074_v3  ;;  %v415_v16 = vld [vmem:[%s1154_s25 + $0x5] sm:$0xff]  ;;  %v1082_v22 = vld [vmem:[%s1265_s1 + $0x10] sm:$0xff]   ;;  %vm199_vm2 = vcmp.gt.s32.totalorder %v179_v6, 0  ;;  %vm205_vm3 = vcmp.lt.s32.totalorder %v179_v6, 3 }
  0x12   : > { %1001 = vmatpush3.bf16.msra.mxu1 %v1075_v4  ;;  %1006 = vmatprep.subr.bf16.mxu0 %v1098_v1  ;;  %v417_v19 = vpack.c.bf16 %v416_v17, %v415_v16  ;;  %v1083_v23 = vld [vmem:[%s1265_s1 + $0x70] sm:$0xff]   ;;  %v407_v24 = vld [vmem:[%s1154_s25 + $0x1] sm:$0xff]  ;;  %v174_v4 = vadd.s32 8, %v173_v63 }
  0x13   : > { %1014 = vmatprep.subr.bf16.mxu1 %v1098_v1  ;;  %v408_v25 = vld [vmem:[%s1154_s25 + $0x9] sm:$0xff]  ;;  %v536_v26 = vld [vmem:[%s1154_s25 + $0x11] sm:$0xff]  ;;  %v1087_v34 = vld [vmem:[%s1265_s1 + $0x20] sm:$0xff]  }
  0x14   : > { %995 = vmatmul.mubr.msk.bf16.vlgmr.msra.gmra.mxu0 %vm238_vm1, %v220_v9  ;;  %v409_v27 = vpack.c.bf16 %v408_v25, %v407_v24  ;;  %v537_v28 = vpack.c.bf16 %v536_v26, %v408_v25  ;;  %v1085_v30 = vld [vmem:[%s1265_s1 + $0x28] sm:$0xff]   ;;  %v1086_v31 = vld [vmem:[%s1265_s1 + $0x50] sm:$0xff]   ;;  %v1089_v40 = vld [vmem:[%s1265_s1 + $0x80] sm:$0xff]   ;;  %v186_v10 = vand.u32 3, %v174_v4  ;;  %v893_v25 = vsel %vm205_vm3, 1.0, %v1098_v1 }
  0x15   : > { %1003 = vmatmul.mubr.msk.bf16.vlgmr.msra.gmra.mxu1 %vm238_vm1, %v213_v12  ;;  %1007 = vmatpush3.bf16.msra.mxu0 %v1076_v5  ;;  %v611_v32 = vld [vmem:[%s1154_s25 + $0x6] sm:$0xff]  ;;  %v612_v33 = vld [vmem:[%s1154_s25 + $0xe] sm:$0xff] }
  0x16   : > { %1015 = vmatpush3.bf16.msra.mxu1 %v1077_v11  ;;  %1008 = vmatprep.subr.bf16.mxu0 %v1098_v1  ;;  %v603_v35 = vld [vmem:[%s1154_s25 + $0x2] sm:$0xff]  ;;  %v604_v36 = vld [vmem:[%s1154_s25 + $0xa] sm:$0xff]  ;;  %v613_v37 = vpack.c.bf16 %v612_v33, %v611_v32  ;;  %v732_v41 = vld [vmem:[%s1154_s25 + $0x12] sm:$0xff]  ;;  %vm200_vm4 = vcmp.gt.s32.totalorder %v186_v10, 0  ;;  %vm206_vm5 = vcmp.lt.s32.totalorder %v186_v10, 3 }
  0x17   : > { %1016 = vmatprep.subr.bf16.mxu1 %v1098_v1  ;;  %1010 = vmatprep.mubr.msk.bf16.mxu0 %vm1099_vm0, %v1098_v1  ;;  %v605_v38 = vpack.c.bf16 %v604_v36, %v603_v35  ;;  %v1088_v39 = vld [vmem:[%s1265_s1 + $0x88] sm:$0xff]   ;;  %v733_v42 = vpack.c.bf16 %v732_v41, %v604_v36  ;;  %v954_v36 = vld [vmem:[%s1266_s2] ss:$0 sm:$0xff] }
  0x18   : > { %1018 = vmatprep.mubr.msk.bf16.mxu1 %vm1099_vm0, %v1098_v1 }
  0x19   : > { %1009 = vmatpush3.bf16.msra.mxu0 %v1078_v13 }
  0x1a   : > { %1017 = vmatpush3.bf16.msra.mxu1 %v1079_v14  ;;  %1022 = vmatprep.subr.bf16.mxu0 %v1098_v1 }
  0x1b   : > { %1030 = vmatprep.subr.bf16.mxu1 %v1098_v1 }
  0x1c   : > { %1011 = vmatmul.mubr.msk.bf16.vlgmr.msra.gmra.mxu0 %vm238_vm1, %v341_v18  ;;  %v891_v18 = vsel %vm199_vm2, 1.0, %v1098_v1 }
  0x1d   : > { %1019 = vmatmul.mubr.msk.bf16.vlgmr.msra.gmra.mxu1 %vm238_vm1, %v417_v19  ;;  %1023 = vmatpush3.bf16.msra.mxu0 %v1080_v20 }
  0x1e   : > { %1031 = vmatpush3.bf16.msra.mxu1 %v1081_v21  ;;  %1024 = vmatprep.subr.bf16.mxu0 %v1098_v1 }
  0x1f   : > { %1032 = vmatprep.subr.bf16.mxu1 %v1098_v1  ;;  %1026 = vmatprep.mubr.msk.bf16.mxu0 %vm1099_vm0, %v1098_v1 }
  0x20   : > { %1034 = vmatprep.mubr.msk.bf16.mxu1 %vm1099_vm0, %v1098_v1 }
  0x21   : > { %1025 = vmatpush3.bf16.msra.mxu0 %v1082_v22 }
  0x22   : > { %1033 = vmatpush3.bf16.msra.mxu1 %v1083_v23  ;;  %1038 = vmatprep.subr.bf16.mxu0 %v1098_v1 }
  0x23   : > { %1046 = vmatprep.subr.bf16.mxu1 %v1098_v1 }
  0x24   : > { %1027 = vmatmul.mubr.msk.bf16.vlgmr.msra.gmra.mxu0 %vm238_vm1, %v409_v27 }
  0x25   : > { %1035 = vmatmul.mubr.msk.bf16.vlgmr.msra.gmra.mxu1 %vm238_vm1, %v537_v28  ;;  %1039 = vmatpush3.bf16.msra.mxu0 %v1084_v29 }
  0x26   : > { %1047 = vmatpush3.bf16.msra.mxu1 %v1085_v30  ;;  %1040 = vmatprep.subr.bf16.mxu0 %v1098_v1  ;;  %v892_v30 = vsel %vm200_vm4, 1.0, %v1098_v1 }
  0x27   : > { %1048 = vmatprep.subr.bf16.mxu1 %v1098_v1  ;;  %1042 = vmatprep.mubr.msk.bf16.mxu0 %vm1099_vm0, %v1098_v1 }
  0x28   : > { %1050 = vmatprep.mubr.msk.bf16.mxu1 %vm1099_vm0, %v1098_v1 }
  0x29   : > { %1041 = vmatpush3.bf16.msra.mxu0 %v1086_v31 }
  0x2a   : > { %1049 = vmatpush3.bf16.msra.mxu1 %v1087_v34  ;;  %1054 = vmatprep.subr.bf16.mxu0 %v1098_v1 }
  0x2c   : > { %1043 = vmatmul.mubr.msk.bf16.vlgmr.msra.gmra.mxu0 %vm238_vm1, %v613_v37  ;;  %v894_v37 = vsel %vm206_vm5, 1.0, %v1098_v1 }
  0x2d   : > { %1051 = vmatmul.mubr.msk.bf16.vlgmr.msra.gmra.mxu1 %vm238_vm1, %v605_v38  ;;  %1055 = vmatpush3.bf16.msra.mxu0 %v1088_v39 }
  0x2e   : > { %1056 = vmatprep.subr.bf16.mxu0 %v1098_v1  ;;  %1058 = vmatprep.mubr.msk.bf16.mxu0 %vm1099_vm0, %v1098_v1 }
  0x31   : > { %1057 = vmatpush3.bf16.msra.mxu0 %v1089_v40 }
  0x34   : > { %1059 = vmatmul.mubr.msk.bf16.vlgmr.msra.gmra.mxu0 %vm238_vm1, %v733_v42 }
  0xd4   : > { %v276_v43 = vpop.f32.mrf.mxu0 }
  0xd5   : > { %v332_v44 = vpop.f32.mrf.mxu1 }
  0xd6   : > { %v996_v45 = vpop.f32.mrf.mxu0  ;;  %v333_v12 = vadd.f32 %v332_v44, %v276_v43 }
  0xd7   : > { %v1004_v46 = vpop.f32.mrf.mxu1 }
  0xd8   : > { %v279_v47 = vpop.f32.mrf.mxu0 }
  0xd9   : > { %v335_v48 = vpop.f32.mrf.mxu1 }
  0xda   : > { %v997_v49 = vpop.f32.mrf.mxu0  ;;  %v336_v20 = vadd.f32 %v335_v48, %v279_v47 }
  0xdb   : > { %v1005_v50 = vpop.f32.mrf.mxu1 }
  0xdc   : > { %v396_v51 = vpop.f32.mrf.mxu0 }
  0xdd   : > { %v472_v52 = vpop.f32.mrf.mxu1  ;;  %v403_v16 = vadd.f32 %v396_v51, %v333_v12 }
  0xde   : > { %v1012_v53 = vpop.f32.mrf.mxu0 }
  0xdf   : > { %v1020_v54 = vpop.f32.mrf.mxu1  ;;  %v405_v27 = vmul.f32 %v891_v18, %v403_v16 }
  0xe0   : > { %v399_v55 = vpop.f32.mrf.mxu0 }
  0xe1   : > { %v475_v56 = vpop.f32.mrf.mxu1  ;;  %v404_v28 = vadd.f32 %v399_v55, %v336_v20 }
  0xe2   : > { %v1013_v57 = vpop.f32.mrf.mxu0 }
  0xe3   : > { %v1021_v59 = vpop.f32.mrf.mxu1  ;;  %v406_v39 = vmul.f32 %v892_v30, %v404_v28 }
  0xe4   : > { %v528_v60 = vpop.f32.mrf.mxu0 }
  0xe5   : > { %v592_v61 = vpop.f32.mrf.mxu1  ;;  %v529_v13 = vadd.f32 %v528_v60, %v472_v52 }
  0xe6   : > { %v1028_v62 = vpop.f32.mrf.mxu0 }
  0xe7   : > { %v1036_v0 = vpop.f32.mrf.mxu1  ;;  %v599_v21 = vadd.f32 %v592_v61, %v529_v13 }
  0xe8   : > { %v531_v2 = vpop.f32.mrf.mxu0 }
  0xe9   : > { %v595_v3 = vpop.f32.mrf.mxu1  ;;  %v532_v22 = vadd.f32 %v531_v2, %v475_v56  ;;  %v601_v32 = vadd.f32 %v599_v21, %v405_v27 }
  0xea   : > { %v1029_v5 = vpop.f32.mrf.mxu0 }
  0xeb   : > { %v1037_v7 = vpop.f32.mrf.mxu1  ;;  %v600_v33 = vadd.f32 %v595_v3, %v532_v22 }
  0xec   : > { %v668_v8 = vpop.f32.mrf.mxu0 }
  0xed   : > { %v724_v9 = vpop.f32.mrf.mxu1  ;;  %v602_v43 = vadd.f32 %v600_v33, %v406_v39 }
  0xee   : > { %v1044_v11 = vpop.f32.mrf.mxu0  ;;  %v725_v23 = vadd.f32 %v724_v9, %v668_v8 }
  0xef   : > { %v1052_v14 = vpop.f32.mrf.mxu1 }
  0xf0   : > { %v671_v15 = vpop.f32.mrf.mxu0 }
  0xf1   : > { %v727_v17 = vpop.f32.mrf.mxu1 }
  0xf2   : > { %v1045_v19 = vpop.f32.mrf.mxu0  ;;  %v728_v34 = vadd.f32 %v727_v17, %v671_v15 }
  0xf3   : > { %v1053_v24 = vpop.f32.mrf.mxu1 }
  0xf4   : > { %v788_v26 = vpop.f32.mrf.mxu0 }
  0xf5   : > { %v795_v29 = vadd.f32 %v788_v26, %v725_v23 }
  0xf6   : > { %v1060_v31 = vpop.f32.mrf.mxu0 }
  0xf7   : > { %v797_v35 = vmul.f32 %v893_v25, %v795_v29 }
  0xf8   : > { %v791_v38 = vpop.f32.mrf.mxu0 }
  0xf9   : > { %v799_v40 = vadd.f32 %v797_v35, %v601_v32  ;;  %v796_v41 = vadd.f32 %v791_v38, %v728_v34 }
  0xfa   : > { %v1061_v42 = vpop.f32.mrf.mxu0 }
  0xfb   : > { %v808_v44 = vadd.f32 %v954_v36, %v799_v40  ;;  %v798_v45 = vmul.f32 %v894_v37, %v796_v41 }
  0xfd   : > { %vm810_vm6 = vcmp.gt.f32.partialorder %v808_v44, 0.0  ;;  %v812_v46 = vmul.f32 0.01, %v808_v44  ;;  %v800_v47 = vadd.f32 %v798_v45, %v602_v43 }
  0xff   : > { %v814_v48 = vsel %vm810_vm6, %v808_v44, %v812_v46  ;;  %v809_v49 = vadd.f32 %v954_v36, %v800_v47 }
 0x100   : > { %v961_v1 = vpack.c.bf16 %v814_v48, %v814_v48 }
 0x101   : > { %vm811_vm8 = vcmp.gt.f32.partialorder %v809_v49, 0.0  ;;  %v813_v50 = vmul.f32 0.01, %v809_v49 }
 0x102   : > { %825 = vst.msk [vmem:[%s170_s7] sm:$0xf] %vm824_vm7, %v961_v1 }
 0x103   : > { %v815_v51 = vsel %vm811_vm8, %v809_v49, %v813_v50 }
 0x104   : > { %v962_v52 = vpack.c.bf16 %v815_v51, %v815_v51 }
 0x106   : > { %826 = vst.msk [vmem:[%s170_s7 + $0x4] sm:$0xf] %vm824_vm7, %v962_v52 }
 0x107 PF: > { %s13_s12 = sadd.s32 1, %s1096_s12  }
 0x108   : > { %p10_p4 = scmp.ge.s32.totalorder %s13_s12, 4  }
 0x10a   :  { %12 = sbr.rel (!%p10_p4) target bundleno = 1 (0x1), region = 70 }

// kernel: dino_semantic_segmentation.30
= control target key start
LH: loop header
LB: loop body
LE: loop exit
PB: predicated region body
PF: predicated region fallthrough
CT: control target
= control target key end

     0   :  { %s2299_s12 = smov 0   ;;  %s2879_s0 = inlined_call_operand.vmem [shape: bf16[2,82,64], index: 0, kind: input, shape index: {}]   ;;  %s2880_s1 = inlined_call_operand.vmem [shape: bf16[9,64,32], index: 1, kind: input, shape index: {}]   ;;  %s2881_s2 = inlined_call_operand.vmem [shape: f32[1,32], index: 2, kind: input, shape index: {}]   ;;  %s2882_s3 = inlined_call_operand.vmem [shape: bf16[2,64,32], index: 3, kind: output, shape index: {}]  }
   0x1 LB: > { %s1766_s13 = sadd.s32 4294967295, %s2276_s12   ;;  %p1770_p0 = scmp.ge.s32.totalorder %s2276_s12, 1  ;;  %s2276_s12 = sphi %s2299_s12, %s13_s12  }
   0x2   : > { %p137_p1 = scmp.lt.s32.totalorder %s2276_s12, 3 }
   0x4   : > { %p138_p2 = pnand %p1770_p0, %p137_p1 }
   0x6   : > { %141 = sbr.rel (%p138_p2) target bundleno = 311 (0x137), region = 32 }
   0xb   : > { %v2207_v0 = vld [vmem:[%s2880_s1 + $0x78] sm:$0xff]   ;;  %p161_p3 = scmp.lt.s32.totalorder %s1766_s13, 1  ;;  %v2209_v2 = vld [vmem:[%s2880_s1 + $0x70] sm:$0xff]   ;;  %v2211_v4 = vld [vmem:[%s2880_s1 + $0x68] sm:$0xff]   ;;  %vm395_vm0 = vcmask 523264   ;;  %vm1260_vm2 = vcmask 1046528  }
   0xc   : > { %v2208_v1 = vld [vmem:[%s2880_s1 + $0x18] sm:$0xff]   ;;  %2045 = vmatprep.subr.bf16.mxu0 %v2207_v0  ;;  %v2210_v3 = vld [vmem:[%s2880_s1 + $0x10] sm:$0xff]   ;;  %v2212_v5 = vld [vmem:[%s2880_s1 + $0x8] sm:$0xff]   ;;  %vm765_vm1 = vsmask.f32 7424 }
   0xd   : > { %s2912_s13 = smov (!%p161_p3, %s1766_s13), 1  ;;  %2061 = vmatprep.subr.bf16.mxu1 %v2208_v1  ;;  %2046 = vmatpush3.bf16.msra.mxu0 %v2207_v0  ;;  %v2213_v6 = vld [vmem:[%s2880_s1 + $0x60] sm:$0xff]   ;;  %v2220_v17 = vld [vmem:[%s2880_s1 + $0xd8] sm:$0xff]   ;;  %v2222_v23 = vld [vmem:[%s2880_s1 + $0xd0] sm:$0xff]  }
   0xe   : > { %2062 = vmatpush3.bf16.msra.mxu1 %v2208_v1  ;;  %2047 = vmatprep.subr.bf16.mxu0 %v2209_v2  ;;  %s2197_s24 = smul.u32 44, %s2912_s13  ;;  %v2214_v9 = vld [vmem:[%s2880_s1] sm:$0xff]   ;;  %v2221_v18 = vld [vmem:[%s2880_s1 + $0x98] sm:$0xff]   ;;  %v2223_v24 = vld [vmem:[%s2880_s1 + $0x90] sm:$0xff]   ;;  %s1964_s18 = sshll.u32 %s2912_s13, 5 }
   0xf   : > { %2063 = vmatprep.subr.bf16.mxu1 %v2210_v3  ;;  %v2228_v30 = vld [vmem:[%s2880_s1 + $0xc8] sm:$0xff]   ;;  %v2230_v46 = vld [vmem:[%s2880_s1 + $0xc0] sm:$0xff]   ;;  %v2237_v56 = vld [vmem:[%s2880_s1 + $0x38] sm:$0xff]   ;;  %s2850_s13 = scalar_lea.vmem %s2882_s3, %s1964_s18 }
  0x10   : > { %s2331_s29 = scalar_lea.vmem %s2879_s0, %s2197_s24  ;;  %v2229_v37 = vld [vmem:[%s2880_s1 + $0x88] sm:$0xff]   ;;  %v2231_v52 = vld [vmem:[%s2880_s1 + $0x80] sm:$0xff]   ;;  %v2238_v58 = vld [vmem:[%s2880_s1 + $0xf8] sm:$0xff]  }
  0x11   : > { %2048 = vmatpush3.bf16.msra.mxu0 %v2209_v2  ;;  %v2337_v7 = vld [vmem:[%s2331_s29 + $0x4] sm:$0xf]  ;;  %v327_v8 = vld [vmem:[%s2331_s29 + $0x8] sm:$0xf]  ;;  %v734_v11 = vld [vmem:[%s2331_s29] sm:$0xf] }
  0x12   : > { %2064 = vmatpush3.bf16.msra.mxu1 %v2210_v3  ;;  %2049 = vmatprep.subr.bf16.mxu0 %v2211_v4  ;;  %v1798_v10 = vcombine.low %v2337_v7, %v327_v8  ;;  %v325_v12 = vld [vmem:[%s2331_s29] sm:$0xf]  ;;  %v328_v13 = vld [vmem:[%s2331_s29 + $0xc] sm:$0xf]  ;;  %v329_v15 = vld [vmem:[%s2331_s29 + $0x10] sm:$0xf]  ;;  %v2351_v16 = vcombine.low %v734_v11, %v2337_v7 }
  0x13   : > { %2065 = vmatprep.subr.bf16.mxu1 %v2212_v5  ;;  %v1810_v14 = vcombine.low %v325_v12, %v2337_v7  ;;  %v1799_v19 = vcombine.low %v328_v13, %v329_v15  ;;  %v330_v20 = vld [vmem:[%s2331_s29 + $0x14] sm:$0xf]  ;;  %v331_v21 = vld [vmem:[%s2331_s29 + $0x18] sm:$0xf]  ;;  %v2362_v22 = vcombine.low %v327_v8, %v328_v13  ;;  %v332_v27 = vld [vmem:[%s2331_s29 + $0x1c] sm:$0xf] }
  0x14   : > { %2053 = vmatprep.mubr.msk.bf16.mxu0 %vm395_vm0, %v1798_v10  ;;  %v912_v25 = vshll.u32 %v2351_v16, 16  ;;  %v1800_v26 = vcombine.low %v330_v20, %v331_v21  ;;  %v2373_v28 = vcombine.low %v329_v15, %v330_v20  ;;  %v341_v29 = vld [vmem:[%s2331_s29 + $0x20] sm:$0xf]  ;;  %v2382_v31 = vld [vmem:[%s2331_s29 + $0x8] sm:$0xf]  ;;  %v910_v43 = vshrl.u32 %v2351_v16, 16 }
  0x15   : > { %2050 = vmatpush3.bf16.msra.mxu0 %v2211_v4  ;;  %2069 = vmatprep.mubr.msk.bf16.mxu1 %vm395_vm0, %v1810_v14  ;;  %v581_v32 = vld [vmem:[%s2331_s29 + $0xc] sm:$0xf]  ;;  %v2386_v33 = vld [vmem:[%s2331_s29 + $0x10] sm:$0xf]  ;;  %v2389_v34 = vld [vmem:[%s2331_s29 + $0x14] sm:$0xf]  ;;  %v1801_v41 = vcombine.low %v332_v27, %v341_v29  ;;  %v2413_v45 = vcombine.low %v331_v21, %v332_v27 }
  0x16   : > { %2066 = vmatpush3.bf16.msra.mxu1 %v2212_v5  ;;  %2051 = vmatprep.subr.bf16.mxu0 %v2213_v6  ;;  %v2392_v35 = vld [vmem:[%s2331_s29 + $0x18] sm:$0xf]  ;;  %v920_v36 = vshrl.u32 %v2362_v22, 16  ;;  %v2400_v38 = vcombine.low %v581_v32, %v2386_v33  ;;  %v745_v40 = vld [vmem:[%s2331_s29 + $0x4] sm:$0xf]  ;;  %v2411_v44 = vrot.slane %v912_v25, 1  ;;  %v1830_v53 = vcombine.low %v2382_v31, %v581_v32 }
  0x17   : > { %2067 = vmatprep.subr.bf16.mxu1 %v2214_v9  ;;  %v2404_v39 = vcombine.low %v2389_v34, %v2392_v35  ;;  %v1858_v42 = vcombine.low %v745_v40, %v2382_v31  ;;  %v585_v57 = vld [vmem:[%s2331_s29 + $0x1c] sm:$0xf]  ;;  %v2436_v59 = vld [vmem:[%s2331_s29 + $0x20] sm:$0xf]  ;;  %v1831_v2 = vcombine.low %v2386_v33, %v2389_v34  ;;  %v2239_v4 = vld [vmem:[%s2880_s1 + $0x30] sm:$0xff]   ;;  %v923_v10 = vshll.u32 %v2373_v28, 16 }
  0x18   : > { %v774_v47 = vshll.u32 %v2400_v38, 16  ;;  %v778_v48 = vshrl.u32 %v2400_v38, 16  ;;  %v2440_v0 = vcombine.low %v585_v57, %v2436_v59  ;;  %v2443_v1 = vld [vmem:[%s2331_s29 + $0x24] ss:$0 sps:$4 sm:$0x11]   ;;  %v2240_v8 = vld [vmem:[%s2880_s1 + $0xf0] sm:$0xff]   ;;  %v915_v40 = vor.u32 %v2411_v44, %v910_v43 }
  0x19   : > { %2052 = vmatpush3.bf16.msra.mxu0 %v2213_v6  ;;  %v782_v49 = vshll.u32 %v2404_v39, 16  ;;  %v767_v50 = vshrl.u32 %v1858_v42, 16  ;;  %v769_v51 = vshll.u32 %v1858_v42, 16  ;;  %v786_v60 = vshrl.u32 %v2404_v39, 16  ;;  %v2463_v15 = vld [vmem:[%s2331_s29 + $0x10] sm:$0xff]   ;;  %v2480_v32 = vld [vmem:[%s2331_s29 + $0x18] sm:$0xff]  }
  0x1a   : > { %2068 = vmatpush3.bf16.msra.mxu1 %v2214_v9  ;;  %2077 = vmatprep.subr.bf16.mxu0 %v2220_v17  ;;  %v776_v54 = vrot.slane %v774_v47, 1  ;;  %v790_v5 = vshll.u32 %v2440_v0, 16  ;;  %v916_v6 = vshll.u32 %v2362_v22, 16  ;;  %v794_v13 = vshrl.u32 %v2440_v0, 16  ;;  %v587_v20 = vld [vmem:[%s2331_s29 + $0x24] sm:$0xf] }
  0x1b   : > { %2093 = vmatprep.subr.bf16.mxu1 %v2221_v18  ;;  %v771_v55 = vrot.slane %v769_v51, 1  ;;  %v784_v63 = vrot.slane %v782_v49, 1  ;;  %v798_v14 = vshll.u32 %v2443_v1, 16  ;;  %v1092_v25 = vshll.u32 %v2463_v15, 16  ;;  %v2246_v33 = vld [vmem:[%s2880_s1 + $0xe8] sm:$0xff]   ;;  %v2248_v42 = vld [vmem:[%s2880_s1 + $0xe0] sm:$0xff]  }
  0x1c   : > { %2054 = vmatmul.mubr.msk.bf16.vlgmr.msra.gmra.mxu0 %vm395_vm0, %v1799_v19  ;;  %v780_v62 = vor.u32 %v778_v48, %v776_v54  ;;  %v792_v12 = vrot.slane %v790_v5, 1  ;;  %v2468_v19 = vld [vmem:[%s2331_s29 + $0xc] sm:$0xf]  ;;  %v918_v34 = vrot.slane %v916_v6, 1  ;;  %v1096_v47 = vshrl.u32 %v2463_v15, 16  ;;  %v2501_v16 = vld [vmem:[%s2331_s29 + $0x20] sm:$0xff]  }
  0x1d   : > { %2070 = vmatmul.mubr.msk.bf16.vlgmr.msra.gmra.mxu1 %vm395_vm0, %v2362_v22  ;;  %2078 = vmatpush3.bf16.msra.mxu0 %v2220_v17  ;;  %v772_v61 = vor.u32 %v771_v55, %v767_v50  ;;  %v788_v9 = vor.u32 %v786_v60, %v784_v63  ;;  %v1832_v17 = vcombine.low %v2392_v35, %v585_v57  ;;  %v800_v27 = vrot.slane %v798_v14, 1  ;;  %v2505_v44 = vld [vmem:[%s2331_s29 + $0x20] ss:$0 sps:$4 sm:$0x11]   ;;  %v2255_v14 = vld [vmem:[%s2880_s1 + $0x50] sm:$0xff]  }
  0x1e   : > { %2094 = vmatpush3.bf16.msra.mxu1 %v2221_v18  ;;  %2079 = vmatprep.subr.bf16.mxu0 %v2222_v23  ;;  %v785_v11 = vsel %vm765_vm1, %v780_v62, %v784_v63  ;;  %v1043_v18 = vld [vmem:[%s2331_s29 + $0x8] sm:$0xf]  ;;  %v1833_v35 = vcombine.low %v2436_v59, %v587_v20  ;;  %v1100_v50 = vshll.u32 %v2480_v32, 16  ;;  %v930_v43 = vshll.u32 %v2413_v45, 16 }
  0x1f   : > { %2095 = vmatprep.subr.bf16.mxu1 %v2223_v24  ;;  %2057 = vmatprep.mubr.msk.bf16.mxu0 %vm395_vm0, %v1800_v26  ;;  %v777_v3 = vsel %vm765_vm1, %v772_v61, %v776_v54  ;;  %v1889_v21 = vcombine.low %v1043_v18, %v2468_v19  ;;  %v796_v26 = vor.u32 %v794_v13, %v792_v12  ;;  %v925_v55 = vrot.slane %v923_v10, 1  ;;  %v2253_v61 = vld [vmem:[%s2880_s1 + $0x58] sm:$0xff]   ;;  %v2254_v10 = vld [vmem:[%s2880_s1 + $0xb0] sm:$0xff]   ;;  %v1237_v13 = vld [vmem:[%s2331_s29] sm:$0xe] }
  0x20   : > { %2073 = vmatprep.mubr.msk.bf16.mxu1 %vm395_vm0, %v2373_v28  ;;  %v919_v51 = vsel %vm765_vm1, %v915_v40, %v918_v34  ;;  %v1108_v57 = vshll.u32 %v2501_v16, 16  ;;  %v1102_v60 = vrot.slane %v1100_v50, 1  ;;  %v932_v62 = vrot.slane %v930_v43, 1  ;;  %v2266_v50 = vld [vmem:[%s2880_s1 + $0x110] sm:$0xff]  }
  0x21   : > { %2080 = vmatpush3.bf16.msra.mxu0 %v2222_v23  ;;  %v793_v23 = vsel %vm765_vm1, %v788_v9, %v792_v12  ;;  %v1085_v29 = vshrl.u32 %v1889_v21, 16  ;;  %v801_v48 = vsel %vm765_vm1, %v796_v26, %v800_v27  ;;  %v934_v63 = vshrl.u32 %v2413_v45, 16  ;;  %v2259_v27 = vld [vmem:[%s2880_s1 + $0xa8] sm:$0xff]  }
  0x22   : > { %2096 = vmatpush3.bf16.msra.mxu1 %v2223_v24  ;;  %2081 = vmatprep.subr.bf16.mxu0 %v2228_v30  ;;  %v2245_v24 = vld [vmem:[%s2880_s1 + $0x28] sm:$0xff]   ;;  %v1110_v5 = vrot.slane %v1108_v57, 1  ;;  %v938_v6 = vshll.u32 %v2505_v44, 16  ;;  %v2268_v57 = vld [vmem:[%s2880_s1 + $0x100] sm:$0xff]  }
  0x23   : > { %2097 = vmatprep.subr.bf16.mxu1 %v2229_v37 }
  0x24   : > { %2058 = vmatmul.mubr.msk.bf16.gmra.mxu0 %vm395_vm0, %v1801_v41 }
  0x25   : > { %2074 = vmatmul.mubr.msk.bf16.gmra.mxu1 %vm395_vm0, %v2413_v45  ;;  %2082 = vmatpush3.bf16.msra.mxu0 %v2228_v30  ;;  %v1087_v30 = vshll.u32 %v1889_v21, 16  ;;  %v936_v21 = vor.u32 %v934_v63, %v932_v62 }
  0x26   : > { %2098 = vmatpush3.bf16.msra.mxu1 %v2229_v37  ;;  %2083 = vmatprep.subr.bf16.mxu0 %v2230_v46  ;;  %v2247_v37 = vld [vmem:[%s2880_s1 + $0x20] sm:$0xff]  }
  0x27   : > { %2099 = vmatprep.subr.bf16.mxu1 %v2231_v52  ;;  %2085 = vmatprep.mubr.msk.bf16.mxu0 %vm395_vm0, %v1830_v53  ;;  %v1089_v41 = vrot.slane %v1087_v30, 1  ;;  %v927_v53 = vshrl.u32 %v2373_v28, 16 }
  0x28   : > { %2101 = vmatprep.mubr.msk.bf16.mxu1 %vm395_vm0, %v777_v3 }
  0x29   : > { %2084 = vmatpush3.bf16.msra.mxu0 %v2230_v46  ;;  %v1094_v46 = vrot.slane %v1092_v25, 1  ;;  %v1090_v49 = vor.u32 %v1089_v41, %v1085_v29  ;;  %v1264_v41 = vrot.slane %v2404_v39, 1  ;;  %v1379_v39 = vrot.slane %v2413_v45, 1 }
  0x2a   : > { %2100 = vmatpush3.bf16.msra.mxu1 %v2231_v52  ;;  %2109 = vmatprep.subr.bf16.mxu0 %v2237_v56  ;;  %v922_v52 = vor.u32 %v920_v36, %v918_v34  ;;  %v2252_v36 = vld [vmem:[%s2880_s1 + $0xb8] sm:$0xff]   ;;  %v1375_v34 = vrot.slane %v2362_v22, 1 }
  0x2b   : > { %2125 = vmatprep.subr.bf16.mxu1 %v2238_v58  ;;  %v1095_v54 = vsel %vm765_vm1, %v1090_v49, %v1094_v46  ;;  %v1098_v59 = vor.u32 %v1096_v47, %v1094_v46  ;;  %v2265_v46 = vld [vmem:[%s2880_s1 + $0x118] sm:$0xff]   ;;  %v1266_v47 = vrot.slane %v2440_v0, 1  ;;  %v1484_v49 = vld [vmem:[%s2331_s29 + $0x8] sm:$0xe] }
  0x2c   : > { %2086 = vmatmul.mubr.msk.bf16.vlgmr.msra.gmra.mxu0 %vm395_vm0, %v1831_v2  ;;  %v929_v2 = vor.u32 %v927_v53, %v925_v55  ;;  %v926_v3 = vsel %vm765_vm1, %v922_v52, %v925_v55  ;;  %v1944_v0 = vcombine.low %v1484_v49, %v2468_v19  ;;  %v1381_v52 = vrot.slane %v2505_v44, 1  ;;  %v2267_v53 = vld [vmem:[%s2880_s1 + $0x108] sm:$0xff]  }
  0x2d   : > { %2102 = vmatmul.mubr.msk.bf16.vlgmr.msra.gmra.mxu1 %vm395_vm0, %v785_v11  ;;  %2110 = vmatpush3.bf16.msra.mxu0 %v2237_v56  ;;  %v1104_v56 = vshrl.u32 %v2480_v32, 16  ;;  %v1103_v9 = vsel %vm765_vm1, %v1098_v59, %v1102_v60  ;;  %v1112_v11 = vshrl.u32 %v2501_v16, 16  ;;  %v1267_v43 = vsel %vm1260_vm2, %v1264_v41, %v1266_v47 }
  0x2e   : > { %2126 = vmatpush3.bf16.msra.mxu1 %v2238_v58  ;;  %2111 = vmatprep.subr.bf16.mxu0 %v2239_v4  ;;  %v2517_v58 = vld [vmem:[%s2331_s29 + $0x28] ss:$0 sps:$4 sm:$0x11]   ;;  %v1497_v19 = vrot.slane %v1944_v0, 1  ;;  %v1382_v44 = vsel %vm1260_vm2, %v1379_v39, %v1381_v52 }
  0x2f   : > { %2127 = vmatprep.subr.bf16.mxu1 %v2240_v8  ;;  %2089 = vmatprep.mubr.msk.bf16.mxu0 %vm395_vm0, %v1832_v17  ;;  %v1116_v12 = vshll.u32 %v2517_v58, 16  ;;  %v933_v17 = vsel %vm765_vm1, %v929_v2, %v932_v62  ;;  %v1114_v25 = vor.u32 %v1112_v11, %v1110_v5 }
  0x30   : > { %2105 = vmatprep.mubr.msk.bf16.mxu1 %vm395_vm0, %v793_v23  ;;  %v940_v23 = vrot.slane %v938_v6, 1 }
  0x31   : > { %2112 = vmatpush3.bf16.msra.mxu0 %v2239_v4  ;;  %v1106_v4 = vor.u32 %v1104_v56, %v1102_v60  ;;  %v1118_v26 = vrot.slane %v1116_v12, 1  ;;  %v1502_v56 = vrot.slane %v2501_v16, 1  ;;  %v1504_v16 = vrot.slane %v2517_v58, 1 }
  0x32   : > { %2128 = vmatpush3.bf16.msra.mxu1 %v2240_v8  ;;  %2113 = vmatprep.subr.bf16.mxu0 %v2245_v24  ;;  %v1247_v8 = vld [vmem:[%s2331_s29 + $0x4] sm:$0xe]  ;;  %v941_v30 = vsel %vm765_vm1, %v936_v21, %v940_v23 }
  0x33   : > { %2129 = vmatprep.subr.bf16.mxu1 %v2246_v33  ;;  %v1918_v18 = vcombine.low %v1247_v8, %v2382_v31  ;;  %v1111_v20 = vsel %vm765_vm1, %v1106_v4, %v1110_v5  ;;  %v2260_v31 = vld [vmem:[%s2880_s1 + $0x48] sm:$0xff]   ;;  %v1505_v60 = vsel %vm1260_vm2, %v1502_v56, %v1504_v16 }
  0x34   : > { %2090 = vmatmul.mubr.msk.bf16.gmra.mxu0 %vm395_vm0, %v1833_v35  ;;  %v1119_v35 = vsel %vm765_vm1, %v1114_v25, %v1118_v26 }
  0x35   : > { %2106 = vmatmul.mubr.msk.bf16.gmra.mxu1 %vm395_vm0, %v801_v48  ;;  %2114 = vmatpush3.bf16.msra.mxu0 %v2245_v24  ;;  %v1927_v24 = vcombine.low %v1237_v13, %v2337_v7  ;;  %v1261_v29 = vrot.slane %v1918_v18, 1  ;;  %v1262_v7 = vrot.slane %v2400_v38, 1  ;;  %v2262_v38 = vld [vmem:[%s2880_s1 + $0x40] sm:$0xff]  }
  0x36   : > { %2130 = vmatpush3.bf16.msra.mxu1 %v2246_v33  ;;  %2115 = vmatprep.subr.bf16.mxu0 %v2247_v37 }
  0x37   : > { %2131 = vmatprep.subr.bf16.mxu1 %v2248_v42  ;;  %2117 = vmatprep.mubr.msk.bf16.mxu0 %vm395_vm0, %v919_v51  ;;  %v1374_v33 = vrot.slane %v1927_v24, 1  ;;  %v1263_v40 = vsel %vm1260_vm2, %v1261_v29, %v1262_v7  ;;  %v1265_v48 = vsel %vm1260_vm2, %v1262_v7, %v1264_v41  ;;  %v1268_v51 = vrot.slane %v2443_v1, 1 }
  0x38   : > { %2133 = vmatprep.mubr.msk.bf16.mxu1 %vm395_vm0, %v1095_v54  ;;  %v1498_v54 = vrot.slane %v2463_v15, 1  ;;  %v1500_v1 = vrot.slane %v2480_v32, 1  ;;  %v172_v7 = vlaneseq }
  0x39   : > { %2116 = vmatpush3.bf16.msra.mxu0 %v2247_v37  ;;  %v2261_v37 = vld [vmem:[%s2880_s1 + $0xa0] sm:$0xff]   ;;  %v1376_v22 = vsel %vm1260_vm2, %v1374_v33, %v1375_v34  ;;  %v1269_v55 = vsel %vm1260_vm2, %v1266_v47, %v1268_v51 }
  0x3a   : > { %2132 = vmatpush3.bf16.msra.mxu1 %v2248_v42  ;;  %2141 = vmatprep.subr.bf16.mxu0 %v2252_v36  ;;  %v1377_v42 = vrot.slane %v2373_v28, 1  ;;  %v1499_v15 = vsel %vm1260_vm2, %v1497_v19, %v1498_v54  ;;  %v1503_v32 = vsel %vm1260_vm2, %v1500_v1, %v1502_v56  ;;  %v1501_v59 = vsel %vm1260_vm2, %v1498_v54, %v1500_v1 }
  0x3b   : > { %2157 = vmatprep.subr.bf16.mxu1 %v2253_v61 }
  0x3c   : > { %2118 = vmatmul.mubr.msk.bf16.vlgmr.msra.gmra.mxu0 %vm395_vm0, %v926_v3  ;;  %v1378_v28 = vsel %vm1260_vm2, %v1375_v34, %v1377_v42  ;;  %v1380_v45 = vsel %vm1260_vm2, %v1377_v42, %v1379_v39 }
  0x3d   : > { %2134 = vmatmul.mubr.msk.bf16.vlgmr.msra.gmra.mxu1 %vm395_vm0, %v1103_v9  ;;  %2142 = vmatpush3.bf16.msra.mxu0 %v2252_v36 }
  0x3e   : > { %2158 = vmatpush3.bf16.msra.mxu1 %v2253_v61  ;;  %2143 = vmatprep.subr.bf16.mxu0 %v2254_v10 }
  0x3f   : > { %2159 = vmatprep.subr.bf16.mxu1 %v2255_v14  ;;  %2121 = vmatprep.mubr.msk.bf16.mxu0 %vm395_vm0, %v933_v17 }
  0x40   : > { %2137 = vmatprep.mubr.msk.bf16.mxu1 %vm395_vm0, %v1111_v20 }
  0x41   : > { %2144 = vmatpush3.bf16.msra.mxu0 %v2254_v10 }
  0x42   : > { %2160 = vmatpush3.bf16.msra.mxu1 %v2255_v14  ;;  %2145 = vmatprep.subr.bf16.mxu0 %v2259_v27 }
  0x43   : > { %2161 = vmatprep.subr.bf16.mxu1 %v2260_v31 }
  0x44   : > { %2122 = vmatmul.mubr.msk.bf16.gmra.mxu0 %vm395_vm0, %v941_v30 }
  0x45   : > { %2138 = vmatmul.mubr.msk.bf16.gmra.mxu1 %vm395_vm0, %v1119_v35  ;;  %2146 = vmatpush3.bf16.msra.mxu0 %v2259_v27 }
  0x46   : > { %2162 = vmatpush3.bf16.msra.mxu1 %v2260_v31  ;;  %2147 = vmatprep.subr.bf16.mxu0 %v2261_v37 }
  0x47   : > { %2163 = vmatprep.subr.bf16.mxu1 %v2262_v38  ;;  %2149 = vmatprep.mubr.msk.bf16.mxu0 %vm395_vm0, %v1263_v40 }
  0x48   : > { %2165 = vmatprep.mubr.msk.bf16.mxu1 %vm395_vm0, %v1376_v22 }
  0x49   : > { %2148 = vmatpush3.bf16.msra.mxu0 %v2261_v37  ;;  %v173_v37 = vshrl.u32 %v172_v7, 7 }
  0x4a   : > { %2164 = vmatpush3.bf16.msra.mxu1 %v2262_v38  ;;  %2173 = vmatprep.subr.bf16.mxu0 %v2265_v46 }
  0x4b   : > { %2189 = vmatprep.subr.bf16.mxu1 %v2265_v46  ;;  %v175_v42 = vadd.s32 16, %v173_v37  ;;  %v179_v51 = vadd.s32 48, %v173_v37  ;;  %v177_v52 = vadd.s32 32, %v173_v37  ;;  %v178_v54 = vadd.s32 40, %v173_v37 }
  0x4c   : > { %2150 = vmatmul.mubr.msk.bf16.vlgmr.msra.gmra.mxu0 %vm395_vm0, %v1265_v48 }
  0x4d   : > { %2166 = vmatmul.mubr.msk.bf16.vlgmr.msra.gmra.mxu1 %vm395_vm0, %v1378_v28  ;;  %2174 = vmatpush3.bf16.msra.mxu0 %v2265_v46  ;;  %v199_v28 = vand.u32 7, %v175_v42 }
  0x4e   : > { %2193 = vmatpush3.bf16.msra.mxu1 %v2265_v46  ;;  %2175 = vmatprep.subr.bf16.mxu0 %v2266_v50  ;;  %v176_v46 = vadd.s32 24, %v173_v37 }
  0x4f   : > { %2190 = vmatprep.subr.bf16.mxu1 %v2266_v50  ;;  %2153 = vmatprep.mubr.msk.bf16.mxu0 %vm395_vm0, %v1267_v43  ;;  %vm279_vm3 = vcmp.gt.s32.totalorder %v199_v28, 0  ;;  %vm303_vm11 = vcmp.lt.s32.totalorder %v199_v28, 7 }
  0x50   : > { %2169 = vmatprep.mubr.msk.bf16.mxu1 %vm395_vm0, %v1380_v45  ;;  %v206_v43 = vand.u32 7, %v176_v46  ;;  %v174_v45 = vadd.s32 8, %v173_v37 }
  0x51   : > { %2176 = vmatpush3.bf16.msra.mxu0 %v2266_v50 }
  0x52   : > { %2194 = vmatpush3.bf16.msra.mxu1 %v2266_v50  ;;  %2177 = vmatprep.subr.bf16.mxu0 %v2267_v53  ;;  %v185_v50 = vand.u32 7, %v173_v37  ;;  %vm280_vm5 = vcmp.gt.s32.totalorder %v206_v43, 0  ;;  %vm304_vm15 = vcmp.lt.s32.totalorder %v206_v43, 7 }
  0x53   : > { %2191 = vmatprep.subr.bf16.mxu1 %v2267_v53 }
  0x54   : > { %2154 = vmatmul.mubr.msk.bf16.gmra.mxu0 %vm395_vm0, %v1269_v55  ;;  %vm277_vm4 = vcmp.gt.s32.totalorder %v185_v50, 0  ;;  %vm301_vm13 = vcmp.lt.s32.totalorder %v185_v50, 7 }
  0x55   : > { %2170 = vmatmul.mubr.msk.bf16.gmra.mxu1 %vm395_vm0, %v1382_v44  ;;  %2178 = vmatpush3.bf16.msra.mxu0 %v2267_v53  ;;  %v192_v44 = vand.u32 7, %v174_v45 }
  0x56   : > { %2195 = vmatpush3.bf16.msra.mxu1 %v2267_v53  ;;  %2179 = vmatprep.subr.bf16.mxu0 %v2268_v57  ;;  %v180_v53 = vadd.s32 56, %v173_v37 }
  0x57   : > { %2192 = vmatprep.subr.bf16.mxu1 %v2268_v57  ;;  %2181 = vmatprep.mubr.msk.bf16.mxu0 %vm395_vm0, %v1499_v15  ;;  %v213_v15 = vand.u32 7, %v177_v52  ;;  %vm278_vm6 = vcmp.gt.s32.totalorder %v192_v44, 0  ;;  %vm302_vm1 = vcmp.lt.s32.totalorder %v192_v44, 7 }
  0x58   : > { %2185 = vmatprep.mubr.msk.bf16.mxu1 %vm395_vm0, %v1503_v32  ;;  %v234_v32 = vand.u32 7, %v180_v53 }
  0x59   : > { %2180 = vmatpush3.bf16.msra.mxu0 %v2268_v57  ;;  %vm281_vm8 = vcmp.gt.s32.totalorder %v213_v15, 0  ;;  %vm305_vm14 = vcmp.lt.s32.totalorder %v213_v15, 7 }
  0x5a   : > { %2196 = vmatpush3.bf16.msra.mxu1 %v2268_v57  ;;  %v227_v57 = vand.u32 7, %v179_v51  ;;  %vm284_vm9 = vcmp.gt.s32.totalorder %v234_v32, 0 }
  0x5c   : > { %2182 = vmatmul.mubr.msk.bf16.vlgmr.msra.gmra.mxu0 %vm395_vm0, %v1501_v59  ;;  %v220_v59 = vand.u32 7, %v178_v54  ;;  %vm283_vm7 = vcmp.gt.s32.totalorder %v227_v57, 0  ;;  %vm307_vm12 = vcmp.lt.s32.totalorder %v227_v57, 7 }
  0x5d   : > { %2186 = vmatmul.mubr.msk.bf16.vlgmr.msra.gmra.mxu1 %vm395_vm0, %v1505_v60  ;;  %vm308_vm0 = vcmp.lt.s32.totalorder %v234_v32, 7 }
  0x5e   : > { %vm282_vm10 = vcmp.gt.s32.totalorder %v220_v59, 0  ;;  %vm2764_vm2 = vcmp.lt.s32.totalorder %v220_v59, 7 }
  0xdc   : > { %v2615_v36 = vpop.f32.mrf.mxu0 }
  0xdd   : > { %v2617_v58 = vpop.f32.mrf.mxu1 }
  0xde   : > { %v2619_v61 = vpop.f32.mrf.mxu0 }
  0xdf   : > { %v2621_v62 = vpop.f32.mrf.mxu1 }
  0xe0   : > { %v2623_v63 = vpop.f32.mrf.mxu0 }
  0xe1   : > { %v2625_v2 = vpop.f32.mrf.mxu1 }
  0xe2   : > { %v445_v3 = vpop.f32.mrf.mxu0 }
  0xe3   : > { %v552_v4 = vpop.f32.mrf.mxu1 }
  0xe4   : > { %v2627_v5 = vadd.f32 %v552_v4, %v445_v3  ;;  %v2629_v6 = vpop.f32.mrf.mxu0  ;;  %v2883_v4 = vmov 0.0  }
  0xe5   : > { %v2631_v8 = vpop.f32.mrf.mxu1  ;;  %v2708_v7 = vsel %vm279_vm3, 1.0, %v2883_v4  ;;  %v2711_v37 = vsel %vm277_vm4, 1.0, %v2883_v4  ;;  %v2714_v42 = vsel %vm280_vm5, 1.0, %v2883_v4  ;;  %v1775_v53 = vsel %vm278_vm6, 1.0, %v2883_v4 }
  0xe6   : > { %v2633_v9 = vpop.f32.mrf.mxu0  ;;  %v1780_v54 = vsel %vm283_vm7, 1.0, %v2883_v4  ;;  %v1779_v28 = vsel %vm282_vm10, 1.0, %v2883_v4  ;;  %v2734_v50 = vsel %vm303_vm11, 1.0, %v2883_v4  ;;  %v2737_v43 = vsel %vm307_vm12, 1.0, %v2883_v4 }
  0xe7   : > { %v2635_v10 = vpop.f32.mrf.mxu1  ;;  %2890 = vst [vmem:[#allocation8_spill] sm:$0xff] %v2734_v50  ;;  %2891 = vst [vmem:[#allocation9_spill] sm:$0xff] %v2737_v43  ;;  %v2740_v44 = vsel %vm301_vm13, 1.0, %v2883_v4  ;;  %v2745_v32 = vsel %vm305_vm14, 1.0, %v2883_v4  ;;  %v558_v43 = vadd.f32 %v2617_v58, %v2615_v36  ;;  %v561_v50 = vadd.f32 %v2625_v2, %v2623_v63 }
  0xe8   : > { %v2637_v11 = vpop.f32.mrf.mxu0  ;;  %2892 = vst [vmem:[#allocation10_spill] sm:$0xff] %v2740_v44  ;;  %2894 = vst [vmem:[#allocation12_spill] sm:$0xff] %v2745_v32  ;;  %v550_v44 = vadd.f32 %v2621_v62, %v2619_v61  ;;  %vm1702_vm3 = vcmask 257024  }
  0xe9   : > { %v2639_v12 = vpop.f32.mrf.mxu1 }
  0xea   : > { %v2641_v13 = vpop.f32.mrf.mxu0  ;;  %v577_v36 = vadd.f32 %v2639_v12, %v2637_v11 }
  0xeb   : > { %v2643_v14 = vpop.f32.mrf.mxu1 }
  0xec   : > { %v2645_v17 = vpop.f32.mrf.mxu0  ;;  %v569_v58 = vadd.f32 %v2643_v14, %v2641_v13 }
  0xed   : > { %v2647_v18 = vpop.f32.mrf.mxu1  ;;  %v720_v62 = vadd.f32 %v2645_v17, %v558_v43 }
  0xee   : > { %v2649_v20 = vpop.f32.mrf.mxu0 }
  0xef   : > { %v2651_v21 = vpop.f32.mrf.mxu1  ;;  %v718_v63 = vadd.f32 %v2649_v20, %v550_v44 }
  0xf0   : > { %v2653_v23 = vpop.f32.mrf.mxu0 }
  0xf1   : > { %v2655_v24 = vpop.f32.mrf.mxu1 }
  0xf2   : > { %v2657_v25 = vpop.f32.mrf.mxu0 }
  0xf3   : > { %v2659_v26 = vpop.f32.mrf.mxu1 }
  0xf4   : > { %v2661_v27 = vpop.f32.mrf.mxu0 }
  0xf5   : > { %v2663_v31 = vpop.f32.mrf.mxu1 }
  0xf6   : > { %v2665_v29 = vpop.f32.mrf.mxu0 }
  0xf7   : > { %v2667_v30 = vpop.f32.mrf.mxu1 }
  0xf8   : > { %v2669_v33 = vpop.f32.mrf.mxu0 }
  0xf9   : > { %v2671_v34 = vpop.f32.mrf.mxu1 }
  0xfa   : > { %v2673_v35 = vpop.f32.mrf.mxu0 }
  0xfb   : > { %v2675_v38 = vpop.f32.mrf.mxu1 }
  0xfc   : > { %2884 = vst [vmem:[#allocation2_spill] sm:$0xff] %v2675_v38  ;;  %v2677_v40 = vpop.f32.mrf.mxu0 }
  0xfd   : > { %v2679_v22 = vpop.f32.mrf.mxu1  ;;  %v1021_v2 = vadd.f32 %v2677_v40, %v2647_v18 }
  0xfe   : > { %v2681_v41 = vpop.f32.mrf.mxu0 }
  0xff   : > { %v2683_v47 = vpop.f32.mrf.mxu1 }
 0x100   : > { %v2685_v48 = vpop.f32.mrf.mxu0 }
 0x101   : > { %v2687_v39 = vpop.f32.mrf.mxu1  ;;  %v1024_v11 = vadd.f32 %v2685_v48, %v2655_v24 }
 0x102   : > { %v2689_v49 = vpop.f32.mrf.mxu0 }
 0x103   : > { %v2691_v0 = vpop.f32.mrf.mxu1  ;;  %v1016_v12 = vadd.f32 %v2689_v49, %v2659_v26  ;;  %v2898_v26 = vmov 0.0  }
 0x104   : > { %v2693_v19 = vpop.f32.mrf.mxu0 }
 0x105   : > { %v2695_v55 = vpop.f32.mrf.mxu1  ;;  %v1037_v18 = vadd.f32 %v2693_v19, %v2663_v31  ;;  %v726_v31 = vmul.f32 %v2711_v37, %v718_v63  ;;  %v1222_v48 = vadd.f32 %v2691_v0, %v1016_v12  ;;  %v2899_v0 = vld [vmem:[#allocation2_spill] sm:$0xff] }
 0x106   : > { %v2697_v1 = vpop.f32.mrf.mxu0 }
 0x107   : > { %v2699_v56 = vpop.f32.mrf.mxu1  ;;  %v1029_v20 = vadd.f32 %v2697_v1, %v2667_v30  ;;  %v1223_v30 = vadd.f32 %v2679_v22, %v1021_v2 }
 0x108   : > { %v2701_v16 = vpop.f32.mrf.mxu0 }
 0x109   : > { %v2703_v60 = vpop.f32.mrf.mxu1  ;;  %v1040_v24 = vadd.f32 %v2701_v16, %v2671_v34  ;;  %v1224_v34 = vadd.f32 %v2687_v39, %v1024_v11  ;;  %v1227_v16 = vadd.f32 %v2695_v55, %v1037_v18  ;;  %v1225_v59 = vadd.f32 %v2699_v56, %v1029_v20  ;;  %v2907_v18 = vld [vmem:[#allocation9_spill] sm:$0xff] }
 0x10a   : > { %v2705_v3 = vpop.f32.mrf.mxu0 }
 0x10b   : > { %2885 = vst [vmem:[#allocation3_spill] sm:$0xff] %v2705_v3  ;;  %v2716_v46 = vpop.f32.mrf.mxu1  ;;  %v1781_v3 = vsel %vm284_vm9, 1.0, %v2883_v4 }
 0x10c   : > { %2886 = vst [vmem:[#allocation4_spill] sm:$0xff] %v2716_v46  ;;  %v2718_v45 = vpop.f32.mrf.mxu0  ;;  %v1778_v46 = vsel %vm281_vm8, 1.0, %v2883_v4 }
 0x10d   : > { %v2720_v51 = vpop.f32.mrf.mxu1 }
 0x10e   : > { %v2722_v52 = vpop.f32.mrf.mxu0  ;;  %v1462_v37 = vadd.f32 %v2720_v51, %v2718_v45 }
 0x10f   : > { %2887 = vst [vmem:[#allocation5_spill] sm:$0xff] %v2722_v52  ;;  %v2728_v38 = vpop.f32.mrf.mxu1  ;;  %v2751_v52 = vsel %vm308_vm0, 1.0, %v2883_v4 }
 0x110   : > { %2888 = vst [vmem:[#allocation6_spill] sm:$0xff] %v2728_v38  ;;  %v2731_v57 = vpop.f32.mrf.mxu0  ;;  %v2748_v38 = vsel %vm304_vm15, 1.0, %v2883_v4  ;;  %2895 = vst [vmem:[#allocation13_spill] sm:$0xff] %v2751_v52  ;;  %v574_v52 = vadd.f32 %v2631_v8, %v2629_v6  ;;  %v1013_v6 = vadd.f32 %v2681_v41, %v2651_v21 }
 0x111   : > { %2889 = vst [vmem:[#allocation7_spill] sm:$0xff] %v2731_v57  ;;  %v2742_v15 = vpop.f32.mrf.mxu1  ;;  %v2754_v57 = vsel %vm302_vm1, 1.0, %v2883_v4  ;;  %v566_v4 = vadd.f32 %v2635_v10, %v2633_v9  ;;  %v721_v9 = vadd.f32 %v2653_v23, %v561_v50  ;;  %v719_v10 = vadd.f32 %v2657_v25, %v2627_v5 }
 0x112   : > { %2893 = vst [vmem:[#allocation11_spill] sm:$0xff] %v2742_v15  ;;  %v2762_v15 = vpop.f32.mrf.mxu0  ;;  %v724_v14 = vadd.f32 %v2661_v27, %v574_v52  ;;  %v725_v5 = vadd.f32 %v2669_v33, %v577_v36  ;;  %v723_v23 = vadd.f32 %v2673_v35, %v569_v58  ;;  %v2804_v27 = vsel %vm2764_vm2, 1.0, %v2898_v26 }
 0x113   : > { %v2776_v61 = vpop.f32.mrf.mxu1  ;;  %v722_v17 = vadd.f32 %v2665_v29, %v566_v4  ;;  %v728_v29 = vmul.f32 %v2708_v7, %v720_v62  ;;  %v1221_v40 = vadd.f32 %v2683_v47, %v1013_v6  ;;  %v729_v35 = vmul.f32 %v2714_v42, %v721_v9  ;;  %v2905_v9 = vld [vmem:[#allocation8_spill] sm:$0xff] }
 0x114   : > { %v2155_v8 = vpop.f32.mrf.mxu0  ;;  %v727_v41 = vmul.f32 %v1775_v53, %v719_v10  ;;  %v732_v19 = vmul.f32 %v1780_v54, %v724_v14  ;;  %v733_v7 = vmul.f32 %v1781_v3, %v725_v5  ;;  %v2815_v22 = vmul.f32 %v1779_v28, %v723_v23  ;;  %v2900_v53 = vld [vmem:[#allocation3_spill] sm:$0xff]  ;;  %v2906_v12 = vld [vmem:[#allocation4_spill] sm:$0xff] }
 0x115   : > { %v2171_v13 = vpop.f32.mrf.mxu1  ;;  %v730_v1 = vmul.f32 %v1778_v46, %v722_v17  ;;  %v1228_v47 = vadd.f32 %v2703_v60, %v1040_v24  ;;  %v1231_v39 = vadd.f32 %v1223_v30, %v728_v29  ;;  %v1229_v52 = vadd.f32 %v1221_v40, %v726_v31  ;;  %v2833_v17 = vld [vmem:[%s2881_s2] ss:$0 sm:$0xff] }
 0x116   : > { %v1356_v21 = vpop.f32.mrf.mxu0  ;;  %v1032_v54 = vadd.f32 %v2900_v53, %v2899_v0  ;;  %v1478_v46 = vadd.f32 %v2171_v13, %v2155_v8  ;;  %v1232_v55 = vadd.f32 %v1224_v34, %v729_v35  ;;  %v2822_v43 = vadd.f32 %v1222_v48, %v727_v41  ;;  %v2901_v56 = vld [vmem:[#allocation5_spill] sm:$0xff] }
 0x117   : > { %v1469_v25 = vpop.f32.mrf.mxu1  ;;  %v2902_v3 = vld [vmem:[#allocation6_spill] sm:$0xff]  ;;  %v1235_v60 = vadd.f32 %v1227_v16, %v732_v19  ;;  %v1233_v36 = vadd.f32 %v1225_v59, %v730_v1  ;;  %v1236_v62 = vadd.f32 %v1228_v47, %v733_v7  ;;  %v1457_v23 = vadd.f32 %v2776_v61, %v2762_v15  ;;  %v2910_v59 = vld [vmem:[#allocation13_spill] sm:$0xff] }
 0x118   : > { %v2156_v33 = vpop.f32.mrf.mxu0  ;;  %v1454_v28 = vadd.f32 %v2902_v3, %v2901_v56  ;;  %v1470_v58 = vadd.f32 %v1469_v25, %v1356_v21  ;;  %v2903_v63 = vld [vmem:[#allocation7_spill] sm:$0xff]  ;;  %v1226_v13 = vadd.f32 %v2906_v12, %v1032_v54  ;;  %v2908_v25 = vld [vmem:[#allocation10_spill] sm:$0xff] }
 0x119   : > { %v2172_v49 = vpop.f32.mrf.mxu1  ;;  %v2904_v2 = vld [vmem:[#allocation11_spill] sm:$0xff] }
 0x11a   : > { %v1359_v4 = vpop.f32.mrf.mxu0  ;;  %v1465_v6 = vadd.f32 %v2904_v2, %v2903_v63  ;;  %v1481_v14 = vadd.f32 %v2172_v49, %v2156_v33  ;;  %v2909_v33 = vld [vmem:[#allocation12_spill] sm:$0xff] }
 0x11b   : > { %v1472_v42 = vpop.f32.mrf.mxu1 }
 0x11c   : > { %v2183_v50 = vpop.f32.mrf.mxu0  ;;  %v1473_v30 = vadd.f32 %v1472_v42, %v1359_v4 }
 0x11d   : > { %v1609_v44 = vadd.f32 %v2183_v50, %v1462_v37  ;;  %v2187_v32 = vpop.f32.mrf.mxu1 }
 0x11e   : > { %v1613_v45 = vadd.f32 %v2187_v32, %v1478_v46  ;;  %v1576_v51 = vpop.f32.mrf.mxu0 }
 0x11f   : > { %v1617_v8 = vmul.f32 %v2905_v9, %v1609_v44  ;;  %v1607_v10 = vadd.f32 %v1576_v51, %v1454_v28  ;;  %v1592_v11 = vpop.f32.mrf.mxu1 }
 0x120   : > { %v1621_v20 = vmul.f32 %v2907_v18, %v1613_v45  ;;  %v1611_v21 = vadd.f32 %v1592_v11, %v1470_v58  ;;  %v2184_v5 = vpop.f32.mrf.mxu0  ;;  %v1234_v58 = vadd.f32 %v1226_v13, %v2815_v22 }
 0x121   : > { %v1625_v24 = vadd.f32 %v1617_v8, %v1231_v39  ;;  %v1615_v26 = vmul.f32 %v2908_v25, %v1607_v10  ;;  %v1610_v29 = vadd.f32 %v2184_v5, %v1465_v6  ;;  %v2188_v31 = vpop.f32.mrf.mxu1 }
 0x122   : > { %v1629_v40 = vadd.f32 %v1621_v20, %v1235_v60  ;;  %v1619_v35 = vmul.f32 %v2909_v33, %v1611_v21  ;;  %v1614_v41 = vadd.f32 %v2188_v31, %v1481_v14  ;;  %v1579_v34 = vpop.f32.mrf.mxu0 }
 0x123   : > { %v1640_v48 = vadd.f32 %v2833_v17, %v1625_v24  ;;  %v1623_v49 = vadd.f32 %v1615_v26, %v1229_v52  ;;  %v1618_v19 = vmul.f32 %v2748_v38, %v1610_v29  ;;  %v1608_v1 = vadd.f32 %v1579_v34, %v1457_v23  ;;  %v1595_v16 = vpop.f32.mrf.mxu1 }
 0x124   : > { %v1644_v15 = vadd.f32 %v2833_v17, %v1629_v40  ;;  %v1627_v61 = vadd.f32 %v1619_v35, %v1233_v36  ;;  %v1622_v7 = vmul.f32 %v2910_v59, %v1614_v41  ;;  %v1612_v47 = vadd.f32 %v1595_v16, %v1473_v30 }
 0x125   : > { %vm1648_vm4 = vcmp.gt.f32.partialorder %v1640_v48, 0.0  ;;  %v1656_v4 = vmul.f32 0.01, %v1640_v48  ;;  %v1638_v37 = vadd.f32 %v2833_v17, %v1623_v49  ;;  %v1626_v42 = vadd.f32 %v1618_v19, %v1232_v55 }
 0x126   : > { %vm1652_vm5 = vcmp.gt.f32.partialorder %v1644_v15, 0.0  ;;  %v1660_v39 = vmul.f32 0.01, %v1644_v15  ;;  %v1642_v52 = vadd.f32 %v2833_v17, %v1627_v61  ;;  %v1630_v0 = vadd.f32 %v1622_v7, %v1236_v62 }
 0x127   : > { %v1664_v38 = vsel %vm1648_vm4, %v1640_v48, %v1656_v4  ;;  %vm1646_vm6 = vcmp.gt.f32.partialorder %v1638_v37, 0.0  ;;  %v1654_v53 = vmul.f32 0.01, %v1638_v37  ;;  %v1641_v54 = vadd.f32 %v2833_v17, %v1626_v42 }
 0x128   : > { %v1967_v46 = vpack.c.bf16 %v1664_v38, %v1664_v38  ;;  %v1668_v50 = vsel %vm1652_vm5, %v1644_v15, %v1660_v39  ;;  %vm1650_vm7 = vcmp.gt.f32.partialorder %v1642_v52, 0.0  ;;  %v1658_v55 = vmul.f32 0.01, %v1642_v52 }
 0x129   : > { %v1971_v56 = vpack.c.bf16 %v1668_v50, %v1668_v50  ;;  %v1662_v3 = vsel %vm1646_vm6, %v1638_v37, %v1654_v53  ;;  %vm1649_vm8 = vcmp.gt.f32.partialorder %v1641_v54, 0.0  ;;  %v1657_v28 = vmul.f32 0.01, %v1641_v54 }
 0x12a   : > { %1705 = vst.msk [vmem:[%s2850_s13 + $0x8] sm:$0xf] %vm1702_vm3, %v1967_v46  ;;  %v1965_v44 = vpack.c.bf16 %v1662_v3, %v1662_v3  ;;  %v1666_v32 = vsel %vm1650_vm7, %v1642_v52, %v1658_v55  ;;  %v1645_v60 = vadd.f32 %v2833_v17, %v1630_v0  ;;  %v1616_v36 = vmul.f32 %v2754_v57, %v1608_v1 }
 0x12b   : > { %1709 = vst.msk [vmem:[%s2850_s13 + $0x18] sm:$0xf] %vm1702_vm3, %v1971_v56  ;;  %v1969_v45 = vpack.c.bf16 %v1666_v32, %v1666_v32  ;;  %v1665_v51 = vsel %vm1649_vm8, %v1641_v54, %v1657_v28  ;;  %v1620_v62 = vmul.f32 %v2804_v27, %v1612_v47 }
 0x12c   : > { %1703 = vst.msk [vmem:[%s2850_s13] sm:$0xf] %vm1702_vm3, %v1965_v44  ;;  %v1968_v63 = vpack.c.bf16 %v1665_v51, %v1665_v51  ;;  %vm1653_vm9 = vcmp.gt.f32.partialorder %v1645_v60, 0.0  ;;  %v1661_v2 = vmul.f32 0.01, %v1645_v60  ;;  %v1624_v6 = vadd.f32 %v1616_v36, %v2822_v43 }
 0x12d   : > { %1707 = vst.msk [vmem:[%s2850_s13 + $0x10] sm:$0xf] %vm1702_vm3, %v1969_v45  ;;  %v1628_v57 = vadd.f32 %v1620_v62, %v1234_v58 }
 0x12e   : > { %1706 = vst.msk [vmem:[%s2850_s13 + $0xc] sm:$0xf] %vm1702_vm3, %v1968_v63  ;;  %v1669_v22 = vsel %vm1653_vm9, %v1645_v60, %v1661_v2  ;;  %v1639_v9 = vadd.f32 %v2833_v17, %v1624_v6 }
 0x12f   : > { %v1972_v8 = vpack.c.bf16 %v1669_v22, %v1669_v22  ;;  %v1643_v27 = vadd.f32 %v2833_v17, %v1628_v57 }
 0x130   : > { %vm1647_vm10 = vcmp.gt.f32.partialorder %v1639_v9, 0.0  ;;  %v1655_v10 = vmul.f32 0.01, %v1639_v9 }
 0x131   : > { %1710 = vst.msk [vmem:[%s2850_s13 + $0x1c] sm:$0xf] %vm1702_vm3, %v1972_v8  ;;  %vm1651_vm11 = vcmp.gt.f32.partialorder %v1643_v27, 0.0  ;;  %v1659_v11 = vmul.f32 0.01, %v1643_v27 }
 0x132   : > { %v1663_v43 = vsel %vm1647_vm10, %v1639_v9, %v1655_v10 }
 0x133   : > { %v1966_v12 = vpack.c.bf16 %v1663_v43, %v1663_v43  ;;  %v1667_v13 = vsel %vm1651_vm11, %v1643_v27, %v1659_v11 }
 0x134   : > { %v1970_v14 = vpack.c.bf16 %v1667_v13, %v1667_v13 }
 0x135   : > { %1704 = vst.msk [vmem:[%s2850_s13 + $0x4] sm:$0xf] %vm1702_vm3, %v1966_v12 }
 0x136   : > { %1708 = vst.msk [vmem:[%s2850_s13 + $0x14] sm:$0xf] %vm1702_vm3, %v1970_v14 }
 0x137 PF: > { %s13_s12 = sadd.s32 1, %s2276_s12  }
 0x138   : > { %p10_p4 = scmp.ge.s32.totalorder %s13_s12, 4  }
 0x13a   :  { %12 = sbr.rel (!%p10_p4) target bundleno = 1 (0x1), region = 70 }

// kernel: dino_semantic_segmentation.32
= control target key start
LH: loop header
LB: loop body
LE: loop exit
PB: predicated region body
PF: predicated region fallthrough
CT: control target
= control target key end

     0   :  { %v158_v1 = vmov 0   ;;  %vm45_vm0 = vcmask 130048   ;;  %v25_v9 = vlaneseq  ;;  %vm129_vm1 = vcmask 1043456   ;;  %s224_s1 = inlined_call_operand.vmem [shape: bf16[16,160], index: 1, kind: input, shape index: {}]   ;;  %s225_s0 = inlined_call_operand.vmem [shape: f32[32,16], index: 0, kind: input, shape index: {}]   ;;  %s226_s2 = inlined_call_operand.vmem [shape: f32[1,160], index: 2, kind: input, shape index: {}]   ;;  %s227_s3 = inlined_call_operand.vmem [shape: bf16[32,160], index: 3, kind: output, shape index: {}]  }
   0x1   :  { %v155_v0 = vld [vmem:[%s224_s1 + $0x4] ss:$8 sps:$4 sm:$0xff]   ;;  %84 = vmatprep.mubr.bf16.mxu0 %v158_v1  ;;  %94 = vmatprep.mubr.bf16.mxu1 %v158_v1  ;;  %v157_v2 = vld [vmem:[%s224_s1] ss:$8 sps:$4 sm:$0xff]   ;;  %v17_v6 = vld [vmem:[%s225_s0 + $0x10] sm:$0xff]  ;;  %vm130_vm2 = vcmask 261124  }
   0x2   :  { %v15_v3 = vld [vmem:[%s225_s0] sm:$0xff]  ;;  %v16_v4 = vld [vmem:[%s225_s0 + $0x8] sm:$0xff]  ;;  %66 = vmatprep.subr.bf16.mxu0 %v155_v0  ;;  %152 = vmatprep.subr.bf16.mxu1 %v155_v0  ;;  %v18_v7 = vld [vmem:[%s225_s0 + $0x18] sm:$0xff]  ;;  %v26_v10 = vshrl.u32 %v25_v9, 7 }
   0x3   :  { %v19_v5 = vpack.c.bf16 %v16_v4, %v15_v3  ;;  %67 = vmatpush1.bf16.msra.mxu0 %v157_v2  ;;  %153 = vmatpush1.bf16.msra.mxu1 %v157_v2  ;;  %v20_v8 = vpack.c.bf16 %v18_v7, %v17_v6  ;;  %v23_v13 = vld [vmem:[%s226_s2] sm:$0x3]  ;;  %vm200_vm3 = vmor %vm130_vm2, %vm129_vm1 }
   0x4   :  { %v27_v11 = vsub.s32 0, %v26_v10  ;;  %v31_v12 = vsub.s32 1, %v26_v10 }
   0x6   :  { %142 = vmatmul.mubr.msk.bf16.vlgmr.msra.gmra.mxu0 %vm45_vm0, %v19_v5  ;;  %143 = vmatmul.mubr.msk.bf16.vlgmr.msra.gmra.mxu1 %vm45_vm0, %v20_v8  ;;  %v28_v14 = vrot.slane %v23_v13, %v27_v11  ;;  %v32_v15 = vrot.slane %v23_v13, %v31_v12 }
  0xc6   :  { %v86_v16 = vpop.f32.mrf.mxu0  ;;  %v96_v17 = vpop.f32.mrf.mxu1 }
  0xc7   :  { %v87_v20 = vadd.f32 %v86_v16, %v28_v14  ;;  %v97_v21 = vadd.f32 %v96_v17, %v28_v14 }
  0xc8   :  { %v88_v18 = vpop.f32.mrf.mxu0  ;;  %v98_v19 = vpop.f32.mrf.mxu1 }
  0xc9   :  { %v89_v22 = vadd.f32 %v88_v18, %v32_v15  ;;  %v99_v23 = vadd.f32 %v98_v19, %v32_v15 }
  0xca   :  { %v90_v25 = vpop.f32.mrf.mxu0  ;;  %v100_v26 = vpop.f32.mrf.mxu1 }
  0xcb   :  { %v148_v27 = vpack.c.bf16 %v89_v22, %v87_v20  ;;  %v150_v28 = vpack.c.bf16 %v99_v23, %v97_v21  ;;  %v91_v31 = vadd.f32 %v90_v25, %v28_v14  ;;  %v101_v32 = vadd.f32 %v100_v26, %v28_v14 }
  0xcc   :  { %v92_v29 = vpop.f32.mrf.mxu0  ;;  %v102_v30 = vpop.f32.mrf.mxu1 }
  0xcd   :  { %132 = vst.msk [vmem:[%s227_s3] sm:$0xff] %vm200_vm3, %v148_v27  ;;  %134 = vst.msk [vmem:[%s227_s3 + $0x10] sm:$0xff] %vm200_vm3, %v150_v28  ;;  %v93_v33 = vadd.f32 %v92_v29, %v32_v15  ;;  %v103_v34 = vadd.f32 %v102_v30, %v32_v15 }
  0xcf   :  { %v149_v35 = vpack.c.bf16 %v93_v33, %v91_v31  ;;  %v151_v36 = vpack.c.bf16 %v103_v34, %v101_v32 }
  0xd1   :  { %133 = vst.msk [vmem:[%s227_s3 + $0x8] sm:$0xff] %vm200_vm3, %v149_v35  ;;  %135 = vst.msk [vmem:[%s227_s3 + $0x18] sm:$0xff] %vm200_vm3, %v151_v36 }

// kernel: dino_semantic_segmentation.33
= control target key start
LH: loop header
LB: loop body
LE: loop exit
PB: predicated region body
PF: predicated region fallthrough
CT: control target
= control target key end

     0   :  { %8 = vsyncpa [#allocation3], 0  ;;  %s1019_s0 = inlined_call_operand.vmem [shape: bf16[320,16], index: 0, kind: input, shape index: {}]   ;;  %s1020_s1 = inlined_call_operand.vmem [shape: bf16[16,32], index: 1, kind: input, shape index: {}]   ;;  %s1021_s2 = inlined_call_operand.vmem [shape: f32[1,32], index: 2, kind: input, shape index: {}]   ;;  %s1022_s3 = inlined_call_operand.hbm [shape: f32[320,32], index: 3, kind: output, shape index: {}]  }
   0x1   :  { %10 = vsyncpa [#allocation3 + $0x1], 0  ;;  %s821_s12 = smov 0   ;;  %s823_s13 = smov 0  }
   0x2   :  { %s825_s14 = smov 0   ;;  %s827_s15 = smov 0  }
   0x3   :  { %s829_s16 = smov 0   ;;  %s831_s17 = smov 0  }
   0x4 LB: > { %s582_s18 = sadd.s32 4294967295, %s796_s17   ;;  %s583_s19 = sadd.s32 4294967294, %s796_s17   ;;  %s796_s17 = sphi %s831_s17, %s16_s17   ;;  %s792_s16 = sphi %s829_s16, %s1029_s16   ;;  %s788_s15 = sphi %s827_s15, %s1028_s15   ;;  %s784_s14 = sphi %s825_s14, %s1027_s14   ;;  %s780_s13 = sphi %s823_s13, %s1026_s13   ;;  %s776_s12 = sphi %s821_s12, %s1025_s12  }
   0x5   : > { %s28_s20 = sadd.s32 1, %s792_s16  ;;  %s115_s21 = sadd.s32 1, %s784_s14 }
   0x6   : > { %p30_p0 = scmp.ge.s32.totalorder %s28_s20, 2  ;;  %p125_p1 = scmp.ne.s32.totalorder %s784_s14, %s780_s13 }
   0x7   : > { %p126_p2 = scmp.eq.s32.totalorder %s582_s18, 1  ;;  %p131_p3 = scmp.ne.s32.totalorder %s780_s13, %s776_s12 }
   0x8   : > { %s1031_s20 = smov (%p30_p0, %s28_s20), 0  ;;  %p132_p5 = scmp.eq.s32.totalorder %s583_s19, 1 }
   0x9   : > { %p861_p4 = por %p126_p2, %p125_p1  ;;  %s110_s23 = ssub.s32 %s792_s16, %s1031_s20 }
   0xa   : > { %p588_p6 = scmp.ge.s32.totalorder %s796_s17, 1  ;;  %p113_p7 = scmp.eq.s32.totalorder %s110_s23, 0 }
   0xb   : > { %p868_p8 = por %p132_p5, %p131_p3  ;;  %p172_p9 = scmp.lt.s32.totalorder %s796_s17, 3 }
   0xc   : > { %s874_s25 = scalar_select %p113_p7, %s784_s14, %s115_s21  }
   0xd   : > { %p173_p10 = pnand %p588_p6, %p172_p9 }
   0xe   : > { %s203_s28 = smul.u32 (!%p173_p10), 20, %s788_s15  ;;  %s200_s6 = sand.u32 (!%p173_p10), 1, %s780_s13  }
   0xf   : > { %176 = sbr.rel (%p173_p10) target bundleno = 256 (0x100), region = 32  ;;  %s798_s27 = smov (!%p173_p10), [#allocation2]  }
  0x10   : > { %p204_p11 = scmp.lt.s32.totalorder (!%p173_p10), %s203_s28, 39  ;;  %s651_s7 = smul.u32 (!%p173_p10), 160, %s200_s6 }
  0x11   : > { %s615_s11 = smul.u32 (!%p173_p10), 2560, %s788_s15  ;;  %s974_s15 = scalar_lea.sflag (!%p173_p10), [#allocation3], %s200_s6 }
  0x12   : > { %s902_s10 = scalar_lea.vmem (!%p173_p10), [#allocation2], %s651_s7 }
  0x13   : > { %s483_s18 = sshll.u32 (!%p173_p10), %s902_s10, 4  ;;  %s963_s23 = scalar_lea.hbm (!%p173_p10), %s1022_s3, %s615_s11  ;;  %s965_s18 = int_to_ptr.vmem [resolvable:$true] %s483_s18 }
  0x14   : > { %v709_v0 = vld [vmem:[%s1020_s1] sm:$0xff]   ;;  %s1033_s28 = smov (!%p204_p11, %s203_s28), 39  ;;  %vm303_vm0 = vcmask 130048   ;;  %vm447_vm1 = vcmask 261120   ;;  %s720_s26 = scalar_lea.vmem %s965_s18, 2560 }
  0x15   : > { %627 = vmatprep.subr.bf16.mxu0 %v709_v0  ;;  %649 = vmatprep.subr.bf16.mxu1 %v709_v0  ;;  %s589_s29 = sshll.u32 %s1033_s28, 2  ;;  %v899_v11 = vld [vmem:[%s1021_s2] ss:$0 sm:$0xff]  ;;  %p721_p12 = scmp.ne.s32.totalorder %s965_s18, %s720_s26 }
  0x16   : > { %628 = vmatpush3.bf16.msra.mxu0 %v709_v0  ;;  %650 = vmatpush3.bf16.msra.mxu1 %v709_v0  ;;  %s207_s5 = scalar_lea.vmem %s1019_s0, %s589_s29  ;;  %s724_s28 = sshll.u32 %s798_s27, 4  ;;  %s725_s28 = int_to_ptr.vmem [resolvable:$false] %s724_s28 }
  0x17   : > { %v710_v1 = vld [vmem:[%s207_s5] sm:$0xff]   ;;  %v711_v2 = vld [vmem:[%s207_s5 + $0x8] sm:$0xff]   ;;  %v712_v3 = vld [vmem:[%s207_s5 + $0x30] sm:$0xff]   ;;  %p722_p13 = pnand %p721_p12, %p861_p4  ;;  %s726_s29 = scalar_lea.vmem %s725_s28, 5120 }
  0x18   : > { %629 = vmatprep.mubr.msk.bf16.mxu0 %vm303_vm0, %v710_v1  ;;  %v713_v4 = vld [vmem:[%s207_s5 + $0x38] sm:$0xff]   ;;  %641 = vmatprep.mubr.msk.bf16.mxu1 %vm303_vm0, %v712_v3  ;;  %v714_v5 = vld [vmem:[%s207_s5 + $0x10] sm:$0xff]   ;;  %v716_v6 = vld [vmem:[%s207_s5 + $0x40] sm:$0xff]   ;;  %p727_p1 = scmp.lt.s32.totalorder %s965_s18, %s725_s28  ;;  %p728_p2 = scmp.lt.s32.totalorder %s726_s29, %s720_s26 }
  0x19   : > { %630 = vmatmul.mubr.msk.bf16.vlgmr.msra.gmra.mxu0 %vm303_vm0, %v711_v2  ;;  %642 = vmatmul.mubr.msk.bf16.vlgmr.msra.gmra.mxu1 %vm303_vm0, %v713_v4  ;;  %v715_v7 = vld [vmem:[%s207_s5 + $0x18] sm:$0xff]   ;;  %v718_v8 = vld [vmem:[%s207_s5 + $0x20] sm:$0xff]   ;;  %v717_v9 = vld [vmem:[%s207_s5 + $0x48] sm:$0xff]   ;;  %p723_p0 = pneg %p722_p13 }
  0x1a   : > { %633 = vmatprep.mubr.msk.bf16.mxu0 %vm303_vm0, %v714_v5  ;;  %645 = vmatprep.mubr.msk.bf16.mxu1 %vm303_vm0, %v716_v6  ;;  %v719_v10 = vld [vmem:[%s207_s5 + $0x28] sm:$0xff]   ;;  %p729_p3 = por %p728_p2, %p727_p1 }
  0x1c   : > { %p730_p5 = pnand %p729_p3, %p723_p0 }
  0x21   : > { %634 = vmatmul.mubr.msk.bf16.gmra.mxu0 %vm303_vm0, %v715_v7  ;;  %646 = vmatmul.mubr.msk.bf16.gmra.mxu1 %vm303_vm0, %v717_v9 }
  0x22   : > { %637 = vmatprep.mubr.msk.bf16.mxu0 %vm303_vm0, %v718_v8 }
  0x29   : > { %638 = vmatmul.mubr.msk.bf16.gmra.mxu0 %vm303_vm0, %v719_v10 }
  0xd9   : > { %v631_v12 = vpop.f32.mrf.mxu0  ;;  %v643_v15 = vpop.f32.mrf.mxu1 }
  0xda   : > { %v377_v13 = vadd.f32 %v631_v12, %v899_v11  ;;  %v425_v17 = vadd.f32 %v643_v15, %v899_v11 }
  0xdb   : > { %v368_v14 = vpop.f32.mrf.mxu0  ;;  %v416_v19 = vpop.f32.mrf.mxu1 }
  0xdc   : > { %450 = vst.msk [vmem:[%s902_s10 + $0x10] sm:$0xff] %vm447_vm1, %v377_v13  ;;  %v369_v16 = vadd.f32 %v899_v11, %v368_v14  ;;  %462 = vst.msk [vmem:[%s902_s10 + $0x70] sm:$0xff] %vm447_vm1, %v425_v17  ;;  %v417_v21 = vadd.f32 %v899_v11, %v416_v19 }
  0xdd   : > { %v632_v18 = vpop.f32.mrf.mxu0  ;;  %v644_v23 = vpop.f32.mrf.mxu1 }
  0xde   : > { %448 = vst.msk [vmem:[%s902_s10] sm:$0xff] %vm447_vm1, %v369_v16  ;;  %v380_v20 = vadd.f32 %v632_v18, %v899_v11  ;;  %460 = vst.msk [vmem:[%s902_s10 + $0x60] sm:$0xff] %vm447_vm1, %v417_v21  ;;  %v428_v25 = vadd.f32 %v644_v23, %v899_v11 }
  0xdf   : > { %v371_v22 = vpop.f32.mrf.mxu0  ;;  %v419_v27 = vpop.f32.mrf.mxu1 }
  0xe0   : > { %451 = vst.msk [vmem:[%s902_s10 + $0x18] sm:$0xff] %vm447_vm1, %v380_v20  ;;  %v372_v24 = vadd.f32 %v899_v11, %v371_v22  ;;  %463 = vst.msk [vmem:[%s902_s10 + $0x78] sm:$0xff] %vm447_vm1, %v428_v25  ;;  %v420_v29 = vadd.f32 %v899_v11, %v419_v27 }
  0xe1   : > { %v635_v26 = vpop.f32.mrf.mxu0  ;;  %v647_v31 = vpop.f32.mrf.mxu1 }
  0xe2   : > { %449 = vst.msk [vmem:[%s902_s10 + $0x8] sm:$0xff] %vm447_vm1, %v372_v24  ;;  %v393_v28 = vadd.f32 %v635_v26, %v899_v11  ;;  %461 = vst.msk [vmem:[%s902_s10 + $0x68] sm:$0xff] %vm447_vm1, %v420_v29  ;;  %v441_v33 = vadd.f32 %v647_v31, %v899_v11 }
  0xe3   : > { %v384_v30 = vpop.f32.mrf.mxu0  ;;  %v432_v35 = vpop.f32.mrf.mxu1 }
  0xe4   : > { %454 = vst.msk [vmem:[%s902_s10 + $0x30] sm:$0xff] %vm447_vm1, %v393_v28  ;;  %v385_v32 = vadd.f32 %v899_v11, %v384_v30  ;;  %466 = vst.msk [vmem:[%s902_s10 + $0x90] sm:$0xff] %vm447_vm1, %v441_v33  ;;  %v433_v37 = vadd.f32 %v899_v11, %v432_v35 }
  0xe5   : > { %v636_v34 = vpop.f32.mrf.mxu0  ;;  %v648_v39 = vpop.f32.mrf.mxu1 }
  0xe6   : > { %452 = vst.msk [vmem:[%s902_s10 + $0x20] sm:$0xff] %vm447_vm1, %v385_v32  ;;  %v396_v36 = vadd.f32 %v636_v34, %v899_v11  ;;  %464 = vst.msk [vmem:[%s902_s10 + $0x80] sm:$0xff] %vm447_vm1, %v433_v37  ;;  %v444_v41 = vadd.f32 %v648_v39, %v899_v11 }
  0xe7   : > { %v387_v38 = vpop.f32.mrf.mxu0  ;;  %v435_v43 = vpop.f32.mrf.mxu1 }
  0xe8   : > { %455 = vst.msk [vmem:[%s902_s10 + $0x38] sm:$0xff] %vm447_vm1, %v396_v36  ;;  %v388_v40 = vadd.f32 %v899_v11, %v387_v38  ;;  %467 = vst.msk [vmem:[%s902_s10 + $0x98] sm:$0xff] %vm447_vm1, %v444_v41  ;;  %v436_v45 = vadd.f32 %v899_v11, %v435_v43 }
  0xe9   : > { %v639_v42 = vpop.f32.mrf.mxu0 }
  0xea   : > { %453 = vst.msk [vmem:[%s902_s10 + $0x28] sm:$0xff] %vm447_vm1, %v388_v40  ;;  %v409_v44 = vadd.f32 %v639_v42, %v899_v11  ;;  %465 = vst.msk [vmem:[%s902_s10 + $0x88] sm:$0xff] %vm447_vm1, %v436_v45 }
  0xeb   : > { %v400_v46 = vpop.f32.mrf.mxu0 }
  0xec   : > { %458 = vst.msk [vmem:[%s902_s10 + $0x50] sm:$0xff] %vm447_vm1, %v409_v44  ;;  %v401_v47 = vadd.f32 %v899_v11, %v400_v46 }
  0xed   : > { %v640_v48 = vpop.f32.mrf.mxu0 }
  0xee   : > { %456 = vst.msk [vmem:[%s902_s10 + $0x40] sm:$0xff] %vm447_vm1, %v401_v47  ;;  %v412_v49 = vadd.f32 %v640_v48, %v899_v11 }
  0xef   : > { %v403_v50 = vpop.f32.mrf.mxu0 }
  0xf0   : > { %459 = vst.msk [vmem:[%s902_s10 + $0x58] sm:$0xff] %vm447_vm1, %v412_v49  ;;  %v404_v51 = vadd.f32 %v899_v11, %v403_v50 }
  0xf2   : > { %457 = vst.msk [vmem:[%s902_s10 + $0x48] sm:$0xff] %vm447_vm1, %v404_v51 }
  0xf3   : > { %733 = shalt.err (!%p730_p5)
}
  0xf4   : > { %s734_s30 = scalar_lea.hbm %s963_s23, 2560  ;;  %s738_s6 = scalar_lea.hbm %s1022_s3, 5120 }
  0xf5   : > { %p735_p6 = scmp.ne.s32.totalorder %s963_s23, %s734_s30  ;;  %p739_p10 = scmp.lt.s32.totalorder %s963_s23, %s1022_s3 }
  0xf6   : > { %p740_p11 = scmp.lt.s32.totalorder %s738_s6, %s734_s30 }
  0xf7   : > { %p736_p7 = pnand %p735_p6, %p861_p4 }
  0xf8   : > { %p741_p12 = por %p740_p11, %p739_p10 }
  0xf9   : > { %p737_p9 = pneg %p736_p7 }
  0xfb   : > { %p742_p13 = pnand %p741_p12, %p737_p9 }
  0xfd   : > { %745 = shalt.err (!%p742_p13)
}
  0xfe   : > { %s799_s9 = smov 128   ;;  %s800_s10 = smov 8  }
  0xff   : > { %652 = dma.vmem_to_hbm [thread:$0]  (%p861_p4), %s965_s18, 2560, %s963_s23, %s974_s15, %s799_s9, %s799_s9, %s800_s10  }
 0x100 PF: > { %p658_p0 = scmp.ge.s32.totalorder %s796_s17, 2  ;;  %s498_s11 = sand.u32 1, %s776_s12  }
 0x101   : > { %s499_s19 = scalar_lea.sflag [#allocation3], %s498_s11 }
 0x102   : > { %p655_p1 = pnand %p658_p0, %p868_p8 }
 0x104   : > { %p656_p2 = pneg %p655_p1 }
 0x106   : > { %771 = dma.done.wait (%p656_p2), %s499_s19, 2560  }
 0x107   : > { %773 = vsyncadd (%p656_p2), %s499_s19, 4294964736  ;;  %s16_s17 = sadd.s32 1, %s796_s17   ;;  %s1025_s12 = smov %s780_s13 }
 0x108   : > { %p13_p3 = scmp.ge.s32.totalorder %s16_s17, 4   ;;  %s1026_s13 = smov %s784_s14 }
 0x109   : > { %s1027_s14 = smov %s874_s25  ;;  %s1028_s15 = smov %s792_s16 }
 0x10a   : > { %s1029_s16 = smov %s1031_s20  ;;  %15 = sbr.rel (!%p13_p3) target bundleno = 4 (0x4), region = 73 }
 0x10f   :  { %504 = vsyncpa [#allocation3], 1 }
 0x110   :  { %506 = vsyncpa [#allocation3 + $0x1], 1 }

// kernel: dino_semantic_segmentation.31
= control target key start
LH: loop header
LB: loop body
LE: loop exit
PB: predicated region body
PF: predicated region fallthrough
CT: control target
= control target key end

     0   :  { %s4998_s12 = smov 0   ;;  %s6434_s0 = inlined_call_operand.vmem [shape: bf16[2,290,32], index: 0, kind: input, shape index: {}]   ;;  %s6435_s1 = inlined_call_operand.vmem [shape: bf16[9,32,5], index: 1, kind: input, shape index: {}]   ;;  %s6436_s2 = inlined_call_operand.vmem [shape: f32[1,5], index: 2, kind: input, shape index: {}]   ;;  %s6437_s3 = inlined_call_operand.vmem [shape: bf16[2,256,5], index: 3, kind: output, shape index: {}]  }
   0x1 LB: > { %s4005_s13 = sadd.s32 4294967295, %s4975_s12   ;;  %p4009_p0 = scmp.ge.s32.totalorder %s4975_s12, 1  ;;  %s4975_s12 = sphi %s4998_s12, %s13_s12  }
   0x2   : > { %p137_p1 = scmp.lt.s32.totalorder %s4975_s12, 3 }
   0x4   : > { %p138_p2 = pnand %p4009_p0, %p137_p1 }
   0x6   : > { %141 = sbr.rel (%p138_p2) target bundleno = 513 (0x201), region = 32 }
   0xb   : > { %v4879_v0 = vld [vmem:[%s6435_s1 + $0x38] sm:$0xff]   ;;  %p161_p3 = scmp.lt.s32.totalorder %s4005_s13, 1  ;;  %v4880_v1 = vld [vmem:[%s6435_s1 + $0x30] sm:$0xff]   ;;  %v4885_v2 = vld [vmem:[%s6435_s1 + $0x8] sm:$0xff]   ;;  %vm916_vm0 = vcmask 261120   ;;  %vm2945_vm1 = vcmask 1046528  }
   0xc   : > { %4541 = vmatprep.subr.bf16.mxu0 %v4879_v0  ;;  %4865 = vmatprep.subr.bf16.mxu1 %v4879_v0  ;;  %v4886_v3 = vld [vmem:[%s6435_s1 + $0x68] sm:$0xff]   ;;  %v4895_v6 = vld [vmem:[%s6435_s1] sm:$0xff]   ;;  %v4905_v21 = vld [vmem:[%s6435_s1 + $0x18] sm:$0xff]   ;;  %vm1838_vm2 = vsmask.f32 7424 }
   0xd   : > { %s6570_s13 = smov (!%p161_p3, %s4005_s13), 1  ;;  %4542 = vmatpush3.bf16.msra.mxu0 %v4879_v0  ;;  %4867 = vmatpush3.bf16.msra.mxu1 %v4879_v0  ;;  %v4896_v8 = vld [vmem:[%s6435_s1 + $0x60] sm:$0xff]   ;;  %v4904_v12 = vld [vmem:[%s6435_s1 + $0x48] sm:$0xff]   ;;  %v4915_v29 = vld [vmem:[%s6435_s1 + $0x10] sm:$0xff]  }
   0xe   : > { %4543 = vmatprep.subr.bf16.mxu0 %v4880_v1  ;;  %4866 = vmatprep.subr.bf16.mxu1 %v4880_v1  ;;  %s4869_s20 = smul.u32 148, %s6570_s13  ;;  %v4914_v28 = vld [vmem:[%s6435_s1 + $0x40] sm:$0xff]   ;;  %v5111_v31 = vld [vmem:[%s6435_s1 + $0x78] sm:$0xff]   ;;  %s4346_s4 = sshll.u32 %s6570_s13, 7 }
   0xf   : > { %v5117_v33 = vld [vmem:[%s6435_s1 + $0x58] sm:$0xff]   ;;  %s6171_s6 = scalar_lea.vmem %s6437_s3, %s4346_s4 }
  0x10   : > { %s5024_s25 = scalar_lea.vmem %s6434_s0, %s4869_s20 }
  0x11   : > { %4544 = vmatpush3.bf16.msra.mxu0 %v4880_v1  ;;  %4868 = vmatpush3.bf16.msra.mxu1 %v4880_v1  ;;  %v4881_v4 = vld [vmem:[%s5024_s25 + $0x8] sm:$0xff]   ;;  %v4883_v7 = vld [vmem:[%s5024_s25 + $0x10] sm:$0xff]   ;;  %v4887_v10 = vld [vmem:[%s5024_s25 + $0x18] sm:$0xff]  }
  0x12   : > { %v5028_v5 = vld [vmem:[%s5024_s25 + $0x48] sm:$0xff]   ;;  %4577 = vmatprep.subr.bf16.mxu1 %v4885_v2  ;;  %4613 = vmatprep.subr.bf16.mxu0 %v4886_v3  ;;  %v5041_v9 = vld [vmem:[%s5024_s25 + $0x50] sm:$0xff]   ;;  %v5048_v11 = vld [vmem:[%s5024_s25 + $0x58] sm:$0xff]  }
  0x13   : > { %4545 = vmatprep.mubr.msk.bf16.mxu0 %vm916_vm0, %v4881_v4  ;;  %4561 = vmatprep.mubr.msk.bf16.mxu1 %vm916_vm0, %v5028_v5  ;;  %v4889_v13 = vld [vmem:[%s5024_s25 + $0x20] sm:$0xff]   ;;  %v4891_v15 = vld [vmem:[%s5024_s25 + $0x28] sm:$0xff]   ;;  %v4893_v17 = vld [vmem:[%s5024_s25 + $0x30] sm:$0xff]  }
  0x14   : > { %4546 = vmatmul.mubr.msk.bf16.vlgmr.msra.gmra.mxu0 %vm916_vm0, %v4883_v7  ;;  %4562 = vmatmul.mubr.msk.bf16.vlgmr.msra.gmra.mxu1 %vm916_vm0, %v5041_v9  ;;  %v5058_v14 = vld [vmem:[%s5024_s25 + $0x60] sm:$0xff]   ;;  %v5062_v16 = vld [vmem:[%s5024_s25 + $0x68] sm:$0xff]   ;;  %v5072_v18 = vld [vmem:[%s5024_s25 + $0x70] sm:$0xff]  }
  0x15   : > { %4614 = vmatpush3.bf16.msra.mxu0 %v4886_v3  ;;  %4578 = vmatpush3.bf16.msra.mxu1 %v4885_v2  ;;  %v4897_v19 = vld [vmem:[%s5024_s25 + $0x38] sm:$0xff]   ;;  %v4899_v22 = vld [vmem:[%s5024_s25 + $0x40] sm:$0xff]   ;;  %v4902_v24 = vld [vmem:[%s5024_s25 + $0x10] sm:$0xff]  }
  0x16   : > { %4549 = vmatprep.mubr.msk.bf16.mxu0 %vm916_vm0, %v4887_v10  ;;  %4565 = vmatprep.mubr.msk.bf16.mxu1 %vm916_vm0, %v5048_v11  ;;  %v5076_v20 = vld [vmem:[%s5024_s25 + $0x78] sm:$0xff]   ;;  %v4900_v23 = vld [vmem:[%s5024_s25 + $0x80] sm:$0xff]   ;;  %v4907_v30 = vld [vmem:[%s5024_s25 + $0x28] sm:$0xff]  }
  0x17   : > { %4579 = vmatprep.subr.bf16.mxu1 %v4895_v6  ;;  %4615 = vmatprep.subr.bf16.mxu0 %v4896_v8  ;;  %v4901_v25 = vld [vmem:[%s5024_s25] sm:$0xff]   ;;  %v4903_v26 = vld [vmem:[%s5024_s25 + $0x18] sm:$0xff]   ;;  %v4908_v32 = vld [vmem:[%s5024_s25 + $0x30] sm:$0xff]  }
  0x18   : > { %v4906_v27 = vld [vmem:[%s5024_s25 + $0x20] sm:$0xff]   ;;  %v4909_v34 = vld [vmem:[%s5024_s25 + $0x38] sm:$0xff]   ;;  %v4911_v36 = vld [vmem:[%s5024_s25 + $0x48] sm:$0xff]  }
  0x19   : > { %4616 = vmatpush3.bf16.msra.mxu0 %v4896_v8  ;;  %4580 = vmatpush3.bf16.msra.mxu1 %v4895_v6  ;;  %v4910_v35 = vld [vmem:[%s5024_s25 + $0x40] sm:$0xff]   ;;  %v4912_v37 = vld [vmem:[%s5024_s25 + $0x50] sm:$0xff]   ;;  %v4913_v38 = vld [vmem:[%s5024_s25 + $0x58] sm:$0xff]  }
  0x1a   : > { %4649 = vmatprep.subr.bf16.mxu1 %v4904_v12  ;;  %4685 = vmatprep.subr.bf16.mxu0 %v4905_v21  ;;  %v5139_v39 = vld [vmem:[%s5024_s25 + $0x10] sm:$0xff]   ;;  %v4916_v40 = vld [vmem:[%s5024_s25 + $0x60] sm:$0xff]   ;;  %v2936_v41 = vld [vmem:[%s5024_s25 + $0x8] sm:$0xe] }
  0x1b   : > { %v5144_v42 = vld [vmem:[%s5024_s25 + $0x18] sm:$0xff]   ;;  %v5147_v43 = vrot.slane %v5139_v39, 1  ;;  %v1712_v44 = vld [vmem:[%s5024_s25 + $0xc] sm:$0xf]  ;;  %v1709_v47 = vld [vmem:[%s5024_s25] sm:$0xf] }
  0x1c   : > { %4550 = vmatmul.mubr.msk.bf16.gmra.mxu0 %vm916_vm0, %v4889_v13  ;;  %4566 = vmatmul.mubr.msk.bf16.gmra.mxu1 %vm916_vm0, %v5058_v14  ;;  %v4250_v45 = vcombine.low %v2936_v41, %v1712_v44  ;;  %v2949_v46 = vrot.slane %v5144_v42, 1  ;;  %v5157_v48 = vld [vmem:[%s5024_s25 + $0x20] sm:$0xff]   ;;  %v1711_v49 = vld [vmem:[%s5024_s25 + $0x8] sm:$0xf]  ;;  %v4918_v56 = vld [vmem:[%s5024_s25 + $0x70] sm:$0xff]   ;;  %v1855_v41 = vshll.u32 %v5144_v42, 16 }
  0x1d   : > { %4553 = vmatprep.mubr.msk.bf16.mxu0 %vm916_vm0, %v4891_v15  ;;  %4569 = vmatprep.mubr.msk.bf16.mxu1 %vm916_vm0, %v5062_v16  ;;  %v5163_v50 = vld [vmem:[%s5024_s25 + $0x28] sm:$0xff]   ;;  %v5171_v54 = vld [vmem:[%s5024_s25 + $0x4] sm:$0xf]  ;;  %v2951_v55 = vrot.slane %v5157_v48, 1  ;;  %v5181_v59 = vld [vmem:[%s5024_s25 + $0x30] sm:$0xff]   ;;  %v5193_v0 = vcombine.low %v1711_v49, %v1712_v44 }
  0x1e   : > { %v2946_v51 = vrot.slane %v4250_v45, 1  ;;  %v5167_v52 = vsel %vm2945_vm1, %v5147_v43, %v2949_v46  ;;  %v4917_v53 = vld [vmem:[%s5024_s25 + $0x68] sm:$0xff]   ;;  %v2953_v58 = vrot.slane %v5163_v50, 1  ;;  %v4183_v60 = vcombine.low %v1709_v47, %v5171_v54  ;;  %v5185_v61 = vld [vmem:[%s5024_s25 + $0x38] sm:$0xff]   ;;  %v5202_v3 = vld [vmem:[%s5024_s25 + $0x40] sm:$0xff]  }
  0x1f   : > { %v5188_v62 = vsel %vm2945_vm1, %v2949_v46, %v2951_v55  ;;  %v2955_v1 = vrot.slane %v5181_v59, 1  ;;  %v2957_v2 = vrot.slane %v5185_v61, 1  ;;  %v1842_v8 = vshll.u32 %v5193_v0, 16  ;;  %v5268_v46 = vld [vmem:[%s5024_s25 + $0x78] sm:$0xff]  }
  0x20   : > { %v5177_v57 = vsel %vm2945_vm1, %v2946_v51, %v5147_v43  ;;  %v5191_v63 = vsel %vm2945_vm1, %v2951_v55, %v2953_v58  ;;  %v1863_v45 = vshll.u32 %v5157_v48, 16 }
  0x21   : > { %v5210_v6 = vsel %vm2945_vm1, %v2955_v1, %v2957_v2 }
  0x24   : > { %4554 = vmatmul.mubr.msk.bf16.gmra.mxu0 %vm916_vm0, %v4893_v17  ;;  %4570 = vmatmul.mubr.msk.bf16.gmra.mxu1 %vm916_vm0, %v5072_v18 }
  0x25   : > { %4557 = vmatprep.mubr.msk.bf16.mxu0 %vm916_vm0, %v4897_v19  ;;  %4573 = vmatprep.mubr.msk.bf16.mxu1 %vm916_vm0, %v5076_v20 }
  0x2c   : > { %4558 = vmatmul.mubr.msk.bf16.gmra.mxu0 %vm916_vm0, %v4899_v22  ;;  %4574 = vmatmul.mubr.msk.bf16.gmra.mxu1 %vm916_vm0, %v4900_v23  ;;  %v1844_v23 = vrot.slane %v1842_v8, 1 }
  0x2d   : > { %4617 = vmatprep.mubr.msk.bf16.mxu0 %vm916_vm0, %v4902_v24  ;;  %4581 = vmatprep.mubr.msk.bf16.mxu1 %vm916_vm0, %v4901_v25  ;;  %v5230_v24 = vld [vmem:[%s5024_s25 + $0x58] sm:$0xff]  }
  0x34   : > { %4618 = vmatmul.mubr.msk.bf16.vlgmr.msra.gmra.mxu0 %vm916_vm0, %v4903_v26  ;;  %4582 = vmatmul.mubr.msk.bf16.vlgmr.msra.gmra.mxu1 %vm916_vm0, %v4881_v4  ;;  %v5205_v4 = vsel %vm2945_vm1, %v2953_v58, %v2955_v1  ;;  %v5237_v26 = vld [vmem:[%s5024_s25 + $0x60] sm:$0xff]   ;;  %v1857_v58 = vrot.slane %v1855_v41, 1  ;;  %v4936_v41 = vld [vmem:[%s6435_s1 + $0x70] sm:$0xff]  }
  0x35   : > { %4686 = vmatpush3.bf16.msra.mxu0 %v4905_v21  ;;  %4650 = vmatpush3.bf16.msra.mxu1 %v4904_v12  ;;  %v4920_v12 = vld [vmem:[%s5024_s25 + $0x80] sm:$0xff]  }
  0x36   : > { %4585 = vmatprep.mubr.msk.bf16.mxu1 %vm916_vm0, %v4883_v7  ;;  %4621 = vmatprep.mubr.msk.bf16.mxu0 %vm916_vm0, %v4906_v27  ;;  %v4919_v7 = vld [vmem:[%s5024_s25 + $0x78] sm:$0xff]  }
  0x37   : > { %4651 = vmatprep.subr.bf16.mxu1 %v4914_v28  ;;  %4687 = vmatprep.subr.bf16.mxu0 %v4915_v29 }
  0x39   : > { %4688 = vmatpush3.bf16.msra.mxu0 %v4915_v29  ;;  %4652 = vmatpush3.bf16.msra.mxu1 %v4914_v28  ;;  %v2965_v28 = vrot.slane %v5230_v24, 1 }
  0x3a   : > { %4721 = vmatprep.subr.bf16.mxu1 %v5111_v31  ;;  %4757 = vmatprep.subr.bf16.mxu0 %v5117_v33 }
  0x3c   : > { %4622 = vmatmul.mubr.msk.bf16.gmra.mxu0 %vm916_vm0, %v4907_v30  ;;  %4586 = vmatmul.mubr.msk.bf16.gmra.mxu1 %vm916_vm0, %v4887_v10  ;;  %v2959_v10 = vrot.slane %v5202_v3, 1  ;;  %v5249_v30 = vld [vmem:[%s5024_s25 + $0x68] sm:$0xff]  }
  0x3d   : > { %4625 = vmatprep.mubr.msk.bf16.mxu0 %vm916_vm0, %v4908_v32  ;;  %4589 = vmatprep.mubr.msk.bf16.mxu1 %vm916_vm0, %v4889_v13  ;;  %v1840_v13 = vshrl.u32 %v5193_v0, 16  ;;  %v2967_v32 = vrot.slane %v5237_v26, 1 }
  0x44   : > { %4626 = vmatmul.mubr.msk.bf16.gmra.mxu0 %vm916_vm0, %v4909_v34  ;;  %4590 = vmatmul.mubr.msk.bf16.gmra.mxu1 %vm916_vm0, %v4891_v15  ;;  %v4921_v34 = vld [vmem:[%s5024_s25 + $0x88] sm:$0xff]  }
  0x45   : > { %4629 = vmatprep.mubr.msk.bf16.mxu0 %vm916_vm0, %v4910_v35  ;;  %4593 = vmatprep.mubr.msk.bf16.mxu1 %vm916_vm0, %v4893_v17  ;;  %v1847_v17 = vshll.u32 %v5139_v39, 16  ;;  %v1845_v35 = vor.u32 %v1844_v23, %v1840_v13 }
  0x4c   : > { %4630 = vmatmul.mubr.msk.bf16.gmra.mxu0 %vm916_vm0, %v4911_v36  ;;  %4594 = vmatmul.mubr.msk.bf16.gmra.mxu1 %vm916_vm0, %v4897_v19  ;;  %v2201_v19 = vshrl.u32 %v4183_v60, 16  ;;  %v1849_v36 = vrot.slane %v1847_v17, 1 }
  0x4d   : > { %4633 = vmatprep.mubr.msk.bf16.mxu0 %vm916_vm0, %v4912_v37  ;;  %4597 = vmatprep.mubr.msk.bf16.mxu1 %vm916_vm0, %v4899_v22  ;;  %v5257_v37 = vld [vmem:[%s5024_s25 + $0x70] sm:$0xff]  }
  0x4e   : > { %v2971_v49 = vrot.slane %v5257_v37, 1  ;;  %v1850_v51 = vsel %vm1838_vm2, %v1845_v35, %v1849_v36 }
  0x54   : > { %4634 = vmatmul.mubr.msk.bf16.gmra.mxu0 %vm916_vm0, %v4913_v38  ;;  %4598 = vmatmul.mubr.msk.bf16.gmra.mxu1 %vm916_vm0, %v5028_v5  ;;  %v2203_v5 = vshll.u32 %v4183_v60, 16  ;;  %v5260_v38 = vsel %vm2945_vm1, %v2965_v28, %v2967_v32 }
  0x55   : > { %4637 = vmatprep.mubr.msk.bf16.mxu0 %vm916_vm0, %v4916_v40  ;;  %4601 = vmatprep.mubr.msk.bf16.mxu1 %vm916_vm0, %v5041_v9  ;;  %v5215_v9 = vld [vmem:[%s5024_s25 + $0x48] sm:$0xff]   ;;  %v1851_v40 = vshrl.u32 %v5139_v39, 16  ;;  %v5277_v39 = vld [vmem:[%s5024_s25 + $0x80] sm:$0xff]  }
  0x56   : > { %v2961_v15 = vrot.slane %v5215_v9, 1  ;;  %v2205_v21 = vrot.slane %v2203_v5, 1  ;;  %v2975_v60 = vrot.slane %v5277_v39, 1 }
  0x57   : > { %v1853_v1 = vor.u32 %v1851_v40, %v1849_v36  ;;  %v1879_v40 = vshll.u32 %v5181_v59, 16 }
  0x58   : > { %v5233_v25 = vsel %vm2945_vm1, %v2959_v10, %v2961_v15  ;;  %v2206_v29 = vor.u32 %v2205_v21, %v2201_v19  ;;  %v1871_v21 = vshll.u32 %v5163_v50, 16 }
  0x5a   : > { %v2207_v44 = vsel %vm1838_vm2, %v2206_v29, %v1844_v23 }
  0x5c   : > { %4638 = vmatmul.mubr.msk.bf16.gmra.mxu0 %vm916_vm0, %v4917_v53  ;;  %4602 = vmatmul.mubr.msk.bf16.gmra.mxu1 %vm916_vm0, %v5048_v11  ;;  %v5219_v11 = vld [vmem:[%s5024_s25 + $0x50] sm:$0xff]   ;;  %v1859_v53 = vshrl.u32 %v5144_v42, 16  ;;  %v5290_v42 = vld [vmem:[%s5024_s25 + $0x88] ss:$0 sps:$4 sm:$0x11]  }
  0x5d   : > { %4641 = vmatprep.mubr.msk.bf16.mxu0 %vm916_vm0, %v4918_v56  ;;  %4605 = vmatprep.mubr.msk.bf16.mxu1 %vm916_vm0, %v5058_v14  ;;  %v5224_v14 = vsel %vm2945_vm1, %v2957_v2, %v2959_v10  ;;  %v2963_v22 = vrot.slane %v5219_v11, 1  ;;  %v5284_v56 = vrot.slane %v5268_v46, 1  ;;  %v1865_v2 = vrot.slane %v1863_v45, 1  ;;  %v5300_v10 = vld [vmem:[%s5024_s25 + $0x14] sm:$0xf] }
  0x5e   : > { %v1861_v8 = vor.u32 %v1859_v53, %v1857_v58  ;;  %v2977_v13 = vrot.slane %v5290_v42, 1 }
  0x5f   : > { %v5240_v27 = vsel %vm2945_vm1, %v2961_v15, %v2963_v22  ;;  %6442 = vst [vmem:[#allocation2_spill] sm:$0xff] %v5284_v56  ;;  %v5296_v5 = vsel %vm2945_vm1, %v2971_v49, %v5284_v56  ;;  %v3391_v15 = vld [vmem:[%s5024_s25 + $0x10] sm:$0xe] }
  0x60   : > { %v4292_v19 = vcombine.low %v3391_v15, %v5300_v10  ;;  %v5318_v23 = vsel %vm2945_vm1, %v2975_v60, %v2977_v13  ;;  %v1883_v13 = vshrl.u32 %v5181_v59, 16 }
  0x62   : > { %v3400_v36 = vrot.slane %v4292_v19, 1  ;;  %v1891_v19 = vshrl.u32 %v5185_v61, 16 }
  0x64   : > { %4642 = vmatmul.mubr.msk.bf16.gmra.mxu0 %vm916_vm0, %v4919_v7  ;;  %4606 = vmatmul.mubr.msk.bf16.gmra.mxu1 %vm916_vm0, %v5062_v16  ;;  %v5254_v16 = vsel %vm2945_vm1, %v2963_v22, %v2965_v28  ;;  %v2930_v7 = vld [vmem:[%s5024_s25] sm:$0xe]  ;;  %v3204_v28 = vrot.slane %v5193_v0, 1 }
  0x65   : > { %4645 = vmatprep.mubr.msk.bf16.mxu0 %vm916_vm0, %v4920_v12  ;;  %4609 = vmatprep.mubr.msk.bf16.mxu1 %vm916_vm0, %v5072_v18  ;;  %v2969_v18 = vrot.slane %v5249_v30, 1  ;;  %v5307_v12 = vsel %vm2945_vm1, %v5284_v56, %v2975_v60  ;;  %v4269_v17 = vcombine.low %v2930_v7, %v5171_v54  ;;  %v5315_v22 = vld [vmem:[%s5024_s25 + $0x20] sm:$0xff]   ;;  %v1866_v54 = vsel %vm1838_vm2, %v1861_v8, %v1865_v2 }
  0x66   : > { %v3403_v0 = vrot.slane %v5315_v22, 1  ;;  %v5343_v45 = vsel %vm2945_vm1, %v3204_v28, %v5147_v43  ;;  %v1881_v60 = vrot.slane %v1879_v40, 1 }
  0x67   : > { %v5271_v47 = vsel %vm2945_vm1, %v2967_v32, %v2969_v18  ;;  %v5281_v55 = vsel %vm2945_vm1, %v2969_v18, %v2971_v49  ;;  %v1858_v32 = vsel %vm1838_vm2, %v1853_v1, %v1857_v58  ;;  %v3203_v35 = vrot.slane %v4269_v17, 1  ;;  %v5355_v58 = vld [vmem:[%s6435_s1 + $0x88] sm:$0xff]  }
  0x68   : > { %v1875_v18 = vshrl.u32 %v5163_v50, 16  ;;  %v1873_v49 = vrot.slane %v1871_v21, 1  ;;  %v5364_v1 = vld [vmem:[%s5024_s25 + $0x28] sm:$0xff]   ;;  %v1895_v21 = vshll.u32 %v5202_v3, 16 }
  0x69   : > { %v3405_v7 = vrot.slane %v5364_v1, 1 }
  0x6a   : > { %v1877_v43 = vor.u32 %v1875_v18, %v1873_v49  ;;  %v1903_v18 = vshll.u32 %v5215_v9, 16 }
  0x6c   : > { %4646 = vmatmul.mubr.msk.bf16.gmra.mxu0 %vm916_vm0, %v4921_v34  ;;  %4610 = vmatmul.mubr.msk.bf16.gmra.mxu1 %vm916_vm0, %v5076_v20  ;;  %v5303_v20 = vld [vmem:[%s5024_s25 + $0x18] sm:$0xff]   ;;  %v1867_v34 = vshrl.u32 %v5157_v48, 16  ;;  %v4937_v48 = vld [vmem:[%s6435_s1 + $0x50] sm:$0xff]   ;;  %v1882_v17 = vsel %vm1838_vm2, %v1877_v43, %v1881_v60 }
  0x6d   : > { %4689 = vmatprep.mubr.msk.bf16.mxu0 %vm916_vm0, %v2207_v44  ;;  %4653 = vmatprep.mubr.msk.bf16.mxu1 %vm916_vm0, %v1850_v51  ;;  %v3401_v29 = vrot.slane %v5303_v20, 1  ;;  %v5336_v44 = vsel %vm2945_vm1, %v3203_v35, %v3204_v28  ;;  %v5380_v28 = vsel %vm2945_vm1, %v3403_v0, %v3405_v7  ;;  %v5390_v35 = vld [vmem:[%s5024_s25 + $0x38] sm:$0xff]  }
  0x6e   : > { %v1869_v53 = vor.u32 %v1867_v34, %v1865_v2  ;;  %v1887_v2 = vshll.u32 %v5185_v61, 16  ;;  %v1885_v61 = vor.u32 %v1883_v13, %v1881_v60  ;;  %v1897_v34 = vrot.slane %v1895_v21, 1  ;;  %v5417_v13 = vld [vmem:[%s5024_s25 + $0x50] sm:$0xff]  }
  0x6f   : > { %v5339_v50 = vsel %vm2945_vm1, %v3400_v36, %v3401_v29  ;;  %v5393_v36 = vld [vmem:[%s5024_s25 + $0x40] sm:$0xff]   ;;  %v1915_v21 = vshrl.u32 %v5219_v11, 16 }
  0x70   : > { %v1874_v8 = vsel %vm1838_vm2, %v1869_v53, %v1873_v49  ;;  %v1907_v49 = vshrl.u32 %v5215_v9, 16  ;;  %v1911_v53 = vshll.u32 %v5219_v11, 16 }
  0x72   : > { %v1913_v9 = vrot.slane %v1911_v53, 1  ;;  %v5441_v53 = vld [vmem:[%s5024_s25 + $0x60] sm:$0xff]  }
  0x74   : > { %4690 = vmatmul.mubr.msk.bf16.vlgmr.msra.gmra.mxu0 %vm916_vm0, %v1850_v51  ;;  %4654 = vmatmul.mubr.msk.bf16.vlgmr.msra.gmra.mxu1 %vm916_vm0, %v1858_v32  ;;  %v5348_v51 = vsel %vm2945_vm1, %v3401_v29, %v3403_v0  ;;  %v1889_v29 = vrot.slane %v1887_v2, 1  ;;  %v3411_v0 = vrot.slane %v5393_v36, 1 }
  0x75   : > { %4758 = vmatpush3.bf16.msra.mxu0 %v5117_v33  ;;  %4722 = vmatpush3.bf16.msra.mxu1 %v5111_v31  ;;  %v5361_v33 = vld [vmem:[%s6435_s1 + $0x28] sm:$0xff]   ;;  %v5367_v31 = vld [vmem:[%s5024_s25 + $0x30] sm:$0xff]  }
  0x76   : > { %4657 = vmatprep.mubr.msk.bf16.mxu1 %vm916_vm0, %v1866_v54  ;;  %4693 = vmatprep.mubr.msk.bf16.mxu0 %vm916_vm0, %v1858_v32  ;;  %v3407_v15 = vrot.slane %v5367_v31, 1  ;;  %v1893_v32 = vor.u32 %v1891_v19, %v1889_v29  ;;  %v1890_v40 = vsel %vm1838_vm2, %v1885_v61, %v1889_v29  ;;  %v3415_v29 = vrot.slane %v5417_v13, 1 }
  0x77   : > { %4723 = vmatprep.subr.bf16.mxu1 %v4936_v41  ;;  %4759 = vmatprep.subr.bf16.mxu0 %v4937_v48 }
  0x78   : > { %v5384_v59 = vsel %vm2945_vm1, %v3405_v7, %v3407_v15 }
  0x79   : > { %4760 = vmatpush3.bf16.msra.mxu0 %v4937_v48  ;;  %4724 = vmatpush3.bf16.msra.mxu1 %v4936_v41  ;;  %v1899_v41 = vshrl.u32 %v5202_v3, 16  ;;  %v1898_v48 = vsel %vm1838_vm2, %v1893_v32, %v1897_v34  ;;  %v1905_v3 = vrot.slane %v1903_v18, 1  ;;  %v1923_v32 = vshrl.u32 %v5230_v24, 16 }
  0x7a   : > { %4829 = vmatprep.subr.bf16.mxu0 %v5355_v58  ;;  %4793 = vmatprep.subr.bf16.mxu1 %v5361_v33 }
  0x7b   : > { %v1901_v2 = vor.u32 %v1899_v41, %v1897_v34  ;;  %v1909_v7 = vor.u32 %v1907_v49, %v1905_v3  ;;  %v1927_v34 = vshll.u32 %v5237_v26, 16  ;;  %v5438_v49 = vld [vmem:[%s5024_s25 + $0x58] sm:$0xff]  }
  0x7c   : > { %4694 = vmatmul.mubr.msk.bf16.gmra.mxu0 %vm916_vm0, %v1866_v54  ;;  %4658 = vmatmul.mubr.msk.bf16.gmra.mxu1 %vm916_vm0, %v1874_v8  ;;  %v3409_v54 = vrot.slane %v5390_v35, 1 }
  0x7d   : > { %4697 = vmatprep.mubr.msk.bf16.mxu0 %vm916_vm0, %v1874_v8  ;;  %4661 = vmatprep.mubr.msk.bf16.mxu1 %vm916_vm0, %v1882_v17  ;;  %v5414_v8 = vld [vmem:[%s5024_s25 + $0x48] sm:$0xff]   ;;  %v1906_v19 = vsel %vm1838_vm2, %v1901_v2, %v1905_v3  ;;  %v1914_v61 = vsel %vm1838_vm2, %v1909_v7, %v1913_v9  ;;  %v1931_v2 = vshrl.u32 %v5237_v26, 16  ;;  %v3419_v7 = vrot.slane %v5441_v53, 1 }
  0x7e   : > { %v5404_v43 = vsel %vm2945_vm1, %v3407_v15, %v3409_v54  ;;  %v5408_v60 = vsel %vm2945_vm1, %v3409_v54, %v3411_v0  ;;  %v1919_v15 = vshll.u32 %v5230_v24, 16  ;;  %v1929_v24 = vrot.slane %v1927_v34, 1 }
  0x80   : > { %v1921_v11 = vrot.slane %v1919_v15, 1  ;;  %v1939_v15 = vshrl.u32 %v5249_v30, 16 }
  0x82   : > { %v1925_v41 = vor.u32 %v1923_v32, %v1921_v11  ;;  %v1933_v32 = vor.u32 %v1931_v2, %v1929_v24 }
  0x84   : > { %4698 = vmatmul.mubr.msk.bf16.gmra.mxu0 %vm916_vm0, %v1882_v17  ;;  %4662 = vmatmul.mubr.msk.bf16.gmra.mxu1 %vm916_vm0, %v1890_v40  ;;  %v3413_v17 = vrot.slane %v5414_v8, 1 }
  0x85   : > { %4701 = vmatprep.mubr.msk.bf16.mxu0 %vm916_vm0, %v1890_v40  ;;  %4665 = vmatprep.mubr.msk.bf16.mxu1 %vm916_vm0, %v1898_v48  ;;  %v1917_v40 = vor.u32 %v1915_v21, %v1913_v9  ;;  %v1930_v9 = vsel %vm1838_vm2, %v1925_v41, %v1929_v24  ;;  %v1947_v41 = vshrl.u32 %v5257_v37, 16  ;;  %v1959_v24 = vshll.u32 %v5277_v39, 16 }
  0x86   : > { %v5428_v18 = vsel %vm2945_vm1, %v3411_v0, %v3413_v17  ;;  %v5432_v54 = vsel %vm2945_vm1, %v3413_v17, %v3415_v29  ;;  %v1935_v0 = vshll.u32 %v5249_v30, 16  ;;  %v1943_v17 = vshll.u32 %v5257_v37, 16 }
  0x87   : > { %v1922_v3 = vsel %vm1838_vm2, %v1917_v40, %v1921_v11  ;;  %v5462_v11 = vld [vmem:[%s5024_s25 + $0x68] sm:$0xff]   ;;  %v2392_v40 = vld [vmem:[%s5024_s25 + $0x10] sm:$0xf] }
  0x88   : > { %v1937_v26 = vrot.slane %v1935_v0, 1  ;;  %v1945_v30 = vrot.slane %v1943_v17, 1  ;;  %v1955_v0 = vshrl.u32 %v5268_v46, 16  ;;  %v4207_v17 = vcombine.low %v2392_v40, %v5300_v10 }
  0x89   : > { %v1961_v10 = vrot.slane %v1959_v24, 1  ;;  %v2521_v24 = vshll.u32 %v5303_v20, 16 }
  0x8a   : > { %v1941_v34 = vor.u32 %v1939_v15, %v1937_v26  ;;  %v2516_v40 = vshll.u32 %v4207_v17, 16 }
  0x8c   : > { %4702 = vmatmul.mubr.msk.bf16.gmra.mxu0 %vm916_vm0, %v1898_v48  ;;  %4666 = vmatmul.mubr.msk.bf16.gmra.mxu1 %vm916_vm0, %v1906_v19  ;;  %v3417_v48 = vrot.slane %v5438_v49, 1  ;;  %v1946_v15 = vsel %vm1838_vm2, %v1941_v34, %v1945_v30 }
  0x8d   : > { %4705 = vmatprep.mubr.msk.bf16.mxu0 %vm916_vm0, %v1906_v19  ;;  %4669 = vmatprep.mubr.msk.bf16.mxu1 %vm916_vm0, %v1914_v61 }
  0x8e   : > { %v5452_v19 = vsel %vm2945_vm1, %v3415_v29, %v3417_v48  ;;  %v5456_v21 = vsel %vm2945_vm1, %v3417_v48, %v3419_v7  ;;  %v1951_v29 = vshll.u32 %v5268_v46, 16  ;;  %v3421_v48 = vrot.slane %v5462_v11, 1  ;;  %v5487_v46 = vld [vmem:[%s5024_s25 + $0x80] ss:$0 sps:$4 sm:$0x11]  }
  0x8f   : > { %6443 = vst [vmem:[#allocation3_spill] sm:$0xff] %v5452_v19  ;;  %6444 = vst [vmem:[#allocation4_spill] sm:$0xff] %v5456_v21  ;;  %v1967_v21 = vshll.u32 %v5290_v42, 16  ;;  %v5515_v19 = vld [vmem:[%s5024_s25 + $0x88] sm:$0xff]  }
  0x90   : > { %v5478_v56 = vsel %vm2945_vm1, %v3419_v7, %v3421_v48  ;;  %v1953_v37 = vrot.slane %v1951_v29, 1  ;;  %6447 = vst [vmem:[#allocation7_spill] sm:$0xff] %v5487_v46  ;;  %v5491_v7 = vld [vmem:[%s5024_s25 + $0x78] sm:$0xff]   ;;  %v2209_v29 = vshll.u32 %v5487_v46, 16 }
  0x91   : > { %6445 = vst [vmem:[#allocation5_spill] sm:$0xff] %v5478_v56  ;;  %v5494_v56 = vld [vmem:[%s5024_s25 + $0x80] sm:$0xff]  }
  0x92   : > { %v1957_v34 = vor.u32 %v1955_v0, %v1953_v37  ;;  %v2518_v0 = vrot.slane %v2516_v40, 1  ;;  %v2211_v42 = vrot.slane %v2209_v29, 1  ;;  %v2523_v40 = vrot.slane %v2521_v24, 1 }
  0x93   : > { %v2525_v29 = vshrl.u32 %v5303_v20, 16  ;;  %v2545_v24 = vshll.u32 %v5367_v31, 16 }
  0x94   : > { %4706 = vmatmul.mubr.msk.bf16.gmra.mxu0 %vm916_vm0, %v1914_v61  ;;  %4670 = vmatmul.mubr.msk.bf16.gmra.mxu1 %vm916_vm0, %v1922_v3  ;;  %v5467_v61 = vld [vmem:[%s5024_s25 + $0x70] sm:$0xff]  }
  0x95   : > { %4709 = vmatprep.mubr.msk.bf16.mxu0 %vm916_vm0, %v1922_v3  ;;  %4673 = vmatprep.mubr.msk.bf16.mxu1 %vm916_vm0, %v1930_v9  ;;  %v1938_v3 = vsel %vm1838_vm2, %v1933_v32, %v1937_v26  ;;  %v3423_v2 = vrot.slane %v5467_v61, 1  ;;  %v1949_v32 = vor.u32 %v1947_v41, %v1945_v30  ;;  %v3427_v30 = vrot.slane %v5494_v56, 1 }
  0x96   : > { %v2514_v41 = vshrl.u32 %v4207_v17, 16  ;;  %v1969_v17 = vrot.slane %v1967_v21, 1 }
  0x97   : > { %v5482_v26 = vsel %vm2945_vm1, %v3421_v48, %v3423_v2  ;;  %v3425_v48 = vrot.slane %v5491_v7, 1 }
  0x98   : > { %6446 = vst [vmem:[#allocation6_spill] sm:$0xff] %v5482_v26  ;;  %v1962_v26 = vsel %vm1838_vm2, %v1957_v34, %v1961_v10 }
  0x99   : > { %v5509_v46 = vsel %vm2945_vm1, %v3425_v48, %v3427_v30 }
  0x9a   : > { %6449 = vst [vmem:[#allocation9_spill] sm:$0xff] %v5509_v46  ;;  %v3429_v46 = vrot.slane %v5515_v19, 1 }
  0x9c   : > { %4710 = vmatmul.mubr.msk.bf16.gmra.mxu0 %vm916_vm0, %v1930_v9  ;;  %4674 = vmatmul.mubr.msk.bf16.gmra.mxu1 %vm916_vm0, %v1938_v3  ;;  %v1963_v9 = vshrl.u32 %v5277_v39, 16  ;;  %v5505_v39 = vsel %vm2945_vm1, %v3423_v2, %v3425_v48  ;;  %v5518_v2 = vld [vmem:[%s5024_s25 + $0x90] ss:$0 sps:$4 sm:$0x11]   ;;  %v2529_v48 = vshll.u32 %v5315_v22, 16 }
  0x9d   : > { %4713 = vmatprep.mubr.msk.bf16.mxu0 %vm916_vm0, %v1938_v3  ;;  %4677 = vmatprep.mubr.msk.bf16.mxu1 %vm916_vm0, %v1946_v15  ;;  %v1954_v3 = vsel %vm1838_vm2, %v1949_v32, %v1953_v37  ;;  %6448 = vst [vmem:[#allocation8_spill] sm:$0xff] %v5505_v39  ;;  %v2519_v32 = vor.u32 %v2518_v0, %v2514_v41 }
  0x9e   : > { %v1965_v37 = vor.u32 %v1963_v9, %v1961_v10  ;;  %v2533_v10 = vshrl.u32 %v5315_v22, 16  ;;  %v2537_v9 = vshll.u32 %v5364_v1, 16  ;;  %v2531_v20 = vrot.slane %v2529_v48, 1 }
  0x9f   : > { %v2524_v21 = vsel %vm1838_vm2, %v2519_v32, %v2523_v40  ;;  %v2527_v41 = vor.u32 %v2525_v29, %v2523_v40  ;;  %v2565_v29 = vshrl.u32 %v5393_v36, 16 }
  0xa0   : > { %v1970_v39 = vsel %vm1838_vm2, %v1965_v37, %v1969_v17  ;;  %v2535_v22 = vor.u32 %v2533_v10, %v2531_v20  ;;  %v2539_v0 = vrot.slane %v2537_v9, 1  ;;  %v2549_v37 = vshrl.u32 %v5367_v31, 16  ;;  %v4960_v17 = vld [vmem:[%s6435_s1 + $0x80] sm:$0xff]  }
  0xa4   : > { %4714 = vmatmul.mubr.msk.bf16.gmra.mxu0 %vm916_vm0, %v1946_v15  ;;  %4678 = vmatmul.mubr.msk.bf16.gmra.mxu1 %vm916_vm0, %v1954_v3  ;;  %v2212_v15 = vsel %vm1838_vm2, %v1957_v34, %v2211_v42  ;;  %v2541_v42 = vshrl.u32 %v5364_v1, 16  ;;  %v2547_v1 = vrot.slane %v2545_v24, 1  ;;  %v2585_v24 = vshll.u32 %v5438_v49, 16 }
  0xa5   : > { %4717 = vmatprep.mubr.msk.bf16.mxu0 %vm916_vm0, %v1954_v3  ;;  %4681 = vmatprep.mubr.msk.bf16.mxu1 %vm916_vm0, %v1962_v26  ;;  %v3431_v26 = vrot.slane %v5518_v2, 1  ;;  %v5530_v3 = vsel %vm2945_vm1, %v3427_v30, %v3429_v46  ;;  %v2532_v30 = vsel %vm1838_vm2, %v2527_v41, %v2531_v20  ;;  %v2577_v20 = vshll.u32 %v5417_v13, 16 }
  0xa6   : > { %v2543_v31 = vor.u32 %v2541_v42, %v2539_v0  ;;  %v2551_v32 = vor.u32 %v2549_v37, %v2547_v1  ;;  %v2573_v41 = vshrl.u32 %v5414_v8, 16  ;;  %v2593_v37 = vshll.u32 %v5441_v53, 16 }
  0xa7   : > { %v5534_v34 = vsel %vm2945_vm1, %v3429_v46, %v3431_v26  ;;  %v2540_v46 = vsel %vm1838_vm2, %v2535_v22, %v2539_v0  ;;  %v2569_v26 = vshll.u32 %v5414_v8, 16  ;;  %v2581_v0 = vshrl.u32 %v5417_v13, 16 }
  0xa8   : > { %v2548_v48 = vsel %vm1838_vm2, %v2543_v31, %v2547_v1  ;;  %v2587_v8 = vrot.slane %v2585_v24, 1  ;;  %v2601_v1 = vshll.u32 %v5462_v11, 16  ;;  %v2595_v31 = vrot.slane %v2593_v37, 1 }
  0xa9   : > { %v2571_v9 = vrot.slane %v2569_v26, 1  ;;  %v2633_v37 = vshll.u32 %v5515_v19, 16 }
  0xab   : > { %v2575_v42 = vor.u32 %v2573_v41, %v2571_v9 }
  0xac   : > { %4718 = vmatmul.mubr.msk.bf16.gmra.mxu0 %vm916_vm0, %v2212_v15  ;;  %4682 = vmatmul.mubr.msk.bf16.gmra.mxu1 %vm916_vm0, %v1970_v39  ;;  %v2553_v39 = vshll.u32 %v5390_v35, 16  ;;  %v2561_v15 = vshll.u32 %v5393_v36, 16 }
  0xad   : > { %4761 = vmatprep.mubr.msk.bf16.mxu0 %vm916_vm0, %v5177_v57  ;;  %4725 = vmatprep.mubr.msk.bf16.mxu1 %vm916_vm0, %v2524_v21  ;;  %v4959_v57 = vld [vmem:[%s6435_s1 + $0x20] sm:$0xff]  }
  0xae   : > { %v2555_v40 = vrot.slane %v2553_v39, 1  ;;  %v2563_v21 = vrot.slane %v2561_v15, 1  ;;  %v2589_v39 = vshrl.u32 %v5438_v49, 16  ;;  %v2603_v49 = vrot.slane %v2601_v1, 1 }
  0xaf   : > { %v2609_v15 = vshll.u32 %v5467_v61, 16 }
  0xb4   : > { %4762 = vmatmul.mubr.msk.bf16.vlgmr.msra.gmra.mxu0 %vm916_vm0, %v5167_v52  ;;  %4726 = vmatmul.mubr.msk.bf16.vlgmr.msra.gmra.mxu1 %vm916_vm0, %v2532_v30  ;;  %v2579_v30 = vrot.slane %v2577_v20, 1 }
  0xb5   : > { %4830 = vmatpush3.bf16.msra.mxu0 %v5355_v58  ;;  %4794 = vmatpush3.bf16.msra.mxu1 %v5361_v33  ;;  %v2557_v58 = vshrl.u32 %v5390_v35, 16  ;;  %v2556_v33 = vsel %vm1838_vm2, %v2551_v32, %v2555_v40  ;;  %v2567_v35 = vor.u32 %v2565_v29, %v2563_v21  ;;  %v2591_v32 = vor.u32 %v2589_v39, %v2587_v8 }
  0xb6   : > { %4729 = vmatprep.mubr.msk.bf16.mxu1 %vm916_vm0, %v2540_v46  ;;  %4765 = vmatprep.mubr.msk.bf16.mxu0 %vm916_vm0, %v5188_v62  ;;  %v2583_v46 = vor.u32 %v2581_v0, %v2579_v30  ;;  %v2580_v13 = vsel %vm1838_vm2, %v2575_v42, %v2579_v30  ;;  %v2617_v29 = vshll.u32 %v5491_v7, 16  ;;  %v2621_v30 = vshrl.u32 %v5491_v7, 16 }
  0xb7   : > { %4795 = vmatprep.subr.bf16.mxu1 %v4959_v57  ;;  %4831 = vmatprep.subr.bf16.mxu0 %v4960_v17  ;;  %v2559_v10 = vor.u32 %v2557_v58, %v2555_v40  ;;  %v2572_v22 = vsel %vm1838_vm2, %v2567_v35, %v2571_v9 }
  0xb8   : > { %v2619_v20 = vrot.slane %v2617_v29, 1 }
  0xb9   : > { %4832 = vmatpush3.bf16.msra.mxu0 %v4960_v17  ;;  %4796 = vmatpush3.bf16.msra.mxu1 %v4959_v57  ;;  %v2564_v36 = vsel %vm1838_vm2, %v2559_v10, %v2563_v21  ;;  %v2588_v57 = vsel %vm1838_vm2, %v2583_v46, %v2587_v8  ;;  %v2597_v17 = vshrl.u32 %v5441_v53, 16  ;;  %v2596_v53 = vsel %vm1838_vm2, %v2591_v32, %v2595_v31 }
  0xba   : > { %v2611_v10 = vrot.slane %v2609_v15, 1  ;;  %v2629_v8 = vshrl.u32 %v5494_v56, 16 }
  0xbb   : > { %v2599_v40 = vor.u32 %v2597_v17, %v2595_v31  ;;  %v2635_v31 = vrot.slane %v2633_v37, 1 }
  0xbc   : > { %4766 = vmatmul.mubr.msk.bf16.gmra.mxu0 %vm916_vm0, %v5191_v63  ;;  %4730 = vmatmul.mubr.msk.bf16.gmra.mxu1 %vm916_vm0, %v2548_v48  ;;  %v2605_v48 = vshrl.u32 %v5462_v11, 16 }
  0xbd   : > { %4769 = vmatprep.mubr.msk.bf16.mxu0 %vm916_vm0, %v5205_v4  ;;  %4733 = vmatprep.mubr.msk.bf16.mxu1 %vm916_vm0, %v2556_v33  ;;  %v2604_v58 = vsel %vm1838_vm2, %v2599_v40, %v2603_v49  ;;  %v2613_v33 = vshrl.u32 %v5467_v61, 16 }
  0xbe   : > { %v2607_v61 = vor.u32 %v2605_v48, %v2603_v49  ;;  %v2641_v48 = vshll.u32 %v5518_v2, 16 }
  0xbf   : > { %v2615_v9 = vor.u32 %v2613_v33, %v2611_v10 }
  0xc0   : > { %v2612_v24 = vsel %vm1838_vm2, %v2607_v61, %v2611_v10  ;;  %v2643_v2 = vrot.slane %v2641_v48, 1 }
  0xc1   : > { %v2620_v46 = vsel %vm1838_vm2, %v2615_v9, %v2619_v20 }
  0xc4   : > { %4770 = vmatmul.mubr.msk.bf16.gmra.mxu0 %vm916_vm0, %v5210_v6  ;;  %4734 = vmatmul.mubr.msk.bf16.gmra.mxu1 %vm916_vm0, %v2564_v36 }
  0xc5   : > { %4773 = vmatprep.mubr.msk.bf16.mxu0 %vm916_vm0, %v5224_v14  ;;  %4737 = vmatprep.mubr.msk.bf16.mxu1 %vm916_vm0, %v2572_v22  ;;  %v2625_v22 = vshll.u32 %v5494_v56, 16  ;;  %v2623_v56 = vor.u32 %v2621_v30, %v2619_v20 }
  0xc7   : > { %v2627_v7 = vrot.slane %v2625_v22, 1 }
  0xc9   : > { %v2631_v1 = vor.u32 %v2629_v8, %v2627_v7  ;;  %v2628_v15 = vsel %vm1838_vm2, %v2623_v56, %v2627_v7 }
  0xcb   : > { %v2636_v33 = vsel %vm1838_vm2, %v2631_v1, %v2635_v31 }
  0xcc   : > { %4774 = vmatmul.mubr.msk.bf16.gmra.mxu0 %vm916_vm0, %v5233_v25  ;;  %4738 = vmatmul.mubr.msk.bf16.gmra.mxu1 %vm916_vm0, %v2580_v13 }
  0xcd   : > { %4777 = vmatprep.mubr.msk.bf16.mxu0 %vm916_vm0, %v5240_v27  ;;  %4741 = vmatprep.mubr.msk.bf16.mxu1 %vm916_vm0, %v2588_v57 }
  0xd4   : > { %v5602_v26 = vpop.f32.mrf.mxu0  ;;  %4778 = vmatmul.mubr.msk.bf16.gmra.mxu0 %vm916_vm0, %v5254_v16  ;;  %v5606_v21 = vpop.f32.mrf.mxu1  ;;  %4742 = vmatmul.mubr.msk.bf16.gmra.mxu1 %vm916_vm0, %v2596_v53  ;;  %v2637_v53 = vshrl.u32 %v5515_v19, 16 }
  0xd5   : > { %4781 = vmatprep.mubr.msk.bf16.mxu0 %vm916_vm0, %v5260_v38  ;;  %4745 = vmatprep.mubr.msk.bf16.mxu1 %vm916_vm0, %v2604_v58 }
  0xd6   : > { %v5611_v11 = vpop.f32.mrf.mxu0  ;;  %v5614_v35 = vpop.f32.mrf.mxu1  ;;  %v2639_v19 = vor.u32 %v2637_v53, %v2635_v31 }
  0xd8   : > { %v5616_v36 = vpop.f32.mrf.mxu0  ;;  %v5618_v41 = vpop.f32.mrf.mxu1  ;;  %v2644_v30 = vsel %vm1838_vm2, %v2639_v19, %v2643_v2 }
  0xda   : > { %v5621_v0 = vpop.f32.mrf.mxu0  ;;  %v5625_v42 = vpop.f32.mrf.mxu1 }
  0xdc   : > { %v5630_v13 = vpop.f32.mrf.mxu0  ;;  %4782 = vmatmul.mubr.msk.bf16.gmra.mxu0 %vm916_vm0, %v5271_v47  ;;  %v5634_v39 = vpop.f32.mrf.mxu1  ;;  %4746 = vmatmul.mubr.msk.bf16.gmra.mxu1 %vm916_vm0, %v2612_v24 }
  0xdd   : > { %4785 = vmatprep.mubr.msk.bf16.mxu0 %vm916_vm0, %v5281_v55  ;;  %4749 = vmatprep.mubr.msk.bf16.mxu1 %vm916_vm0, %v2620_v46 }
  0xde   : > { %v5639_v57 = vpop.f32.mrf.mxu0  ;;  %v5642_v17 = vpop.f32.mrf.mxu1 }
  0xe0   : > { %v5644_v32 = vpop.f32.mrf.mxu0  ;;  %v5646_v40 = vpop.f32.mrf.mxu1 }
  0xe2   : > { %v5648_v49 = vpop.f32.mrf.mxu0  ;;  %v5653_v58 = vpop.f32.mrf.mxu1 }
  0xe4   : > { %v5656_v29 = vpop.f32.mrf.mxu0  ;;  %4786 = vmatmul.mubr.msk.bf16.gmra.mxu0 %vm916_vm0, %v5296_v5  ;;  %v5660_v10 = vpop.f32.mrf.mxu1  ;;  %4750 = vmatmul.mubr.msk.bf16.gmra.mxu1 %vm916_vm0, %v2628_v15 }
  0xe5   : > { %4789 = vmatprep.mubr.msk.bf16.mxu0 %vm916_vm0, %v5307_v12  ;;  %4753 = vmatprep.mubr.msk.bf16.mxu1 %vm916_vm0, %v2636_v33 }
  0xe6   : > { %v5665_v61 = vpop.f32.mrf.mxu0  ;;  %v5668_v9 = vpop.f32.mrf.mxu1 }
  0xe8   : > { %v5670_v20 = vpop.f32.mrf.mxu0  ;;  %v5672_v22 = vpop.f32.mrf.mxu1 }
  0xea   : > { %v5674_v24 = vpop.f32.mrf.mxu0  ;;  %v5677_v46 = vpop.f32.mrf.mxu1 }
  0xec   : > { %v5679_v8 = vpop.f32.mrf.mxu0  ;;  %4790 = vmatmul.mubr.msk.bf16.gmra.mxu0 %vm916_vm0, %v5318_v23  ;;  %v5683_v12 = vpop.f32.mrf.mxu1  ;;  %4754 = vmatmul.mubr.msk.bf16.gmra.mxu1 %vm916_vm0, %v2644_v30 }
  0xed   : > { %4833 = vmatprep.mubr.msk.bf16.mxu0 %vm916_vm0, %v5339_v50  ;;  %4797 = vmatprep.mubr.msk.bf16.mxu1 %vm916_vm0, %v5336_v44 }
  0xee   : > { %v5688_v37 = vpop.f32.mrf.mxu0  ;;  %v5692_v7 = vpop.f32.mrf.mxu1 }
  0xf0   : > { %v5694_v56 = vpop.f32.mrf.mxu0  ;;  %v5696_v1 = vpop.f32.mrf.mxu1 }
  0xf1   : > { %6450 = vst [vmem:[#allocation10_spill] sm:$0xff] %v5696_v1 }
  0xf2   : > { %v5698_v31 = vpop.f32.mrf.mxu0  ;;  %v5700_v23 = vpop.f32.mrf.mxu1 }
  0xf3   : > { %6451 = vst [vmem:[#allocation11_spill] sm:$0xff] %v5700_v23 }
  0xf4   : > { %v4619_v15 = vpop.f32.mrf.mxu0  ;;  %4834 = vmatmul.mubr.msk.bf16.vlgmr.msra.gmra.mxu0 %vm916_vm0, %v5348_v51  ;;  %v4583_v50 = vpop.f32.mrf.mxu1  ;;  %4798 = vmatmul.mubr.msk.bf16.vlgmr.msra.gmra.mxu1 %vm916_vm0, %v5343_v45 }
  0xf5   : > { %4837 = vmatprep.mubr.msk.bf16.mxu0 %vm916_vm0, %v5380_v28  ;;  %v1189_v44 = vadd.f32 %v4583_v50, %v5602_v26  ;;  %4801 = vmatprep.mubr.msk.bf16.mxu1 %vm916_vm0, %v5167_v52 }
  0xf6   : > { %v1518_v53 = vpop.f32.mrf.mxu0  ;;  %v1180_v48 = vpop.f32.mrf.mxu1 }
  0xf7   : > { %v5711_v33 = vadd.f32 %v4619_v15, %v1189_v44  ;;  %v1181_v19 = vadd.f32 %v1180_v48, %v5611_v11 }
  0xf8   : > { %v4620_v2 = vpop.f32.mrf.mxu0  ;;  %v4584_v51 = vpop.f32.mrf.mxu1 }
  0xf9   : > { %v5714_v30 = vadd.f32 %v1518_v53, %v1181_v19  ;;  %v1192_v45 = vadd.f32 %v4584_v51, %v5616_v36 }
  0xfa   : > { %v1521_v23 = vpop.f32.mrf.mxu0  ;;  %v1183_v1 = vpop.f32.mrf.mxu1 }
  0xfb   : > { %v5717_v28 = vadd.f32 %v4620_v2, %v1192_v45  ;;  %v1184_v26 = vadd.f32 %v1183_v1, %v5621_v0 }
  0xfc   : > { %v4623_v50 = vpop.f32.mrf.mxu0  ;;  %4838 = vmatmul.mubr.msk.bf16.gmra.mxu0 %vm916_vm0, %v5384_v59  ;;  %v4587_v52 = vpop.f32.mrf.mxu1  ;;  %4802 = vmatmul.mubr.msk.bf16.gmra.mxu1 %vm916_vm0, %v5188_v62 }
  0xfd   : > { %4841 = vmatprep.mubr.msk.bf16.mxu0 %vm916_vm0, %v5404_v43  ;;  %v5726_v11 = vadd.f32 %v1521_v23, %v1184_v26  ;;  %v1205_v36 = vadd.f32 %v4587_v52, %v5630_v13  ;;  %4805 = vmatprep.mubr.msk.bf16.mxu1 %vm916_vm0, %v5191_v63 }
  0xfe   : > { %v1534_v15 = vpop.f32.mrf.mxu0  ;;  %v1196_v0 = vpop.f32.mrf.mxu1 }
  0xff   : > { %v5731_v1 = vadd.f32 %v4623_v50, %v1205_v36  ;;  %v1197_v59 = vadd.f32 %v1196_v0, %v5639_v57 }
 0x100   : > { %v4624_v44 = vpop.f32.mrf.mxu0  ;;  %v4588_v53 = vpop.f32.mrf.mxu1 }
 0x101   : > { %v5734_v48 = vadd.f32 %v1534_v15, %v1197_v59  ;;  %v1208_v62 = vadd.f32 %v4588_v53, %v5644_v32 }
 0x102   : > { %v1537_v43 = vpop.f32.mrf.mxu0  ;;  %v1199_v23 = vpop.f32.mrf.mxu1 }
 0x103   : > { %v5737_v19 = vadd.f32 %v4624_v44, %v1208_v62  ;;  %v1200_v13 = vadd.f32 %v1199_v23, %v5648_v49 }
 0x104   : > { %v4627_v2 = vpop.f32.mrf.mxu0  ;;  %4842 = vmatmul.mubr.msk.bf16.gmra.mxu0 %vm916_vm0, %v5408_v60  ;;  %v4591_v63 = vpop.f32.mrf.mxu1  ;;  %4806 = vmatmul.mubr.msk.bf16.gmra.mxu1 %vm916_vm0, %v5205_v4 }
 0x105   : > { %4845 = vmatprep.mubr.msk.bf16.mxu0 %vm916_vm0, %v5428_v18  ;;  %v5746_v57 = vadd.f32 %v1537_v43, %v1200_v13  ;;  %v1221_v32 = vadd.f32 %v4591_v63, %v5656_v29  ;;  %4809 = vmatprep.mubr.msk.bf16.mxu1 %vm916_vm0, %v5210_v6 }
 0x106   : > { %v1550_v51 = vpop.f32.mrf.mxu0  ;;  %v1212_v49 = vpop.f32.mrf.mxu1 }
 0x107   : > { %v5751_v45 = vadd.f32 %v4627_v2, %v1221_v32  ;;  %v1213_v60 = vadd.f32 %v1212_v49, %v5665_v61  ;;  %v6452_v61 = vld [vmem:[#allocation3_spill] sm:$0xff] }
 0x108   : > { %v4628_v26 = vpop.f32.mrf.mxu0  ;;  %v4592_v50 = vpop.f32.mrf.mxu1 }
 0x109   : > { %v5754_v52 = vadd.f32 %v1550_v51, %v1213_v60  ;;  %v1224_v4 = vadd.f32 %v4592_v50, %v5670_v20  ;;  %v6453_v51 = vld [vmem:[#allocation4_spill] sm:$0xff] }
 0x10a   : > { %v1553_v18 = vpop.f32.mrf.mxu0  ;;  %v1215_v36 = vpop.f32.mrf.mxu1 }
 0x10b   : > { %v5757_v15 = vadd.f32 %v4628_v26, %v1224_v4  ;;  %v1216_v29 = vadd.f32 %v1215_v36, %v5674_v24 }
 0x10c   : > { %v4631_v0 = vpop.f32.mrf.mxu0  ;;  %4846 = vmatmul.mubr.msk.bf16.gmra.mxu0 %vm916_vm0, %v5432_v54  ;;  %v4595_v6 = vpop.f32.mrf.mxu1  ;;  %4810 = vmatmul.mubr.msk.bf16.gmra.mxu1 %vm916_vm0, %v5224_v14 }
 0x10d   : > { %4849 = vmatprep.mubr.msk.bf16.mxu0 %vm916_vm0, %v6452_v61  ;;  %v5766_v59 = vadd.f32 %v1553_v18, %v1216_v29  ;;  %v1237_v20 = vadd.f32 %v4595_v6, %v5679_v8  ;;  %4813 = vmatprep.mubr.msk.bf16.mxu1 %vm916_vm0, %v5233_v25 }
 0x10e   : > { %v1566_v44 = vpop.f32.mrf.mxu0  ;;  %v1228_v24 = vpop.f32.mrf.mxu1 }
 0x10f   : > { %v5771_v53 = vadd.f32 %v4631_v0, %v1237_v20  ;;  %v1229_v54 = vadd.f32 %v1228_v24, %v5688_v37  ;;  %v6454_v37 = vld [vmem:[#allocation5_spill] sm:$0xff]  ;;  %v6455_v20 = vld [vmem:[#allocation6_spill] sm:$0xff] }
 0x110   : > { %v4632_v62 = vpop.f32.mrf.mxu0  ;;  %v4596_v43 = vpop.f32.mrf.mxu1 }
 0x111   : > { %v5774_v23 = vadd.f32 %v1566_v44, %v1229_v54  ;;  %v1240_v14 = vadd.f32 %v4596_v43, %v5694_v56 }
 0x112   : > { %v1569_v13 = vpop.f32.mrf.mxu0  ;;  %v1231_v2 = vpop.f32.mrf.mxu1 }
 0x113   : > { %v5777_v63 = vadd.f32 %v4632_v62, %v1240_v14  ;;  %v1232_v8 = vadd.f32 %v1231_v2, %v5698_v31 }
 0x114   : > { %v4635_v32 = vpop.f32.mrf.mxu0  ;;  %4850 = vmatmul.mubr.msk.bf16.gmra.mxu0 %vm916_vm0, %v6453_v51  ;;  %v4599_v25 = vpop.f32.mrf.mxu1  ;;  %4814 = vmatmul.mubr.msk.bf16.gmra.mxu1 %vm916_vm0, %v5240_v27 }
 0x115   : > { %4853 = vmatprep.mubr.msk.bf16.mxu0 %vm916_vm0, %v6454_v37  ;;  %v5786_v49 = vadd.f32 %v1569_v13, %v1232_v8  ;;  %v1253_v56 = vadd.f32 %v4599_v25, %v5606_v21  ;;  %4817 = vmatprep.mubr.msk.bf16.mxu1 %vm916_vm0, %v5254_v16  ;;  %v6458_v25 = vld [vmem:[#allocation9_spill] sm:$0xff] }
 0x116   : > { %v1582_v60 = vpop.f32.mrf.mxu0  ;;  %v1244_v31 = vpop.f32.mrf.mxu1 }
 0x117   : > { %v5791_v26 = vadd.f32 %v4635_v32, %v1253_v56  ;;  %v1245_v50 = vadd.f32 %v1244_v31, %v5614_v35  ;;  %v6456_v35 = vld [vmem:[#allocation8_spill] sm:$0xff] }
 0x118   : > { %v4636_v4 = vpop.f32.mrf.mxu0  ;;  %v4600_v18 = vpop.f32.mrf.mxu1 }
 0x119   : > { %v5794_v36 = vadd.f32 %v1582_v60, %v1245_v50  ;;  %v1256_v27 = vadd.f32 %v4600_v18, %v5618_v41 }
 0x11a   : > { %v1585_v29 = vpop.f32.mrf.mxu0  ;;  %v1247_v0 = vpop.f32.mrf.mxu1 }
 0x11b   : > { %v5797_v6 = vadd.f32 %v4636_v4, %v1256_v27  ;;  %v1248_v21 = vadd.f32 %v1247_v0, %v5625_v42 }
 0x11c   : > { %v4639_v61 = vpop.f32.mrf.mxu0  ;;  %4854 = vmatmul.mubr.msk.bf16.gmra.mxu0 %vm916_vm0, %v6455_v20  ;;  %v4603_v16 = vpop.f32.mrf.mxu1  ;;  %4818 = vmatmul.mubr.msk.bf16.gmra.mxu1 %vm916_vm0, %v5260_v38 }
 0x11d   : > { %4857 = vmatprep.mubr.msk.bf16.mxu0 %vm916_vm0, %v6456_v35  ;;  %v5806_v44 = vadd.f32 %v1585_v29, %v1248_v21  ;;  %v1269_v41 = vadd.f32 %v4603_v16, %v5634_v39  ;;  %4821 = vmatprep.mubr.msk.bf16.mxu1 %vm916_vm0, %v5271_v47  ;;  %v6463_v29 = vld [vmem:[#allocation2_spill] sm:$0xff] }
 0x11e   : > { %v1598_v24 = vpop.f32.mrf.mxu0  ;;  %v1260_v42 = vpop.f32.mrf.mxu1 }
 0x11f   : > { %v5811_v54 = vadd.f32 %v4639_v61, %v1269_v41  ;;  %v1261_v62 = vadd.f32 %v1260_v42, %v5642_v17 }
 0x120   : > { %v4640_v43 = vpop.f32.mrf.mxu0  ;;  %v4604_v14 = vpop.f32.mrf.mxu1 }
 0x121   : > { %v5814_v13 = vadd.f32 %v1598_v24, %v1261_v62  ;;  %v1272_v38 = vadd.f32 %v4604_v14, %v5646_v40 }
 0x122   : > { %v1601_v2 = vpop.f32.mrf.mxu0  ;;  %v1263_v8 = vpop.f32.mrf.mxu1 }
 0x123   : > { %v5817_v32 = vadd.f32 %v4640_v43, %v1272_v38  ;;  %v1264_v39 = vadd.f32 %v1263_v8, %v5653_v58  ;;  %v6460_v58 = vld [vmem:[#allocation7_spill] sm:$0xff]  ;;  %v6468_v43 = vld [vmem:[#allocation10_spill] sm:$0xff] }
 0x124   : > { %v4643_v51 = vpop.f32.mrf.mxu0  ;;  %4858 = vmatmul.mubr.msk.bf16.gmra.mxu0 %vm916_vm0, %v6458_v25  ;;  %v4607_v47 = vpop.f32.mrf.mxu1  ;;  %4822 = vmatmul.mubr.msk.bf16.gmra.mxu1 %vm916_vm0, %v5281_v55  ;;  %v3207_v56 = vrot.slane %v6460_v58, 1  ;;  %v6470_v8 = vld [vmem:[#allocation11_spill] sm:$0xff] }
 0x125   : > { %6457 = vst [vmem:[#allocation3_spill] sm:$0xff] %v5817_v32  ;;  %4861 = vmatprep.mubr.msk.bf16.mxu0 %vm916_vm0, %v5530_v3  ;;  %v5826_v17 = vadd.f32 %v1601_v2, %v1264_v39  ;;  %v1285_v40 = vadd.f32 %v4607_v47, %v5660_v10  ;;  %4825 = vmatprep.mubr.msk.bf16.mxu1 %vm916_vm0, %v5296_v5 }
 0x126   : > { %v1614_v37 = vpop.f32.mrf.mxu0  ;;  %v1276_v60 = vpop.f32.mrf.mxu1  ;;  %v3208_v10 = vsel %vm2945_vm1, %v6463_v29, %v3207_v56 }
 0x127   : > { %6459 = vst [vmem:[#allocation4_spill] sm:$0xff] %v5826_v17  ;;  %v5832_v31 = vadd.f32 %v4643_v51, %v1285_v40  ;;  %v1277_v50 = vadd.f32 %v1276_v60, %v5668_v9 }
 0x128   : > { %v4644_v4 = vpop.f32.mrf.mxu0  ;;  %v4608_v55 = vpop.f32.mrf.mxu1 }
 0x129   : > { %6461 = vst [vmem:[#allocation5_spill] sm:$0xff] %v5832_v31  ;;  %v5835_v18 = vadd.f32 %v1614_v37, %v1277_v50  ;;  %v1288_v3 = vadd.f32 %v4608_v55, %v5672_v22 }
 0x12a   : > { %v1617_v27 = vpop.f32.mrf.mxu0  ;;  %v1279_v0 = vpop.f32.mrf.mxu1 }
 0x12b   : > { %6462 = vst [vmem:[#allocation6_spill] sm:$0xff] %v5835_v18  ;;  %v5840_v21 = vadd.f32 %v4644_v4, %v1288_v3  ;;  %v1280_v5 = vadd.f32 %v1279_v0, %v5677_v46 }
 0x12c   : > { %v4647_v61 = vpop.f32.mrf.mxu0  ;;  %4862 = vmatmul.mubr.msk.bf16.gmra.mxu0 %vm916_vm0, %v5534_v34  ;;  %v4611_v9 = vpop.f32.mrf.mxu1  ;;  %4826 = vmatmul.mubr.msk.bf16.gmra.mxu1 %vm916_vm0, %v3208_v10 }
 0x12d   : > { %6464 = vst [vmem:[#allocation8_spill] sm:$0xff] %v5840_v21  ;;  %v5846_v20 = vadd.f32 %v1617_v27, %v1280_v5  ;;  %v1301_v22 = vadd.f32 %v4611_v9, %v5683_v12 }
 0x12e   : > { %v1630_v16 = vpop.f32.mrf.mxu0  ;;  %v1292_v35 = vpop.f32.mrf.mxu1 }
 0x12f   : > { %6465 = vst [vmem:[#allocation9_spill] sm:$0xff] %v5846_v20  ;;  %v5849_v41 = vadd.f32 %v4647_v61, %v1301_v22  ;;  %v1293_v24 = vadd.f32 %v1292_v35, %v5692_v7 }
 0x130   : > { %v4648_v42 = vpop.f32.mrf.mxu0  ;;  %v4612_v62 = vpop.f32.mrf.mxu1 }
 0x131   : > { %6466 = vst [vmem:[#allocation7_spill] sm:$0xff] %v5849_v41  ;;  %v5852_v46 = vadd.f32 %v1630_v16, %v1293_v24  ;;  %v1304_v14 = vadd.f32 %v4612_v62, %v6468_v43 }
 0x132   : > { %v1633_v34 = vpop.f32.mrf.mxu0  ;;  %v1295_v38 = vpop.f32.mrf.mxu1 }
 0x133   : > { %6467 = vst [vmem:[#allocation2_spill] sm:$0xff] %v5852_v46  ;;  %v5855_v2 = vadd.f32 %v4648_v42, %v1304_v14  ;;  %v1296_v39 = vadd.f32 %v1295_v38, %v6470_v8 }
 0x134   : > { %v4691_v51 = vpop.f32.mrf.mxu0  ;;  %v4655_v12 = vpop.f32.mrf.mxu1 }
 0x135   : > { %6469 = vst [vmem:[#allocation10_spill] sm:$0xff] %v5855_v2  ;;  %v5858_v25 = vadd.f32 %v1633_v34, %v1296_v39  ;;  %v5860_v47 = vadd.f32 %v4691_v51, %v4655_v12 }
 0x136   : > { %v2265_v40 = vpop.f32.mrf.mxu0  ;;  %v2065_v7 = vpop.f32.mrf.mxu1 }
 0x137   : > { %6471 = vst [vmem:[#allocation11_spill] sm:$0xff] %v5858_v25  ;;  %v5862_v37 = vadd.f32 %v2265_v40, %v2065_v7 }
 0x138   : > { %v4692_v58 = vpop.f32.mrf.mxu0  ;;  %v4656_v56 = vpop.f32.mrf.mxu1 }
 0x139   : > { %v5864_v60 = vadd.f32 %v4692_v58, %v4656_v56 }
 0x13a   : > { %v2268_v50 = vpop.f32.mrf.mxu0  ;;  %v2068_v4 = vpop.f32.mrf.mxu1 }
 0x13b   : > { %v5866_v55 = vadd.f32 %v2268_v50, %v2068_v4 }
 0x13c   : > { %v4695_v3 = vpop.f32.mrf.mxu0  ;;  %v4659_v27 = vpop.f32.mrf.mxu1 }
 0x13d   : > { %v5868_v29 = vadd.f32 %v4695_v3, %v4659_v27 }
 0x13e   : > { %v2281_v10 = vpop.f32.mrf.mxu0  ;;  %v2081_v0 = vpop.f32.mrf.mxu1 }
 0x13f   : > { %v5870_v5 = vadd.f32 %v2281_v10, %v2081_v0 }
 0x140   : > { %v4696_v61 = vpop.f32.mrf.mxu0  ;;  %v4660_v9 = vpop.f32.mrf.mxu1 }
 0x141   : > { %v5872_v22 = vadd.f32 %v4696_v61, %v4660_v9 }
 0x142   : > { %v2284_v16 = vpop.f32.mrf.mxu0  ;;  %v2084_v35 = vpop.f32.mrf.mxu1 }
 0x143   : > { %v5874_v24 = vadd.f32 %v2284_v16, %v2084_v35 }
 0x144   : > { %v4699_v42 = vpop.f32.mrf.mxu0  ;;  %v4663_v62 = vpop.f32.mrf.mxu1 }
 0x145   : > { %v5876_v43 = vadd.f32 %v4699_v42, %v4663_v62 }
 0x146   : > { %v2297_v14 = vpop.f32.mrf.mxu0  ;;  %v2097_v34 = vpop.f32.mrf.mxu1 }
 0x147   : > { %v5878_v38 = vadd.f32 %v2297_v14, %v2097_v34 }
 0x148   : > { %v4700_v8 = vpop.f32.mrf.mxu0  ;;  %v4664_v39 = vpop.f32.mrf.mxu1 }
 0x149   : > { %v5880_v51 = vadd.f32 %v4700_v8, %v4664_v39 }
 0x14a   : > { %v2300_v12 = vpop.f32.mrf.mxu0  ;;  %v2100_v40 = vpop.f32.mrf.mxu1 }
 0x14b   : > { %v5882_v7 = vadd.f32 %v2300_v12, %v2100_v40 }
 0x14c   : > { %v4703_v58 = vpop.f32.mrf.mxu0  ;;  %v4667_v56 = vpop.f32.mrf.mxu1 }
 0x14d   : > { %v5884_v50 = vadd.f32 %v4703_v58, %v4667_v56 }
 0x14e   : > { %v2313_v4 = vpop.f32.mrf.mxu0  ;;  %v2113_v3 = vpop.f32.mrf.mxu1 }
 0x14f   : > { %v5886_v27 = vadd.f32 %v2313_v4, %v2113_v3 }
 0x150   : > { %v4704_v10 = vpop.f32.mrf.mxu0  ;;  %v4668_v0 = vpop.f32.mrf.mxu1 }
 0x151   : > { %v5888_v61 = vadd.f32 %v4704_v10, %v4668_v0 }
 0x152   : > { %v2316_v9 = vpop.f32.mrf.mxu0  ;;  %v2116_v16 = vpop.f32.mrf.mxu1 }
 0x153   : > { %v5890_v35 = vadd.f32 %v2316_v9, %v2116_v16 }
 0x154   : > { %v4707_v42 = vpop.f32.mrf.mxu0  ;;  %v4671_v62 = vpop.f32.mrf.mxu1 }
 0x155   : > { %v5892_v14 = vadd.f32 %v4707_v42, %v4671_v62  ;;  %v172_v42 = vlaneseq }
 0x156   : > { %v2329_v34 = vpop.f32.mrf.mxu0  ;;  %v2129_v8 = vpop.f32.mrf.mxu1 }
 0x157   : > { %v5894_v39 = vadd.f32 %v2329_v34, %v2129_v8 }
 0x158   : > { %v4708_v12 = vpop.f32.mrf.mxu0  ;;  %v4672_v40 = vpop.f32.mrf.mxu1 }
 0x159   : > { %v5896_v58 = vadd.f32 %v4708_v12, %v4672_v40  ;;  %v5906_v40 = vshrl.u32 %v172_v42, 7 }
 0x15a   : > { %v2332_v56 = vpop.f32.mrf.mxu0  ;;  %v2132_v4 = vpop.f32.mrf.mxu1 }
 0x15b   : > { %v5898_v3 = vadd.f32 %v2332_v56, %v2132_v4  ;;  %v175_v21 = vadd.s32 16, %v5906_v40 }
 0x15c   : > { %v4711_v10 = vpop.f32.mrf.mxu0  ;;  %v4675_v0 = vpop.f32.mrf.mxu1 }
 0x15d   : > { %v5900_v9 = vadd.f32 %v4711_v10, %v4675_v0  ;;  %v223_v42 = vand.u32 15, %v175_v21  ;;  %v177_v21 = vadd.s32 32, %v5906_v40 }
 0x15e   : > { %v2345_v16 = vpop.f32.mrf.mxu0  ;;  %v2145_v25 = vpop.f32.mrf.mxu1 }
 0x15f   : > { %v5902_v62 = vadd.f32 %v2345_v16, %v2145_v25  ;;  %vm591_vm3 = vcmp.gt.s32.totalorder %v223_v42, 0 }
 0x160   : > { %v4712_v2 = vpop.f32.mrf.mxu0  ;;  %v4676_v34 = vpop.f32.mrf.mxu1 }
 0x161   : > { %v5904_v8 = vadd.f32 %v4712_v2, %v4676_v34 }
 0x162   : > { %v2348_v46 = vpop.f32.mrf.mxu0  ;;  %v2148_v12 = vpop.f32.mrf.mxu1 }
 0x163   : > { %v5908_v20 = vadd.f32 %v2348_v46, %v2148_v12 }
 0x164   : > { %v4715_v56 = vpop.f32.mrf.mxu0  ;;  %v4679_v4 = vpop.f32.mrf.mxu1 }
 0x165   : > { %6472 = vst [vmem:[#allocation12_spill] sm:$0xff] %v5908_v20  ;;  %v5910_v41 = vadd.f32 %v4715_v56, %v4679_v4  ;;  %v209_v56 = vand.u32 15, %v5906_v40 }
 0x166   : > { %v2361_v10 = vpop.f32.mrf.mxu0  ;;  %v2161_v0 = vpop.f32.mrf.mxu1 }
 0x167   : > { %6473 = vst [vmem:[#allocation13_spill] sm:$0xff] %v5910_v41  ;;  %v5913_v25 = vadd.f32 %v2361_v10, %v2161_v0  ;;  %v179_v10 = vadd.s32 48, %v5906_v40  ;;  %vm589_vm4 = vcmp.gt.s32.totalorder %v209_v56, 0  ;;  %v237_v56 = vand.u32 15, %v177_v21 }
 0x168   : > { %v4716_v16 = vpop.f32.mrf.mxu0  ;;  %v4680_v18 = vpop.f32.mrf.mxu1 }
 0x169   : > { %6474 = vst [vmem:[#allocation14_spill] sm:$0xff] %v5913_v25  ;;  %v5915_v2 = vadd.f32 %v4716_v16, %v4680_v18  ;;  %vm593_vm6 = vcmp.gt.s32.totalorder %v237_v56, 0 }
 0x16a   : > { %v2364_v34 = vpop.f32.mrf.mxu0  ;;  %v2164_v17 = vpop.f32.mrf.mxu1 }
 0x16b   : > { %6475 = vst [vmem:[#allocation15_spill] sm:$0xff] %v5915_v2  ;;  %v5917_v31 = vadd.f32 %v2364_v34, %v2164_v17 }
 0x16c   : > { %v4719_v46 = vpop.f32.mrf.mxu0  ;;  %v4683_v12 = vpop.f32.mrf.mxu1 }
 0x16d   : > { %6476 = vst [vmem:[#allocation16_spill] sm:$0xff] %v5917_v31  ;;  %v5920_v4 = vadd.f32 %v4719_v46, %v4683_v12  ;;  %v6440_v31 = vmov 0.0   ;;  %v251_v12 = vand.u32 15, %v179_v10 }
 0x16e   : > { %v2377_v41 = vpop.f32.mrf.mxu0  ;;  %v2177_v20 = vpop.f32.mrf.mxu1  ;;  %v4014_v2 = vsel %vm591_vm3, 1.0, %v6440_v31 }
 0x16f   : > { %6477 = vst [vmem:[#allocation17_spill] sm:$0xff] %v5920_v4  ;;  %v5923_v0 = vadd.f32 %v2377_v41, %v2177_v20  ;;  %v4013_v20 = vsel %vm589_vm4, 1.0, %v6440_v31  ;;  %vm595_vm5 = vcmp.gt.s32.totalorder %v251_v12, 0 }
 0x170   : > { %v4720_v18 = vpop.f32.mrf.mxu0  ;;  %v4684_v16 = vpop.f32.mrf.mxu1  ;;  %v1677_v32 = vmul.f32 %v4013_v20, %v5714_v30 }
 0x171   : > { %6478 = vst [vmem:[#allocation18_spill] sm:$0xff] %v5923_v0  ;;  %v5926_v17 = vadd.f32 %v4720_v18, %v4684_v16  ;;  %v1679_v0 = vmul.f32 %v4014_v2, %v5711_v33  ;;  %v183_v16 = vadd.s32 80, %v5906_v40  ;;  %v181_v33 = vadd.s32 64, %v5906_v40 }
 0x172   : > { %v2380_v34 = vpop.f32.mrf.mxu0  ;;  %v2180_v46 = vpop.f32.mrf.mxu1 }
 0x173   : > { %6479 = vst [vmem:[#allocation19_spill] sm:$0xff] %v5926_v17  ;;  %v5929_v4 = vadd.f32 %v2380_v34, %v2180_v46  ;;  %v279_v30 = vand.u32 15, %v183_v16  ;;  %v265_v56 = vand.u32 15, %v181_v33 }
 0x174   : > { %v5931_v42 = vpop.f32.mrf.mxu0  ;;  %v4727_v41 = vpop.f32.mrf.mxu1 }
 0x175   : > { %v2868_v25 = vadd.f32 %v4727_v41, %v5860_v47  ;;  %v6481_v41 = vmov 0.0   ;;  %vm599_vm7 = vcmp.gt.s32.totalorder %v279_v30, 0  ;;  %vm597_vm8 = vcmp.gt.s32.totalorder %v265_v56, 0 }
 0x176   : > { %v5936_v18 = vpop.f32.mrf.mxu0  ;;  %v2739_v17 = vpop.f32.mrf.mxu1 }
 0x177   : > { %6480 = vst [vmem:[#allocation20_spill] sm:$0xff] %v5936_v18  ;;  %v5940_v10 = vadd.f32 %v2868_v25, %v1679_v0  ;;  %v2866_v34 = vadd.f32 %v2739_v17, %v5862_v37  ;;  %v4016_v18 = vsel %vm595_vm5, 1.0, %v6481_v41  ;;  %v4015_v17 = vsel %vm593_vm6, 1.0, %v6481_v41 }
 0x178   : > { %v5943_v46 = vpop.f32.mrf.mxu0  ;;  %v4728_v31 = vpop.f32.mrf.mxu1  ;;  %vm3917_vm5 = vcmask 35840  }
 0x179   : > { %v5946_v2 = vadd.f32 %v2866_v34, %v1677_v32  ;;  %v2869_v47 = vadd.f32 %v4728_v31, %v5864_v60  ;;  %v1683_v32 = vmul.f32 %v4016_v18, %v5731_v1  ;;  %v1681_v34 = vmul.f32 %v4015_v17, %v5734_v48 }
 0x17a   : > { %v5949_v21 = vpop.f32.mrf.mxu0  ;;  %v2742_v12 = vpop.f32.mrf.mxu1  ;;  %v4018_v48 = vsel %vm599_vm7, 1.0, %v6481_v41 }
 0x17b   : > { %v5953_v25 = vadd.f32 %v2869_v47, %v5717_v28  ;;  %v2867_v37 = vadd.f32 %v2742_v12, %v5866_v55  ;;  %v187_v55 = vadd.s32 112, %v5906_v40 }
 0x17c   : > { %v5956_v0 = vpop.f32.mrf.mxu0  ;;  %v4731_v20 = vpop.f32.mrf.mxu1 }
 0x17d   : > { %6482 = vst [vmem:[#allocation21_spill] sm:$0xff] %v5953_v25  ;;  %v5961_v31 = vadd.f32 %v2867_v37, %v5726_v11  ;;  %v2872_v60 = vadd.f32 %v4731_v20, %v5868_v29  ;;  %v185_v11 = vadd.s32 96, %v5906_v40  ;;  %v307_v37 = vand.u32 15, %v187_v55 }
 0x17e   : > { %v5964_v16 = vpop.f32.mrf.mxu0  ;;  %v2755_v28 = vpop.f32.mrf.mxu1 }
 0x17f   : > { %v5968_v47 = vadd.f32 %v2872_v60, %v1683_v32  ;;  %v2870_v12 = vadd.f32 %v2755_v28, %v5870_v5  ;;  %v4017_v32 = vsel %vm597_vm8, 1.0, %v6481_v41  ;;  %v1687_v60 = vmul.f32 %v4018_v48, %v5751_v45 }
 0x180   : > { %v5971_v25 = vpop.f32.mrf.mxu0  ;;  %v4732_v1 = vpop.f32.mrf.mxu1  ;;  %v293_v28 = vand.u32 15, %v185_v11  ;;  %vm603_vm9 = vcmp.gt.s32.totalorder %v307_v37, 0 }
 0x181   : > { %v5974_v18 = vadd.f32 %v2870_v12, %v1681_v34  ;;  %v2873_v29 = vadd.f32 %v4732_v1, %v5872_v22 }
 0x182   : > { %v5977_v33 = vpop.f32.mrf.mxu0  ;;  %v2758_v30 = vpop.f32.mrf.mxu1  ;;  %vm601_vm10 = vcmp.gt.s32.totalorder %v293_v28, 0 }
 0x183   : > { %v5981_v17 = vadd.f32 %v2873_v29, %v5737_v19  ;;  %v2871_v5 = vadd.f32 %v2758_v30, %v5874_v24  ;;  %v191_v19 = vadd.s32 144, %v5906_v40  ;;  %v1685_v24 = vmul.f32 %v4017_v32, %v5754_v52 }
 0x184   : > { %v5984_v20 = vpop.f32.mrf.mxu0  ;;  %v4735_v56 = vpop.f32.mrf.mxu1 }
 0x185   : > { %v5989_v22 = vadd.f32 %v2871_v5, %v5746_v57  ;;  %v2876_v34 = vadd.f32 %v4735_v56, %v5876_v43  ;;  %v189_v57 = vadd.s32 128, %v5906_v40  ;;  %v4020_v5 = vsel %vm603_vm9, 1.0, %v6481_v41 }
 0x186   : > { %v5992_v12 = vpop.f32.mrf.mxu0  ;;  %v2771_v55 = vpop.f32.mrf.mxu1  ;;  %v335_v52 = vand.u32 15, %v191_v19 }
 0x187   : > { %v5996_v1 = vadd.f32 %v2876_v34, %v1687_v60  ;;  %v2874_v29 = vadd.f32 %v2771_v55, %v5878_v38  ;;  %v4019_v60 = vsel %vm601_vm10, 1.0, %v6481_v41  ;;  %v1691_v34 = vmul.f32 %v4020_v5, %v5771_v53 }
 0x188   : > { %v5999_v30 = vpop.f32.mrf.mxu0  ;;  %v4736_v45 = vpop.f32.mrf.mxu1  ;;  %v321_v55 = vand.u32 15, %v189_v57  ;;  %vm607_vm11 = vcmp.gt.s32.totalorder %v335_v52, 0 }
 0x189   : > { %v6002_v11 = vadd.f32 %v2874_v29, %v1685_v24  ;;  %v2877_v43 = vadd.f32 %v4736_v45, %v5880_v51  ;;  %v1689_v29 = vmul.f32 %v4019_v60, %v5774_v23  ;;  %v4022_v23 = vsel %vm607_vm11, 1.0, %v6481_v41 }
 0x18a   : > { %v6005_v48 = vpop.f32.mrf.mxu0  ;;  %v2774_v37 = vpop.f32.mrf.mxu1  ;;  %vm605_vm12 = vcmp.gt.s32.totalorder %v321_v55, 0 }
 0x18b   : > { %v6009_v32 = vadd.f32 %v2877_v43, %v5757_v15  ;;  %v2875_v38 = vadd.f32 %v2774_v37, %v5882_v7  ;;  %v195_v7 = vadd.s32 176, %v5906_v40 }
 0x18c   : > { %v6012_v56 = vpop.f32.mrf.mxu0  ;;  %v4739_v28 = vpop.f32.mrf.mxu1 }
 0x18d   : > { %v6017_v51 = vadd.f32 %v2875_v38, %v5766_v59  ;;  %v2880_v24 = vadd.f32 %v4739_v28, %v5884_v50  ;;  %v193_v59 = vadd.s32 160, %v5906_v40  ;;  %v363_v38 = vand.u32 15, %v195_v7 }
 0x18e   : > { %v6020_v19 = vpop.f32.mrf.mxu0  ;;  %v2787_v15 = vpop.f32.mrf.mxu1 }
 0x18f   : > { %v6024_v45 = vadd.f32 %v2880_v24, %v1691_v34  ;;  %v2878_v43 = vadd.f32 %v2787_v15, %v5886_v27  ;;  %v4021_v34 = vsel %vm605_vm12, 1.0, %v6481_v41  ;;  %v1695_v24 = vmul.f32 %v4022_v23, %v5791_v26 }
 0x190   : > { %v6027_v37 = vpop.f32.mrf.mxu0  ;;  %v4740_v53 = vpop.f32.mrf.mxu1  ;;  %v349_v15 = vand.u32 15, %v193_v59  ;;  %vm611_vm13 = vcmp.gt.s32.totalorder %v363_v38, 0 }
 0x191   : > { %v6030_v57 = vadd.f32 %v2878_v43, %v1689_v29  ;;  %v2881_v50 = vadd.f32 %v4740_v53, %v5888_v61 }
 0x192   : > { %v6033_v5 = vpop.f32.mrf.mxu0  ;;  %v2790_v52 = vpop.f32.mrf.mxu1  ;;  %vm609_vm14 = vcmp.gt.s32.totalorder %v349_v15, 0 }
 0x193   : > { %v6037_v60 = vadd.f32 %v2881_v50, %v5777_v63  ;;  %v2879_v27 = vadd.f32 %v2790_v52, %v5890_v35  ;;  %v199_v63 = vadd.s32 208, %v5906_v40  ;;  %v1693_v35 = vmul.f32 %v4021_v34, %v5794_v36 }
 0x194   : > { %v6040_v28 = vpop.f32.mrf.mxu0  ;;  %v4743_v55 = vpop.f32.mrf.mxu1 }
 0x195   : > { %v6045_v61 = vadd.f32 %v2879_v27, %v5786_v49  ;;  %v2884_v29 = vadd.f32 %v4743_v55, %v5892_v14  ;;  %v197_v49 = vadd.s32 192, %v5906_v40  ;;  %v4024_v27 = vsel %vm611_vm13, 1.0, %v6481_v41 }
 0x196   : > { %v6048_v43 = vpop.f32.mrf.mxu0  ;;  %v2803_v7 = vpop.f32.mrf.mxu1  ;;  %v391_v36 = vand.u32 15, %v199_v63 }
 0x197   : > { %v6052_v53 = vadd.f32 %v2884_v29, %v1695_v24  ;;  %v2882_v50 = vadd.f32 %v2803_v7, %v5894_v39  ;;  %v4023_v24 = vsel %vm609_vm14, 1.0, %v6481_v41  ;;  %v1699_v29 = vmul.f32 %v4024_v27, %v5811_v54 }
 0x198   : > { %v6055_v52 = vpop.f32.mrf.mxu0  ;;  %v4744_v26 = vpop.f32.mrf.mxu1  ;;  %v377_v7 = vand.u32 15, %v197_v49  ;;  %vm615_vm15 = vcmp.gt.s32.totalorder %v391_v36, 0 }
 0x199   : > { %v6058_v59 = vadd.f32 %v2882_v50, %v1693_v35  ;;  %v2885_v14 = vadd.f32 %v4744_v26, %v5896_v58  ;;  %v1697_v50 = vmul.f32 %v4023_v24, %v5814_v13  ;;  %v4026_v13 = vsel %vm615_vm15, 1.0, %v6481_v41  ;;  %v6488_v24 = vld [vmem:[#allocation3_spill] sm:$0xff] }
 0x19a   : > { %v6061_v23 = vpop.f32.mrf.mxu0  ;;  %v2806_v38 = vpop.f32.mrf.mxu1  ;;  %vm613_vm0 = vcmp.gt.s32.totalorder %v377_v7, 0 }
 0x19b   : > { %v6065_v34 = vadd.f32 %v2885_v14, %v5797_v6  ;;  %v2883_v39 = vadd.f32 %v2806_v38, %v5898_v3  ;;  %v203_v3 = vadd.s32 240, %v5906_v40  ;;  %v4025_v7 = vsel %vm613_vm0, 1.0, %v6481_v41 }
 0x19c   : > { %v6068_v55 = vpop.f32.mrf.mxu0  ;;  %v4747_v15 = vpop.f32.mrf.mxu1 }
 0x19d   : > { %v6073_v58 = vadd.f32 %v2883_v39, %v5806_v44  ;;  %v2888_v35 = vadd.f32 %v4747_v15, %v5900_v9  ;;  %v201_v44 = vadd.s32 224, %v5906_v40  ;;  %v419_v39 = vand.u32 15, %v203_v3 }
 0x19e   : > { %v6076_v63 = vpop.f32.mrf.mxu0  ;;  %v2819_v6 = vpop.f32.mrf.mxu1 }
 0x19f   : > { %6483 = vst [vmem:[#allocation22_spill] sm:$0xff] %v6073_v58  ;;  %v6080_v26 = vadd.f32 %v2888_v35, %v1699_v29  ;;  %v2886_v14 = vadd.f32 %v2819_v6, %v5902_v62  ;;  %v6490_v62 = vld [vmem:[#allocation12_spill] sm:$0xff]  ;;  %vm619_vm1 = vcmp.gt.s32.totalorder %v419_v39, 0 }
 0x1a0   : > { %v6083_v38 = vpop.f32.mrf.mxu0  ;;  %v4748_v54 = vpop.f32.mrf.mxu1 }
 0x1a1   : > { %6484 = vst [vmem:[#allocation23_spill] sm:$0xff] %v6080_v26  ;;  %6485 = vst [vmem:[#allocation24_spill] sm:$0xff] %v6083_v38  ;;  %v6086_v49 = vadd.f32 %v2886_v14, %v1697_v50  ;;  %v2889_v9 = vadd.f32 %v4748_v54, %v5904_v8  ;;  %v6492_v50 = vld [vmem:[#allocation5_spill] sm:$0xff]  ;;  %v6493_v8 = vld [vmem:[#allocation4_spill] sm:$0xff] }
 0x1a2   : > { %v6089_v27 = vpop.f32.mrf.mxu0  ;;  %v2822_v36 = vpop.f32.mrf.mxu1  ;;  %v1703_v14 = vmul.f32 %v4026_v13, %v6492_v50  ;;  %v6500_v13 = vld [vmem:[#allocation15_spill] sm:$0xff] }
 0x1a3   : > { %6486 = vst [vmem:[#allocation25_spill] sm:$0xff] %v6086_v49  ;;  %6487 = vst [vmem:[#allocation26_spill] sm:$0xff] %v6089_v27  ;;  %v6093_v15 = vadd.f32 %v2889_v9, %v6488_v24  ;;  %v2887_v29 = vadd.f32 %v2822_v36, %v6490_v62  ;;  %v405_v49 = vand.u32 15, %v201_v44  ;;  %v6495_v27 = vld [vmem:[#allocation13_spill] sm:$0xff]  ;;  %v6496_v9 = vld [vmem:[#allocation6_spill] sm:$0xff] }
 0x1a4   : > { %v6096_v35 = vpop.f32.mrf.mxu0  ;;  %v4751_v6 = vpop.f32.mrf.mxu1  ;;  %v1701_v24 = vmul.f32 %v4025_v7, %v6496_v9  ;;  %v6497_v62 = vld [vmem:[#allocation14_spill] sm:$0xff] }
 0x1a5   : > { %6489 = vst [vmem:[#allocation3_spill] sm:$0xff] %v6093_v15  ;;  %6491 = vst [vmem:[#allocation12_spill] sm:$0xff] %v6096_v35  ;;  %v6101_v54 = vadd.f32 %v2887_v29, %v6493_v8  ;;  %v2892_v58 = vadd.f32 %v4751_v6, %v6495_v27  ;;  %vm617_vm2 = vcmp.gt.s32.totalorder %v405_v49, 0  ;;  %v4028_v27 = vsel %vm619_vm1, 1.0, %v6481_v41  ;;  %v6502_v8 = vld [vmem:[#allocation8_spill] sm:$0xff]  ;;  %v6506_v49 = vld [vmem:[#allocation7_spill] sm:$0xff] }
 0x1a6   : > { %v6104_v38 = vpop.f32.mrf.mxu0  ;;  %v2835_v3 = vpop.f32.mrf.mxu1 }
 0x1a7   : > { %6494 = vst [vmem:[#allocation5_spill] sm:$0xff] %v6101_v54  ;;  %v6107_v36 = vadd.f32 %v2892_v58, %v1703_v14  ;;  %v2890_v15 = vadd.f32 %v2835_v3, %v6497_v62  ;;  %v6504_v58 = vld [vmem:[#allocation16_spill] sm:$0xff]  ;;  %v4027_v3 = vsel %vm617_vm2, 1.0, %v6481_v41  ;;  %v6510_v54 = vld [vmem:[#allocation2_spill] sm:$0xff] }
 0x1a8   : > { %v6110_v35 = vpop.f32.mrf.mxu0  ;;  %v4752_v26 = vpop.f32.mrf.mxu1 }
 0x1a9   : > { %6498 = vst [vmem:[#allocation4_spill] sm:$0xff] %v6110_v35  ;;  %v6112_v44 = vadd.f32 %v2890_v15, %v1701_v24  ;;  %v2893_v29 = vadd.f32 %v4752_v26, %v6500_v13  ;;  %v1707_v15 = vmul.f32 %v4028_v27, %v6506_v49  ;;  %v6507_v24 = vld [vmem:[#allocation9_spill] sm:$0xff] }
 0x1aa   : > { %v6115_v50 = vpop.f32.mrf.mxu0  ;;  %v2838_v6 = vpop.f32.mrf.mxu1  ;;  %v6509_v26 = vld [vmem:[#allocation17_spill] sm:$0xff] }
 0x1ab   : > { %6499 = vst [vmem:[#allocation13_spill] sm:$0xff] %v6112_v44  ;;  %6501 = vst [vmem:[#allocation6_spill] sm:$0xff] %v6115_v50  ;;  %v6119_v7 = vadd.f32 %v2893_v29, %v6502_v8  ;;  %v2891_v39 = vadd.f32 %v2838_v6, %v6504_v58  ;;  %v1705_v29 = vmul.f32 %v4027_v3, %v6510_v54  ;;  %v6512_v6 = vld [vmem:[#allocation18_spill] sm:$0xff] }
 0x1ac   : > { %v6122_v14 = vpop.f32.mrf.mxu0  ;;  %v4755_v9 = vpop.f32.mrf.mxu1 }
 0x1ad   : > { %6503 = vst [vmem:[#allocation14_spill] sm:$0xff] %v6119_v7  ;;  %6505 = vst [vmem:[#allocation15_spill] sm:$0xff] %v6122_v14  ;;  %v6127_v62 = vadd.f32 %v2891_v39, %v6507_v24  ;;  %v2896_v13 = vadd.f32 %v4755_v9, %v6509_v26  ;;  %v176_v14 = vadd.s32 24, %v5906_v40  ;;  %v6515_v39 = vld [vmem:[#allocation19_spill] sm:$0xff]  ;;  %v174_v9 = vadd.s32 8, %v5906_v40 }
 0x1ae   : > { %v6130_v50 = vpop.f32.mrf.mxu0  ;;  %v2851_v44 = vpop.f32.mrf.mxu1 }
 0x1af   : > { %6508 = vst [vmem:[#allocation8_spill] sm:$0xff] %v6127_v62  ;;  %v6133_v8 = vadd.f32 %v2896_v13, %v1707_v15  ;;  %v2894_v58 = vadd.f32 %v2851_v44, %v6512_v6  ;;  %v6517_v62 = vld [vmem:[#allocation10_spill] sm:$0xff]  ;;  %v230_v15 = vand.u32 15, %v176_v14  ;;  %v6519_v6 = vld [vmem:[#allocation11_spill] sm:$0xff] }
 0x1b0   : > { %v6136_v7 = vpop.f32.mrf.mxu0  ;;  %v4756_v35 = vpop.f32.mrf.mxu1 }
 0x1b1   : > { %6511 = vst [vmem:[#allocation16_spill] sm:$0xff] %v6133_v8  ;;  %6513 = vst [vmem:[#allocation7_spill] sm:$0xff] %v6136_v7  ;;  %v6139_v27 = vadd.f32 %v2894_v58, %v1705_v29  ;;  %v2897_v49 = vadd.f32 %v4756_v35, %v6515_v39  ;;  %v216_v58 = vand.u32 15, %v174_v9  ;;  %v6521_v8 = vld [vmem:[#allocation20_spill] sm:$0xff]  ;;  %vm688_vm3 = vcmp.lt.s32.totalorder %v230_v15, 15 }
 0x1b2   : > { %v6142_v24 = vpop.f32.mrf.mxu0  ;;  %v2854_v26 = vpop.f32.mrf.mxu1 }
 0x1b3   : > { %6514 = vst [vmem:[#allocation9_spill] sm:$0xff] %v6139_v27  ;;  %6516 = vst [vmem:[#allocation17_spill] sm:$0xff] %v6142_v24  ;;  %v6146_v54 = vadd.f32 %v2897_v49, %v6517_v62  ;;  %v2895_v3 = vadd.f32 %v2854_v26, %v5929_v4  ;;  %v180_v24 = vadd.s32 56, %v5906_v40  ;;  %v6158_v4 = vld [vmem:[%s6436_s2] ss:$0 sm:$0xff]  ;;  %v178_v26 = vadd.s32 40, %v5906_v40 }
 0x1b4   : > { %v4835_v44 = vpop.f32.mrf.mxu0  ;;  %v4799_v13 = vpop.f32.mrf.mxu1  ;;  %vm686_vm4 = vcmp.lt.s32.totalorder %v216_v58, 15 }
 0x1b5   : > { %6518 = vst [vmem:[#allocation2_spill] sm:$0xff] %v6146_v54  ;;  %v6150_v7 = vadd.f32 %v2895_v3, %v6519_v6  ;;  %v3273_v29 = vadd.f32 %v4799_v13, %v5931_v42  ;;  %v258_v13 = vand.u32 15, %v180_v24 }
 0x1b6   : > { %v3527_v35 = vpop.f32.mrf.mxu0  ;;  %v3264_v39 = vpop.f32.mrf.mxu1 }
 0x1b7   : > { %6520 = vst [vmem:[#allocation18_spill] sm:$0xff] %v6150_v7  ;;  %v3656_v27 = vadd.f32 %v4835_v44, %v3273_v29  ;;  %v3265_v62 = vadd.f32 %v3264_v39, %v6521_v8  ;;  %v4030_v8 = vsel %vm688_vm3, 1.0, %v6481_v41  ;;  %vm6176_vm6 = vcmp.lt.s32.totalorder %v258_v13, 15 }
 0x1b8   : > { %v4836_v49 = vpop.f32.mrf.mxu0  ;;  %v4800_v14 = vpop.f32.mrf.mxu1  ;;  %v182_v13 = vadd.s32 72, %v5906_v40 }
 0x1b9   : > { %v3720_v42 = vadd.f32 %v3656_v27, %v5940_v10  ;;  %v3654_v9 = vadd.f32 %v3527_v35, %v3265_v62  ;;  %v3276_v3 = vadd.f32 %v4800_v14, %v5943_v46  ;;  %v4029_v10 = vsel %vm686_vm4, 1.0, %v6481_v41 }
 0x1ba   : > { %v3530_v44 = vpop.f32.mrf.mxu0  ;;  %v3267_v15 = vpop.f32.mrf.mxu1  ;;  %v244_v27 = vand.u32 15, %v178_v26  ;;  %v6524_v26 = vld [vmem:[#allocation21_spill] sm:$0xff] }
 0x1bb   : > { %v3759_v6 = vadd.f32 %v6158_v4, %v3720_v42  ;;  %v3718_v29 = vadd.f32 %v3654_v9, %v5946_v2  ;;  %v3657_v39 = vadd.f32 %v4836_v49, %v3276_v3  ;;  %v3268_v7 = vadd.f32 %v3267_v15, %v5949_v21 }
 0x1bc   : > { %v4839_v54 = vpop.f32.mrf.mxu0  ;;  %v4803_v46 = vpop.f32.mrf.mxu1  ;;  %v184_v42 = vadd.s32 88, %v5906_v40  ;;  %vm6185_vm7 = vcmp.lt.s32.totalorder %v244_v27, 15  ;;  %v4032_v27 = vsel %vm6176_vm6, 1.0, %v6481_v41 }
 0x1bd   : > { %v4349_v24 = vpack.c.bf16 %v3759_v6, %v3759_v6  ;;  %v3757_v35 = vadd.f32 %v6158_v4, %v3718_v29  ;;  %v3689_v58 = vmul.f32 %v4030_v8, %v3657_v39  ;;  %v3655_v2 = vadd.f32 %v3530_v44, %v3268_v7 }
 0x1be   : > { %v3543_v62 = vpop.f32.mrf.mxu0  ;;  %v3289_v21 = vadd.f32 %v4803_v46, %v5956_v0  ;;  %v3280_v49 = vpop.f32.mrf.mxu1 }
 0x1bf   : > { %3920 = vst.msk [vmem:[%s6171_s6 + $0x8] sm:$0xf] %vm3917_vm5, %v4349_v24  ;;  %v4347_v9 = vpack.c.bf16 %v3757_v35, %v3757_v35  ;;  %v3721_v3 = vadd.f32 %v3689_v58, %v6524_v26  ;;  %v3687_v15 = vmul.f32 %v4029_v10, %v3655_v2  ;;  %v3281_v8 = vadd.f32 %v3280_v49, %v5964_v16 }
 0x1c0   : > { %v4840_v7 = vpop.f32.mrf.mxu0  ;;  %v3660_v44 = vadd.f32 %v4839_v54, %v3289_v21  ;;  %v4804_v6 = vpop.f32.mrf.mxu1  ;;  %v286_v35 = vand.u32 15, %v184_v42 }
 0x1c1   : > { %3918 = vst.msk [vmem:[%s6171_s6] sm:$0xf] %vm3917_vm5, %v4347_v9  ;;  %v3760_v29 = vadd.f32 %v6158_v4, %v3721_v3  ;;  %v3719_v39 = vadd.f32 %v3687_v15, %v5961_v31  ;;  %v3658_v46 = vadd.f32 %v3543_v62, %v3281_v8  ;;  %v3292_v10 = vadd.f32 %v4804_v6, %v5971_v25 }
 0x1c2   : > { %v3546_v16 = vpop.f32.mrf.mxu0  ;;  %v3724_v54 = vadd.f32 %v3660_v44, %v5968_v47  ;;  %v3283_v24 = vpop.f32.mrf.mxu1  ;;  %v4031_v47 = vsel %vm6185_vm7, 1.0, %v6481_v41  ;;  %v272_v9 = vand.u32 15, %v182_v13  ;;  %vm6210_vm8 = vcmp.lt.s32.totalorder %v286_v35, 15 }
 0x1c3   : > { %v4350_v58 = vpack.c.bf16 %v3760_v29, %v3760_v29  ;;  %v3758_v2 = vadd.f32 %v6158_v4, %v3719_v39  ;;  %v3722_v21 = vadd.f32 %v3658_v46, %v5974_v18  ;;  %v3661_v49 = vadd.f32 %v4840_v7, %v3292_v10 }
 0x1c4   : > { %v4843_v31 = vpop.f32.mrf.mxu0  ;;  %v3763_v62 = vadd.f32 %v6158_v4, %v3724_v54  ;;  %v3284_v25 = vadd.f32 %v3283_v24, %v5977_v33  ;;  %v4807_v14 = vpop.f32.mrf.mxu1  ;;  %v188_v6 = vadd.s32 120, %v5906_v40  ;;  %vm6221_vm9 = vcmp.lt.s32.totalorder %v272_v9, 15 }
 0x1c5   : > { %3921 = vst.msk [vmem:[%s6171_s6 + $0xc] sm:$0xf] %vm3917_vm5, %v4350_v58  ;;  %v4348_v42 = vpack.c.bf16 %v3758_v2, %v3758_v2  ;;  %v3761_v26 = vadd.f32 %v6158_v4, %v3722_v21  ;;  %v3693_v18 = vmul.f32 %v4032_v27, %v3661_v49  ;;  %v3305_v3 = vadd.f32 %v4807_v14, %v5984_v20 }
 0x1c6   : > { %v3559_v15 = vpop.f32.mrf.mxu0  ;;  %v4353_v8 = vpack.c.bf16 %v3763_v62, %v3763_v62  ;;  %v3659_v7 = vadd.f32 %v3546_v16, %v3284_v25  ;;  %v3296_v33 = vpop.f32.mrf.mxu1  ;;  %v186_v54 = vadd.s32 104, %v5906_v40  ;;  %v4034_v2 = vsel %vm6210_vm8, 1.0, %v6481_v41 }
 0x1c7   : > { %3919 = vst.msk [vmem:[%s6171_s6 + $0x4] sm:$0xf] %vm3917_vm5, %v4348_v42  ;;  %v4351_v0 = vpack.c.bf16 %v3761_v26, %v3761_v26  ;;  %v3725_v13 = vadd.f32 %v3693_v18, %v5981_v17  ;;  %v3664_v29 = vadd.f32 %v4843_v31, %v3305_v3  ;;  %v3297_v39 = vadd.f32 %v3296_v33, %v5992_v12 }
 0x1c8   : > { %v4844_v20 = vpop.f32.mrf.mxu0  ;;  %3924 = vst.msk [vmem:[%s6171_s6 + $0x18] sm:$0xf] %vm3917_vm5, %v4353_v8  ;;  %v3691_v46 = vmul.f32 %v4031_v47, %v3659_v7  ;;  %v4808_v10 = vpop.f32.mrf.mxu1  ;;  %v314_v49 = vand.u32 15, %v188_v6  ;;  %v300_v42 = vand.u32 15, %v186_v54  ;;  %v192_v44 = vadd.s32 152, %v5906_v40 }
 0x1c9   : > { %3922 = vst.msk [vmem:[%s6171_s6 + $0x10] sm:$0xf] %vm3917_vm5, %v4351_v0  ;;  %v3764_v27 = vadd.f32 %v6158_v4, %v3725_v13  ;;  %v3728_v17 = vadd.f32 %v3664_v29, %v5996_v1  ;;  %v3662_v24 = vadd.f32 %v3559_v15, %v3297_v39  ;;  %v3308_v12 = vadd.f32 %v4808_v10, %v5999_v30 }
 0x1ca   : > { %v3562_v35 = vpop.f32.mrf.mxu0  ;;  %v3723_v58 = vadd.f32 %v3691_v46, %v5989_v22  ;;  %v3299_v21 = vpop.f32.mrf.mxu1  ;;  %v4033_v22 = vsel %vm6221_vm9, 1.0, %v6481_v41  ;;  %vm6246_vm10 = vcmp.lt.s32.totalorder %v314_v49, 15  ;;  %vm6257_vm11 = vcmp.lt.s32.totalorder %v300_v42, 15 }
 0x1cb   : > { %v4354_v31 = vpack.c.bf16 %v3764_v27, %v3764_v27  ;;  %v3767_v62 = vadd.f32 %v6158_v4, %v3728_v17  ;;  %v3726_v25 = vadd.f32 %v3662_v24, %v6002_v11  ;;  %v3665_v47 = vadd.f32 %v4844_v20, %v3308_v12 }
 0x1cc   : > { %v4847_v1 = vpop.f32.mrf.mxu0  ;;  %v3762_v14 = vadd.f32 %v6158_v4, %v3723_v58  ;;  %v3300_v30 = vadd.f32 %v3299_v21, %v6005_v48  ;;  %v4811_v9 = vpop.f32.mrf.mxu1  ;;  %v190_v10 = vadd.s32 136, %v5906_v40  ;;  %v4036_v24 = vsel %vm6246_vm10, 1.0, %v6481_v41 }
 0x1cd   : > { %3925 = vst.msk [vmem:[%s6171_s6 + $0x1c] sm:$0xf] %vm3917_vm5, %v4354_v31  ;;  %v4357_v26 = vpack.c.bf16 %v3767_v62, %v3767_v62  ;;  %v3765_v18 = vadd.f32 %v6158_v4, %v3726_v25  ;;  %v3697_v11 = vmul.f32 %v4034_v2, %v3665_v47  ;;  %v3321_v3 = vadd.f32 %v4811_v9, %v6012_v56 }
 0x1ce   : > { %v3575_v15 = vpop.f32.mrf.mxu0  ;;  %v4352_v8 = vpack.c.bf16 %v3762_v14, %v3762_v14  ;;  %v3663_v7 = vadd.f32 %v3562_v35, %v3300_v30  ;;  %v3312_v48 = vpop.f32.mrf.mxu1  ;;  %v342_v35 = vand.u32 15, %v192_v44  ;;  %v328_v25 = vand.u32 15, %v190_v10 }
 0x1cf   : > { %3928 = vst.msk [vmem:[%s6171_s6 + $0x28] sm:$0xf] %vm3917_vm5, %v4357_v26  ;;  %v4355_v6 = vpack.c.bf16 %v3765_v18, %v3765_v18  ;;  %v3729_v0 = vadd.f32 %v3697_v11, %v6009_v32  ;;  %v3668_v13 = vadd.f32 %v4847_v1, %v3321_v3  ;;  %v3313_v29 = vadd.f32 %v3312_v48, %v6020_v19 }
 0x1d0   : > { %v4848_v56 = vpop.f32.mrf.mxu0  ;;  %3923 = vst.msk [vmem:[%s6171_s6 + $0x14] sm:$0xf] %vm3917_vm5, %v4352_v8  ;;  %v3695_v39 = vmul.f32 %v4033_v22, %v3663_v7  ;;  %v4812_v20 = vpop.f32.mrf.mxu1  ;;  %vm6282_vm12 = vcmp.lt.s32.totalorder %v342_v35, 15  ;;  %v196_v26 = vadd.s32 184, %v5906_v40  ;;  %vm6293_vm13 = vcmp.lt.s32.totalorder %v328_v25, 15 }
 0x1d1   : > { %3926 = vst.msk [vmem:[%s6171_s6 + $0x20] sm:$0xf] %vm3917_vm5, %v4355_v6  ;;  %v3768_v16 = vadd.f32 %v6158_v4, %v3729_v0  ;;  %v3732_v32 = vadd.f32 %v3668_v13, %v6024_v45  ;;  %v3666_v54 = vadd.f32 %v3575_v15, %v3313_v29  ;;  %v3324_v19 = vadd.f32 %v4812_v20, %v6027_v37 }
 0x1d2   : > { %v3578_v27 = vpop.f32.mrf.mxu0  ;;  %v3727_v17 = vadd.f32 %v3695_v39, %v6017_v51  ;;  %v3315_v12 = vpop.f32.mrf.mxu1  ;;  %v4035_v51 = vsel %vm6257_vm11, 1.0, %v6481_v41  ;;  %v194_v33 = vadd.s32 168, %v5906_v40  ;;  %v4038_v29 = vsel %vm6282_vm12, 1.0, %v6481_v41 }
 0x1d3   : > { %v4358_v58 = vpack.c.bf16 %v3768_v16, %v3768_v16  ;;  %v3771_v2 = vadd.f32 %v6158_v4, %v3732_v32  ;;  %v3730_v21 = vadd.f32 %v3666_v54, %v6030_v57  ;;  %v3669_v49 = vadd.f32 %v4848_v56, %v3324_v19 }
 0x1d4   : > { %v4851_v45 = vpop.f32.mrf.mxu0  ;;  %v3766_v31 = vadd.f32 %v6158_v4, %v3727_v17  ;;  %v3316_v37 = vadd.f32 %v3315_v12, %v6033_v5  ;;  %v4815_v62 = vpop.f32.mrf.mxu1  ;;  %v370_v39 = vand.u32 15, %v196_v26  ;;  %v356_v19 = vand.u32 15, %v194_v33  ;;  %v6547_v33 = vld [vmem:[#allocation26_spill] sm:$0xff] }
 0x1d5   : > { %3929 = vst.msk [vmem:[%s6171_s6 + $0x2c] sm:$0xf] %vm3917_vm5, %v4358_v58  ;;  %v4361_v47 = vpack.c.bf16 %v3771_v2, %v3771_v2  ;;  %v3769_v1 = vadd.f32 %v6158_v4, %v3730_v21  ;;  %v3701_v57 = vmul.f32 %v4036_v24, %v3669_v49  ;;  %v3337_v14 = vadd.f32 %v4815_v62, %v6040_v28  ;;  %v6554_v2 = vld [vmem:[#allocation4_spill] sm:$0xff] }
 0x1d6   : > { %v3591_v30 = vpop.f32.mrf.mxu0  ;;  %v4356_v22 = vpack.c.bf16 %v3766_v31, %v3766_v31  ;;  %v3667_v9 = vadd.f32 %v3578_v27, %v3316_v37  ;;  %v3328_v5 = vpop.f32.mrf.mxu1  ;;  %vm6318_vm14 = vcmp.lt.s32.totalorder %v370_v39, 15  ;;  %v200_v21 = vadd.s32 216, %v5906_v40 }
 0x1d7   : > { %3932 = vst.msk [vmem:[%s6171_s6 + $0x38] sm:$0xf] %vm3917_vm5, %v4361_v47  ;;  %v4359_v18 = vpack.c.bf16 %v3769_v1, %v3769_v1  ;;  %v3733_v11 = vadd.f32 %v3701_v57, %v6037_v60  ;;  %v3672_v3 = vadd.f32 %v4851_v45, %v3337_v14  ;;  %v3329_v15 = vadd.f32 %v3328_v5, %v6048_v43  ;;  %v6543_v57 = vld [vmem:[#allocation23_spill] sm:$0xff] }
 0x1d8   : > { %v4852_v28 = vpop.f32.mrf.mxu0  ;;  %3927 = vst.msk [vmem:[%s6171_s6 + $0x24] sm:$0xf] %vm3917_vm5, %v4356_v22  ;;  %v3699_v8 = vmul.f32 %v4035_v51, %v3667_v9  ;;  %v4816_v7 = vpop.f32.mrf.mxu1  ;;  %vm6329_vm15 = vcmp.lt.s32.totalorder %v356_v19, 15  ;;  %v198_v47 = vadd.s32 200, %v5906_v40  ;;  %v6545_v9 = vld [vmem:[#allocation22_spill] sm:$0xff]  ;;  %v4040_v42 = vsel %vm6318_vm14, 1.0, %v6481_v41 }
 0x1d9   : > { %3930 = vst.msk [vmem:[%s6171_s6 + $0x30] sm:$0xf] %vm3917_vm5, %v4359_v18  ;;  %v3772_v44 = vadd.f32 %v6158_v4, %v3733_v11  ;;  %v3736_v60 = vadd.f32 %v3672_v3, %v6052_v53  ;;  %v3670_v6 = vadd.f32 %v3591_v30, %v3329_v15  ;;  %v3340_v43 = vadd.f32 %v4816_v7, %v6055_v52  ;;  %v6544_v30 = vld [vmem:[#allocation24_spill] sm:$0xff]  ;;  %v6546_v15 = vld [vmem:[#allocation25_spill] sm:$0xff] }
 0x1da   : > { %v3594_v0 = vpop.f32.mrf.mxu0  ;;  %v3731_v13 = vadd.f32 %v3699_v8, %v6045_v61  ;;  %v3331_v56 = vpop.f32.mrf.mxu1  ;;  %v4037_v61 = vsel %vm6293_vm13, 1.0, %v6481_v41  ;;  %v398_v18 = vand.u32 15, %v200_v21 }
 0x1db   : > { %v4362_v20 = vpack.c.bf16 %v3772_v44, %v3772_v44  ;;  %v3775_v46 = vadd.f32 %v6158_v4, %v3736_v60  ;;  %v3734_v10 = vadd.f32 %v3670_v6, %v6058_v59  ;;  %v3673_v16 = vadd.f32 %v4852_v28, %v3340_v43 }
 0x1dc   : > { %v4855_v53 = vpop.f32.mrf.mxu0  ;;  %v3770_v32 = vadd.f32 %v6158_v4, %v3731_v13  ;;  %v3332_v52 = vadd.f32 %v3331_v56, %v6061_v23  ;;  %v4819_v54 = vpop.f32.mrf.mxu1  ;;  %v4039_v60 = vsel %vm6329_vm15, 1.0, %v6481_v41  ;;  %v384_v43 = vand.u32 15, %v198_v47  ;;  %v6548_v56 = vld [vmem:[#allocation12_spill] sm:$0xff]  ;;  %v6556_v47 = vld [vmem:[#allocation13_spill] sm:$0xff] }
 0x1dd   : > { %3933 = vst.msk [vmem:[%s6171_s6 + $0x3c] sm:$0xf] %vm3917_vm5, %v4362_v20  ;;  %v4365_v27 = vpack.c.bf16 %v3775_v46, %v3775_v46  ;;  %v3773_v17 = vadd.f32 %v6158_v4, %v3734_v10  ;;  %v3705_v59 = vmul.f32 %v4038_v29, %v3673_v16  ;;  %v3353_v24 = vadd.f32 %v4819_v54, %v6068_v55 }
 0x1de   : > { %v3607_v12 = vpop.f32.mrf.mxu0  ;;  %v4360_v35 = vpack.c.bf16 %v3770_v32, %v3770_v32  ;;  %v3671_v58 = vadd.f32 %v3594_v0, %v3332_v52  ;;  %v3344_v23 = vpop.f32.mrf.mxu1  ;;  %vm6354_vm0 = vcmp.lt.s32.totalorder %v398_v18, 15  ;;  %v204_v32 = vadd.s32 248, %v5906_v40 }
 0x1df   : > { %3936 = vst.msk [vmem:[%s6171_s6 + $0x48] sm:$0xf] %vm3917_vm5, %v4365_v27  ;;  %v4363_v49 = vpack.c.bf16 %v3773_v17, %v3773_v17  ;;  %v3737_v45 = vadd.f32 %v3705_v59, %v6065_v34  ;;  %v3676_v31 = vadd.f32 %v4855_v53, %v3353_v24  ;;  %v3345_v37 = vadd.f32 %v3344_v23, %v6076_v63 }
 0x1e0   : > { %v4856_v55 = vpop.f32.mrf.mxu0  ;;  %3931 = vst.msk [vmem:[%s6171_s6 + $0x34] sm:$0xf] %vm3917_vm5, %v4360_v35  ;;  %v3703_v51 = vmul.f32 %v4037_v61, %v3671_v58  ;;  %v4820_v62 = vpop.f32.mrf.mxu1  ;;  %v6551_v61 = vld [vmem:[#allocation3_spill] sm:$0xff]  ;;  %vm6365_vm1 = vcmp.lt.s32.totalorder %v384_v43, 15 }
 0x1e1   : > { %3934 = vst.msk [vmem:[%s6171_s6 + $0x40] sm:$0xf] %vm3917_vm5, %v4363_v49  ;;  %v3776_v1 = vadd.f32 %v6158_v4, %v3737_v45  ;;  %v3740_v34 = vadd.f32 %v3676_v31, %v6543_v57  ;;  %v3674_v14 = vadd.f32 %v3607_v12, %v3345_v37  ;;  %v3356_v63 = vadd.f32 %v4820_v62, %v6544_v30  ;;  %v6555_v49 = vld [vmem:[#allocation5_spill] sm:$0xff] }
 0x1e2   : > { %v3610_v22 = vpop.f32.mrf.mxu0  ;;  %v3735_v5 = vadd.f32 %v3703_v51, %v6545_v9  ;;  %v3347_v26 = vpop.f32.mrf.mxu1  ;;  %v4042_v31 = vsel %vm6354_vm0, 1.0, %v6481_v41  ;;  %v202_v51 = vadd.s32 232, %v5906_v40 }
 0x1e3   : > { %v4366_v11 = vpack.c.bf16 %v3776_v1, %v3776_v1  ;;  %v3779_v3 = vadd.f32 %v6158_v4, %v3740_v34  ;;  %v3738_v28 = vadd.f32 %v3674_v14, %v6546_v15  ;;  %v3677_v8 = vadd.f32 %v4856_v55, %v3356_v63  ;;  %v6557_v14 = vld [vmem:[#allocation6_spill] sm:$0xff] }
 0x1e4   : > { %v4859_v7 = vpop.f32.mrf.mxu0  ;;  %v3774_v48 = vadd.f32 %v6158_v4, %v3735_v5  ;;  %v3348_v44 = vadd.f32 %v3347_v26, %v6547_v33  ;;  %v4823_v6 = vpop.f32.mrf.mxu1  ;;  %v426_v55 = vand.u32 15, %v204_v32  ;;  %v4041_v63 = vsel %vm6365_vm1, 1.0, %v6481_v41 }
 0x1e5   : > { %3937 = vst.msk [vmem:[%s6171_s6 + $0x4c] sm:$0xf] %vm3917_vm5, %v4366_v11  ;;  %v4369_v0 = vpack.c.bf16 %v3779_v3, %v3779_v3  ;;  %v3777_v13 = vadd.f32 %v6158_v4, %v3738_v28  ;;  %v3709_v29 = vmul.f32 %v4040_v42, %v3677_v8  ;;  %v3369_v39 = vadd.f32 %v4823_v6, %v6548_v56  ;;  %v6558_v42 = vld [vmem:[#allocation15_spill] sm:$0xff] }
 0x1e6   : > { %v3623_v20 = vpop.f32.mrf.mxu0  ;;  %v4364_v46 = vpack.c.bf16 %v3774_v48, %v3774_v48  ;;  %v3675_v10 = vadd.f32 %v3610_v22, %v3348_v44  ;;  %v3360_v16 = vpop.f32.mrf.mxu1  ;;  %vm6390_vm2 = vcmp.lt.s32.totalorder %v426_v55, 15  ;;  %v412_v8 = vand.u32 15, %v202_v51  ;;  %v6561_v48 = vld [vmem:[#allocation14_spill] sm:$0xff] }
 0x1e7   : > { %3940 = vst.msk [vmem:[%s6171_s6 + $0x58] sm:$0xf] %vm3917_vm5, %v4369_v0  ;;  %v4367_v52 = vpack.c.bf16 %v3777_v13, %v3777_v13  ;;  %v3741_v54 = vadd.f32 %v3709_v29, %v6551_v61  ;;  %v3680_v19 = vadd.f32 %v4859_v7, %v3369_v39  ;;  %v3361_v27 = vadd.f32 %v3360_v16, %v6104_v38  ;;  %v6562_v13 = vld [vmem:[#allocation16_spill] sm:$0xff]  ;;  %v6563_v39 = vld [vmem:[#allocation7_spill] sm:$0xff]  ;;  %v6565_v61 = vld [vmem:[#allocation9_spill] sm:$0xff] }
 0x1e8   : > { %v4860_v17 = vpop.f32.mrf.mxu0  ;;  %3935 = vst.msk [vmem:[%s6171_s6 + $0x44] sm:$0xf] %vm3917_vm5, %v4364_v46  ;;  %v3707_v59 = vmul.f32 %v4039_v60, %v3675_v10  ;;  %v4824_v24 = vpop.f32.mrf.mxu1  ;;  %v6564_v10 = vld [vmem:[#allocation8_spill] sm:$0xff]  ;;  %vm714_vm3 = vcmp.lt.s32.totalorder %v412_v8, 15  ;;  %v6568_v55 = vld [vmem:[#allocation18_spill] sm:$0xff] }
 0x1e9   : > { %3938 = vst.msk [vmem:[%s6171_s6 + $0x50] sm:$0xf] %vm3917_vm5, %v4367_v52  ;;  %v3780_v35 = vadd.f32 %v6158_v4, %v3741_v54  ;;  %v3744_v58 = vadd.f32 %v3680_v19, %v6107_v36  ;;  %v3678_v23 = vadd.f32 %v3623_v20, %v3361_v27  ;;  %v3372_v21 = vadd.f32 %v4824_v24, %v6554_v2 }
 0x1ea   : > { %v3626_v38 = vpop.f32.mrf.mxu0  ;;  %v3739_v45 = vadd.f32 %v3707_v59, %v6555_v49  ;;  %v3363_v37 = vpop.f32.mrf.mxu1  ;;  %v6567_v49 = vld [vmem:[#allocation2_spill] sm:$0xff] }
 0x1eb   : > { %v4370_v62 = vpack.c.bf16 %v3780_v35, %v3780_v35  ;;  %v3783_v25 = vadd.f32 %v6158_v4, %v3744_v58  ;;  %v3742_v36 = vadd.f32 %v3678_v23, %v6556_v47  ;;  %v3681_v1 = vadd.f32 %v4860_v17, %v3372_v21  ;;  %v6566_v17 = vld [vmem:[#allocation17_spill] sm:$0xff] }
 0x1ec   : > { %v4863_v57 = vpop.f32.mrf.mxu0  ;;  %v3778_v34 = vadd.f32 %v6158_v4, %v3739_v45  ;;  %v3364_v30 = vadd.f32 %v3363_v37, %v6557_v14  ;;  %v4827_v22 = vpop.f32.mrf.mxu1  ;;  %v4043_v58 = vsel %vm714_vm3, 1.0, %v6481_v41 }
 0x1ed   : > { %3941 = vst.msk [vmem:[%s6171_s6 + $0x5c] sm:$0xf] %vm3917_vm5, %v4370_v62  ;;  %v4373_v40 = vpack.c.bf16 %v3783_v25, %v3783_v25  ;;  %v3781_v9 = vadd.f32 %v6158_v4, %v3742_v36  ;;  %v3713_v5 = vmul.f32 %v4042_v31, %v3681_v1  ;;  %v3385_v26 = vadd.f32 %v4827_v22, %v6558_v42 }
 0x1ee   : > { %v3639_v18 = vpop.f32.mrf.mxu0  ;;  %v4368_v11 = vpack.c.bf16 %v3778_v34, %v3778_v34  ;;  %v3679_v3 = vadd.f32 %v3626_v38, %v3364_v30  ;;  %v3376_v15 = vpop.f32.mrf.mxu1 }
 0x1ef   : > { %3944 = vst.msk [vmem:[%s6171_s6 + $0x68] sm:$0xf] %vm3917_vm5, %v4373_v40  ;;  %v4371_v7 = vpack.c.bf16 %v3781_v9, %v3781_v9  ;;  %v3745_v33 = vadd.f32 %v3713_v5, %v6561_v48  ;;  %v3684_v44 = vadd.f32 %v4863_v57, %v3385_v26  ;;  %v3377_v60 = vadd.f32 %v3376_v15, %v6130_v50 }
 0x1f0   : > { %3939 = vst.msk [vmem:[%s6171_s6 + $0x54] sm:$0xf] %vm3917_vm5, %v4368_v11  ;;  %v3711_v6 = vmul.f32 %v4041_v63, %v3679_v3  ;;  %v4828_v43 = vpop.f32.mrf.mxu1  ;;  %v4864_v46 = vpop.f32.mrf.mxu0  ;;  %v4044_v50 = vsel %vm6390_vm2, 1.0, %v6481_v41 }
 0x1f1   : > { %3942 = vst.msk [vmem:[%s6171_s6 + $0x60] sm:$0xf] %vm3917_vm5, %v4371_v7  ;;  %v3784_v0 = vadd.f32 %v6158_v4, %v3745_v33  ;;  %v3748_v29 = vadd.f32 %v3684_v44, %v6562_v13  ;;  %v3682_v56 = vadd.f32 %v3639_v18, %v3377_v60  ;;  %v3388_v20 = vadd.f32 %v4828_v43, %v6563_v39 }
 0x1f2   : > { %v3743_v16 = vadd.f32 %v3711_v6, %v6564_v10  ;;  %v3379_v53 = vpop.f32.mrf.mxu1  ;;  %v3642_v23 = vpop.f32.mrf.mxu0 }
 0x1f3   : > { %v4374_v32 = vpack.c.bf16 %v3784_v0, %v3784_v0  ;;  %v3787_v52 = vadd.f32 %v6158_v4, %v3748_v29  ;;  %v3746_v54 = vadd.f32 %v3682_v56, %v6565_v61  ;;  %v3685_v19 = vadd.f32 %v4864_v46, %v3388_v20 }
 0x1f4   : > { %v3782_v27 = vadd.f32 %v6158_v4, %v3743_v16  ;;  %v3380_v59 = vadd.f32 %v3379_v53, %v6566_v17 }
 0x1f5   : > { %3945 = vst.msk [vmem:[%s6171_s6 + $0x6c] sm:$0xf] %vm3917_vm5, %v4374_v32  ;;  %v4377_v24 = vpack.c.bf16 %v3787_v52, %v3787_v52  ;;  %v3785_v12 = vadd.f32 %v6158_v4, %v3746_v54  ;;  %v3717_v35 = vmul.f32 %v4044_v50, %v3685_v19 }
 0x1f6   : > { %v4372_v2 = vpack.c.bf16 %v3782_v27, %v3782_v27  ;;  %v3683_v21 = vadd.f32 %v3642_v23, %v3380_v59 }
 0x1f7   : > { %3948 = vst.msk [vmem:[%s6171_s6 + $0x78] sm:$0xf] %vm3917_vm5, %v4377_v24  ;;  %v4375_v38 = vpack.c.bf16 %v3785_v12, %v3785_v12  ;;  %v3749_v45 = vadd.f32 %v3717_v35, %v6567_v49 }
 0x1f8   : > { %3943 = vst.msk [vmem:[%s6171_s6 + $0x64] sm:$0xf] %vm3917_vm5, %v4372_v2  ;;  %v3715_v31 = vmul.f32 %v4043_v58, %v3683_v21 }
 0x1f9   : > { %3946 = vst.msk [vmem:[%s6171_s6 + $0x70] sm:$0xf] %vm3917_vm5, %v4375_v38  ;;  %v3788_v37 = vadd.f32 %v6158_v4, %v3749_v45 }
 0x1fa   : > { %v3747_v51 = vadd.f32 %v3715_v31, %v6568_v55 }
 0x1fb   : > { %v4378_v62 = vpack.c.bf16 %v3788_v37, %v3788_v37 }
 0x1fc   : > { %v3786_v41 = vadd.f32 %v6158_v4, %v3747_v51 }
 0x1fd   : > { %3949 = vst.msk [vmem:[%s6171_s6 + $0x7c] sm:$0xf] %vm3917_vm5, %v4378_v62 }
 0x1fe   : > { %v4376_v25 = vpack.c.bf16 %v3786_v41, %v3786_v41 }
 0x200   : > { %3947 = vst.msk [vmem:[%s6171_s6 + $0x74] sm:$0xf] %vm3917_vm5, %v4376_v25 }
 0x201 PF: > { %s13_s12 = sadd.s32 1, %s4975_s12  }
 0x202   : > { %p10_p4 = scmp.ge.s32.totalorder %s13_s12, 4  }
 0x204   :  { %12 = sbr.rel (!%p10_p4) target bundleno = 1 (0x1), region = 70 }

</bundles_post_ra>
